<compile_context>
chip_gen: v7x
topology: tpu7x:2x2x1
jax: 0.10.0
libtpu: 0.0.40
codegen_flags: <defaults>
</compile_context>

<pallas_src>
import functools

import jax
import jax.numpy as jnp
from jax.experimental import pallas as pl
from jax.experimental.pallas import tpu as pltpu


def _compiler_params(**kwargs):
    """pltpu.CompilerParams, with a fallback name for older JAX releases."""
    cls = getattr(pltpu, "CompilerParams", None)
    if cls is None:  # pragma: no cover - version compatibility only
        cls = getattr(pltpu, "TPUCompilerParams")
    return cls(**kwargs)


def _round_up(x, m):
    return (x + m - 1) // m * m


# ---------------------------------------------------------------------------
# Tiled matmul + bias (+ ReLU) — used by conv1/conv2 (im2col) and all FCs.
# ---------------------------------------------------------------------------

def _matmul_bias_kernel(x_ref, w_ref, b_ref, o_ref, acc_ref, *, apply_relu):
    """o = relu?(X @ W + b); K-reduction over grid axis 2, f32 accumulator."""

    @pl.when(pl.program_id(2) == 0)
    def _():
        acc_ref[...] = jnp.zeros_like(acc_ref)

    acc_ref[...] += jnp.dot(x_ref[...], w_ref[...],
                            preferred_element_type=jnp.float32)

    @pl.when(pl.program_id(2) == pl.num_programs(2) - 1)
    def _():
        out = acc_ref[...] + b_ref[...]
        if apply_relu:
            out = jnp.maximum(out, 0.0)
        o_ref[...] = out.astype(o_ref.dtype)


def matmul_bias(x, w, b, *, apply_relu, tm=256, tn=512, tk=2048):
    """x: (M, K) float, w: (K, N) bf16, b: (1, N) f32 -> (M, N) f32."""
    M, K = x.shape
    K2, N = w.shape
    assert K == K2 and b.shape == (1, N)

    tm = min(tm, _round_up(M, 8))
    tn = min(tn, _round_up(N, 128))
    if K <= 128:
        tk = _round_up(K, 8)          # small contractions (conv1): pad to 8 only
    else:
        tk = min(tk, _round_up(K, 128))
    Mp, Np, Kp = _round_up(M, tm), _round_up(N, tn), _round_up(K, tk)

    xb = x.astype(jnp.bfloat16)
    if (Mp, Kp) != (M, K):
        xb = jnp.pad(xb, ((0, Mp - M), (0, Kp - K)))
    # big weights (fc1/fc2) already match the tiling, so no per-call copies
    wb = w if (Kp, Np) == (K, N) else jnp.pad(w, ((0, Kp - K), (0, Np - N)))
    bb = b if Np == N else jnp.pad(b, ((0, 0), (0, Np - N)))

    kernel = functools.partial(_matmul_bias_kernel, apply_relu=apply_relu)
    out = pl.pallas_call(
        kernel,
        out_shape=jax.ShapeDtypeStruct((Mp, Np), jnp.float32),
        grid=(Mp // tm, Np // tn, Kp // tk),
        in_specs=[
            pl.BlockSpec((tm, tk), lambda i, j, k: (i, k)),
            pl.BlockSpec((tk, tn), lambda i, j, k: (k, j)),
            pl.BlockSpec((1, tn), lambda i, j, k: (0, j)),
        ],
        out_specs=pl.BlockSpec((tm, tn), lambda i, j, k: (i, j)),
        scratch_shapes=[pltpu.VMEM((tm, tn), jnp.float32)],
        compiler_params=_compiler_params(
            dimension_semantics=("parallel", "parallel", "arbitrary")),
    )(xb, wb, bb)
    return out[:M, :N]


# ---------------------------------------------------------------------------
# Direct stride-1 Conv1d + folded-BN + ReLU (no im2col) — conv3 / conv4.
# ---------------------------------------------------------------------------

def _conv1d_s1_bn_relu_kernel(x_ref, w_ref, b_ref, o_ref):
    """One batch element: out = relu( sum_k x[l+k] @ W_k + b ).

    x_ref: (1, L_out+K-1, C_in) bf16; w_ref: (K, C_in, C_out) bf16 (BN scale
    folded in); b_ref: (1, C_out) f32; o_ref: (1, L_out, C_out) f32.
    """
    K = w_ref.shape[0]
    L_out = o_ref.shape[1]
    x = x_ref[0]                                   # (L_out + K - 1, C_in)
    acc = jnp.dot(x[0:L_out], w_ref[0], preferred_element_type=jnp.float32)
    for k in range(1, K):
        acc = acc + jnp.dot(x[k:k + L_out], w_ref[k],
                            preferred_element_type=jnp.float32)
    o_ref[0] = jnp.maximum(acc + b_ref[...], 0.0)


def conv1d_s1_bn_relu(x, w_taps, bias, *, padding):
    """Stride-1 Conv1d + BatchNorm(eval) + ReLU without materializing im2col.

    x: (B, L, C_in) f32 channels-last; w_taps: (K, C_in, C_out) bf16 with the
    BN scale folded in; bias: (1, C_out) f32.  Per-batch activations of this
    model fit in VMEM (<0.6 MiB even at input_length=4500), so each grid step
    processes one full batch element.
    # TODO(synk): fusing conv3+conv4+pool4 into one per-batch kernel would
    # remove two more HBM round-trips of small intermediates.
    """
    B, L, C_in = x.shape
    K, _, C_out = w_taps.shape
    L_out = L + 2 * padding - K + 1
    Lp = L + 2 * padding
    xp = jnp.pad(x, ((0, 0), (padding, padding), (0, 0))).astype(jnp.bfloat16)
    return pl.pallas_call(
        _conv1d_s1_bn_relu_kernel,
        out_shape=jax.ShapeDtypeStruct((B, L_out, C_out), jnp.float32),
        grid=(B,),
        in_specs=[
            pl.BlockSpec((1, Lp, C_in), lambda b: (b, 0, 0)),
            pl.BlockSpec((K, C_in, C_out), lambda b: (0, 0, 0)),
            pl.BlockSpec((1, C_out), lambda b: (0, 0)),
        ],
        out_specs=pl.BlockSpec((1, L_out, C_out), lambda b: (b, 0, 0)),
        compiler_params=_compiler_params(dimension_semantics=("parallel",)),
    )(xp, w_taps, bias)


# ---------------------------------------------------------------------------
# Strided Conv1d (conv1 / conv2) via im2col + the tiled matmul kernel.
# ---------------------------------------------------------------------------

def conv1d_strided_bn_relu(x, w_mat, bias, *, kernel_size, stride, padding):
    """Strided Conv1d + BN(eval) + ReLU; patch matrices here are tiny.

    x: (B, L, C_in) f32.  w_mat: (C_in*K, C_out) bf16 with BN scale folded,
    rows ordered (C_in major, K fastest) to match the im2col layout.
    # TODO(synk): stride-2 taps are non-contiguous; a direct (no-im2col) path
    # like conv3/conv4 would need stride-folded layouts — not worth it at
    # these sizes.
    """
    B, L, C_in = x.shape
    K = kernel_size
    C_out = w_mat.shape[1]
    L_out = (L + 2 * padding - K) // stride + 1
    xp = jnp.pad(x, ((0, 0), (padding, padding), (0, 0)))
    taps = [xp[:, k: k + stride * (L_out - 1) + 1: stride, :] for k in range(K)]
    patches = jnp.stack(taps, axis=-1).reshape(B * L_out, C_in * K)
    out = matmul_bias(patches, w_mat, bias, apply_relu=True)
    return out.reshape(B, L_out, C_out)


# ---------------------------------------------------------------------------
# MaxPool1d(kernel_size=3, stride=2, padding=1), channels-last.
# ---------------------------------------------------------------------------

def _maxpool3_kernel(even_ref, oddp_ref, o_ref):
    """out[i] = max(x[2i-1], x[2i], x[2i+1]) for one batch element.

    even_ref: (1, Lo, C)   holds x[2i]
    oddp_ref: (1, Lo+1, C) holds [-inf, x[1], x[3], ..., (-inf)] so that
              oddp[i] = x[2i-1] and oddp[i+1] = x[2i+1].
    """
    Lo = o_ref.shape[1]
    left = oddp_ref[0, pl.ds(0, Lo), :]
    mid = even_ref[0]
    right = oddp_ref[0, pl.ds(1, Lo), :]
    o_ref[0] = jnp.maximum(jnp.maximum(left, mid), right)


def maxpool1d_k3_s2_p1(x):
    """MaxPool1d(3, stride=2, padding=1) on (B, L, C).  Handles odd L:
    L_out = (L - 1) // 2 + 1, matching PyTorch.
    # TODO(synk): fully fusing the pool into the preceding conv epilogue would
    # remove one more HBM round-trip of the conv output.
    """
    B, L, C = x.shape
    Lo = (L - 1) // 2 + 1
    even = x[:, 0::2, :]                                   # x[2i], length Lo
    odd = x[:, 1::2, :]                                    # x[2i+1]
    neg = jnp.full((B, 1, C), -jnp.inf, dtype=x.dtype)
    pieces = [neg, odd] + ([neg] if L % 2 == 1 else [])
    odd_p = jnp.concatenate(pieces, axis=1)                # length Lo + 1
    return pl.pallas_call(
        _maxpool3_kernel,
        out_shape=jax.ShapeDtypeStruct((B, Lo, C), x.dtype),
        grid=(B,),
        in_specs=[
            pl.BlockSpec((1, Lo, C), lambda b: (b, 0, 0)),
            pl.BlockSpec((1, Lo + 1, C), lambda b: (b, 0, 0)),
        ],
        out_specs=pl.BlockSpec((1, Lo, C), lambda b: (b, 0, 0)),
        compiler_params=_compiler_params(dimension_semantics=("parallel",)),
    )(even, odd_p)


# ---------------------------------------------------------------------------
# Parameters (pre-transformed / BN-folded / bf16 at init) and the model.
# ---------------------------------------------------------------------------

def init_params(key, input_length, num_classes, eps=1e-5):
    ks = jax.random.split(key, 40)
    it = iter(ks)

    def conv_torch(c_out, c_in, k):
        w = 0.1 * jax.random.normal(next(it), (c_out, c_in, k), jnp.float32)
        b = 0.05 * jax.random.normal(next(it), (c_out,), jnp.float32)
        return w, b

    def bn_stats(c):
        gamma = 1.0 + 0.1 * jax.random.normal(next(it), (c,), jnp.float32)
        beta = 0.05 * jax.random.normal(next(it), (c,), jnp.float32)
        mean = 0.05 * jax.random.normal(next(it), (c,), jnp.float32)
        var = jax.random.uniform(next(it), (c,), jnp.float32, 0.5, 1.5)
        return gamma, beta, mean, var

    def fold_bn(conv_b, bn):
        gamma, beta, mean, var = bn
        scale = gamma / jnp.sqrt(var + eps)                 # (c_out,)
        bias = (beta + (conv_b - mean) * scale)[None, :]    # (1, c_out) f32
        return scale, bias

    def conv_matmul(c_out, c_in, k):
        # im2col path: (C_in*K, C_out) bf16, BN scale folded in
        w, b = conv_torch(c_out, c_in, k)
        scale, bias = fold_bn(b, bn_stats(c_out))
        w_mat = (w.reshape(c_out, c_in * k).T * scale[None, :]).astype(jnp.bfloat16)
        return w_mat, bias

    def conv_taps(c_out, c_in, k):
        # direct path: (K, C_in, C_out) bf16, BN scale folded in
        w, b = conv_torch(c_out, c_in, k)
        scale, bias = fold_bn(b, bn_stats(c_out))
        w_taps = (jnp.transpose(w, (2, 1, 0)) * scale[None, None, :]).astype(jnp.bfloat16)
        return w_taps, bias

    def fc(c_out, c_in):
        w = 0.05 * jax.random.normal(next(it), (c_out, c_in), jnp.float32)
        b = 0.05 * jax.random.normal(next(it), (c_out,), jnp.float32)
        return w.T.astype(jnp.bfloat16), b[None, :]         # (in, out) bf16

    # replicate _get_conv_output's length computation
    def conv_len(L, k, s, p):
        return (L + 2 * p - k) // s + 1

    L = input_length
    L = conv_len(L, 7, 2, 3)   # conv1
    L = conv_len(L, 3, 2, 1)   # pool1
    L = conv_len(L, 5, 2, 2)   # conv2
    L = conv_len(L, 3, 2, 1)   # pool2
    # conv3 / conv4 (stride 1, padding 1) keep the length
    L = conv_len(L, 3, 2, 1)   # pool4
    C_last = 512
    feature_size = C_last * L

    # fc1 with the flatten permutation folded in:  PyTorch flattens (B, C, L)
    # channel-major (flat index = c*L + l), while our activation is channels-
    # last (B, L, C) whose plain reshape gives flat index = l*C + c.  Permute
    # the fc1 weight rows ONCE at init so the forward pass needs no transpose.
    w1, b1 = fc(1024, feature_size)                         # rows ordered c*L + l
    w1 = (w1.reshape(C_last, L, 1024)
            .transpose(1, 0, 2)
            .reshape(feature_size, 1024))                   # rows ordered l*C + c

    params = dict(
        conv1=conv_matmul(64, 1, 7),
        conv2=conv_matmul(128, 64, 5),
        conv3=conv_taps(256, 128, 3),
        conv4=conv_taps(512, 256, 3),
        fc1=(w1, b1),
        fc2=fc(512, 1024),
        fc3=fc(num_classes, 512),
    )
    return params, feature_size


def xrd_classifier_forward(x_ncl, params):
    """x_ncl: (B, 1, L) — PyTorch NCL layout.  Returns (B, num_classes) f32."""
    B = x_ncl.shape[0]
    h = jnp.transpose(x_ncl, (0, 2, 1))                    # (B, L, 1) channels-last

    w, b = params["conv1"]
    h = conv1d_strided_bn_relu(h, w, b, kernel_size=7, stride=2, padding=3)
    h = maxpool1d_k3_s2_p1(h)

    w, b = params["conv2"]
    h = conv1d_strided_bn_relu(h, w, b, kernel_size=5, stride=2, padding=2)
    h = maxpool1d_k3_s2_p1(h)

    w, b = params["conv3"]
    h = conv1d_s1_bn_relu(h, w, b, padding=1)

    w, b = params["conv4"]
    h = conv1d_s1_bn_relu(h, w, b, padding=1)
    h = maxpool1d_k3_s2_p1(h)

    # plain reshape — the PyTorch (B, C, L) flatten order is folded into the
    # fc1 weight row permutation at init, so no activation transpose is needed
    h = h.reshape(B, -1)

    w, b = params["fc1"]
    h = matmul_bias(h, w, b, apply_relu=True)
    # dropout1 (p=0.5): identity in eval mode
    w, b = params["fc2"]
    h = matmul_bias(h, w, b, apply_relu=True)
    # dropout2 (p=0.3): identity in eval mode
    w, b = params["fc3"]
    logits = matmul_bias(h, w, b, apply_relu=False)
    return logits


# ---------------------------------------------------------------------------
# Demo
# ---------------------------------------------------------------------------

if __name__ == "__main__":
    INPUT_LENGTH = 256   # small stand-in for the 4500-long XRD pattern
    NUM_CLASSES = 2
    BATCH = 2

    key = jax.random.PRNGKey(0)
    pkey, xkey = jax.random.split(key)

    params, feature_size = init_params(pkey, INPUT_LENGTH, NUM_CLASSES)
    x = jax.random.normal(xkey, (BATCH, 1, INPUT_LENGTH), jnp.float32)

    fwd = jax.jit(xrd_classifier_forward)
    logits = jax.block_until_ready(fwd(x, params))

    assert logits.shape == (BATCH, NUM_CLASSES), logits.shape
    assert bool(jnp.all(jnp.isfinite(logits)))
    print("KERNEL_OK")
</pallas_src>

<mosaic_0001>
module attributes {stable_mosaic.version = 11 : i64} {
  func.func @_matmul_bias_kernel(%arg0: i32, %arg1: i32, %arg2: i32, %arg3: memref<256x8xbf16, #tpu.memory_space<vmem>>, %arg4: memref<8x128xbf16, #tpu.memory_space<vmem>>, %arg5: memref<1x128xf32, #tpu.memory_space<vmem>>, %arg6: memref<256x128xf32, #tpu.memory_space<vmem>>, %arg7: memref<256x128xf32, #tpu.memory_space<vmem>>) attributes {dimension_semantics = [#tpu.dimension_semantics<parallel>, #tpu.dimension_semantics<parallel>, #tpu.dimension_semantics<arbitrary>], iteration_bounds = array<i64: 1, 1, 1>, scalar_prefetch = 0 : i64, scratch_operands = 1 : i64, tpu.core_type = #tpu.core_type<tc>, window_params = [{transform_indices = @transform_0, window_bounds = array<i64: 256, 8>}, {transform_indices = @transform_1, window_bounds = array<i64: 8, 128>}, {transform_indices = @transform_2, window_bounds = array<i64: 1, 128>}, {transform_indices = @transform_3, window_bounds = array<i64: 256, 128>}]} {
    %c0_i32 = arith.constant 0 : i32
    %0 = arith.cmpi eq, %arg2, %c0_i32 : i32
    %1 = arith.extui %0 : i1 to i32
    %c0_i32_0 = arith.constant 0 : i32
    %2 = arith.cmpi ne, %1, %c0_i32_0 : i32
    scf.if %2 {
      %cst_10 = arith.constant 0.000000e+00 : f32
      %12 = vector.broadcast %cst_10 : f32 to vector<256x128xf32>
      %c0_11 = arith.constant 0 : index
      %c0_12 = arith.constant 0 : index
      %13 = vector.load %arg7[%c0_11, %c0_12] : memref<256x128xf32, #tpu.memory_space<vmem>>, vector<256x128xf32>
      tpu.vector_store %arg7[%c0_11, %c0_12], %12 {strides = array<i32>} : memref<256x128xf32, #tpu.memory_space<vmem>>, vector<256x128xf32>,
    } else {
    }
    %c0 = arith.constant 0 : index
    %c0_1 = arith.constant 0 : index
    %3 = vector.load %arg7[%c0, %c0_1] : memref<256x128xf32, #tpu.memory_space<vmem>>, vector<256x128xf32>
    %c0_2 = arith.constant 0 : index
    %c0_3 = arith.constant 0 : index
    %4 = vector.load %arg3[%c0_2, %c0_3] : memref<256x8xbf16, #tpu.memory_space<vmem>>, vector<256x8xbf16>
    %c0_4 = arith.constant 0 : index
    %c0_5 = arith.constant 0 : index
    %5 = vector.load %arg4[%c0_4, %c0_5] : memref<8x128xbf16, #tpu.memory_space<vmem>>, vector<8x128xbf16>
    %cst = arith.constant dense<0.000000e+00> : vector<256x128xf32>
    %6 = tpu.matmul %4, %5, %cst {dimension_numbers = #tpu.dot_dimension_numbers<[1], [0], [0], [1], [0, 0, 1, 1], [], []>} : vector<256x8xbf16>, vector<8x128xbf16>, vector<256x128xf32> -> vector<256x128xf32>
    %7 = arith.addf %3, %6 : vector<256x128xf32>
    %c0_6 = arith.constant 0 : index
    %c0_7 = arith.constant 0 : index
    %8 = vector.load %arg7[%c0_6, %c0_7] : memref<256x128xf32, #tpu.memory_space<vmem>>, vector<256x128xf32>
    tpu.vector_store %arg7[%c0_6, %c0_7], %7 {strides = array<i32>} : memref<256x128xf32, #tpu.memory_space<vmem>>, vector<256x128xf32>,
    %c0_i32_8 = arith.constant 0 : i32
    %9 = arith.cmpi eq, %arg2, %c0_i32_8 : i32
    %10 = arith.extui %9 : i1 to i32
    %c0_i32_9 = arith.constant 0 : i32
    %11 = arith.cmpi ne, %10, %c0_i32_9 : i32
    scf.if %11 {
      %c0_10 = arith.constant 0 : index
      %c0_11 = arith.constant 0 : index
      %12 = vector.load %arg7[%c0_10, %c0_11] : memref<256x128xf32, #tpu.memory_space<vmem>>, vector<256x128xf32>
      %c0_12 = arith.constant 0 : index
      %c0_13 = arith.constant 0 : index
      %13 = vector.load %arg5[%c0_12, %c0_13] : memref<1x128xf32, #tpu.memory_space<vmem>>, vector<1x128xf32>
      %14 = vector.broadcast %13 : vector<1x128xf32> to vector<256x128xf32>
      %15 = arith.addf %12, %14 : vector<256x128xf32>
      %cst_14 = arith.constant 0.000000e+00 : f32
      %16 = vector.broadcast %cst_14 : f32 to vector<256x128xf32>
      %17 = arith.maximumf %15, %16 : vector<256x128xf32>
      %c0_15 = arith.constant 0 : index
      %c0_16 = arith.constant 0 : index
      %18 = vector.load %arg6[%c0_15, %c0_16] : memref<256x128xf32, #tpu.memory_space<vmem>>, vector<256x128xf32>
      tpu.vector_store %arg6[%c0_15, %c0_16], %17 {strides = array<i32>} : memref<256x128xf32, #tpu.memory_space<vmem>>, vector<256x128xf32>,
    } else {
    }
    return
  }
  func.func @transform_0(%arg0: i32, %arg1: i32, %arg2: i32) -> (i32, i32) {
    %c0_i32 = arith.constant 0 : i32
    return %arg0, %arg2 : i32, i32
  }
  func.func @transform_1(%arg0: i32, %arg1: i32, %arg2: i32) -> (i32, i32) {
    %c0_i32 = arith.constant 0 : i32
    return %arg2, %arg1 : i32, i32
  }
  func.func @transform_2(%arg0: i32, %arg1: i32, %arg2: i32) -> (i32, i32) {
    %c0_i32 = arith.constant 0 : i32
    %c0_i32_0 = arith.constant 0 : i32
    return %c0_i32, %arg1 : i32, i32
  }
  func.func @transform_3(%arg0: i32, %arg1: i32, %arg2: i32) -> (i32, i32) {
    %c0_i32 = arith.constant 0 : i32
    return %arg0, %arg1 : i32, i32
  }
}

module attributes {stable_mosaic.version = 11 : i64} {
  func.func @_maxpool3_kernel(%arg0: i32, %arg1: memref<1x64x64xf32, #tpu.memory_space<vmem>>, %arg2: memref<1x65x64xf32, #tpu.memory_space<vmem>>, %arg3: memref<1x64x64xf32, #tpu.memory_space<vmem>>) attributes {dimension_semantics = [#tpu.dimension_semantics<parallel>], iteration_bounds = array<i64: 2>, scalar_prefetch = 0 : i64, scratch_operands = 0 : i64, tpu.core_type = #tpu.core_type<tc>, window_params = [{transform_indices = @transform_0, window_bounds = array<i64: 1, 64, 64>}, {transform_indices = @transform_1, window_bounds = array<i64: 1, 65, 64>}, {transform_indices = @transform_2, window_bounds = array<i64: 1, 64, 64>}]} {
    %c0 = arith.constant 0 : index
    %c0_0 = arith.constant 0 : index
    %c0_1 = arith.constant 0 : index
    %0 = vector.load %arg2[%c0, %c0_0, %c0_1] : memref<1x65x64xf32, #tpu.memory_space<vmem>>, vector<1x64x64xf32>
    %1 = vector.shape_cast %0 : vector<1x64x64xf32> to vector<64x64xf32>
    %c0_2 = arith.constant 0 : index
    %c0_3 = arith.constant 0 : index
    %c0_4 = arith.constant 0 : index
    %2 = vector.load %arg1[%c0_2, %c0_3, %c0_4] : memref<1x64x64xf32, #tpu.memory_space<vmem>>, vector<1x64x64xf32>
    %3 = vector.shape_cast %2 : vector<1x64x64xf32> to vector<64x64xf32>
    %c0_5 = arith.constant 0 : index
    %c1 = arith.constant 1 : index
    %c0_6 = arith.constant 0 : index
    %4 = vector.load %arg2[%c0_5, %c1, %c0_6] : memref<1x65x64xf32, #tpu.memory_space<vmem>>, vector<1x64x64xf32>
    %5 = vector.shape_cast %4 : vector<1x64x64xf32> to vector<64x64xf32>
    %6 = arith.maximumf %1, %3 : vector<64x64xf32>
    %7 = arith.maximumf %6, %5 : vector<64x64xf32>
    %c0_7 = arith.constant 0 : index
    %c0_8 = arith.constant 0 : index
    %c0_9 = arith.constant 0 : index
    %8 = vector.load %arg3[%c0_7, %c0_8, %c0_9] : memref<1x64x64xf32, #tpu.memory_space<vmem>>, vector<1x64x64xf32>
    %9 = vector.shape_cast %8 : vector<1x64x64xf32> to vector<64x64xf32>
    %10 = vector.shape_cast %7 : vector<64x64xf32> to vector<1x64x64xf32>
    tpu.vector_store %arg3[%c0_7, %c0_8, %c0_9], %10 {strides = array<i32>} : memref<1x64x64xf32, #tpu.memory_space<vmem>>, vector<1x64x64xf32>,
    return
  }
  func.func @transform_0(%arg0: i32) -> (i32, i32, i32) {
    %c0_i32 = arith.constant 0 : i32
    %c0_i32_0 = arith.constant 0 : i32
    %c0_i32_1 = arith.constant 0 : i32
    return %arg0, %c0_i32, %c0_i32_0 : i32, i32, i32
  }
  func.func @transform_1(%arg0: i32) -> (i32, i32, i32) {
    %c0_i32 = arith.constant 0 : i32
    %c0_i32_0 = arith.constant 0 : i32
    %c0_i32_1 = arith.constant 0 : i32
    return %arg0, %c0_i32, %c0_i32_0 : i32, i32, i32
  }
  func.func @transform_2(%arg0: i32) -> (i32, i32, i32) {
    %c0_i32 = arith.constant 0 : i32
    %c0_i32_0 = arith.constant 0 : i32
    %c0_i32_1 = arith.constant 0 : i32
    return %arg0, %c0_i32, %c0_i32_0 : i32, i32, i32
  }
}

module attributes {stable_mosaic.version = 11 : i64} {
  func.func @_matmul_bias_kernel(%arg0: i32, %arg1: i32, %arg2: i32, %arg3: memref<64x384xbf16, #tpu.memory_space<vmem>>, %arg4: memref<384x128xbf16, #tpu.memory_space<vmem>>, %arg5: memref<1x128xf32, #tpu.memory_space<vmem>>, %arg6: memref<64x128xf32, #tpu.memory_space<vmem>>, %arg7: memref<64x128xf32, #tpu.memory_space<vmem>>) attributes {dimension_semantics = [#tpu.dimension_semantics<parallel>, #tpu.dimension_semantics<parallel>, #tpu.dimension_semantics<arbitrary>], iteration_bounds = array<i64: 1, 1, 1>, scalar_prefetch = 0 : i64, scratch_operands = 1 : i64, tpu.core_type = #tpu.core_type<tc>, window_params = [{transform_indices = @transform_0, window_bounds = array<i64: 64, 384>}, {transform_indices = @transform_1, window_bounds = array<i64: 384, 128>}, {transform_indices = @transform_2, window_bounds = array<i64: 1, 128>}, {transform_indices = @transform_3, window_bounds = array<i64: 64, 128>}]} {
    %c0_i32 = arith.constant 0 : i32
    %0 = arith.cmpi eq, %arg2, %c0_i32 : i32
    %1 = arith.extui %0 : i1 to i32
    %c0_i32_0 = arith.constant 0 : i32
    %2 = arith.cmpi ne, %1, %c0_i32_0 : i32
    scf.if %2 {
      %cst_10 = arith.constant 0.000000e+00 : f32
      %12 = vector.broadcast %cst_10 : f32 to vector<64x128xf32>
      %c0_11 = arith.constant 0 : index
      %c0_12 = arith.constant 0 : index
      %13 = vector.load %arg7[%c0_11, %c0_12] : memref<64x128xf32, #tpu.memory_space<vmem>>, vector<64x128xf32>
      tpu.vector_store %arg7[%c0_11, %c0_12], %12 {strides = array<i32>} : memref<64x128xf32, #tpu.memory_space<vmem>>, vector<64x128xf32>,
    } else {
    }
    %c0 = arith.constant 0 : index
    %c0_1 = arith.constant 0 : index
    %3 = vector.load %arg7[%c0, %c0_1] : memref<64x128xf32, #tpu.memory_space<vmem>>, vector<64x128xf32>
    %c0_2 = arith.constant 0 : index
    %c0_3 = arith.constant 0 : index
    %4 = vector.load %arg3[%c0_2, %c0_3] : memref<64x384xbf16, #tpu.memory_space<vmem>>, vector<64x384xbf16>
    %c0_4 = arith.constant 0 : index
    %c0_5 = arith.constant 0 : index
    %5 = vector.load %arg4[%c0_4, %c0_5] : memref<384x128xbf16, #tpu.memory_space<vmem>>, vector<384x128xbf16>
    %cst = arith.constant dense<0.000000e+00> : vector<64x128xf32>
    %6 = tpu.matmul %4, %5, %cst {dimension_numbers = #tpu.dot_dimension_numbers<[1], [0], [0], [1], [0, 0, 1, 1], [], []>} : vector<64x384xbf16>, vector<384x128xbf16>, vector<64x128xf32> -> vector<64x128xf32>
    %7 = arith.addf %3, %6 : vector<64x128xf32>
    %c0_6 = arith.constant 0 : index
    %c0_7 = arith.constant 0 : index
    %8 = vector.load %arg7[%c0_6, %c0_7] : memref<64x128xf32, #tpu.memory_space<vmem>>, vector<64x128xf32>
    tpu.vector_store %arg7[%c0_6, %c0_7], %7 {strides = array<i32>} : memref<64x128xf32, #tpu.memory_space<vmem>>, vector<64x128xf32>,
    %c0_i32_8 = arith.constant 0 : i32
    %9 = arith.cmpi eq, %arg2, %c0_i32_8 : i32
    %10 = arith.extui %9 : i1 to i32
    %c0_i32_9 = arith.constant 0 : i32
    %11 = arith.cmpi ne, %10, %c0_i32_9 : i32
    scf.if %11 {
      %c0_10 = arith.constant 0 : index
      %c0_11 = arith.constant 0 : index
      %12 = vector.load %arg7[%c0_10, %c0_11] : memref<64x128xf32, #tpu.memory_space<vmem>>, vector<64x128xf32>
      %c0_12 = arith.constant 0 : index
      %c0_13 = arith.constant 0 : index
      %13 = vector.load %arg5[%c0_12, %c0_13] : memref<1x128xf32, #tpu.memory_space<vmem>>, vector<1x128xf32>
      %14 = vector.broadcast %13 : vector<1x128xf32> to vector<64x128xf32>
      %15 = arith.addf %12, %14 : vector<64x128xf32>
      %cst_14 = arith.constant 0.000000e+00 : f32
      %16 = vector.broadcast %cst_14 : f32 to vector<64x128xf32>
      %17 = arith.maximumf %15, %16 : vector<64x128xf32>
      %c0_15 = arith.constant 0 : index
      %c0_16 = arith.constant 0 : index
      %18 = vector.load %arg6[%c0_15, %c0_16] : memref<64x128xf32, #tpu.memory_space<vmem>>, vector<64x128xf32>
      tpu.vector_store %arg6[%c0_15, %c0_16], %17 {strides = array<i32>} : memref<64x128xf32, #tpu.memory_space<vmem>>, vector<64x128xf32>,
    } else {
    }
    return
  }
  func.func @transform_0(%arg0: i32, %arg1: i32, %arg2: i32) -> (i32, i32) {
    %c0_i32 = arith.constant 0 : i32
    return %arg0, %arg2 : i32, i32
  }
  func.func @transform_1(%arg0: i32, %arg1: i32, %arg2: i32) -> (i32, i32) {
    %c0_i32 = arith.constant 0 : i32
    return %arg2, %arg1 : i32, i32
  }
  func.func @transform_2(%arg0: i32, %arg1: i32, %arg2: i32) -> (i32, i32) {
    %c0_i32 = arith.constant 0 : i32
    %c0_i32_0 = arith.constant 0 : i32
    return %c0_i32, %arg1 : i32, i32
  }
  func.func @transform_3(%arg0: i32, %arg1: i32, %arg2: i32) -> (i32, i32) {
    %c0_i32 = arith.constant 0 : i32
    return %arg0, %arg1 : i32, i32
  }
}

module attributes {stable_mosaic.version = 11 : i64} {
  func.func @_maxpool3_kernel(%arg0: i32, %arg1: memref<1x16x128xf32, #tpu.memory_space<vmem>>, %arg2: memref<1x17x128xf32, #tpu.memory_space<vmem>>, %arg3: memref<1x16x128xf32, #tpu.memory_space<vmem>>) attributes {dimension_semantics = [#tpu.dimension_semantics<parallel>], iteration_bounds = array<i64: 2>, scalar_prefetch = 0 : i64, scratch_operands = 0 : i64, tpu.core_type = #tpu.core_type<tc>, window_params = [{transform_indices = @transform_0, window_bounds = array<i64: 1, 16, 128>}, {transform_indices = @transform_1, window_bounds = array<i64: 1, 17, 128>}, {transform_indices = @transform_2, window_bounds = array<i64: 1, 16, 128>}]} {
    %c0 = arith.constant 0 : index
    %c0_0 = arith.constant 0 : index
    %c0_1 = arith.constant 0 : index
    %0 = vector.load %arg2[%c0, %c0_0, %c0_1] : memref<1x17x128xf32, #tpu.memory_space<vmem>>, vector<1x16x128xf32>
    %1 = vector.shape_cast %0 : vector<1x16x128xf32> to vector<16x128xf32>
    %c0_2 = arith.constant 0 : index
    %c0_3 = arith.constant 0 : index
    %c0_4 = arith.constant 0 : index
    %2 = vector.load %arg1[%c0_2, %c0_3, %c0_4] : memref<1x16x128xf32, #tpu.memory_space<vmem>>, vector<1x16x128xf32>
    %3 = vector.shape_cast %2 : vector<1x16x128xf32> to vector<16x128xf32>
    %c0_5 = arith.constant 0 : index
    %c1 = arith.constant 1 : index
    %c0_6 = arith.constant 0 : index
    %4 = vector.load %arg2[%c0_5, %c1, %c0_6] : memref<1x17x128xf32, #tpu.memory_space<vmem>>, vector<1x16x128xf32>
    %5 = vector.shape_cast %4 : vector<1x16x128xf32> to vector<16x128xf32>
    %6 = arith.maximumf %1, %3 : vector<16x128xf32>
    %7 = arith.maximumf %6, %5 : vector<16x128xf32>
    %c0_7 = arith.constant 0 : index
    %c0_8 = arith.constant 0 : index
    %c0_9 = arith.constant 0 : index
    %8 = vector.load %arg3[%c0_7, %c0_8, %c0_9] : memref<1x16x128xf32, #tpu.memory_space<vmem>>, vector<1x16x128xf32>
    %9 = vector.shape_cast %8 : vector<1x16x128xf32> to vector<16x128xf32>
    %10 = vector.shape_cast %7 : vector<16x128xf32> to vector<1x16x128xf32>
    tpu.vector_store %arg3[%c0_7, %c0_8, %c0_9], %10 {strides = array<i32>} : memref<1x16x128xf32, #tpu.memory_space<vmem>>, vector<1x16x128xf32>,
    return
  }
  func.func @transform_0(%arg0: i32) -> (i32, i32, i32) {
    %c0_i32 = arith.constant 0 : i32
    %c0_i32_0 = arith.constant 0 : i32
    %c0_i32_1 = arith.constant 0 : i32
    return %arg0, %c0_i32, %c0_i32_0 : i32, i32, i32
  }
  func.func @transform_1(%arg0: i32) -> (i32, i32, i32) {
    %c0_i32 = arith.constant 0 : i32
    %c0_i32_0 = arith.constant 0 : i32
    %c0_i32_1 = arith.constant 0 : i32
    return %arg0, %c0_i32, %c0_i32_0 : i32, i32, i32
  }
  func.func @transform_2(%arg0: i32) -> (i32, i32, i32) {
    %c0_i32 = arith.constant 0 : i32
    %c0_i32_0 = arith.constant 0 : i32
    %c0_i32_1 = arith.constant 0 : i32
    return %arg0, %c0_i32, %c0_i32_0 : i32, i32, i32
  }
}

module attributes {stable_mosaic.version = 11 : i64} {
  func.func @_conv1d_s1_bn_relu_kernel(%arg0: i32, %arg1: memref<1x18x128xbf16, #tpu.memory_space<vmem>>, %arg2: memref<3x128x256xbf16, #tpu.memory_space<vmem>>, %arg3: memref<1x256xf32, #tpu.memory_space<vmem>>, %arg4: memref<1x16x256xf32, #tpu.memory_space<vmem>>) attributes {dimension_semantics = [#tpu.dimension_semantics<parallel>], iteration_bounds = array<i64: 2>, scalar_prefetch = 0 : i64, scratch_operands = 0 : i64, tpu.core_type = #tpu.core_type<tc>, window_params = [{transform_indices = @transform_0, window_bounds = array<i64: 1, 18, 128>}, {pipeline_mode = #tpu.pipeline_mode<synchronous>, transform_indices = @transform_1, window_bounds = array<i64: 3, 128, 256>}, {pipeline_mode = #tpu.pipeline_mode<synchronous>, transform_indices = @transform_2, window_bounds = array<i64: 1, 256>}, {transform_indices = @transform_3, window_bounds = array<i64: 1, 16, 256>}]} {
    %c0 = arith.constant 0 : index
    %c0_0 = arith.constant 0 : index
    %c0_1 = arith.constant 0 : index
    %0 = vector.load %arg1[%c0, %c0_0, %c0_1] : memref<1x18x128xbf16, #tpu.memory_space<vmem>>, vector<1x18x128xbf16>
    %1 = vector.shape_cast %0 : vector<1x18x128xbf16> to vector<18x128xbf16>
    %2 = vector.extract_strided_slice %1 {offsets = [0, 0], sizes = [16, 128], strides = [1, 1]} : vector<18x128xbf16> to vector<16x128xbf16>
    %c0_2 = arith.constant 0 : index
    %c0_3 = arith.constant 0 : index
    %c0_4 = arith.constant 0 : index
    %3 = vector.load %arg2[%c0_2, %c0_3, %c0_4] : memref<3x128x256xbf16, #tpu.memory_space<vmem>>, vector<1x128x256xbf16>
    %4 = vector.shape_cast %3 : vector<1x128x256xbf16> to vector<128x256xbf16>
    %cst = arith.constant dense<0.000000e+00> : vector<16x256xf32>
    %5 = tpu.matmul %2, %4, %cst {dimension_numbers = #tpu.dot_dimension_numbers<[1], [0], [0], [1], [0, 0, 1, 1], [], []>} : vector<16x128xbf16>, vector<128x256xbf16>, vector<16x256xf32> -> vector<16x256xf32>
    %6 = vector.extract_strided_slice %1 {offsets = [1, 0], sizes = [16, 128], strides = [1, 1]} : vector<18x128xbf16> to vector<16x128xbf16>
    %c1 = arith.constant 1 : index
    %c0_5 = arith.constant 0 : index
    %c0_6 = arith.constant 0 : index
    %7 = vector.load %arg2[%c1, %c0_5, %c0_6] : memref<3x128x256xbf16, #tpu.memory_space<vmem>>, vector<1x128x256xbf16>
    %8 = vector.shape_cast %7 : vector<1x128x256xbf16> to vector<128x256xbf16>
    %cst_7 = arith.constant dense<0.000000e+00> : vector<16x256xf32>
    %9 = tpu.matmul %6, %8, %cst_7 {dimension_numbers = #tpu.dot_dimension_numbers<[1], [0], [0], [1], [0, 0, 1, 1], [], []>} : vector<16x128xbf16>, vector<128x256xbf16>, vector<16x256xf32> -> vector<16x256xf32>
    %10 = arith.addf %5, %9 : vector<16x256xf32>
    %11 = vector.extract_strided_slice %1 {offsets = [2, 0], sizes = [16, 128], strides = [1, 1]} : vector<18x128xbf16> to vector<16x128xbf16>
    %c2 = arith.constant 2 : index
    %c0_8 = arith.constant 0 : index
    %c0_9 = arith.constant 0 : index
    %12 = vector.load %arg2[%c2, %c0_8, %c0_9] : memref<3x128x256xbf16, #tpu.memory_space<vmem>>, vector<1x128x256xbf16>
    %13 = vector.shape_cast %12 : vector<1x128x256xbf16> to vector<128x256xbf16>
    %cst_10 = arith.constant dense<0.000000e+00> : vector<16x256xf32>
    %14 = tpu.matmul %11, %13, %cst_10 {dimension_numbers = #tpu.dot_dimension_numbers<[1], [0], [0], [1], [0, 0, 1, 1], [], []>} : vector<16x128xbf16>, vector<128x256xbf16>, vector<16x256xf32> -> vector<16x256xf32>
    %15 = arith.addf %10, %14 : vector<16x256xf32>
    %c0_11 = arith.constant 0 : index
    %c0_12 = arith.constant 0 : index
    %16 = vector.load %arg3[%c0_11, %c0_12] : memref<1x256xf32, #tpu.memory_space<vmem>>, vector<1x256xf32>
    %17 = vector.broadcast %16 : vector<1x256xf32> to vector<16x256xf32>
    %18 = arith.addf %15, %17 : vector<16x256xf32>
    %cst_13 = arith.constant 0.000000e+00 : f32
    %19 = vector.broadcast %cst_13 : f32 to vector<16x256xf32>
    %20 = arith.maximumf %18, %19 : vector<16x256xf32>
    %c0_14 = arith.constant 0 : index
    %c0_15 = arith.constant 0 : index
    %c0_16 = arith.constant 0 : index
    %21 = vector.load %arg4[%c0_14, %c0_15, %c0_16] : memref<1x16x256xf32, #tpu.memory_space<vmem>>, vector<1x16x256xf32>
    %22 = vector.shape_cast %21 : vector<1x16x256xf32> to vector<16x256xf32>
    %23 = vector.shape_cast %20 : vector<16x256xf32> to vector<1x16x256xf32>
    tpu.vector_store %arg4[%c0_14, %c0_15, %c0_16], %23 {strides = array<i32>} : memref<1x16x256xf32, #tpu.memory_space<vmem>>, vector<1x16x256xf32>,
    return
  }
  func.func @transform_0(%arg0: i32) -> (i32, i32, i32) {
    %c0_i32 = arith.constant 0 : i32
    %c0_i32_0 = arith.constant 0 : i32
    %c0_i32_1 = arith.constant 0 : i32
    return %arg0, %c0_i32, %c0_i32_0 : i32, i32, i32
  }
  func.func @transform_1(%arg0: i32) -> (i32, i32, i32) {
    %c0_i32 = arith.constant 0 : i32
    %c0_i32_0 = arith.constant 0 : i32
    %c0_i32_1 = arith.constant 0 : i32
    %c0_i32_2 = arith.constant 0 : i32
    return %c0_i32, %c0_i32_0, %c0_i32_1 : i32, i32, i32
  }
  func.func @transform_2(%arg0: i32) -> (i32, i32) {
    %c0_i32 = arith.constant 0 : i32
    %c0_i32_0 = arith.constant 0 : i32
    %c0_i32_1 = arith.constant 0 : i32
    return %c0_i32, %c0_i32_0 : i32, i32
  }
  func.func @transform_3(%arg0: i32) -> (i32, i32, i32) {
    %c0_i32 = arith.constant 0 : i32
    %c0_i32_0 = arith.constant 0 : i32
    %c0_i32_1 = arith.constant 0 : i32
    return %arg0, %c0_i32, %c0_i32_0 : i32, i32, i32
  }
}

module attributes {stable_mosaic.version = 11 : i64} {
  func.func @_conv1d_s1_bn_relu_kernel(%arg0: i32, %arg1: memref<1x18x256xbf16, #tpu.memory_space<vmem>>, %arg2: memref<3x256x512xbf16, #tpu.memory_space<vmem>>, %arg3: memref<1x512xf32, #tpu.memory_space<vmem>>, %arg4: memref<1x16x512xf32, #tpu.memory_space<vmem>>) attributes {dimension_semantics = [#tpu.dimension_semantics<parallel>], iteration_bounds = array<i64: 2>, scalar_prefetch = 0 : i64, scratch_operands = 0 : i64, tpu.core_type = #tpu.core_type<tc>, window_params = [{transform_indices = @transform_0, window_bounds = array<i64: 1, 18, 256>}, {pipeline_mode = #tpu.pipeline_mode<synchronous>, transform_indices = @transform_1, window_bounds = array<i64: 3, 256, 512>}, {pipeline_mode = #tpu.pipeline_mode<synchronous>, transform_indices = @transform_2, window_bounds = array<i64: 1, 512>}, {transform_indices = @transform_3, window_bounds = array<i64: 1, 16, 512>}]} {
    %c0 = arith.constant 0 : index
    %c0_0 = arith.constant 0 : index
    %c0_1 = arith.constant 0 : index
    %0 = vector.load %arg1[%c0, %c0_0, %c0_1] : memref<1x18x256xbf16, #tpu.memory_space<vmem>>, vector<1x18x256xbf16>
    %1 = vector.shape_cast %0 : vector<1x18x256xbf16> to vector<18x256xbf16>
    %2 = vector.extract_strided_slice %1 {offsets = [0, 0], sizes = [16, 256], strides = [1, 1]} : vector<18x256xbf16> to vector<16x256xbf16>
    %c0_2 = arith.constant 0 : index
    %c0_3 = arith.constant 0 : index
    %c0_4 = arith.constant 0 : index
    %3 = vector.load %arg2[%c0_2, %c0_3, %c0_4] : memref<3x256x512xbf16, #tpu.memory_space<vmem>>, vector<1x256x512xbf16>
    %4 = vector.shape_cast %3 : vector<1x256x512xbf16> to vector<256x512xbf16>
    %cst = arith.constant dense<0.000000e+00> : vector<16x512xf32>
    %5 = tpu.matmul %2, %4, %cst {dimension_numbers = #tpu.dot_dimension_numbers<[1], [0], [0], [1], [0, 0, 1, 1], [], []>} : vector<16x256xbf16>, vector<256x512xbf16>, vector<16x512xf32> -> vector<16x512xf32>
    %6 = vector.extract_strided_slice %1 {offsets = [1, 0], sizes = [16, 256], strides = [1, 1]} : vector<18x256xbf16> to vector<16x256xbf16>
    %c1 = arith.constant 1 : index
    %c0_5 = arith.constant 0 : index
    %c0_6 = arith.constant 0 : index
    %7 = vector.load %arg2[%c1, %c0_5, %c0_6] : memref<3x256x512xbf16, #tpu.memory_space<vmem>>, vector<1x256x512xbf16>
    %8 = vector.shape_cast %7 : vector<1x256x512xbf16> to vector<256x512xbf16>
    %cst_7 = arith.constant dense<0.000000e+00> : vector<16x512xf32>
    %9 = tpu.matmul %6, %8, %cst_7 {dimension_numbers = #tpu.dot_dimension_numbers<[1], [0], [0], [1], [0, 0, 1, 1], [], []>} : vector<16x256xbf16>, vector<256x512xbf16>, vector<16x512xf32> -> vector<16x512xf32>
    %10 = arith.addf %5, %9 : vector<16x512xf32>
    %11 = vector.extract_strided_slice %1 {offsets = [2, 0], sizes = [16, 256], strides = [1, 1]} : vector<18x256xbf16> to vector<16x256xbf16>
    %c2 = arith.constant 2 : index
    %c0_8 = arith.constant 0 : index
    %c0_9 = arith.constant 0 : index
    %12 = vector.load %arg2[%c2, %c0_8, %c0_9] : memref<3x256x512xbf16, #tpu.memory_space<vmem>>, vector<1x256x512xbf16>
    %13 = vector.shape_cast %12 : vector<1x256x512xbf16> to vector<256x512xbf16>
    %cst_10 = arith.constant dense<0.000000e+00> : vector<16x512xf32>
    %14 = tpu.matmul %11, %13, %cst_10 {dimension_numbers = #tpu.dot_dimension_numbers<[1], [0], [0], [1], [0, 0, 1, 1], [], []>} : vector<16x256xbf16>, vector<256x512xbf16>, vector<16x512xf32> -> vector<16x512xf32>
    %15 = arith.addf %10, %14 : vector<16x512xf32>
    %c0_11 = arith.constant 0 : index
    %c0_12 = arith.constant 0 : index
    %16 = vector.load %arg3[%c0_11, %c0_12] : memref<1x512xf32, #tpu.memory_space<vmem>>, vector<1x512xf32>
    %17 = vector.broadcast %16 : vector<1x512xf32> to vector<16x512xf32>
    %18 = arith.addf %15, %17 : vector<16x512xf32>
    %cst_13 = arith.constant 0.000000e+00 : f32
    %19 = vector.broadcast %cst_13 : f32 to vector<16x512xf32>
    %20 = arith.maximumf %18, %19 : vector<16x512xf32>
    %c0_14 = arith.constant 0 : index
    %c0_15 = arith.constant 0 : index
    %c0_16 = arith.constant 0 : index
    %21 = vector.load %arg4[%c0_14, %c0_15, %c0_16] : memref<1x16x512xf32, #tpu.memory_space<vmem>>, vector<1x16x512xf32>
    %22 = vector.shape_cast %21 : vector<1x16x512xf32> to vector<16x512xf32>
    %23 = vector.shape_cast %20 : vector<16x512xf32> to vector<1x16x512xf32>
    tpu.vector_store %arg4[%c0_14, %c0_15, %c0_16], %23 {strides = array<i32>} : memref<1x16x512xf32, #tpu.memory_space<vmem>>, vector<1x16x512xf32>,
    return
  }
  func.func @transform_0(%arg0: i32) -> (i32, i32, i32) {
    %c0_i32 = arith.constant 0 : i32
    %c0_i32_0 = arith.constant 0 : i32
    %c0_i32_1 = arith.constant 0 : i32
    return %arg0, %c0_i32, %c0_i32_0 : i32, i32, i32
  }
  func.func @transform_1(%arg0: i32) -> (i32, i32, i32) {
    %c0_i32 = arith.constant 0 : i32
    %c0_i32_0 = arith.constant 0 : i32
    %c0_i32_1 = arith.constant 0 : i32
    %c0_i32_2 = arith.constant 0 : i32
    return %c0_i32, %c0_i32_0, %c0_i32_1 : i32, i32, i32
  }
  func.func @transform_2(%arg0: i32) -> (i32, i32) {
    %c0_i32 = arith.constant 0 : i32
    %c0_i32_0 = arith.constant 0 : i32
    %c0_i32_1 = arith.constant 0 : i32
    return %c0_i32, %c0_i32_0 : i32, i32
  }
  func.func @transform_3(%arg0: i32) -> (i32, i32, i32) {
    %c0_i32 = arith.constant 0 : i32
    %c0_i32_0 = arith.constant 0 : i32
    %c0_i32_1 = arith.constant 0 : i32
    return %arg0, %c0_i32, %c0_i32_0 : i32, i32, i32
  }
}

module attributes {stable_mosaic.version = 11 : i64} {
  func.func @_maxpool3_kernel(%arg0: i32, %arg1: memref<1x8x512xf32, #tpu.memory_space<vmem>>, %arg2: memref<1x9x512xf32, #tpu.memory_space<vmem>>, %arg3: memref<1x8x512xf32, #tpu.memory_space<vmem>>) attributes {dimension_semantics = [#tpu.dimension_semantics<parallel>], iteration_bounds = array<i64: 2>, scalar_prefetch = 0 : i64, scratch_operands = 0 : i64, tpu.core_type = #tpu.core_type<tc>, window_params = [{transform_indices = @transform_0, window_bounds = array<i64: 1, 8, 512>}, {transform_indices = @transform_1, window_bounds = array<i64: 1, 9, 512>}, {transform_indices = @transform_2, window_bounds = array<i64: 1, 8, 512>}]} {
    %c0 = arith.constant 0 : index
    %c0_0 = arith.constant 0 : index
    %c0_1 = arith.constant 0 : index
    %0 = vector.load %arg2[%c0, %c0_0, %c0_1] : memref<1x9x512xf32, #tpu.memory_space<vmem>>, vector<1x8x512xf32>
    %1 = vector.shape_cast %0 : vector<1x8x512xf32> to vector<8x512xf32>
    %c0_2 = arith.constant 0 : index
    %c0_3 = arith.constant 0 : index
    %c0_4 = arith.constant 0 : index
    %2 = vector.load %arg1[%c0_2, %c0_3, %c0_4] : memref<1x8x512xf32, #tpu.memory_space<vmem>>, vector<1x8x512xf32>
    %3 = vector.shape_cast %2 : vector<1x8x512xf32> to vector<8x512xf32>
    %c0_5 = arith.constant 0 : index
    %c1 = arith.constant 1 : index
    %c0_6 = arith.constant 0 : index
    %4 = vector.load %arg2[%c0_5, %c1, %c0_6] : memref<1x9x512xf32, #tpu.memory_space<vmem>>, vector<1x8x512xf32>
    %5 = vector.shape_cast %4 : vector<1x8x512xf32> to vector<8x512xf32>
    %6 = arith.maximumf %1, %3 : vector<8x512xf32>
    %7 = arith.maximumf %6, %5 : vector<8x512xf32>
    %c0_7 = arith.constant 0 : index
    %c0_8 = arith.constant 0 : index
    %c0_9 = arith.constant 0 : index
    %8 = vector.load %arg3[%c0_7, %c0_8, %c0_9] : memref<1x8x512xf32, #tpu.memory_space<vmem>>, vector<1x8x512xf32>
    %9 = vector.shape_cast %8 : vector<1x8x512xf32> to vector<8x512xf32>
    %10 = vector.shape_cast %7 : vector<8x512xf32> to vector<1x8x512xf32>
    tpu.vector_store %arg3[%c0_7, %c0_8, %c0_9], %10 {strides = array<i32>} : memref<1x8x512xf32, #tpu.memory_space<vmem>>, vector<1x8x512xf32>,
    return
  }
  func.func @transform_0(%arg0: i32) -> (i32, i32, i32) {
    %c0_i32 = arith.constant 0 : i32
    %c0_i32_0 = arith.constant 0 : i32
    %c0_i32_1 = arith.constant 0 : i32
    return %arg0, %c0_i32, %c0_i32_0 : i32, i32, i32
  }
  func.func @transform_1(%arg0: i32) -> (i32, i32, i32) {
    %c0_i32 = arith.constant 0 : i32
    %c0_i32_0 = arith.constant 0 : i32
    %c0_i32_1 = arith.constant 0 : i32
    return %arg0, %c0_i32, %c0_i32_0 : i32, i32, i32
  }
  func.func @transform_2(%arg0: i32) -> (i32, i32, i32) {
    %c0_i32 = arith.constant 0 : i32
    %c0_i32_0 = arith.constant 0 : i32
    %c0_i32_1 = arith.constant 0 : i32
    return %arg0, %c0_i32, %c0_i32_0 : i32, i32, i32
  }
}

module attributes {stable_mosaic.version = 11 : i64} {
  func.func @_matmul_bias_kernel(%arg0: i32, %arg1: i32, %arg2: i32, %arg3: memref<8x2048xbf16, #tpu.memory_space<vmem>>, %arg4: memref<2048x512xbf16, #tpu.memory_space<vmem>>, %arg5: memref<1x512xf32, #tpu.memory_space<vmem>>, %arg6: memref<8x512xf32, #tpu.memory_space<vmem>>, %arg7: memref<8x512xf32, #tpu.memory_space<vmem>>) attributes {dimension_semantics = [#tpu.dimension_semantics<parallel>, #tpu.dimension_semantics<parallel>, #tpu.dimension_semantics<arbitrary>], iteration_bounds = array<i64: 1, 2, 2>, scalar_prefetch = 0 : i64, scratch_operands = 1 : i64, tpu.core_type = #tpu.core_type<tc>, window_params = [{transform_indices = @transform_0, window_bounds = array<i64: 8, 2048>}, {transform_indices = @transform_1, window_bounds = array<i64: 2048, 512>}, {transform_indices = @transform_2, window_bounds = array<i64: 1, 512>}, {transform_indices = @transform_3, window_bounds = array<i64: 8, 512>}]} {
    %c0_i32 = arith.constant 0 : i32
    %0 = arith.cmpi eq, %arg2, %c0_i32 : i32
    %1 = arith.extui %0 : i1 to i32
    %c0_i32_0 = arith.constant 0 : i32
    %2 = arith.cmpi ne, %1, %c0_i32_0 : i32
    scf.if %2 {
      %cst_9 = arith.constant 0.000000e+00 : f32
      %12 = vector.broadcast %cst_9 : f32 to vector<8x512xf32>
      %c0_10 = arith.constant 0 : index
      %c0_11 = arith.constant 0 : index
      %13 = vector.load %arg7[%c0_10, %c0_11] : memref<8x512xf32, #tpu.memory_space<vmem>>, vector<8x512xf32>
      tpu.vector_store %arg7[%c0_10, %c0_11], %12 {strides = array<i32>} : memref<8x512xf32, #tpu.memory_space<vmem>>, vector<8x512xf32>,
    } else {
    }
    %c0 = arith.constant 0 : index
    %c0_1 = arith.constant 0 : index
    %3 = vector.load %arg7[%c0, %c0_1] : memref<8x512xf32, #tpu.memory_space<vmem>>, vector<8x512xf32>
    %c0_2 = arith.constant 0 : index
    %c0_3 = arith.constant 0 : index
    %4 = vector.load %arg3[%c0_2, %c0_3] : memref<8x2048xbf16, #tpu.memory_space<vmem>>, vector<8x2048xbf16>
    %c0_4 = arith.constant 0 : index
    %c0_5 = arith.constant 0 : index
    %5 = vector.load %arg4[%c0_4, %c0_5] : memref<2048x512xbf16, #tpu.memory_space<vmem>>, vector<2048x512xbf16>
    %cst = arith.constant dense<0.000000e+00> : vector<8x512xf32>
    %6 = tpu.matmul %4, %5, %cst {dimension_numbers = #tpu.dot_dimension_numbers<[1], [0], [0], [1], [0, 0, 1, 1], [], []>} : vector<8x2048xbf16>, vector<2048x512xbf16>, vector<8x512xf32> -> vector<8x512xf32>
    %7 = arith.addf %3, %6 : vector<8x512xf32>
    %c0_6 = arith.constant 0 : index
    %c0_7 = arith.constant 0 : index
    %8 = vector.load %arg7[%c0_6, %c0_7] : memref<8x512xf32, #tpu.memory_space<vmem>>, vector<8x512xf32>
    tpu.vector_store %arg7[%c0_6, %c0_7], %7 {strides = array<i32>} : memref<8x512xf32, #tpu.memory_space<vmem>>, vector<8x512xf32>,
    %c1_i32 = arith.constant 1 : i32
    %9 = arith.cmpi eq, %arg2, %c1_i32 : i32
    %10 = arith.extui %9 : i1 to i32
    %c0_i32_8 = arith.constant 0 : i32
    %11 = arith.cmpi ne, %10, %c0_i32_8 : i32
    scf.if %11 {
      %c0_9 = arith.constant 0 : index
      %c0_10 = arith.constant 0 : index
      %12 = vector.load %arg7[%c0_9, %c0_10] : memref<8x512xf32, #tpu.memory_space<vmem>>, vector<8x512xf32>
      %c0_11 = arith.constant 0 : index
      %c0_12 = arith.constant 0 : index
      %13 = vector.load %arg5[%c0_11, %c0_12] : memref<1x512xf32, #tpu.memory_space<vmem>>, vector<1x512xf32>
      %14 = vector.broadcast %13 : vector<1x512xf32> to vector<8x512xf32>
      %15 = arith.addf %12, %14 : vector<8x512xf32>
      %cst_13 = arith.constant 0.000000e+00 : f32
      %16 = vector.broadcast %cst_13 : f32 to vector<8x512xf32>
      %17 = arith.maximumf %15, %16 : vector<8x512xf32>
      %c0_14 = arith.constant 0 : index
      %c0_15 = arith.constant 0 : index
      %18 = vector.load %arg6[%c0_14, %c0_15] : memref<8x512xf32, #tpu.memory_space<vmem>>, vector<8x512xf32>
      tpu.vector_store %arg6[%c0_14, %c0_15], %17 {strides = array<i32>} : memref<8x512xf32, #tpu.memory_space<vmem>>, vector<8x512xf32>,
    } else {
    }
    return
  }
  func.func @transform_0(%arg0: i32, %arg1: i32, %arg2: i32) -> (i32, i32) {
    %c0_i32 = arith.constant 0 : i32
    return %arg0, %arg2 : i32, i32
  }
  func.func @transform_1(%arg0: i32, %arg1: i32, %arg2: i32) -> (i32, i32) {
    %c0_i32 = arith.constant 0 : i32
    return %arg2, %arg1 : i32, i32
  }
  func.func @transform_2(%arg0: i32, %arg1: i32, %arg2: i32) -> (i32, i32) {
    %c0_i32 = arith.constant 0 : i32
    %c0_i32_0 = arith.constant 0 : i32
    return %c0_i32, %arg1 : i32, i32
  }
  func.func @transform_3(%arg0: i32, %arg1: i32, %arg2: i32) -> (i32, i32) {
    %c0_i32 = arith.constant 0 : i32
    return %arg0, %arg1 : i32, i32
  }
}

module attributes {stable_mosaic.version = 11 : i64} {
  func.func @_matmul_bias_kernel(%arg0: i32, %arg1: i32, %arg2: i32, %arg3: memref<8x1024xbf16, #tpu.memory_space<vmem>>, %arg4: memref<1024x512xbf16, #tpu.memory_space<vmem>>, %arg5: memref<1x512xf32, #tpu.memory_space<vmem>>, %arg6: memref<8x512xf32, #tpu.memory_space<vmem>>, %arg7: memref<8x512xf32, #tpu.memory_space<vmem>>) attributes {dimension_semantics = [#tpu.dimension_semantics<parallel>, #tpu.dimension_semantics<parallel>, #tpu.dimension_semantics<arbitrary>], iteration_bounds = array<i64: 1, 1, 1>, scalar_prefetch = 0 : i64, scratch_operands = 1 : i64, tpu.core_type = #tpu.core_type<tc>, window_params = [{transform_indices = @transform_0, window_bounds = array<i64: 8, 1024>}, {transform_indices = @transform_1, window_bounds = array<i64: 1024, 512>}, {transform_indices = @transform_2, window_bounds = array<i64: 1, 512>}, {transform_indices = @transform_3, window_bounds = array<i64: 8, 512>}]} {
    %c0_i32 = arith.constant 0 : i32
    %0 = arith.cmpi eq, %arg2, %c0_i32 : i32
    %1 = arith.extui %0 : i1 to i32
    %c0_i32_0 = arith.constant 0 : i32
    %2 = arith.cmpi ne, %1, %c0_i32_0 : i32
    scf.if %2 {
      %cst_10 = arith.constant 0.000000e+00 : f32
      %12 = vector.broadcast %cst_10 : f32 to vector<8x512xf32>
      %c0_11 = arith.constant 0 : index
      %c0_12 = arith.constant 0 : index
      %13 = vector.load %arg7[%c0_11, %c0_12] : memref<8x512xf32, #tpu.memory_space<vmem>>, vector<8x512xf32>
      tpu.vector_store %arg7[%c0_11, %c0_12], %12 {strides = array<i32>} : memref<8x512xf32, #tpu.memory_space<vmem>>, vector<8x512xf32>,
    } else {
    }
    %c0 = arith.constant 0 : index
    %c0_1 = arith.constant 0 : index
    %3 = vector.load %arg7[%c0, %c0_1] : memref<8x512xf32, #tpu.memory_space<vmem>>, vector<8x512xf32>
    %c0_2 = arith.constant 0 : index
    %c0_3 = arith.constant 0 : index
    %4 = vector.load %arg3[%c0_2, %c0_3] : memref<8x1024xbf16, #tpu.memory_space<vmem>>, vector<8x1024xbf16>
    %c0_4 = arith.constant 0 : index
    %c0_5 = arith.constant 0 : index
    %5 = vector.load %arg4[%c0_4, %c0_5] : memref<1024x512xbf16, #tpu.memory_space<vmem>>, vector<1024x512xbf16>
    %cst = arith.constant dense<0.000000e+00> : vector<8x512xf32>
    %6 = tpu.matmul %4, %5, %cst {dimension_numbers = #tpu.dot_dimension_numbers<[1], [0], [0], [1], [0, 0, 1, 1], [], []>} : vector<8x1024xbf16>, vector<1024x512xbf16>, vector<8x512xf32> -> vector<8x512xf32>
    %7 = arith.addf %3, %6 : vector<8x512xf32>
    %c0_6 = arith.constant 0 : index
    %c0_7 = arith.constant 0 : index
    %8 = vector.load %arg7[%c0_6, %c0_7] : memref<8x512xf32, #tpu.memory_space<vmem>>, vector<8x512xf32>
    tpu.vector_store %arg7[%c0_6, %c0_7], %7 {strides = array<i32>} : memref<8x512xf32, #tpu.memory_space<vmem>>, vector<8x512xf32>,
    %c0_i32_8 = arith.constant 0 : i32
    %9 = arith.cmpi eq, %arg2, %c0_i32_8 : i32
    %10 = arith.extui %9 : i1 to i32
    %c0_i32_9 = arith.constant 0 : i32
    %11 = arith.cmpi ne, %10, %c0_i32_9 : i32
    scf.if %11 {
      %c0_10 = arith.constant 0 : index
      %c0_11 = arith.constant 0 : index
      %12 = vector.load %arg7[%c0_10, %c0_11] : memref<8x512xf32, #tpu.memory_space<vmem>>, vector<8x512xf32>
      %c0_12 = arith.constant 0 : index
      %c0_13 = arith.constant 0 : index
      %13 = vector.load %arg5[%c0_12, %c0_13] : memref<1x512xf32, #tpu.memory_space<vmem>>, vector<1x512xf32>
      %14 = vector.broadcast %13 : vector<1x512xf32> to vector<8x512xf32>
      %15 = arith.addf %12, %14 : vector<8x512xf32>
      %cst_14 = arith.constant 0.000000e+00 : f32
      %16 = vector.broadcast %cst_14 : f32 to vector<8x512xf32>
      %17 = arith.maximumf %15, %16 : vector<8x512xf32>
      %c0_15 = arith.constant 0 : index
      %c0_16 = arith.constant 0 : index
      %18 = vector.load %arg6[%c0_15, %c0_16] : memref<8x512xf32, #tpu.memory_space<vmem>>, vector<8x512xf32>
      tpu.vector_store %arg6[%c0_15, %c0_16], %17 {strides = array<i32>} : memref<8x512xf32, #tpu.memory_space<vmem>>, vector<8x512xf32>,
    } else {
    }
    return
  }
  func.func @transform_0(%arg0: i32, %arg1: i32, %arg2: i32) -> (i32, i32) {
    %c0_i32 = arith.constant 0 : i32
    return %arg0, %arg2 : i32, i32
  }
  func.func @transform_1(%arg0: i32, %arg1: i32, %arg2: i32) -> (i32, i32) {
    %c0_i32 = arith.constant 0 : i32
    return %arg2, %arg1 : i32, i32
  }
  func.func @transform_2(%arg0: i32, %arg1: i32, %arg2: i32) -> (i32, i32) {
    %c0_i32 = arith.constant 0 : i32
    %c0_i32_0 = arith.constant 0 : i32
    return %c0_i32, %arg1 : i32, i32
  }
  func.func @transform_3(%arg0: i32, %arg1: i32, %arg2: i32) -> (i32, i32) {
    %c0_i32 = arith.constant 0 : i32
    return %arg0, %arg1 : i32, i32
  }
}

module attributes {stable_mosaic.version = 11 : i64} {
  func.func @_matmul_bias_kernel(%arg0: i32, %arg1: i32, %arg2: i32, %arg3: memref<8x512xbf16, #tpu.memory_space<vmem>>, %arg4: memref<512x128xbf16, #tpu.memory_space<vmem>>, %arg5: memref<1x128xf32, #tpu.memory_space<vmem>>, %arg6: memref<8x128xf32, #tpu.memory_space<vmem>>, %arg7: memref<8x128xf32, #tpu.memory_space<vmem>>) attributes {dimension_semantics = [#tpu.dimension_semantics<parallel>, #tpu.dimension_semantics<parallel>, #tpu.dimension_semantics<arbitrary>], iteration_bounds = array<i64: 1, 1, 1>, scalar_prefetch = 0 : i64, scratch_operands = 1 : i64, tpu.core_type = #tpu.core_type<tc>, window_params = [{transform_indices = @transform_0, window_bounds = array<i64: 8, 512>}, {transform_indices = @transform_1, window_bounds = array<i64: 512, 128>}, {transform_indices = @transform_2, window_bounds = array<i64: 1, 128>}, {transform_indices = @transform_3, window_bounds = array<i64: 8, 128>}]} {
    %c0_i32 = arith.constant 0 : i32
    %0 = arith.cmpi eq, %arg2, %c0_i32 : i32
    %1 = arith.extui %0 : i1 to i32
    %c0_i32_0 = arith.constant 0 : i32
    %2 = arith.cmpi ne, %1, %c0_i32_0 : i32
    scf.if %2 {
      %cst_10 = arith.constant 0.000000e+00 : f32
      %12 = vector.broadcast %cst_10 : f32 to vector<8x128xf32>
      %c0_11 = arith.constant 0 : index
      %c0_12 = arith.constant 0 : index
      %13 = vector.load %arg7[%c0_11, %c0_12] : memref<8x128xf32, #tpu.memory_space<vmem>>, vector<8x128xf32>
      tpu.vector_store %arg7[%c0_11, %c0_12], %12 {strides = array<i32>} : memref<8x128xf32, #tpu.memory_space<vmem>>, vector<8x128xf32>,
    } else {
    }
    %c0 = arith.constant 0 : index
    %c0_1 = arith.constant 0 : index
    %3 = vector.load %arg7[%c0, %c0_1] : memref<8x128xf32, #tpu.memory_space<vmem>>, vector<8x128xf32>
    %c0_2 = arith.constant 0 : index
    %c0_3 = arith.constant 0 : index
    %4 = vector.load %arg3[%c0_2, %c0_3] : memref<8x512xbf16, #tpu.memory_space<vmem>>, vector<8x512xbf16>
    %c0_4 = arith.constant 0 : index
    %c0_5 = arith.constant 0 : index
    %5 = vector.load %arg4[%c0_4, %c0_5] : memref<512x128xbf16, #tpu.memory_space<vmem>>, vector<512x128xbf16>
    %cst = arith.constant dense<0.000000e+00> : vector<8x128xf32>
    %6 = tpu.matmul %4, %5, %cst {dimension_numbers = #tpu.dot_dimension_numbers<[1], [0], [0], [1], [0, 0, 1, 1], [], []>} : vector<8x512xbf16>, vector<512x128xbf16>, vector<8x128xf32> -> vector<8x128xf32>
    %7 = arith.addf %3, %6 : vector<8x128xf32>
    %c0_6 = arith.constant 0 : index
    %c0_7 = arith.constant 0 : index
    %8 = vector.load %arg7[%c0_6, %c0_7] : memref<8x128xf32, #tpu.memory_space<vmem>>, vector<8x128xf32>
    tpu.vector_store %arg7[%c0_6, %c0_7], %7 {strides = array<i32>} : memref<8x128xf32, #tpu.memory_space<vmem>>, vector<8x128xf32>,
    %c0_i32_8 = arith.constant 0 : i32
    %9 = arith.cmpi eq, %arg2, %c0_i32_8 : i32
    %10 = arith.extui %9 : i1 to i32
    %c0_i32_9 = arith.constant 0 : i32
    %11 = arith.cmpi ne, %10, %c0_i32_9 : i32
    scf.if %11 {
      %c0_10 = arith.constant 0 : index
      %c0_11 = arith.constant 0 : index
      %12 = vector.load %arg7[%c0_10, %c0_11] : memref<8x128xf32, #tpu.memory_space<vmem>>, vector<8x128xf32>
      %c0_12 = arith.constant 0 : index
      %c0_13 = arith.constant 0 : index
      %13 = vector.load %arg5[%c0_12, %c0_13] : memref<1x128xf32, #tpu.memory_space<vmem>>, vector<1x128xf32>
      %14 = vector.broadcast %13 : vector<1x128xf32> to vector<8x128xf32>
      %15 = arith.addf %12, %14 : vector<8x128xf32>
      %c0_14 = arith.constant 0 : index
      %c0_15 = arith.constant 0 : index
      %16 = vector.load %arg6[%c0_14, %c0_15] : memref<8x128xf32, #tpu.memory_space<vmem>>, vector<8x128xf32>
      tpu.vector_store %arg6[%c0_14, %c0_15], %15 {strides = array<i32>} : memref<8x128xf32, #tpu.memory_space<vmem>>, vector<8x128xf32>,
    } else {
    }
    return
  }
  func.func @transform_0(%arg0: i32, %arg1: i32, %arg2: i32) -> (i32, i32) {
    %c0_i32 = arith.constant 0 : i32
    return %arg0, %arg2 : i32, i32
  }
  func.func @transform_1(%arg0: i32, %arg1: i32, %arg2: i32) -> (i32, i32) {
    %c0_i32 = arith.constant 0 : i32
    return %arg2, %arg1 : i32, i32
  }
  func.func @transform_2(%arg0: i32, %arg1: i32, %arg2: i32) -> (i32, i32) {
    %c0_i32 = arith.constant 0 : i32
    %c0_i32_0 = arith.constant 0 : i32
    return %c0_i32, %arg1 : i32, i32
  }
  func.func @transform_3(%arg0: i32, %arg1: i32, %arg2: i32) -> (i32, i32) {
    %c0_i32 = arith.constant 0 : i32
    return %arg0, %arg1 : i32, i32
  }
}

</mosaic_0001>

<bundles_post_ra>
// kernel: xrd_classifier_forward.11
= control target key start
LH: loop header
LB: loop body
LE: loop exit
PB: predicated region body
PF: predicated region fallthrough
CT: control target
= control target key end

     0   :  { %s326_s9 = smov 0   ;;  %s392_s0 = inlined_call_operand.vmem [shape: f32[2,64,64], index: 0, kind: input, shape index: {}]   ;;  %s393_s1 = inlined_call_operand.vmem [shape: f32[2,65,64], index: 1, kind: input, shape index: {}]   ;;  %s394_s2 = inlined_call_operand.vmem [shape: f32[2,64,64], index: 2, kind: output, shape index: {}]  }
   0x1 LB: > { %s280_s10 = sadd.s32 4294967295, %s309_s9   ;;  %p284_p0 = scmp.ge.s32.totalorder %s309_s9, 1  ;;  %s309_s9 = sphi %s326_s9, %s12_s9  }
   0x2   : > { %p122_p1 = scmp.lt.s32.totalorder %s309_s9, 3 }
   0x4   : > { %p123_p2 = pnand %p284_p0, %p122_p1 }
   0x5   : > { %p149_p3 = scmp.lt.s32.totalorder (!%p123_p2), %s280_s10, 1  ;;  %vm204_vm0 = vcmask (!%p123_p2), 523264  }
   0x6   : > { %126 = sbr.rel (%p123_p2) target bundleno = 29 (0x1d), region = 28 }
   0xd   : > { %s396_s10 = smov (!%p149_p3, %s280_s10), 1 }
   0xe   : > { %s292_s11 = sshll.u32 %s396_s10, 6  ;;  %s294_s12 = smul.u32 72, %s396_s10 }
   0xf   : > { %s337_s15 = scalar_lea.vmem %s392_s0, %s292_s11  ;;  %s356_s21 = scalar_lea.vmem %s394_s2, %s292_s11 }
  0x10   : > { %s342_s18 = scalar_lea.vmem %s393_s1, %s294_s12  ;;  %v172_v0 = vld [vmem:[%s337_s15] sm:$0xff]  ;;  %v173_v1 = vld [vmem:[%s337_s15 + $0x8] sm:$0xff]  ;;  %v174_v2 = vld [vmem:[%s337_s15 + $0x10] sm:$0xff] }
  0x11   : > { %v164_v3 = vld [vmem:[%s342_s18] sm:$0xff]  ;;  %v165_v5 = vld [vmem:[%s342_s18 + $0x8] sm:$0xff]  ;;  %v166_v9 = vld [vmem:[%s342_s18 + $0x10] sm:$0xff] }
  0x12   : > { %v180_v4 = vld [vmem:[%s342_s18 + $0x1] sm:$0xff]  ;;  %v188_v6 = vmax.f32 %v164_v3, %v172_v0  ;;  %v181_v7 = vld [vmem:[%s342_s18 + $0x9] sm:$0xff]  ;;  %v189_v8 = vmax.f32 %v165_v5, %v173_v1  ;;  %v182_v10 = vld [vmem:[%s342_s18 + $0x11] sm:$0xff]  ;;  %v190_v11 = vmax.f32 %v166_v9, %v174_v2 }
  0x13   : > { %v167_v12 = vld [vmem:[%s342_s18 + $0x18] sm:$0xff]  ;;  %v168_v18 = vld [vmem:[%s342_s18 + $0x20] sm:$0xff]  ;;  %v169_v23 = vld [vmem:[%s342_s18 + $0x28] sm:$0xff] }
  0x14   : > { %v175_v13 = vld [vmem:[%s337_s15 + $0x18] sm:$0xff]  ;;  %v196_v15 = vmax.f32 %v188_v6, %v180_v4  ;;  %v197_v16 = vmax.f32 %v189_v8, %v181_v7  ;;  %v176_v19 = vld [vmem:[%s337_s15 + $0x20] sm:$0xff]  ;;  %v198_v21 = vmax.f32 %v190_v11, %v182_v10  ;;  %v177_v24 = vld [vmem:[%s337_s15 + $0x28] sm:$0xff] }
  0x15   : > { %v183_v14 = vld [vmem:[%s342_s18 + $0x19] sm:$0xff]  ;;  %v191_v17 = vmax.f32 %v167_v12, %v175_v13  ;;  %v184_v20 = vld [vmem:[%s342_s18 + $0x21] sm:$0xff]  ;;  %v192_v22 = vmax.f32 %v168_v18, %v176_v19  ;;  %v185_v25 = vld [vmem:[%s342_s18 + $0x29] sm:$0xff]  ;;  %v193_v27 = vmax.f32 %v169_v23, %v177_v24 }
  0x16   : > { %205 = vst.msk [vmem:[%s356_s21] sm:$0xff] %vm204_vm0, %v196_v15  ;;  %206 = vst.msk [vmem:[%s356_s21 + $0x8] sm:$0xff] %vm204_vm0, %v197_v16  ;;  %v170_v28 = vld [vmem:[%s342_s18 + $0x30] sm:$0xff]  ;;  %v171_v33 = vld [vmem:[%s342_s18 + $0x38] sm:$0xff] }
  0x17   : > { %v199_v26 = vmax.f32 %v191_v17, %v183_v14  ;;  %v178_v29 = vld [vmem:[%s337_s15 + $0x30] sm:$0xff]  ;;  %207 = vst.msk [vmem:[%s356_s21 + $0x10] sm:$0xff] %vm204_vm0, %v198_v21  ;;  %v200_v31 = vmax.f32 %v192_v22, %v184_v20  ;;  %v179_v34 = vld [vmem:[%s337_s15 + $0x38] sm:$0xff]  ;;  %v201_v36 = vmax.f32 %v193_v27, %v185_v25 }
  0x18   : > { %v186_v30 = vld [vmem:[%s342_s18 + $0x31] sm:$0xff]  ;;  %v194_v32 = vmax.f32 %v170_v28, %v178_v29  ;;  %v187_v35 = vld [vmem:[%s342_s18 + $0x39] sm:$0xff]  ;;  %v195_v37 = vmax.f32 %v171_v33, %v179_v34 }
  0x19   : > { %208 = vst.msk [vmem:[%s356_s21 + $0x18] sm:$0xff] %vm204_vm0, %v199_v26  ;;  %209 = vst.msk [vmem:[%s356_s21 + $0x20] sm:$0xff] %vm204_vm0, %v200_v31 }
  0x1a   : > { %v202_v38 = vmax.f32 %v194_v32, %v186_v30  ;;  %210 = vst.msk [vmem:[%s356_s21 + $0x28] sm:$0xff] %vm204_vm0, %v201_v36  ;;  %v203_v39 = vmax.f32 %v195_v37, %v187_v35 }
  0x1c   : > { %211 = vst.msk [vmem:[%s356_s21 + $0x30] sm:$0xff] %vm204_vm0, %v202_v38  ;;  %212 = vst.msk [vmem:[%s356_s21 + $0x38] sm:$0xff] %vm204_vm0, %v203_v39 }
  0x1d PF: > { %s12_s9 = sadd.s32 1, %s309_s9  }
  0x1e   : > { %p9_p4 = scmp.ge.s32.totalorder %s12_s9, 4  }
  0x20   :  { %11 = sbr.rel (!%p9_p4) target bundleno = 1 (0x1), region = 61 }

// kernel: xrd_classifier_forward.10
= control target key start
LH: loop header
LB: loop body
LE: loop exit
PB: predicated region body
PF: predicated region fallthrough
CT: control target
= control target key end

     0   :  { %vm245_vm0 = vcmask 1043456   ;;  %vm196_vm1 = vcmask 64512   ;;  %s940_s1 = inlined_call_operand.vmem [shape: bf16[8,128], index: 1, kind: input, shape index: {}]   ;;  %s941_s0 = inlined_call_operand.vmem [shape: bf16[256,8], index: 0, kind: input, shape index: {}]   ;;  %s942_s2 = inlined_call_operand.vmem [shape: f32[1,128], index: 2, kind: input, shape index: {}]   ;;  %s943_s3 = inlined_call_operand.vmem [shape: f32[256,128], index: 3, kind: output, shape index: {}]  }
   0x1   :  { %v115_v0 = vld [vmem:[%s940_s1] sm:$0xf]  ;;  %v706_v4 = vld [vmem:[%s941_s0 + $0x8] sm:$0xff]   ;;  %v708_v6 = vld [vmem:[%s941_s0 + $0x10] sm:$0xff]  }
   0x2   :  { %702 = vmatprep.subr.msk.bf16.mxu0 %vm245_vm0, %v115_v0  ;;  %703 = vmatprep.subr.msk.bf16.mxu1 %vm245_vm0, %v115_v0  ;;  %v247_v1 = vsel %vm245_vm0, %v115_v0, 0  ;;  %v704_v2 = vld [vmem:[%s941_s0] sm:$0xff]   ;;  %v707_v5 = vld [vmem:[%s941_s0 + $0x48] sm:$0xff]   ;;  %v709_v7 = vld [vmem:[%s941_s0 + $0x50] sm:$0xff]  }
   0x3   :  { %667 = vmatpush3.bf16.msra.mxu0 %v247_v1  ;;  %701 = vmatpush3.bf16.msra.mxu1 %v247_v1  ;;  %v705_v3 = vld [vmem:[%s941_s0 + $0x40] sm:$0xff]   ;;  %v710_v8 = vld [vmem:[%s941_s0 + $0x18] sm:$0xff]   ;;  %v714_v12 = vld [vmem:[%s941_s0 + $0x28] sm:$0xff]  }
   0x4   :  { %668 = vmatprep.mubr.msk.bf16.mxu0 %vm196_vm1, %v704_v2  ;;  %684 = vmatprep.mubr.msk.bf16.mxu1 %vm196_vm1, %v705_v3  ;;  %v711_v9 = vld [vmem:[%s941_s0 + $0x58] sm:$0xff]   ;;  %v712_v10 = vld [vmem:[%s941_s0 + $0x20] sm:$0xff]   ;;  %v715_v13 = vld [vmem:[%s941_s0 + $0x68] sm:$0xff]  }
   0x5   :  { %v713_v11 = vld [vmem:[%s941_s0 + $0x60] sm:$0xff]   ;;  %v716_v14 = vld [vmem:[%s941_s0 + $0x30] sm:$0xff]   ;;  %v718_v16 = vld [vmem:[%s941_s0 + $0x38] sm:$0xff]  }
   0x6   :  { %669 = vmatmul.mubr.msk.bf16.vlgmr.msra.gmra.mrb[0].mxu0 %vm196_vm1, %v706_v4  ;;  %685 = vmatmul.mubr.msk.bf16.vlgmr.msra.gmra.mrb[0].mxu1 %vm196_vm1, %v707_v5  ;;  %v717_v15 = vld [vmem:[%s941_s0 + $0x70] sm:$0xff]   ;;  %v719_v17 = vld [vmem:[%s941_s0 + $0x78] sm:$0xff]   ;;  %v810_v18 = vld [vmem:[%s942_s2] ss:$0 sm:$0xff] }
   0x7   :  { %672 = vmatprep.mubr.msk.bf16.mxu0 %vm196_vm1, %v708_v6  ;;  %688 = vmatprep.mubr.msk.bf16.mxu1 %vm196_vm1, %v709_v7 }
   0xe   :  { %673 = vmatmul.mubr.msk.bf16.gmra.mrb[4].mxu0 %vm196_vm1, %v710_v8  ;;  %689 = vmatmul.mubr.msk.bf16.gmra.mrb[4].mxu1 %vm196_vm1, %v711_v9 }
   0xf   :  { %676 = vmatprep.mubr.msk.bf16.mxu0 %vm196_vm1, %v712_v10  ;;  %692 = vmatprep.mubr.msk.bf16.mxu1 %vm196_vm1, %v713_v11 }
  0x16   :  { %677 = vmatmul.mubr.msk.bf16.gmra.mrb[8].mxu0 %vm196_vm1, %v714_v12  ;;  %693 = vmatmul.mubr.msk.bf16.gmra.mrb[8].mxu1 %vm196_vm1, %v715_v13 }
  0x17   :  { %680 = vmatprep.mubr.msk.bf16.mxu0 %vm196_vm1, %v716_v14  ;;  %696 = vmatprep.mubr.msk.bf16.mxu1 %vm196_vm1, %v717_v15 }
  0x1e   :  { %681 = vmatmul.mubr.msk.bf16.gmra.mrb[12].mxu0 %vm196_vm1, %v718_v16  ;;  %697 = vmatmul.mubr.msk.bf16.gmra.mrb[12].mxu1 %vm196_vm1, %v719_v17 }
  0xd9   :  { %v670_v19 = vpop.f32.mrb[0].mxu0  ;;  %v686_v21 = vpop.f32.mrb[0].mxu1 }
  0xda   :  { %v518_v20 = vadd.f32 %v670_v19, %v810_v18  ;;  %v283_v22 = vpop.f32.mrb[1].mxu0  ;;  %v534_v23 = vadd.f32 %v686_v21, %v810_v18  ;;  %v347_v25 = vpop.f32.mrb[1].mxu1 }
  0xdb   :  { %v516_v24 = vadd.f32 %v810_v18, %v283_v22  ;;  %v671_v26 = vpop.f32.mrb[2].mxu0  ;;  %v532_v28 = vadd.f32 %v810_v18, %v347_v25  ;;  %v687_v30 = vpop.f32.mrb[2].mxu1 }
  0xdc   :  { %v550_v27 = vmax.f32 %v518_v20, 0.0  ;;  %v519_v29 = vadd.f32 %v671_v26, %v810_v18  ;;  %v286_v31 = vpop.f32.mrb[3].mxu0  ;;  %v566_v32 = vmax.f32 %v534_v23, 0.0  ;;  %v535_v34 = vadd.f32 %v687_v30, %v810_v18  ;;  %v350_v36 = vpop.f32.mrb[3].mxu1 }
  0xdd   :  { %v548_v33 = vmax.f32 %v516_v24, 0.0  ;;  %v517_v35 = vadd.f32 %v810_v18, %v286_v31  ;;  %v564_v37 = vmax.f32 %v532_v28, 0.0  ;;  %v533_v39 = vadd.f32 %v810_v18, %v350_v36 }
  0xde   :  { %582 = vst [vmem:[%s943_s3 + $0x10] sm:$0xff] %v550_v27  ;;  %v551_v38 = vmax.f32 %v519_v29, 0.0  ;;  %598 = vst [vmem:[%s943_s3 + $0x90] sm:$0xff] %v566_v32  ;;  %v567_v40 = vmax.f32 %v535_v34, 0.0 }
  0xdf   :  { %580 = vst [vmem:[%s943_s3] sm:$0xff] %v548_v33  ;;  %v549_v41 = vmax.f32 %v517_v35, 0.0  ;;  %596 = vst [vmem:[%s943_s3 + $0x80] sm:$0xff] %v564_v37  ;;  %v565_v42 = vmax.f32 %v533_v39, 0.0 }
  0xe0   :  { %583 = vst [vmem:[%s943_s3 + $0x18] sm:$0xff] %v551_v38  ;;  %599 = vst [vmem:[%s943_s3 + $0x98] sm:$0xff] %v567_v40 }
  0xe1   :  { %581 = vst [vmem:[%s943_s3 + $0x8] sm:$0xff] %v549_v41  ;;  %v674_v43 = vpop.f32.mrb[4].mxu0  ;;  %597 = vst [vmem:[%s943_s3 + $0x88] sm:$0xff] %v565_v42  ;;  %v690_v45 = vpop.f32.mrb[4].mxu1 }
  0xe2   :  { %v522_v44 = vadd.f32 %v674_v43, %v810_v18  ;;  %v299_v46 = vpop.f32.mrb[5].mxu0  ;;  %v538_v47 = vadd.f32 %v690_v45, %v810_v18  ;;  %v363_v49 = vpop.f32.mrb[5].mxu1 }
  0xe3   :  { %v520_v48 = vadd.f32 %v810_v18, %v299_v46  ;;  %v675_v50 = vpop.f32.mrb[6].mxu0  ;;  %v536_v52 = vadd.f32 %v810_v18, %v363_v49  ;;  %v691_v54 = vpop.f32.mrb[6].mxu1 }
  0xe4   :  { %v554_v51 = vmax.f32 %v522_v44, 0.0  ;;  %v523_v53 = vadd.f32 %v675_v50, %v810_v18  ;;  %v302_v55 = vpop.f32.mrb[7].mxu0  ;;  %v570_v56 = vmax.f32 %v538_v47, 0.0  ;;  %v539_v58 = vadd.f32 %v691_v54, %v810_v18  ;;  %v366_v60 = vpop.f32.mrb[7].mxu1 }
  0xe5   :  { %v552_v57 = vmax.f32 %v520_v48, 0.0  ;;  %v521_v59 = vadd.f32 %v810_v18, %v302_v55  ;;  %v568_v61 = vmax.f32 %v536_v52, 0.0  ;;  %v537_v63 = vadd.f32 %v810_v18, %v366_v60 }
  0xe6   :  { %586 = vst [vmem:[%s943_s3 + $0x30] sm:$0xff] %v554_v51  ;;  %v555_v62 = vmax.f32 %v523_v53, 0.0  ;;  %602 = vst [vmem:[%s943_s3 + $0xb0] sm:$0xff] %v570_v56  ;;  %v571_v0 = vmax.f32 %v539_v58, 0.0 }
  0xe7   :  { %584 = vst [vmem:[%s943_s3 + $0x20] sm:$0xff] %v552_v57  ;;  %v553_v1 = vmax.f32 %v521_v59, 0.0  ;;  %600 = vst [vmem:[%s943_s3 + $0xa0] sm:$0xff] %v568_v61  ;;  %v569_v2 = vmax.f32 %v537_v63, 0.0 }
  0xe8   :  { %587 = vst [vmem:[%s943_s3 + $0x38] sm:$0xff] %v555_v62  ;;  %603 = vst [vmem:[%s943_s3 + $0xb8] sm:$0xff] %v571_v0 }
  0xe9   :  { %585 = vst [vmem:[%s943_s3 + $0x28] sm:$0xff] %v553_v1  ;;  %v678_v3 = vpop.f32.mrb[8].mxu0  ;;  %601 = vst [vmem:[%s943_s3 + $0xa8] sm:$0xff] %v569_v2  ;;  %v694_v5 = vpop.f32.mrb[8].mxu1 }
  0xea   :  { %v526_v4 = vadd.f32 %v678_v3, %v810_v18  ;;  %v315_v6 = vpop.f32.mrb[9].mxu0  ;;  %v542_v7 = vadd.f32 %v694_v5, %v810_v18  ;;  %v379_v9 = vpop.f32.mrb[9].mxu1 }
  0xeb   :  { %v524_v8 = vadd.f32 %v810_v18, %v315_v6  ;;  %v679_v10 = vpop.f32.mrb[10].mxu0  ;;  %v540_v12 = vadd.f32 %v810_v18, %v379_v9  ;;  %v695_v14 = vpop.f32.mrb[10].mxu1 }
  0xec   :  { %v558_v11 = vmax.f32 %v526_v4, 0.0  ;;  %v527_v13 = vadd.f32 %v679_v10, %v810_v18  ;;  %v318_v15 = vpop.f32.mrb[11].mxu0  ;;  %v574_v16 = vmax.f32 %v542_v7, 0.0  ;;  %v543_v19 = vadd.f32 %v695_v14, %v810_v18  ;;  %v382_v21 = vpop.f32.mrb[11].mxu1 }
  0xed   :  { %v556_v17 = vmax.f32 %v524_v8, 0.0  ;;  %v525_v20 = vadd.f32 %v810_v18, %v318_v15  ;;  %v572_v22 = vmax.f32 %v540_v12, 0.0  ;;  %v541_v24 = vadd.f32 %v810_v18, %v382_v21 }
  0xee   :  { %590 = vst [vmem:[%s943_s3 + $0x50] sm:$0xff] %v558_v11  ;;  %v559_v23 = vmax.f32 %v527_v13, 0.0  ;;  %606 = vst [vmem:[%s943_s3 + $0xd0] sm:$0xff] %v574_v16  ;;  %v575_v25 = vmax.f32 %v543_v19, 0.0 }
  0xef   :  { %588 = vst [vmem:[%s943_s3 + $0x40] sm:$0xff] %v556_v17  ;;  %v557_v26 = vmax.f32 %v525_v20, 0.0  ;;  %604 = vst [vmem:[%s943_s3 + $0xc0] sm:$0xff] %v572_v22  ;;  %v573_v27 = vmax.f32 %v541_v24, 0.0 }
  0xf0   :  { %591 = vst [vmem:[%s943_s3 + $0x58] sm:$0xff] %v559_v23  ;;  %607 = vst [vmem:[%s943_s3 + $0xd8] sm:$0xff] %v575_v25 }
  0xf1   :  { %589 = vst [vmem:[%s943_s3 + $0x48] sm:$0xff] %v557_v26  ;;  %v682_v28 = vpop.f32.mrb[12].mxu0  ;;  %605 = vst [vmem:[%s943_s3 + $0xc8] sm:$0xff] %v573_v27  ;;  %v698_v30 = vpop.f32.mrb[12].mxu1 }
  0xf2   :  { %v530_v29 = vadd.f32 %v682_v28, %v810_v18  ;;  %v331_v31 = vpop.f32.mrb[13].mxu0  ;;  %v546_v32 = vadd.f32 %v698_v30, %v810_v18  ;;  %v395_v34 = vpop.f32.mrb[13].mxu1 }
  0xf3   :  { %v528_v33 = vadd.f32 %v810_v18, %v331_v31  ;;  %v683_v35 = vpop.f32.mrb[14].mxu0  ;;  %v544_v37 = vadd.f32 %v810_v18, %v395_v34  ;;  %v699_v39 = vpop.f32.mrb[14].mxu1 }
  0xf4   :  { %v562_v36 = vmax.f32 %v530_v29, 0.0  ;;  %v531_v38 = vadd.f32 %v683_v35, %v810_v18  ;;  %v334_v40 = vpop.f32.mrb[15].mxu0  ;;  %v578_v41 = vmax.f32 %v546_v32, 0.0  ;;  %v547_v43 = vadd.f32 %v699_v39, %v810_v18  ;;  %v398_v45 = vpop.f32.mrb[15].mxu1 }
  0xf5   :  { %v560_v42 = vmax.f32 %v528_v33, 0.0  ;;  %v529_v44 = vadd.f32 %v810_v18, %v334_v40  ;;  %v576_v46 = vmax.f32 %v544_v37, 0.0  ;;  %v545_v48 = vadd.f32 %v810_v18, %v398_v45 }
  0xf6   :  { %594 = vst [vmem:[%s943_s3 + $0x70] sm:$0xff] %v562_v36  ;;  %v563_v47 = vmax.f32 %v531_v38, 0.0  ;;  %610 = vst [vmem:[%s943_s3 + $0xf0] sm:$0xff] %v578_v41  ;;  %v579_v49 = vmax.f32 %v547_v43, 0.0 }
  0xf7   :  { %592 = vst [vmem:[%s943_s3 + $0x60] sm:$0xff] %v560_v42  ;;  %v561_v50 = vmax.f32 %v529_v44, 0.0  ;;  %608 = vst [vmem:[%s943_s3 + $0xe0] sm:$0xff] %v576_v46  ;;  %v577_v51 = vmax.f32 %v545_v48, 0.0 }
  0xf8   :  { %595 = vst [vmem:[%s943_s3 + $0x78] sm:$0xff] %v563_v47  ;;  %611 = vst [vmem:[%s943_s3 + $0xf8] sm:$0xff] %v579_v49 }
  0xf9   :  { %593 = vst [vmem:[%s943_s3 + $0x68] sm:$0xff] %v561_v50  ;;  %609 = vst [vmem:[%s943_s3 + $0xe8] sm:$0xff] %v577_v51 }

// kernel: xrd_classifier_forward.13
= control target key start
LH: loop header
LB: loop body
LE: loop exit
PB: predicated region body
PF: predicated region fallthrough
CT: control target
= control target key end

     0   :  { %s289_s9 = smov 0   ;;  %s303_s0 = inlined_call_operand.vmem [shape: f32[2,16,128], index: 0, kind: input, shape index: {}]   ;;  %s304_s1 = inlined_call_operand.vmem [shape: f32[2,17,128], index: 1, kind: input, shape index: {}]   ;;  %s305_s2 = inlined_call_operand.vmem [shape: f32[2,16,128], index: 2, kind: output, shape index: {}]  }
   0x1 LB: > { %s243_s10 = sadd.s32 4294967295, %s272_s9   ;;  %p247_p0 = scmp.ge.s32.totalorder %s272_s9, 1  ;;  %s272_s9 = sphi %s289_s9, %s12_s9  }
   0x2   : > { %p122_p1 = scmp.lt.s32.totalorder %s272_s9, 3 }
   0x4   : > { %p123_p2 = pnand %p247_p0, %p122_p1 }
   0x5   : > { %p149_p3 = scmp.lt.s32.totalorder (!%p123_p2), %s243_s10, 1 }
   0x6   : > { %126 = sbr.rel (%p123_p2) target bundleno = 23 (0x17), region = 28 }
   0xd   : > { %s307_s10 = smov (!%p149_p3, %s243_s10), 1 }
   0xe   : > { %s255_s11 = sshll.u32 %s307_s10, 4  ;;  %s257_s12 = smul.u32 24, %s307_s10 }
   0xf   : > { %s153_s15 = scalar_lea.vmem %s303_s0, %s255_s11  ;;  %s163_s21 = scalar_lea.vmem %s305_s2, %s255_s11 }
  0x10   : > { %s158_s18 = scalar_lea.vmem %s304_s1, %s257_s12  ;;  %v166_v0 = vld [vmem:[%s153_s15] sm:$0xff]  ;;  %v167_v1 = vld [vmem:[%s153_s15 + $0x8] sm:$0xff] }
  0x11   : > { %v164_v2 = vld [vmem:[%s158_s18] sm:$0xff]  ;;  %v165_v4 = vld [vmem:[%s158_s18 + $0x8] sm:$0xff] }
  0x12   : > { %v168_v3 = vld [vmem:[%s158_s18 + $0x1] sm:$0xff]  ;;  %v170_v5 = vmax.f32 %v164_v2, %v166_v0  ;;  %v169_v6 = vld [vmem:[%s158_s18 + $0x9] sm:$0xff]  ;;  %v171_v7 = vmax.f32 %v165_v4, %v167_v1 }
  0x14   : > { %v172_v8 = vmax.f32 %v170_v5, %v168_v3  ;;  %v173_v9 = vmax.f32 %v171_v7, %v169_v6 }
  0x16   : > { %174 = vst [vmem:[%s163_s21] sm:$0xff] %v172_v8  ;;  %175 = vst [vmem:[%s163_s21 + $0x8] sm:$0xff] %v173_v9 }
  0x17 PF: > { %s12_s9 = sadd.s32 1, %s272_s9  }
  0x18   : > { %p9_p4 = scmp.ge.s32.totalorder %s12_s9, 4  }
  0x1a   :  { %11 = sbr.rel (!%p9_p4) target bundleno = 1 (0x1), region = 61 }

// kernel: xrd_classifier_forward.12
= control target key start
LH: loop header
LB: loop body
LE: loop exit
PB: predicated region body
PF: predicated region fallthrough
CT: control target
= control target key end

     0   :  { %8 = vsyncpa [#allocation4], 0  ;;  %s690_s12 = smov [#allocation3]   ;;  %s855_s0 = inlined_call_operand.vmem [shape: bf16[64,384], index: 0, kind: input, shape index: {}]   ;;  %s856_s1 = inlined_call_operand.vmem [shape: bf16[384,128], index: 1, kind: input, shape index: {}]   ;;  %s857_s2 = inlined_call_operand.hbm [shape: f32[1,128], index: 2, kind: input, shape index: {}]   ;;  %s858_s3 = inlined_call_operand.vmem [shape: f32[64,128], index: 3, kind: output, shape index: {}]  }
   0x1   :  { %s19_s13 = sshll.u32 %s690_s12, 4  ;;  %s666_s16 = scalar_lea.hbm %s857_s2, 16  ;;  %s20_s13 = int_to_ptr.vmem [resolvable:$true] %s19_s13 }
   0x2   :  { %p667_p0 = scmp.ne.s32.totalorder %s857_s2, %s666_s16  ;;  %p670_p1 = scmp.lt.u32.totalorder %s666_s16, %s857_s2 }
   0x4   :  { %p672_p2 = pnand %p670_p1, %p667_p0 }
   0x6   :  { %675 = shalt.err (!%p672_p2)
}
   0x7   :  { %s676_s21 = scalar_lea.vmem %s20_s13, 16  ;;  %s680_s22 = scalar_lea.vmem %s20_s13, 32 }
   0x8   :  { %p677_p3 = scmp.ne.s32.totalorder %s20_s13, %s676_s21  ;;  %p681_p4 = scmp.lt.s32.totalorder %s20_s13, %s20_s13 }
   0x9   :  { %p682_p5 = scmp.lt.s32.totalorder %s680_s22, %s676_s21 }
   0xb   :  { %p683_p6 = por %p682_p5, %p681_p4 }
   0xd   :  { %p684_p7 = pnand %p683_p6, %p677_p3 }
   0xf   :  { %687 = shalt.err (!%p684_p7)
}
  0x10   :  { %22 = dma.hbm_to_vmem [thread:$0]  %s857_s2, 16, %s20_s13, [#allocation4]  }
  0x11   :  { %688 = dma.done.wait [#allocation4], 16  }
  0x12   :  { %689 = vsyncadd [#allocation4], 4294967280  ;;  %v626_v0 = vld [vmem:[%s856_s1 + $0x40] sm:$0xff]   ;;  %v629_v3 = vld [vmem:[%s856_s1 + $0x48] sm:$0xff]  }
  0x13   :  { %v627_v1 = vld [vmem:[%s856_s1] sm:$0xff]   ;;  %549 = vmatprep.subr.bf16.mxu0 %v626_v0  ;;  %v630_v4 = vld [vmem:[%s856_s1 + $0x8] sm:$0xff]   ;;  %v632_v6 = vld [vmem:[%s856_s1 + $0x50] sm:$0xff]  }
  0x14   :  { %v628_v2 = vld [vmem:[%s856_s1 + $0x80] sm:$0xff]   ;;  %550 = vmatpush3.bf16.msra.mxu0 %v627_v1  ;;  %v631_v5 = vld [vmem:[%s856_s1 + $0x88] sm:$0xff]   ;;  %v633_v7 = vld [vmem:[%s856_s1 + $0x10] sm:$0xff]  }
  0x15   :  { %601 = vmatprep.subr.bf16.mxu1 %v628_v2  ;;  %551 = vmatprep.subr.bf16.mxu0 %v629_v3  ;;  %v634_v8 = vld [vmem:[%s856_s1 + $0x90] sm:$0xff]   ;;  %v635_v9 = vld [vmem:[%s856_s1 + $0x58] sm:$0xff]   ;;  %v638_v12 = vld [vmem:[%s856_s1 + $0x60] sm:$0xff]  }
  0x16   :  { %602 = vmatpush3.bf16.msra.mxu1 %v628_v2  ;;  %v636_v10 = vld [vmem:[%s856_s1 + $0x18] sm:$0xff]   ;;  %v640_v13 = vld [vmem:[%s856_s1 + $0xa0] sm:$0xff]   ;;  %v641_v15 = vld [vmem:[%s856_s1 + $0x68] sm:$0xff]  }
  0x17   :  { %603 = vmatprep.subr.bf16.mxu1 %v631_v5  ;;  %v637_v11 = vld [vmem:[%s856_s1 + $0x98] sm:$0xff]   ;;  %v639_v14 = vld [vmem:[%s856_s1 + $0x20] sm:$0xff]   ;;  %v643_v16 = vld [vmem:[%s856_s1 + $0xa8] sm:$0xff]  }
  0x18   :  { %552 = vmatpush3.bf16.msra.mxu0 %v630_v4  ;;  %v642_v17 = vld [vmem:[%s856_s1 + $0x28] sm:$0xff]   ;;  %v644_v18 = vld [vmem:[%s856_s1 + $0x70] sm:$0xff]   ;;  %v647_v21 = vld [vmem:[%s856_s1 + $0x78] sm:$0xff]  }
  0x19   :  { %553 = vmatprep.subr.bf16.mxu0 %v632_v6  ;;  %v645_v19 = vld [vmem:[%s856_s1 + $0x30] sm:$0xff]   ;;  %v649_v22 = vld [vmem:[%s856_s1 + $0xb8] sm:$0xff]   ;;  %v650_v26 = vld [vmem:[%s855_s0] ss:$12 sps:$4 sm:$0xff]  }
  0x1a   :  { %604 = vmatpush3.bf16.msra.mxu1 %v631_v5  ;;  %v646_v20 = vld [vmem:[%s856_s1 + $0xb0] sm:$0xff]   ;;  %v648_v25 = vld [vmem:[%s856_s1 + $0x38] sm:$0xff]   ;;  %v654_v28 = vld [vmem:[%s855_s0 + $0x20] ss:$12 sps:$4 sm:$0xff]  }
  0x1b   :  { %605 = vmatprep.subr.bf16.mxu1 %v634_v8  ;;  %v652_v23 = vld [vmem:[%s855_s0 + $0x4] ss:$12 sps:$4 sm:$0xff]   ;;  %v653_v24 = vld [vmem:[%s855_s0 + $0x8] ss:$12 sps:$4 sm:$0xff]   ;;  %v663_v34 = vld [vmem:[%s855_s0 + $0x4c] ss:$12 sps:$4 sm:$0xff]  }
  0x1c   :  { %554 = vmatpush3.bf16.msra.mxu0 %v633_v7  ;;  %351 = vmatprep.mubr.bf16.mxu0 %v652_v23  ;;  %v655_v27 = vld [vmem:[%s855_s0 + $0x1c] ss:$12 sps:$4 sm:$0xff]   ;;  %v661_v29 = vld [vmem:[%s855_s0 + $0x38] ss:$12 sps:$4 sm:$0xff]   ;;  %v658_v31 = vld [vmem:[%s855_s0 + $0x34] ss:$12 sps:$4 sm:$0xff]  }
  0x1d   :  { %555 = vmatprep.subr.bf16.mxu0 %v635_v9  ;;  %617 = vmatprep.mubr.bf16.mxu1 %v653_v24  ;;  %v657_v30 = vld [vmem:[%s855_s0 + $0x18] ss:$12 sps:$4 sm:$0xff]   ;;  %v662_v32 = vld [vmem:[%s855_s0 + $0x50] ss:$12 sps:$4 sm:$0xff]   ;;  %v665_v35 = vld [vmem:[%s855_s0 + $0x48] ss:$12 sps:$4 sm:$0xff]  }
  0x1e   :  { %606 = vmatpush3.bf16.msra.mxu1 %v634_v8  ;;  %v660_v33 = vld [vmem:[%s855_s0 + $0x30] ss:$12 sps:$4 sm:$0xff]   ;;  %v548_v43 = vld [vmem:[#allocation3] ss:$0 sm:$0xff] }
  0x1f   :  { %607 = vmatprep.subr.bf16.mxu1 %v637_v11 }
  0x20   :  { %556 = vmatpush3.bf16.msra.mxu0 %v636_v10 }
  0x21   :  { %557 = vmatprep.subr.bf16.mxu0 %v638_v12 }
  0x22   :  { %608 = vmatpush3.bf16.msra.mxu1 %v637_v11 }
  0x23   :  { %609 = vmatprep.subr.bf16.mxu1 %v640_v13 }
  0x24   :  { %558 = vmatpush3.bf16.msra.mxu0 %v639_v14 }
  0x25   :  { %559 = vmatprep.subr.bf16.mxu0 %v641_v15 }
  0x26   :  { %610 = vmatpush3.bf16.msra.mxu1 %v640_v13 }
  0x27   :  { %611 = vmatprep.subr.bf16.mxu1 %v643_v16 }
  0x28   :  { %560 = vmatpush3.bf16.msra.mxu0 %v642_v17 }
  0x29   :  { %561 = vmatprep.subr.bf16.mxu0 %v644_v18 }
  0x2a   :  { %612 = vmatpush3.bf16.msra.mxu1 %v643_v16 }
  0x2b   :  { %613 = vmatprep.subr.bf16.mxu1 %v646_v20 }
  0x2c   :  { %562 = vmatpush3.bf16.msra.mxu0 %v645_v19 }
  0x2d   :  { %563 = vmatprep.subr.bf16.mxu0 %v647_v21 }
  0x2e   :  { %614 = vmatpush3.bf16.msra.mxu1 %v646_v20 }
  0x2f   :  { %615 = vmatprep.subr.bf16.mxu1 %v649_v22 }
  0x30   :  { %564 = vmatpush3.bf16.msra.mxu0 %v648_v25 }
  0x32   :  { %616 = vmatpush3.bf16.msra.mxu1 %v649_v22 }
  0x33   :  { %352 = vmatmul.mubr.bf16.vlgmr.msra.gmra.mrb[0].mxu0 %v650_v26 }
  0x34   :  { %359 = vmatprep.mubr.bf16.mxu0 %v655_v27 }
  0x35   :  { %618 = vmatmul.mubr.bf16.vlgmr.msra.gmra.mrb[0].mxu1 %v654_v28 }
  0x36   :  { %621 = vmatprep.mubr.bf16.mxu1 %v661_v29 }
  0x3b   :  { %360 = vmatmul.mubr.bf16.gmra.mrb[4].mxu0 %v657_v30 }
  0x3c   :  { %367 = vmatprep.mubr.bf16.mxu0 %v658_v31 }
  0x3d   :  { %622 = vmatmul.mubr.bf16.gmra.mrb[4].mxu1 %v662_v32 }
  0x43   :  { %368 = vmatmul.mubr.bf16.gmra.mrb[8].mxu0 %v660_v33 }
  0x44   :  { %375 = vmatprep.mubr.bf16.mxu0 %v663_v34 }
  0x4b   :  { %376 = vmatmul.mubr.bf16.gmra.mrb[12].mxu0 %v665_v35 }
 0x106   :  { %v565_v36 = vpop.f32.mrb[0].mxu0 }
 0x107   :  { %v566_v37 = vpop.f32.mrb[1].mxu0 }
 0x108   :  { %v567_v38 = vadd.f32 %v566_v37, %v565_v36  ;;  %v568_v39 = vpop.f32.mrb[2].mxu0  ;;  %v619_v40 = vpop.f32.mrb[0].mxu1 }
 0x109   :  { %v569_v41 = vpop.f32.mrb[3].mxu0  ;;  %v418_v42 = vpop.f32.mrb[1].mxu1 }
 0x10a   :  { %v570_v44 = vadd.f32 %v569_v41, %v568_v39  ;;  %v419_v45 = vadd.f32 %v567_v38, %v418_v42  ;;  %v620_v46 = vpop.f32.mrb[2].mxu1 }
 0x10b   :  { %v421_v47 = vpop.f32.mrb[3].mxu1 }
 0x10c   :  { %v483_v48 = vadd.f32 %v548_v43, %v419_v45  ;;  %v422_v49 = vadd.f32 %v570_v44, %v421_v47 }
 0x10e   :  { %v491_v50 = vmax.f32 %v483_v48, 0.0  ;;  %v484_v51 = vadd.f32 %v548_v43, %v422_v49  ;;  %v571_v52 = vpop.f32.mrb[4].mxu0 }
 0x10f   :  { %v572_v53 = vpop.f32.mrb[5].mxu0 }
 0x110   :  { %499 = vst [vmem:[%s858_s3] sm:$0xff] %v491_v50  ;;  %v492_v54 = vmax.f32 %v484_v51, 0.0  ;;  %v573_v55 = vadd.f32 %v572_v53, %v571_v52  ;;  %v574_v56 = vpop.f32.mrb[6].mxu0  ;;  %v623_v57 = vpop.f32.mrb[4].mxu1 }
 0x111   :  { %v575_v58 = vpop.f32.mrb[7].mxu0  ;;  %v434_v59 = vpop.f32.mrb[5].mxu1 }
 0x112   :  { %500 = vst [vmem:[%s858_s3 + $0x8] sm:$0xff] %v492_v54  ;;  %v427_v60 = vadd.f32 %v619_v40, %v573_v55  ;;  %v576_v61 = vadd.f32 %v575_v58, %v574_v56  ;;  %v624_v62 = vpop.f32.mrb[6].mxu1 }
 0x113   :  { %v437_v63 = vpop.f32.mrb[7].mxu1 }
 0x114   :  { %v485_v0 = vadd.f32 %v548_v43, %v427_v60  ;;  %v430_v1 = vadd.f32 %v620_v46, %v576_v61 }
 0x116   :  { %v493_v2 = vmax.f32 %v485_v0, 0.0  ;;  %v486_v3 = vadd.f32 %v548_v43, %v430_v1  ;;  %v577_v4 = vpop.f32.mrb[8].mxu0 }
 0x117   :  { %v578_v5 = vpop.f32.mrb[9].mxu0 }
 0x118   :  { %501 = vst [vmem:[%s858_s3 + $0x10] sm:$0xff] %v493_v2  ;;  %v494_v6 = vmax.f32 %v486_v3, 0.0  ;;  %v579_v7 = vadd.f32 %v578_v5, %v577_v4  ;;  %v580_v8 = vpop.f32.mrb[10].mxu0 }
 0x119   :  { %v581_v9 = vpop.f32.mrb[11].mxu0 }
 0x11a   :  { %502 = vst [vmem:[%s858_s3 + $0x18] sm:$0xff] %v494_v6  ;;  %v582_v10 = vadd.f32 %v581_v9, %v580_v8  ;;  %v435_v11 = vadd.f32 %v579_v7, %v434_v59 }
 0x11c   :  { %v487_v12 = vadd.f32 %v548_v43, %v435_v11  ;;  %v438_v13 = vadd.f32 %v582_v10, %v437_v63 }
 0x11e   :  { %v495_v14 = vmax.f32 %v487_v12, 0.0  ;;  %v488_v15 = vadd.f32 %v548_v43, %v438_v13  ;;  %v583_v16 = vpop.f32.mrb[12].mxu0 }
 0x11f   :  { %v584_v17 = vpop.f32.mrb[13].mxu0 }
 0x120   :  { %503 = vst [vmem:[%s858_s3 + $0x20] sm:$0xff] %v495_v14  ;;  %v496_v18 = vmax.f32 %v488_v15, 0.0  ;;  %v585_v19 = vadd.f32 %v584_v17, %v583_v16  ;;  %v586_v20 = vpop.f32.mrb[14].mxu0 }
 0x121   :  { %v587_v21 = vpop.f32.mrb[15].mxu0 }
 0x122   :  { %504 = vst [vmem:[%s858_s3 + $0x28] sm:$0xff] %v496_v18  ;;  %v443_v22 = vadd.f32 %v623_v57, %v585_v19  ;;  %v588_v23 = vadd.f32 %v587_v21, %v586_v20 }
 0x124   :  { %v489_v24 = vadd.f32 %v548_v43, %v443_v22  ;;  %v446_v25 = vadd.f32 %v624_v62, %v588_v23 }
 0x126   :  { %v497_v26 = vmax.f32 %v489_v24, 0.0  ;;  %v490_v27 = vadd.f32 %v548_v43, %v446_v25 }
 0x128   :  { %505 = vst [vmem:[%s858_s3 + $0x30] sm:$0xff] %v497_v26  ;;  %v498_v28 = vmax.f32 %v490_v27, 0.0 }
 0x12a   :  { %506 = vst [vmem:[%s858_s3 + $0x38] sm:$0xff] %v498_v28 }
 0x12b   :  { %511 = vsyncpa [#allocation4], 1 }

// kernel: xrd_classifier_forward.14
= control target key start
LH: loop header
LB: loop body
LE: loop exit
PB: predicated region body
PF: predicated region fallthrough
CT: control target
= control target key end

     0   :  { %8 = vsyncpa [#allocation3], 0  ;;  %s1136_s0 = inlined_call_operand.vmem [shape: bf16[2,18,128], index: 0, kind: input, shape index: {}]   ;;  %s1137_s1 = inlined_call_operand.hbm [shape: bf16[3,128,256], index: 1, kind: input, shape index: {}]   ;;  %s1138_s2 = inlined_call_operand.hbm [shape: f32[1,256], index: 2, kind: input, shape index: {}]   ;;  %s1139_s3 = inlined_call_operand.vmem [shape: f32[2,16,256], index: 3, kind: output, shape index: {}]  }
   0x1   :  { %9 = vsyncpa [#allocation5], 0  ;;  %s1032_s12 = smov 0  }
   0x2 LB: > { %s1038_s13 = sadd.s32 4294967295, %s1005_s12   ;;  %p757_p0 = scmp.ge.s32.totalorder %s1005_s12, 1  ;;  %s1005_s12 = sphi %s1032_s12, %s15_s12  }
   0x3   : > { %p114_p1 = scmp.lt.s32.totalorder %s1005_s12, 3  ;;  %s1007_s14 = smov [#allocation2]  }
   0x4   : > { %s126_s15 = sshll.u32 %s1007_s14, 4  ;;  %p1140_p3 = scmp.eq.s32.totalorder %s1038_s13, 0  ;;  %s127_s15 = int_to_ptr.vmem [resolvable:$true] %s126_s15 }
   0x5   : > { %p1042_p2 = pnand %p757_p0, %p114_p1  ;;  %s1008_s17 = smov [#allocation4]  }
   0x6   : > { %s140_s18 = sshll.u32 %s1008_s17, 4  ;;  %s935_s22 = scalar_lea.hbm %s1137_s1, 6144  ;;  %s1055_s18 = int_to_ptr.vmem [resolvable:$true] %s140_s18 }
   0x7   : > { %s1142_s16 = scalar_select %p1042_p2, 1, 0 }
   0x8   : > { %p837_p4 = pneg %p1042_p2  ;;  %p936_p6 = scmp.ne.s32.totalorder %s1137_s1, %s935_s22 }
   0x9   : > { %p942_p10 = scmp.lt.u32.totalorder %s935_s22, %s1137_s1 }
   0xa   : > { %p1051_p5 = pnand %p1140_p3, %p837_p4 }
   0xc   : > { %p937_p7 = pneg %p1051_p5 }
   0xe   : > { %p938_p8 = pnand %p937_p7, %p936_p6 }
  0x10   : > { %p939_p9 = pneg %p938_p8 }
  0x12   : > { %p944_p11 = pnand %p942_p10, %p939_p9 }
  0x14   : > { %947 = shalt.err (!%p944_p11)
}
  0x15   : > { %s948_s27 = scalar_lea.vmem %s127_s15, 6144  ;;  %p956_p1 = scmp.lt.s32.totalorder %s127_s15, %s127_s15 }
  0x16   : > { %p949_p12 = scmp.ne.s32.totalorder %s127_s15, %s948_s27  ;;  %p957_p4 = scmp.lt.s32.totalorder %s948_s27, %s948_s27 }
  0x18   : > { %p951_p13 = pnand %p949_p12, %p937_p7  ;;  %p958_p3 = por %p957_p4, %p956_p1 }
  0x1a   : > { %p952_p0 = pneg %p951_p13 }
  0x1c   : > { %p959_p2 = pnand %p958_p3, %p952_p0 }
  0x1e   : > { %962 = shalt.err (!%p959_p2)
}
  0x1f   : > { %s1009_s28 = smov 128   ;;  %s1010_s29 = smov 8  }
  0x20   : > { %840 = dma.hbm_to_vmem [thread:$0]  (!%p1051_p5), %s1137_s1, 6144, %s127_s15, [#allocation3], %s1009_s28, %s1009_s28, %s1010_s29  }
  0x21   : > { %s963_s7 = scalar_lea.hbm %s1138_s2, 32 }
  0x22   : > { %p964_p6 = scmp.ne.s32.totalorder %s1138_s2, %s963_s7  ;;  %p970_p8 = scmp.lt.u32.totalorder %s963_s7, %s1138_s2 }
  0x24   : > { %p966_p2 = pnand %p964_p6, %p937_p7 }
  0x26   : > { %p967_p3 = pneg %p966_p2 }
  0x28   : > { %p972_p9 = pnand %p970_p8, %p967_p3 }
  0x2a   : > { %975 = shalt.err (!%p972_p9)
}
  0x2b   : > { %s976_s14 = scalar_lea.vmem %s1055_s18, 32  ;;  %p984_p13 = scmp.lt.s32.totalorder %s1055_s18, %s1055_s18 }
  0x2c   : > { %p977_p10 = scmp.ne.s32.totalorder %s1055_s18, %s976_s14  ;;  %p985_p0 = scmp.lt.s32.totalorder %s976_s14, %s976_s14 }
  0x2e   : > { %p979_p11 = pnand %p977_p10, %p937_p7  ;;  %p986_p1 = por %p985_p0, %p984_p13 }
  0x30   : > { %p980_p12 = pneg %p979_p11 }
  0x32   : > { %p987_p4 = pnand %p986_p1, %p980_p12 }
  0x34   : > { %990 = shalt.err (!%p987_p4)
}
  0x35   : > { %843 = dma.hbm_to_vmem [thread:$0]  (!%p1051_p5), %s1138_s2, 32, %s1055_s18, [#allocation5]  }
  0x36   : > { %p1144_p6 = scmp.ne.s32.totalorder %s1142_s16, 0 }
  0x37   : > { %p1145_p2 = scmp.eq.s32.totalorder (!%p1144_p6), %s1038_s13, 0 }
  0x38   : > { %161 = sbr.rel (%p1144_p6) target bundleno = 355 (0x163), region = 32 }
  0x3f   : > { %996 = dma.done.wait (%p1145_p2), [#allocation3], 6144   ;;  %p1146_p7 = pmov %p1145_p2 }
  0x40   : > { %p1147_p3 = pmov %p1145_p2 }
  0x41   : > { %998 = vsyncadd (%p1146_p7), [#allocation3], 4294961152 }
  0x42   : > { %1000 = dma.done.wait (%p1147_p3), [#allocation5], 32   ;;  %p1148_p8 = pmov %p1145_p2 }
  0x43   : > { %v1011_v0 = vmov 0   ;;  %v861_v1 = vld [vmem:[#allocation2 + $0x4] ss:$8 sps:$4 sm:$0xff]   ;;  %v863_v2 = vld [vmem:[#allocation2] ss:$8 sps:$4 sm:$0xff]   ;;  %p189_p5 = scmp.lt.s32.totalorder %s1038_s13, 1 }
  0x44   : > { %1002 = vsyncadd (%p1148_p8), [#allocation5], 4294967264  ;;  %494 = vmatprep.mubr.bf16.mxu0 %v1011_v0  ;;  %370 = vmatprep.mubr.bf16.mxu1 %v1011_v0  ;;  %v864_v3 = vld [vmem:[#allocation2 + $0x14] ss:$8 sps:$4 sm:$0xff]   ;;  %v866_v4 = vld [vmem:[#allocation2 + $0x10] ss:$8 sps:$4 sm:$0xff]  }
  0x45   : > { %462 = vmatprep.subr.bf16.mxu0 %v861_v1  ;;  %v867_v5 = vld [vmem:[#allocation2 + $0x24] ss:$8 sps:$4 sm:$0xff]   ;;  %s1150_s13 = smov (!%p189_p5, %s1038_s13), 1  ;;  %v869_v6 = vld [vmem:[#allocation2 + $0x20] ss:$8 sps:$4 sm:$0xff]   ;;  %vm522_vm1 = vcmask 1046528   ;;  %v656_v1 = vlaneseq }
  0x46   : > { %463 = vmatpush1.bf16.msra.mxu0 %v863_v2  ;;  %v870_v7 = vld [vmem:[#allocation2 + $0x34] ss:$8 sps:$4 sm:$0xff]   ;;  %s828_s16 = smul.u32 12, %s1150_s13  ;;  %v872_v8 = vld [vmem:[#allocation2 + $0x30] ss:$8 sps:$4 sm:$0xff]   ;;  %s819_s21 = sshll.u32 %s1150_s13, 5 }
  0x47   : > { %464 = vmatprep.subr.bf16.mxu0 %v864_v3  ;;  %v884_v9 = vld [vmem:[#allocation2 + $0x84] ss:$8 sps:$4 sm:$0xff]   ;;  %v887_v10 = vld [vmem:[#allocation2 + $0x80] ss:$8 sps:$4 sm:$0xff]   ;;  %v891_v12 = vld [vmem:[#allocation2 + $0x94] ss:$8 sps:$4 sm:$0xff]   ;;  %s198_s24 = scalar_lea.vmem %s1139_s3, %s819_s21 }
  0x48   : > { %v873_v11 = vld [vmem:[#allocation2 + $0x44] ss:$8 sps:$4 sm:$0xff]   ;;  %338 = vmatprep.subr.bf16.mxu1 %v884_v9  ;;  %s1124_s20 = scalar_lea.vmem %s1136_s0, %s828_s16  ;;  %v875_v13 = vld [vmem:[#allocation2 + $0x40] ss:$8 sps:$4 sm:$0xff]   ;;  %v894_v14 = vld [vmem:[#allocation2 + $0x90] ss:$8 sps:$4 sm:$0xff]  }
  0x49   : > { %339 = vmatpush1.bf16.msra.mxu1 %v887_v10  ;;  %v876_v15 = vld [vmem:[#allocation2 + $0x54] ss:$8 sps:$4 sm:$0xff]   ;;  %v898_v16 = vld [vmem:[#allocation2 + $0xa4] ss:$8 sps:$4 sm:$0xff]   ;;  %v900_v17 = vld [vmem:[#allocation2 + $0xa0] ss:$8 sps:$4 sm:$0xff]  }
  0x4a   : > { %465 = vmatpush1.bf16.msra.mxu0 %v866_v4  ;;  %340 = vmatprep.subr.bf16.mxu1 %v891_v12  ;;  %v878_v18 = vld [vmem:[#allocation2 + $0x50] ss:$8 sps:$4 sm:$0xff]   ;;  %v879_v19 = vld [vmem:[#allocation2 + $0x64] ss:$8 sps:$4 sm:$0xff]   ;;  %v904_v20 = vld [vmem:[#allocation2 + $0xb4] ss:$8 sps:$4 sm:$0xff]  }
  0x4b   : > { %466 = vmatprep.subr.bf16.mxu0 %v867_v5  ;;  %v906_v21 = vld [vmem:[#allocation2 + $0xb0] ss:$8 sps:$4 sm:$0xff]   ;;  %v881_v22 = vld [vmem:[#allocation2 + $0x60] ss:$8 sps:$4 sm:$0xff]   ;;  %v910_v23 = vld [vmem:[#allocation2 + $0xc4] ss:$8 sps:$4 sm:$0xff]  }
  0x4c   : > { %v882_v24 = vld [vmem:[#allocation2 + $0x74] ss:$8 sps:$4 sm:$0xff]   ;;  %v912_v25 = vld [vmem:[#allocation2 + $0xc0] ss:$8 sps:$4 sm:$0xff]   ;;  %v886_v26 = vld [vmem:[#allocation2 + $0x70] ss:$8 sps:$4 sm:$0xff]  }
  0x4d   : > { %341 = vmatpush1.bf16.msra.mxu1 %v894_v14  ;;  %v916_v27 = vld [vmem:[#allocation2 + $0xd4] ss:$8 sps:$4 sm:$0xff]   ;;  %v890_v28 = vld [vmem:[#allocation2 + $0x104] ss:$8 sps:$4 sm:$0xff]   ;;  %v918_v30 = vld [vmem:[#allocation2 + $0xd0] ss:$8 sps:$4 sm:$0xff]  }
  0x4e   : > { %467 = vmatpush1.bf16.msra.mxu0 %v869_v6  ;;  %342 = vmatprep.subr.bf16.mxu1 %v898_v16  ;;  %v893_v29 = vld [vmem:[%s1124_s20] sm:$0xff]   ;;  %v897_v34 = vld [vmem:[#allocation2 + $0x114] ss:$8 sps:$4 sm:$0xff]   ;;  %v934_v35 = vld [vmem:[%s1124_s20 + $0x8] ss:$0 sps:$4 sm:$0x11]  }
  0x4f   : > { %468 = vmatprep.subr.bf16.mxu0 %v870_v7  ;;  %v248_v31 = vshll.u32 %v893_v29, 16  ;;  %v888_v32 = vld [vmem:[#allocation2 + $0x100] ss:$8 sps:$4 sm:$0xff]   ;;  %v922_v33 = vld [vmem:[#allocation2 + $0xe4] ss:$8 sps:$4 sm:$0xff]   ;;  %v246_v37 = vshrl.u32 %v893_v29, 16 }
  0x50   : > { %v924_v36 = vld [vmem:[#allocation2 + $0xe0] ss:$8 sps:$4 sm:$0xff]   ;;  %v895_v39 = vld [vmem:[#allocation2 + $0x110] ss:$8 sps:$4 sm:$0xff]   ;;  %v928_v40 = vld [vmem:[#allocation2 + $0xf4] ss:$8 sps:$4 sm:$0xff]  }
  0x51   : > { %343 = vmatpush1.bf16.msra.mxu1 %v900_v17  ;;  %v250_v38 = vrot.slane %v248_v31, 1  ;;  %v253_v41 = vshll.u32 %v934_v35, 16  ;;  %v903_v42 = vld [vmem:[#allocation2 + $0x124] ss:$8 sps:$4 sm:$0xff]   ;;  %v930_v43 = vld [vmem:[#allocation2 + $0xf0] ss:$8 sps:$4 sm:$0xff]  }
  0x52   : > { %469 = vmatpush1.bf16.msra.mxu0 %v872_v8  ;;  %344 = vmatprep.subr.bf16.mxu1 %v904_v20  ;;  %v901_v46 = vld [vmem:[#allocation2 + $0x120] ss:$8 sps:$4 sm:$0xff]   ;;  %vm244_vm0 = vsmask.f32 7424  ;;  %v909_v47 = vld [vmem:[#allocation2 + $0x134] ss:$8 sps:$4 sm:$0xff]  }
  0x53   : > { %470 = vmatprep.subr.bf16.mxu0 %v873_v11  ;;  %v251_v44 = vor.u32 %v250_v38, %v246_v37  ;;  %v255_v45 = vrot.slane %v253_v41, 1  ;;  %v907_v49 = vld [vmem:[#allocation2 + $0x130] ss:$8 sps:$4 sm:$0xff]   ;;  %v915_v50 = vld [vmem:[#allocation2 + $0x144] ss:$8 sps:$4 sm:$0xff]   ;;  %v523_v58 = vrot.slane %v893_v29, 1 }
  0x54   : > { %v913_v51 = vld [vmem:[#allocation2 + $0x140] ss:$8 sps:$4 sm:$0xff]   ;;  %v921_v52 = vld [vmem:[#allocation2 + $0x154] ss:$8 sps:$4 sm:$0xff]   ;;  %v919_v53 = vld [vmem:[#allocation2 + $0x150] ss:$8 sps:$4 sm:$0xff]  }
  0x55   : > { %345 = vmatpush1.bf16.msra.mxu1 %v906_v21  ;;  %v256_v48 = vsel %vm244_vm0, %v251_v44, %v255_v45  ;;  %v927_v54 = vld [vmem:[#allocation2 + $0x164] ss:$8 sps:$4 sm:$0xff]   ;;  %v925_v55 = vld [vmem:[#allocation2 + $0x160] ss:$8 sps:$4 sm:$0xff]   ;;  %v933_v56 = vld [vmem:[#allocation2 + $0x174] ss:$8 sps:$4 sm:$0xff]  }
  0x56   : > { %471 = vmatpush1.bf16.msra.mxu0 %v875_v13  ;;  %346 = vmatprep.subr.bf16.mxu1 %v910_v23  ;;  %v931_v57 = vld [vmem:[#allocation2 + $0x170] ss:$8 sps:$4 sm:$0xff]   ;;  %v524_v59 = vrot.slane %v934_v35, 1  ;;  %v657_v2 = vshrl.u32 %v656_v1, 7  ;;  %v654_v4 = vld [vmem:[#allocation4] sm:$0x3] }
  0x57   : > { %472 = vmatprep.subr.bf16.mxu0 %v876_v15 }
  0x58   : > { %v525_v60 = vsel %vm522_vm1, %v523_v58, %v524_v59  ;;  %v658_v3 = vsub.s32 0, %v657_v2  ;;  %v662_v5 = vsub.s32 1, %v657_v2 }
  0x59   : > { %347 = vmatpush1.bf16.msra.mxu1 %v912_v25 }
  0x5a   : > { %473 = vmatpush1.bf16.msra.mxu0 %v878_v18  ;;  %348 = vmatprep.subr.bf16.mxu1 %v916_v27  ;;  %v659_v6 = vrot.slane %v654_v4, %v658_v3  ;;  %v663_v8 = vrot.slane %v654_v4, %v662_v5 }
  0x5b   : > { %474 = vmatprep.subr.bf16.mxu0 %v879_v19 }
  0x5d   : > { %349 = vmatpush1.bf16.msra.mxu1 %v918_v30 }
  0x5e   : > { %475 = vmatpush1.bf16.msra.mxu0 %v881_v22  ;;  %350 = vmatprep.subr.bf16.mxu1 %v922_v33 }
  0x5f   : > { %476 = vmatprep.subr.bf16.mxu0 %v882_v24 }
  0x61   : > { %351 = vmatpush1.bf16.msra.mxu1 %v924_v36 }
  0x62   : > { %477 = vmatpush1.bf16.msra.mxu0 %v886_v26  ;;  %352 = vmatprep.subr.bf16.mxu1 %v928_v40 }
  0x63   : > { %607 = vmatprep.subr.bf16.mxu0 %v890_v28 }
  0x65   : > { %495 = vmatmul.mubr.bf16.vlgmr.msra.gmra.mrb[0].mxu0 %v893_v29  ;;  %353 = vmatpush1.bf16.msra.mxu1 %v930_v43 }
  0x66   : > { %608 = vmatpush1.bf16.msra.mxu0 %v888_v32  ;;  %639 = vmatprep.mubr.bf16.mxu0 %v1011_v0 }
  0x67   : > { %609 = vmatprep.subr.bf16.mxu0 %v897_v34 }
  0x68   : > { %371 = vmatmul.mubr.bf16.vlgmr.msra.gmra.mrb[0].mxu1 %v256_v48 }
  0x6a   : > { %610 = vmatpush1.bf16.msra.mxu0 %v895_v39 }
  0x6b   : > { %611 = vmatprep.subr.bf16.mxu0 %v903_v42 }
  0x6e   : > { %612 = vmatpush1.bf16.msra.mxu0 %v901_v46 }
  0x6f   : > { %613 = vmatprep.subr.bf16.mxu0 %v909_v47 }
  0x72   : > { %614 = vmatpush1.bf16.msra.mxu0 %v907_v49 }
  0x73   : > { %615 = vmatprep.subr.bf16.mxu0 %v915_v50 }
  0x76   : > { %616 = vmatpush1.bf16.msra.mxu0 %v913_v51 }
  0x77   : > { %617 = vmatprep.subr.bf16.mxu0 %v921_v52 }
  0x7a   : > { %618 = vmatpush1.bf16.msra.mxu0 %v919_v53 }
  0x7b   : > { %619 = vmatprep.subr.bf16.mxu0 %v927_v54 }
  0x7e   : > { %620 = vmatpush1.bf16.msra.mxu0 %v925_v55 }
  0x7f   : > { %621 = vmatprep.subr.bf16.mxu0 %v933_v56 }
  0x82   : > { %622 = vmatpush1.bf16.msra.mxu0 %v931_v57 }
  0x85   : > { %640 = vmatmul.mubr.bf16.vlgmr.msra.gmra.mrb[0].mxu0 %v525_v60 }
 0x13b   : > { %v372_v61 = vpop.f32.mrb[0].mxu1 }
 0x13c   : > { %v374_v62 = vpop.f32.mrb[1].mxu1 }
 0x13d   : > { %v376_v63 = vpop.f32.mrb[2].mxu1 }
 0x13e   : > { %v378_v0 = vpop.f32.mrb[3].mxu1 }
 0x158   : > { %v641_v7 = vpop.f32.mrb[0].mxu0 }
 0x159   : > { %v820_v9 = vadd.f32 %v641_v7, %v372_v61  ;;  %v643_v10 = vpop.f32.mrb[1].mxu0 }
 0x15a   : > { %v821_v11 = vadd.f32 %v643_v10, %v374_v62  ;;  %v645_v12 = vpop.f32.mrb[2].mxu0 }
 0x15b   : > { %v666_v13 = vadd.f32 %v820_v9, %v659_v6  ;;  %v822_v14 = vadd.f32 %v645_v12, %v376_v63  ;;  %v647_v15 = vpop.f32.mrb[3].mxu0 }
 0x15c   : > { %v667_v16 = vadd.f32 %v821_v11, %v663_v8  ;;  %v823_v17 = vadd.f32 %v647_v15, %v378_v0 }
 0x15d   : > { %v670_v18 = vmax.f32 %v666_v13, 0.0  ;;  %v668_v19 = vadd.f32 %v822_v14, %v659_v6 }
 0x15e   : > { %v671_v20 = vmax.f32 %v667_v16, 0.0  ;;  %v669_v21 = vadd.f32 %v823_v17, %v663_v8 }
 0x15f   : > { %674 = vst [vmem:[%s198_s24] sm:$0xff] %v670_v18  ;;  %v672_v22 = vmax.f32 %v668_v19, 0.0 }
 0x160   : > { %675 = vst [vmem:[%s198_s24 + $0x8] sm:$0xff] %v671_v20  ;;  %v673_v23 = vmax.f32 %v669_v21, 0.0 }
 0x161   : > { %676 = vst [vmem:[%s198_s24 + $0x10] sm:$0xff] %v672_v22 }
 0x162   : > { %677 = vst [vmem:[%s198_s24 + $0x18] sm:$0xff] %v673_v23 }
 0x163 PF: > { %s15_s12 = sadd.s32 1, %s1005_s12  }
 0x164   : > { %p12_p9 = scmp.ge.s32.totalorder %s15_s12, 4  }
 0x166   :  { %14 = sbr.rel (!%p12_p9) target bundleno = 2 (0x2), region = 73 }
 0x16d   :  { %699 = vsyncpa [#allocation3], 1 }
 0x16e   :  { %701 = vsyncpa [#allocation3 + $0x1], 1 }
 0x16f   :  { %702 = vsyncpa [#allocation5], 1 }

// kernel: xrd_classifier_forward.16
= control target key start
LH: loop header
LB: loop body
LE: loop exit
PB: predicated region body
PF: predicated region fallthrough
CT: control target
= control target key end

     0   :  { %s331_s9 = smov 0   ;;  %s355_s0 = inlined_call_operand.vmem [shape: f32[2,8,512], index: 0, kind: input, shape index: {}]   ;;  %s356_s1 = inlined_call_operand.vmem [shape: f32[2,9,512], index: 1, kind: input, shape index: {}]   ;;  %s357_s2 = inlined_call_operand.vmem [shape: f32[2,8,512], index: 2, kind: output, shape index: {}]  }
   0x1 LB: > { %s284_s10 = sadd.s32 4294967295, %s314_s9   ;;  %p288_p0 = scmp.ge.s32.totalorder %s314_s9, 1  ;;  %s314_s9 = sphi %s331_s9, %s12_s9  }
   0x2   : > { %p122_p1 = scmp.lt.s32.totalorder %s314_s9, 3 }
   0x4   : > { %p123_p2 = pnand %p288_p0, %p122_p1 }
   0x5   : > { %p149_p3 = scmp.lt.s32.totalorder (!%p123_p2), %s284_s10, 1  ;;  %vm192_vm0 = vcmask (!%p123_p2), 1046528  }
   0x6   : > { %126 = sbr.rel (%p123_p2) target bundleno = 28 (0x1c), region = 28 }
   0xd   : > { %s359_s10 = smov (!%p149_p3, %s284_s10), 1 }
   0xe   : > { %s297_s11 = sshll.u32 %s359_s10, 5  ;;  %s298_s12 = sshll.u32 %s359_s10, 6 }
   0xf   : > { %s153_s15 = scalar_lea.vmem %s355_s0, %s297_s11  ;;  %s158_s18 = scalar_lea.vmem %s356_s1, %s298_s12 }
  0x10   : > { %v164_v0 = vld [vmem:[%s158_s18] sm:$0xff]  ;;  %v165_v6 = vld [vmem:[%s158_s18 + $0x8] sm:$0xff]  ;;  %v166_v12 = vld [vmem:[%s158_s18 + $0x10] sm:$0xff]  ;;  %s163_s21 = scalar_lea.vmem %s357_s2, %s297_s11 }
  0x11   : > { %v168_v1 = vld [vmem:[%s153_s15] sm:$0xff]  ;;  %v169_v7 = vld [vmem:[%s153_s15 + $0x8] sm:$0xff]  ;;  %v170_v15 = vld [vmem:[%s153_s15 + $0x10] sm:$0xff] }
  0x12   : > { %v172_v2 = vld [vmem:[%s158_s18] sm:$0xfe]  ;;  %v176_v3 = vld [vmem:[%s158_s18 + $0x20] sm:$0x1]  ;;  %v180_v4 = vmax.f32 %v164_v0, %v168_v1  ;;  %v173_v9 = vld [vmem:[%s158_s18 + $0x8] sm:$0xfe]  ;;  %v181_v11 = vmax.f32 %v165_v6, %v169_v7  ;;  %v182_v20 = vmax.f32 %v166_v12, %v170_v15 }
  0x13   : > { %v193_v5 = vrot.slane %v172_v2, 1  ;;  %v194_v8 = vrot.slane %v176_v3, 1  ;;  %v177_v10 = vld [vmem:[%s158_s18 + $0x28] sm:$0x1]  ;;  %v196_v13 = vrot.slane %v173_v9, 1  ;;  %v167_v17 = vld [vmem:[%s158_s18 + $0x18] sm:$0xff] }
  0x14   : > { %v197_v14 = vrot.slane %v177_v10, 1  ;;  %v174_v16 = vld [vmem:[%s158_s18 + $0x10] sm:$0xfe]  ;;  %v178_v19 = vld [vmem:[%s158_s18 + $0x30] sm:$0x1]  ;;  %v171_v22 = vld [vmem:[%s153_s15 + $0x18] sm:$0xff] }
  0x15   : > { %v195_v18 = vsel %vm192_vm0, %v193_v5, %v194_v8  ;;  %v199_v21 = vrot.slane %v174_v16, 1  ;;  %v175_v23 = vld [vmem:[%s158_s18 + $0x18] sm:$0xfe]  ;;  %v200_v26 = vrot.slane %v178_v19, 1  ;;  %v179_v27 = vld [vmem:[%s158_s18 + $0x38] sm:$0x1]  ;;  %v183_v28 = vmax.f32 %v167_v17, %v171_v22 }
  0x16   : > { %v209_v24 = vmax.f32 %v180_v4, %v195_v18  ;;  %v198_v25 = vsel %vm192_vm0, %v196_v13, %v197_v14  ;;  %v202_v30 = vrot.slane %v175_v23, 1  ;;  %v203_v31 = vrot.slane %v179_v27, 1 }
  0x17   : > { %v210_v29 = vmax.f32 %v181_v11, %v198_v25  ;;  %v201_v32 = vsel %vm192_vm0, %v199_v21, %v200_v26 }
  0x18   : > { %213 = vst [vmem:[%s163_s21] sm:$0xff] %v209_v24  ;;  %v211_v33 = vmax.f32 %v182_v20, %v201_v32  ;;  %v204_v34 = vsel %vm192_vm0, %v202_v30, %v203_v31 }
  0x19   : > { %214 = vst [vmem:[%s163_s21 + $0x8] sm:$0xff] %v210_v29  ;;  %v212_v35 = vmax.f32 %v183_v28, %v204_v34 }
  0x1a   : > { %215 = vst [vmem:[%s163_s21 + $0x10] sm:$0xff] %v211_v33 }
  0x1b   : > { %216 = vst [vmem:[%s163_s21 + $0x18] sm:$0xff] %v212_v35 }
  0x1c PF: > { %s12_s9 = sadd.s32 1, %s314_s9  }
  0x1d   : > { %p9_p4 = scmp.ge.s32.totalorder %s12_s9, 4  }
  0x1f   :  { %11 = sbr.rel (!%p9_p4) target bundleno = 1 (0x1), region = 61 }

// kernel: xrd_classifier_forward.15
= control target key start
LH: loop header
LB: loop body
LE: loop exit
PB: predicated region body
PF: predicated region fallthrough
CT: control target
= control target key end

     0   :  { %8 = vsyncpa [#allocation3], 0  ;;  %s2571_s0 = inlined_call_operand.vmem [shape: bf16[2,18,256], index: 0, kind: input, shape index: {}]   ;;  %s2572_s1 = inlined_call_operand.hbm [shape: bf16[3,256,512], index: 1, kind: input, shape index: {}]   ;;  %s2573_s2 = inlined_call_operand.hbm [shape: f32[1,512], index: 2, kind: input, shape index: {}]   ;;  %s2574_s3 = inlined_call_operand.vmem [shape: f32[2,16,512], index: 3, kind: output, shape index: {}]  }
   0x1   :  { %9 = vsyncpa [#allocation5], 0  ;;  %s2444_s12 = smov 0  }
   0x2 LB: > { %s2450_s13 = sadd.s32 4294967295, %s2418_s12   ;;  %p1798_p0 = scmp.ge.s32.totalorder %s2418_s12, 1  ;;  %s2418_s12 = sphi %s2444_s12, %s15_s12  }
   0x3   : > { %p114_p1 = scmp.lt.s32.totalorder %s2418_s12, 3  ;;  %s2420_s14 = smov [#allocation2]  }
   0x4   : > { %s126_s15 = sshll.u32 %s2420_s14, 4  ;;  %p2575_p3 = scmp.eq.s32.totalorder %s2450_s13, 0  ;;  %s127_s15 = int_to_ptr.vmem [resolvable:$true] %s126_s15 }
   0x5   : > { %p2454_p2 = pnand %p1798_p0, %p114_p1  ;;  %s2421_s17 = smov [#allocation4]  }
   0x6   : > { %s140_s18 = sshll.u32 %s2421_s17, 4  ;;  %s2348_s22 = scalar_lea.hbm %s2572_s1, 24576  ;;  %s2467_s18 = int_to_ptr.vmem [resolvable:$true] %s140_s18 }
   0x7   : > { %s2577_s16 = scalar_select %p2454_p2, 1, 0 }
   0x8   : > { %p2032_p4 = pneg %p2454_p2  ;;  %p2349_p6 = scmp.ne.s32.totalorder %s2572_s1, %s2348_s22 }
   0x9   : > { %p2355_p10 = scmp.lt.u32.totalorder %s2348_s22, %s2572_s1 }
   0xa   : > { %p2463_p5 = pnand %p2575_p3, %p2032_p4 }
   0xc   : > { %p2350_p7 = pneg %p2463_p5 }
   0xe   : > { %p2351_p8 = pnand %p2350_p7, %p2349_p6 }
  0x10   : > { %p2352_p9 = pneg %p2351_p8 }
  0x12   : > { %p2357_p11 = pnand %p2355_p10, %p2352_p9 }
  0x14   : > { %2360 = shalt.err (!%p2357_p11)
}
  0x15   : > { %s2361_s27 = scalar_lea.vmem %s127_s15, 24576  ;;  %p2369_p1 = scmp.lt.s32.totalorder %s127_s15, %s127_s15 }
  0x16   : > { %p2362_p12 = scmp.ne.s32.totalorder %s127_s15, %s2361_s27  ;;  %p2370_p4 = scmp.lt.s32.totalorder %s2361_s27, %s2361_s27 }
  0x18   : > { %p2364_p13 = pnand %p2362_p12, %p2350_p7  ;;  %p2371_p3 = por %p2370_p4, %p2369_p1 }
  0x1a   : > { %p2365_p0 = pneg %p2364_p13 }
  0x1c   : > { %p2372_p2 = pnand %p2371_p3, %p2365_p0 }
  0x1e   : > { %2375 = shalt.err (!%p2372_p2)
}
  0x1f   : > { %s2422_s28 = smov 256   ;;  %s2423_s29 = smov 16  }
  0x20   : > { %2035 = dma.hbm_to_vmem [thread:$0]  (!%p2463_p5), %s2572_s1, 24576, %s127_s15, [#allocation3], %s2422_s28, %s2422_s28, %s2423_s29  }
  0x21   : > { %s2376_s7 = scalar_lea.hbm %s2573_s2, 64 }
  0x22   : > { %p2377_p6 = scmp.ne.s32.totalorder %s2573_s2, %s2376_s7  ;;  %p2383_p8 = scmp.lt.u32.totalorder %s2376_s7, %s2573_s2 }
  0x24   : > { %p2379_p2 = pnand %p2377_p6, %p2350_p7 }
  0x26   : > { %p2380_p3 = pneg %p2379_p2 }
  0x28   : > { %p2385_p9 = pnand %p2383_p8, %p2380_p3 }
  0x2a   : > { %2388 = shalt.err (!%p2385_p9)
}
  0x2b   : > { %s2389_s14 = scalar_lea.vmem %s2467_s18, 64  ;;  %p2397_p13 = scmp.lt.s32.totalorder %s2467_s18, %s2467_s18 }
  0x2c   : > { %p2390_p10 = scmp.ne.s32.totalorder %s2467_s18, %s2389_s14  ;;  %p2398_p0 = scmp.lt.s32.totalorder %s2389_s14, %s2389_s14 }
  0x2e   : > { %p2392_p11 = pnand %p2390_p10, %p2350_p7  ;;  %p2399_p1 = por %p2398_p0, %p2397_p13 }
  0x30   : > { %p2393_p12 = pneg %p2392_p11 }
  0x32   : > { %p2400_p4 = pnand %p2399_p1, %p2393_p12 }
  0x34   : > { %2403 = shalt.err (!%p2400_p4)
}
  0x35   : > { %2038 = dma.hbm_to_vmem [thread:$0]  (!%p2463_p5), %s2573_s2, 64, %s2467_s18, [#allocation5]  }
  0x36   : > { %p2579_p6 = scmp.ne.s32.totalorder %s2577_s16, 0 }
  0x37   : > { %p2580_p2 = scmp.eq.s32.totalorder (!%p2579_p6), %s2450_s13, 0 }
  0x38   : > { %161 = sbr.rel (%p2579_p6) target bundleno = 480 (0x1e0), region = 32 }
  0x3f   : > { %2409 = dma.done.wait (%p2580_p2), [#allocation3], 24576   ;;  %p2581_p7 = pmov %p2580_p2 }
  0x40   : > { %p2582_p3 = pmov %p2580_p2 }
  0x41   : > { %2411 = vsyncadd (%p2581_p7), [#allocation3], 4294942720 }
  0x42   : > { %2413 = dma.done.wait (%p2582_p3), [#allocation5], 64   ;;  %p2583_p8 = pmov %p2580_p2 }
  0x43   : > { %v2055_v0 = vld [vmem:[#allocation2 + $0x204] ss:$16 sps:$4 sm:$0xff]   ;;  %v2057_v1 = vld [vmem:[#allocation2 + $0x20c] ss:$16 sps:$4 sm:$0xff]   ;;  %v2059_v2 = vld [vmem:[#allocation2 + $0x200] ss:$16 sps:$4 sm:$0xff]  }
  0x44   : > { %2415 = vsyncadd (%p2583_p8), [#allocation5], 4294967232  ;;  %691 = vmatprep.subr.bf16.mxu0 %v2055_v0  ;;  %v2060_v3 = vld [vmem:[#allocation2 + $0x208] ss:$16 sps:$4 sm:$0xff]   ;;  %734 = vmatprep.subr.bf16.mxu1 %v2057_v1  ;;  %v2061_v4 = vld [vmem:[#allocation2 + $0x224] ss:$16 sps:$4 sm:$0xff]  }
  0x45   : > { %692 = vmatpush1.bf16.msra.mxu0 %v2059_v2  ;;  %735 = vmatpush1.bf16.msra.mxu1 %v2060_v3  ;;  %v2063_v5 = vld [vmem:[#allocation2 + $0x22c] ss:$16 sps:$4 sm:$0xff]   ;;  %v2065_v6 = vld [vmem:[#allocation2 + $0x220] ss:$16 sps:$4 sm:$0xff]   ;;  %v2066_v7 = vld [vmem:[#allocation2 + $0x228] ss:$16 sps:$4 sm:$0xff]  }
  0x46   : > { %693 = vmatprep.subr.bf16.mxu0 %v2061_v4  ;;  %736 = vmatprep.subr.bf16.mxu1 %v2063_v5  ;;  %v2067_v8 = vld [vmem:[#allocation2 + $0x244] ss:$16 sps:$4 sm:$0xff]   ;;  %v2069_v9 = vld [vmem:[#allocation2 + $0x24c] ss:$16 sps:$4 sm:$0xff]   ;;  %v2071_v10 = vld [vmem:[#allocation2 + $0x240] ss:$16 sps:$4 sm:$0xff]  }
  0x47   : > { %v2072_v11 = vld [vmem:[#allocation2 + $0x248] ss:$16 sps:$4 sm:$0xff]   ;;  %v2073_v12 = vld [vmem:[#allocation2 + $0x264] ss:$16 sps:$4 sm:$0xff]   ;;  %v2075_v13 = vld [vmem:[#allocation2 + $0x26c] ss:$16 sps:$4 sm:$0xff]  }
  0x48   : > { %v2077_v14 = vld [vmem:[#allocation2 + $0x260] ss:$16 sps:$4 sm:$0xff]   ;;  %v2078_v15 = vld [vmem:[#allocation2 + $0x268] ss:$16 sps:$4 sm:$0xff]   ;;  %v2079_v16 = vld [vmem:[#allocation2 + $0x284] ss:$16 sps:$4 sm:$0xff]  }
  0x49   : > { %694 = vmatpush1.bf16.msra.mxu0 %v2065_v6  ;;  %737 = vmatpush1.bf16.msra.mxu1 %v2066_v7  ;;  %v2081_v17 = vld [vmem:[#allocation2 + $0x28c] ss:$16 sps:$4 sm:$0xff]   ;;  %v2083_v18 = vld [vmem:[#allocation2 + $0x280] ss:$16 sps:$4 sm:$0xff]   ;;  %v2084_v19 = vld [vmem:[#allocation2 + $0x288] ss:$16 sps:$4 sm:$0xff]  }
  0x4a   : > { %695 = vmatprep.subr.bf16.mxu0 %v2067_v8  ;;  %738 = vmatprep.subr.bf16.mxu1 %v2069_v9  ;;  %v2085_v20 = vld [vmem:[#allocation2 + $0x2a4] ss:$16 sps:$4 sm:$0xff]   ;;  %v2087_v21 = vld [vmem:[#allocation2 + $0x2ac] ss:$16 sps:$4 sm:$0xff]   ;;  %v2089_v22 = vld [vmem:[#allocation2 + $0x2a0] ss:$16 sps:$4 sm:$0xff]  }
  0x4b   : > { %v2090_v23 = vld [vmem:[#allocation2 + $0x2a8] ss:$16 sps:$4 sm:$0xff]   ;;  %v2091_v24 = vld [vmem:[#allocation2 + $0x2c4] ss:$16 sps:$4 sm:$0xff]   ;;  %v2093_v25 = vld [vmem:[#allocation2 + $0x2cc] ss:$16 sps:$4 sm:$0xff]  }
  0x4c   : > { %v2095_v26 = vld [vmem:[#allocation2 + $0x2c0] ss:$16 sps:$4 sm:$0xff]   ;;  %v2096_v27 = vld [vmem:[#allocation2 + $0x2c8] ss:$16 sps:$4 sm:$0xff]   ;;  %v2097_v28 = vld [vmem:[#allocation2 + $0x2e4] ss:$16 sps:$4 sm:$0xff]  }
  0x4d   : > { %696 = vmatpush1.bf16.msra.mxu0 %v2071_v10  ;;  %739 = vmatpush1.bf16.msra.mxu1 %v2072_v11  ;;  %v2099_v29 = vld [vmem:[#allocation2 + $0x2ec] ss:$16 sps:$4 sm:$0xff]   ;;  %v2101_v30 = vld [vmem:[#allocation2 + $0x2e0] ss:$16 sps:$4 sm:$0xff]   ;;  %v2102_v31 = vld [vmem:[#allocation2 + $0x2e8] ss:$16 sps:$4 sm:$0xff]  }
  0x4e   : > { %697 = vmatprep.subr.bf16.mxu0 %v2073_v12  ;;  %740 = vmatprep.subr.bf16.mxu1 %v2075_v13  ;;  %v2103_v32 = vld [vmem:[#allocation2 + $0x304] ss:$16 sps:$4 sm:$0xff]   ;;  %p189_p5 = scmp.lt.s32.totalorder %s2450_s13, 1  ;;  %v2105_v33 = vld [vmem:[#allocation2 + $0x30c] ss:$16 sps:$4 sm:$0xff]   ;;  %vm1250_vm1 = vcmask 1046528  }
  0x4f   : > { %v2107_v34 = vld [vmem:[#allocation2 + $0x300] ss:$16 sps:$4 sm:$0xff]   ;;  %v2108_v35 = vld [vmem:[#allocation2 + $0x308] ss:$16 sps:$4 sm:$0xff]   ;;  %v2109_v36 = vld [vmem:[#allocation2 + $0x324] ss:$16 sps:$4 sm:$0xff]  }
  0x50   : > { %s2585_s13 = smov (!%p189_p5, %s2450_s13), 1  ;;  %v2111_v37 = vld [vmem:[#allocation2 + $0x32c] ss:$16 sps:$4 sm:$0xff]   ;;  %v2113_v38 = vld [vmem:[#allocation2 + $0x320] ss:$16 sps:$4 sm:$0xff]  }
  0x51   : > { %698 = vmatpush1.bf16.msra.mxu0 %v2077_v14  ;;  %741 = vmatpush1.bf16.msra.mxu1 %v2078_v15  ;;  %v2114_v39 = vld [vmem:[#allocation2 + $0x328] ss:$16 sps:$4 sm:$0xff]   ;;  %v2115_v40 = vld [vmem:[#allocation2 + $0x344] ss:$16 sps:$4 sm:$0xff]   ;;  %s2023_s16 = smul.u32 24, %s2585_s13  ;;  %s2006_s21 = sshll.u32 %s2585_s13, 6 }
  0x52   : > { %699 = vmatprep.subr.bf16.mxu0 %v2079_v16  ;;  %742 = vmatprep.subr.bf16.mxu1 %v2081_v17  ;;  %v2117_v41 = vld [vmem:[#allocation2 + $0x34c] ss:$16 sps:$4 sm:$0xff]   ;;  %v2119_v42 = vld [vmem:[#allocation2 + $0x340] ss:$16 sps:$4 sm:$0xff]   ;;  %v2120_v43 = vld [vmem:[#allocation2 + $0x348] ss:$16 sps:$4 sm:$0xff]   ;;  %s198_s24 = scalar_lea.vmem %s2574_s3, %s2006_s21 }
  0x53   : > { %v2121_v44 = vld [vmem:[#allocation2 + $0x364] ss:$16 sps:$4 sm:$0xff]   ;;  %s193_s20 = scalar_lea.vmem %s2571_s0, %s2023_s16  ;;  %v2123_v45 = vld [vmem:[#allocation2 + $0x36c] ss:$16 sps:$4 sm:$0xff]   ;;  %v2125_v46 = vld [vmem:[#allocation2 + $0x360] ss:$16 sps:$4 sm:$0xff]  }
  0x54   : > { %v2126_v47 = vld [vmem:[#allocation2 + $0x368] ss:$16 sps:$4 sm:$0xff]   ;;  %v201_v48 = vld [vmem:[%s193_s20 + $0x10] sm:$0x11]  ;;  %v2534_v49 = vld [vmem:[%s193_s20 + $0x4] ss:$8 sps:$4 sm:$0xff]  }
  0x55   : > { %700 = vmatpush1.bf16.msra.mxu0 %v2083_v18  ;;  %743 = vmatpush1.bf16.msra.mxu1 %v2084_v19  ;;  %v2536_v50 = vcombine.high %v201_v48, %v201_v48  ;;  %v2127_v51 = vld [vmem:[#allocation2 + $0x384] ss:$16 sps:$4 sm:$0xff]   ;;  %v2129_v52 = vld [vmem:[#allocation2 + $0x38c] ss:$16 sps:$4 sm:$0xff]   ;;  %v2131_v53 = vld [vmem:[#allocation2 + $0x380] ss:$16 sps:$4 sm:$0xff]   ;;  %v2544_v4 = vcombine.low %v201_v48, %v201_v48 }
  0x56   : > { %701 = vmatprep.subr.bf16.mxu0 %v2085_v20  ;;  %744 = vmatprep.subr.bf16.mxu1 %v2087_v21  ;;  %v358_v54 = vshrl.u32 %v2534_v49, 16  ;;  %v360_v55 = vshll.u32 %v2534_v49, 16  ;;  %v2132_v57 = vld [vmem:[#allocation2 + $0x388] ss:$16 sps:$4 sm:$0xff]   ;;  %v2133_v58 = vld [vmem:[#allocation2 + $0x3a4] ss:$16 sps:$4 sm:$0xff]  }
  0x57   : > { %v365_v56 = vshll.u32 %v2536_v50, 16  ;;  %v2541_v59 = vld [vmem:[%s193_s20] ss:$8 sps:$4 sm:$0xff]   ;;  %v2135_v62 = vld [vmem:[#allocation2 + $0x3ac] ss:$16 sps:$4 sm:$0xff]   ;;  %v353_v12 = vshll.u32 %v2544_v4, 16 }
  0x58   : > { %v362_v60 = vrot.slane %v360_v55, 1  ;;  %vm344_vm0 = vsmask.f32 7424  ;;  %v2137_v0 = vld [vmem:[#allocation2 + $0x3a0] ss:$16 sps:$4 sm:$0xff]   ;;  %v348_v5 = vshll.u32 %v2541_v59, 16 }
  0x59   : > { %702 = vmatpush1.bf16.msra.mxu0 %v2089_v22  ;;  %745 = vmatpush1.bf16.msra.mxu1 %v2090_v23  ;;  %v367_v61 = vrot.slane %v365_v56, 1  ;;  %v2138_v1 = vld [vmem:[#allocation2 + $0x3a8] ss:$16 sps:$4 sm:$0xff]   ;;  %v2139_v2 = vld [vmem:[#allocation2 + $0x3c4] ss:$16 sps:$4 sm:$0xff]   ;;  %v346_v10 = vshrl.u32 %v2541_v59, 16 }
  0x5a   : > { %703 = vmatprep.subr.bf16.mxu0 %v2091_v24  ;;  %746 = vmatprep.subr.bf16.mxu1 %v2093_v25  ;;  %v363_v63 = vor.u32 %v362_v60, %v358_v54  ;;  %v2141_v6 = vld [vmem:[#allocation2 + $0x3cc] ss:$16 sps:$4 sm:$0xff]   ;;  %v2143_v7 = vld [vmem:[#allocation2 + $0x3c0] ss:$16 sps:$4 sm:$0xff]   ;;  %v2144_v8 = vld [vmem:[#allocation2 + $0x3c8] ss:$16 sps:$4 sm:$0xff]  }
  0x5b   : > { %v2145_v9 = vld [vmem:[#allocation2 + $0x3e4] ss:$16 sps:$4 sm:$0xff]   ;;  %v350_v11 = vrot.slane %v348_v5, 1  ;;  %v2147_v13 = vld [vmem:[#allocation2 + $0x3ec] ss:$16 sps:$4 sm:$0xff]   ;;  %v355_v18 = vrot.slane %v353_v12, 1 }
  0x5c   : > { %v368_v3 = vsel %vm344_vm0, %v363_v63, %v367_v61  ;;  %v2149_v14 = vld [vmem:[#allocation2 + $0x3e0] ss:$16 sps:$4 sm:$0xff]   ;;  %v2150_v15 = vld [vmem:[#allocation2 + $0x3e8] ss:$16 sps:$4 sm:$0xff]   ;;  %v2157_v16 = vld [vmem:[#allocation2 + $0x4] ss:$16 sps:$4 sm:$0xff]  }
  0x5d   : > { %704 = vmatpush1.bf16.msra.mxu0 %v2095_v26  ;;  %747 = vmatpush1.bf16.msra.mxu1 %v2096_v27  ;;  %v351_v17 = vor.u32 %v350_v11, %v346_v10  ;;  %v2160_v19 = vld [vmem:[#allocation2 + $0xc] ss:$16 sps:$4 sm:$0xff]   ;;  %v2155_v20 = vld [vmem:[#allocation2] ss:$16 sps:$4 sm:$0xff]   ;;  %v1254_v21 = vrot.slane %v2534_v49, 1  ;;  %v1255_v26 = vrot.slane %v2536_v50, 1 }
  0x5e   : > { %705 = vmatprep.subr.bf16.mxu0 %v2097_v28  ;;  %748 = vmatprep.subr.bf16.mxu1 %v2099_v29  ;;  %v2158_v22 = vld [vmem:[#allocation2 + $0x8] ss:$16 sps:$4 sm:$0xff]   ;;  %v2164_v24 = vld [vmem:[#allocation2 + $0x24] ss:$16 sps:$4 sm:$0xff]   ;;  %v2167_v25 = vld [vmem:[#allocation2 + $0x2c] ss:$16 sps:$4 sm:$0xff]  }
  0x5f   : > { %723 = vmatprep.mubr.bf16.mxu0 %v368_v3  ;;  %766 = vmatprep.mubr.bf16.mxu1 %v368_v3  ;;  %v356_v23 = vsel %vm344_vm0, %v351_v17, %v355_v18  ;;  %v2162_v27 = vld [vmem:[#allocation2 + $0x20] ss:$16 sps:$4 sm:$0xff]   ;;  %v2553_v28 = vsel %vm1250_vm1, %v1254_v21, %v1255_v26  ;;  %v2165_v29 = vld [vmem:[#allocation2 + $0x28] ss:$16 sps:$4 sm:$0xff]   ;;  %v2200_v50 = vld [vmem:[#allocation2 + $0xe4] ss:$16 sps:$4 sm:$0xff]  }
  0x60   : > { %v2192_v48 = vld [vmem:[#allocation2 + $0xc0] ss:$16 sps:$4 sm:$0xff]   ;;  %v2206_v54 = vld [vmem:[#allocation2 + $0x104] ss:$16 sps:$4 sm:$0xff]   ;;  %v2209_v55 = vld [vmem:[#allocation2 + $0x10c] ss:$16 sps:$4 sm:$0xff]  }
  0x61   : > { %706 = vmatpush1.bf16.msra.mxu0 %v2101_v30  ;;  %749 = vmatpush1.bf16.msra.mxu1 %v2102_v31  ;;  %v2170_v30 = vld [vmem:[#allocation2 + $0x44] ss:$16 sps:$4 sm:$0xff]   ;;  %v2173_v31 = vld [vmem:[#allocation2 + $0x4c] ss:$16 sps:$4 sm:$0xff]   ;;  %v2204_v56 = vld [vmem:[#allocation2 + $0x100] ss:$16 sps:$4 sm:$0xff]  }
  0x62   : > { %707 = vmatprep.subr.bf16.mxu0 %v2103_v32  ;;  %750 = vmatprep.subr.bf16.mxu1 %v2105_v33  ;;  %v2168_v32 = vld [vmem:[#allocation2 + $0x40] ss:$16 sps:$4 sm:$0xff]   ;;  %v2171_v33 = vld [vmem:[#allocation2 + $0x48] ss:$16 sps:$4 sm:$0xff]   ;;  %v2215_v60 = vld [vmem:[#allocation2 + $0x12c] ss:$16 sps:$4 sm:$0xff]  }
  0x63   : > { %v2210_v61 = vld [vmem:[#allocation2 + $0x120] ss:$16 sps:$4 sm:$0xff]   ;;  %v2218_v63 = vld [vmem:[#allocation2 + $0x144] ss:$16 sps:$4 sm:$0xff]   ;;  %v2227_v5 = vld [vmem:[#allocation2 + $0x16c] ss:$16 sps:$4 sm:$0xff]  }
  0x64   : > { %v2224_v3 = vld [vmem:[#allocation2 + $0x164] ss:$16 sps:$4 sm:$0xff]   ;;  %v2228_v10 = vld [vmem:[#allocation2 + $0x180] ss:$16 sps:$4 sm:$0xff]   ;;  %v2231_v11 = vld [vmem:[#allocation2 + $0x188] ss:$16 sps:$4 sm:$0xff]  }
  0x65   : > { %708 = vmatpush1.bf16.msra.mxu0 %v2107_v34  ;;  %751 = vmatpush1.bf16.msra.mxu1 %v2108_v35  ;;  %v2176_v34 = vld [vmem:[#allocation2 + $0x64] ss:$16 sps:$4 sm:$0xff]   ;;  %v2179_v35 = vld [vmem:[#allocation2 + $0x6c] ss:$16 sps:$4 sm:$0xff]   ;;  %v2240_v18 = vld [vmem:[#allocation2 + $0x1c0] ss:$16 sps:$4 sm:$0xff]  }
  0x66   : > { %709 = vmatprep.subr.bf16.mxu0 %v2109_v36  ;;  %752 = vmatprep.subr.bf16.mxu1 %v2111_v37  ;;  %v2174_v36 = vld [vmem:[#allocation2 + $0x60] ss:$16 sps:$4 sm:$0xff]   ;;  %v2177_v37 = vld [vmem:[#allocation2 + $0x68] ss:$16 sps:$4 sm:$0xff]   ;;  %v2236_v12 = vld [vmem:[#allocation2 + $0x1a4] ss:$16 sps:$4 sm:$0xff]  }
  0x67   : > { %v2245_v17 = vld [vmem:[#allocation2 + $0x1cc] ss:$16 sps:$4 sm:$0xff]   ;;  %v2252_v26 = vld [vmem:[#allocation2 + $0x400] ss:$16 sps:$4 sm:$0xff]  }
  0x68   : > { %v2251_v21 = vld [vmem:[#allocation2 + $0x1ec] ss:$16 sps:$4 sm:$0xff]  }
  0x69   : > { %710 = vmatpush1.bf16.msra.mxu0 %v2113_v38  ;;  %753 = vmatpush1.bf16.msra.mxu1 %v2114_v39  ;;  %v2182_v38 = vld [vmem:[#allocation2 + $0x84] ss:$16 sps:$4 sm:$0xff]   ;;  %v2185_v39 = vld [vmem:[#allocation2 + $0x8c] ss:$16 sps:$4 sm:$0xff]  }
  0x6a   : > { %711 = vmatprep.subr.bf16.mxu0 %v2115_v40  ;;  %754 = vmatprep.subr.bf16.mxu1 %v2117_v41  ;;  %v2180_v40 = vld [vmem:[#allocation2 + $0x80] ss:$16 sps:$4 sm:$0xff]   ;;  %v2183_v41 = vld [vmem:[#allocation2 + $0x88] ss:$16 sps:$4 sm:$0xff]  }
  0x6d   : > { %712 = vmatpush1.bf16.msra.mxu0 %v2119_v42  ;;  %755 = vmatpush1.bf16.msra.mxu1 %v2120_v43  ;;  %v2188_v42 = vld [vmem:[#allocation2 + $0xa4] ss:$16 sps:$4 sm:$0xff]   ;;  %v2191_v43 = vld [vmem:[#allocation2 + $0xac] ss:$16 sps:$4 sm:$0xff]  }
  0x6e   : > { %713 = vmatprep.subr.bf16.mxu0 %v2121_v44  ;;  %756 = vmatprep.subr.bf16.mxu1 %v2123_v45  ;;  %v2186_v44 = vld [vmem:[#allocation2 + $0xa0] ss:$16 sps:$4 sm:$0xff]   ;;  %v2189_v45 = vld [vmem:[#allocation2 + $0xa8] ss:$16 sps:$4 sm:$0xff]  }
  0x71   : > { %714 = vmatpush1.bf16.msra.mxu0 %v2125_v46  ;;  %757 = vmatpush1.bf16.msra.mxu1 %v2126_v47  ;;  %v2194_v46 = vld [vmem:[#allocation2 + $0xc4] ss:$16 sps:$4 sm:$0xff]   ;;  %v2197_v47 = vld [vmem:[#allocation2 + $0xcc] ss:$16 sps:$4 sm:$0xff]  }
  0x72   : > { %715 = vmatprep.subr.bf16.mxu0 %v2127_v51  ;;  %758 = vmatprep.subr.bf16.mxu1 %v2129_v52  ;;  %v2203_v51 = vld [vmem:[#allocation2 + $0xec] ss:$16 sps:$4 sm:$0xff]   ;;  %v2198_v52 = vld [vmem:[#allocation2 + $0xe0] ss:$16 sps:$4 sm:$0xff]  }
  0x75   : > { %716 = vmatpush1.bf16.msra.mxu0 %v2131_v53  ;;  %759 = vmatpush1.bf16.msra.mxu1 %v2132_v57  ;;  %v2201_v53 = vld [vmem:[#allocation2 + $0xe8] ss:$16 sps:$4 sm:$0xff]  }
  0x76   : > { %717 = vmatprep.subr.bf16.mxu0 %v2133_v58  ;;  %760 = vmatprep.subr.bf16.mxu1 %v2135_v62  ;;  %v2207_v57 = vld [vmem:[#allocation2 + $0x108] ss:$16 sps:$4 sm:$0xff]   ;;  %v2212_v58 = vld [vmem:[#allocation2 + $0x124] ss:$16 sps:$4 sm:$0xff]  }
  0x77   : > { %v2213_v62 = vld [vmem:[#allocation2 + $0x128] ss:$16 sps:$4 sm:$0xff]  }
  0x79   : > { %718 = vmatpush1.bf16.msra.mxu0 %v2137_v0  ;;  %761 = vmatpush1.bf16.msra.mxu1 %v2138_v1  ;;  %v2221_v0 = vld [vmem:[#allocation2 + $0x14c] ss:$16 sps:$4 sm:$0xff]   ;;  %v2216_v1 = vld [vmem:[#allocation2 + $0x140] ss:$16 sps:$4 sm:$0xff]  }
  0x7a   : > { %719 = vmatprep.subr.bf16.mxu0 %v2139_v2  ;;  %762 = vmatprep.subr.bf16.mxu1 %v2141_v6  ;;  %v2219_v2 = vld [vmem:[#allocation2 + $0x148] ss:$16 sps:$4 sm:$0xff]   ;;  %v2222_v6 = vld [vmem:[#allocation2 + $0x160] ss:$16 sps:$4 sm:$0xff]  }
  0x7d   : > { %720 = vmatpush1.bf16.msra.mxu0 %v2143_v7  ;;  %763 = vmatpush1.bf16.msra.mxu1 %v2144_v8  ;;  %v2225_v7 = vld [vmem:[#allocation2 + $0x168] ss:$16 sps:$4 sm:$0xff]   ;;  %v2230_v8 = vld [vmem:[#allocation2 + $0x184] ss:$16 sps:$4 sm:$0xff]  }
  0x7e   : > { %721 = vmatprep.subr.bf16.mxu0 %v2145_v9  ;;  %764 = vmatprep.subr.bf16.mxu1 %v2147_v13  ;;  %v2233_v9 = vld [vmem:[#allocation2 + $0x18c] ss:$16 sps:$4 sm:$0xff]  }
  0x7f   : > { %v2239_v13 = vld [vmem:[#allocation2 + $0x1ac] ss:$16 sps:$4 sm:$0xff]  }
  0x81   : > { %722 = vmatpush1.bf16.msra.mxu0 %v2149_v14  ;;  %765 = vmatpush1.bf16.msra.mxu1 %v2150_v15  ;;  %v2234_v14 = vld [vmem:[#allocation2 + $0x1a0] ss:$16 sps:$4 sm:$0xff]   ;;  %v2237_v15 = vld [vmem:[#allocation2 + $0x1a8] ss:$16 sps:$4 sm:$0xff]  }
  0x82   : > { %1099 = vmatprep.subr.bf16.mxu0 %v2157_v16  ;;  %1142 = vmatprep.subr.bf16.mxu1 %v2160_v19  ;;  %v2242_v16 = vld [vmem:[#allocation2 + $0x1c4] ss:$16 sps:$4 sm:$0xff]   ;;  %v2243_v19 = vld [vmem:[#allocation2 + $0x1c8] ss:$16 sps:$4 sm:$0xff]  }
  0x84   : > { %724 = vmatmul.mubr.bf16.vlgmr.msra.gmra.mrb[0].mxu0 %v356_v23  ;;  %767 = vmatmul.mubr.bf16.vlgmr.msra.gmra.mrb[0].mxu1 %v356_v23  ;;  %v2249_v23 = vld [vmem:[#allocation2 + $0x1e8] ss:$16 sps:$4 sm:$0xff]  }
  0x85   : > { %1100 = vmatpush1.bf16.msra.mxu0 %v2155_v20  ;;  %1143 = vmatpush1.bf16.msra.mxu1 %v2158_v22  ;;  %v2248_v20 = vld [vmem:[#allocation2 + $0x1e4] ss:$16 sps:$4 sm:$0xff]   ;;  %v2246_v22 = vld [vmem:[#allocation2 + $0x1e0] ss:$16 sps:$4 sm:$0xff]  }
  0x86   : > { %1101 = vmatprep.subr.bf16.mxu0 %v2164_v24  ;;  %1144 = vmatprep.subr.bf16.mxu1 %v2167_v25  ;;  %v2254_v24 = vld [vmem:[#allocation2 + $0x404] ss:$16 sps:$4 sm:$0xff]   ;;  %v2257_v25 = vld [vmem:[#allocation2 + $0x40c] ss:$16 sps:$4 sm:$0xff]  }
  0x87   : > { %1131 = vmatprep.mubr.bf16.mxu0 %v2534_v49  ;;  %1174 = vmatprep.mubr.bf16.mxu1 %v2534_v49  ;;  %v2195_v49 = vld [vmem:[#allocation2 + $0xc8] ss:$16 sps:$4 sm:$0xff]  }
  0x89   : > { %1102 = vmatpush1.bf16.msra.mxu0 %v2162_v27  ;;  %1145 = vmatpush1.bf16.msra.mxu1 %v2165_v29  ;;  %v2255_v27 = vld [vmem:[#allocation2 + $0x408] ss:$16 sps:$4 sm:$0xff]   ;;  %v2260_v29 = vld [vmem:[#allocation2 + $0x424] ss:$16 sps:$4 sm:$0xff]  }
  0x8a   : > { %1103 = vmatprep.subr.bf16.mxu0 %v2170_v30  ;;  %1146 = vmatprep.subr.bf16.mxu1 %v2173_v31  ;;  %v2263_v30 = vld [vmem:[#allocation2 + $0x42c] ss:$16 sps:$4 sm:$0xff]   ;;  %v2258_v31 = vld [vmem:[#allocation2 + $0x420] ss:$16 sps:$4 sm:$0xff]  }
  0x8d   : > { %1104 = vmatpush1.bf16.msra.mxu0 %v2168_v32  ;;  %1147 = vmatpush1.bf16.msra.mxu1 %v2171_v33  ;;  %v2261_v32 = vld [vmem:[#allocation2 + $0x428] ss:$16 sps:$4 sm:$0xff]   ;;  %v2266_v33 = vld [vmem:[#allocation2 + $0x444] ss:$16 sps:$4 sm:$0xff]  }
  0x8e   : > { %1105 = vmatprep.subr.bf16.mxu0 %v2176_v34  ;;  %1148 = vmatprep.subr.bf16.mxu1 %v2179_v35  ;;  %v2269_v34 = vld [vmem:[#allocation2 + $0x44c] ss:$16 sps:$4 sm:$0xff]   ;;  %v2264_v35 = vld [vmem:[#allocation2 + $0x440] ss:$16 sps:$4 sm:$0xff]  }
  0x91   : > { %1106 = vmatpush1.bf16.msra.mxu0 %v2174_v36  ;;  %1149 = vmatpush1.bf16.msra.mxu1 %v2177_v37  ;;  %v2267_v36 = vld [vmem:[#allocation2 + $0x448] ss:$16 sps:$4 sm:$0xff]   ;;  %v2272_v37 = vld [vmem:[#allocation2 + $0x464] ss:$16 sps:$4 sm:$0xff]  }
  0x92   : > { %1107 = vmatprep.subr.bf16.mxu0 %v2182_v38  ;;  %1150 = vmatprep.subr.bf16.mxu1 %v2185_v39  ;;  %v2275_v38 = vld [vmem:[#allocation2 + $0x46c] ss:$16 sps:$4 sm:$0xff]   ;;  %v2270_v39 = vld [vmem:[#allocation2 + $0x460] ss:$16 sps:$4 sm:$0xff]  }
  0x95   : > { %1108 = vmatpush1.bf16.msra.mxu0 %v2180_v40  ;;  %1151 = vmatpush1.bf16.msra.mxu1 %v2183_v41  ;;  %v2273_v40 = vld [vmem:[#allocation2 + $0x468] ss:$16 sps:$4 sm:$0xff]   ;;  %v2278_v41 = vld [vmem:[#allocation2 + $0x484] ss:$16 sps:$4 sm:$0xff]  }
  0x96   : > { %1109 = vmatprep.subr.bf16.mxu0 %v2188_v42  ;;  %1152 = vmatprep.subr.bf16.mxu1 %v2191_v43  ;;  %v2281_v42 = vld [vmem:[#allocation2 + $0x48c] ss:$16 sps:$4 sm:$0xff]   ;;  %v2276_v43 = vld [vmem:[#allocation2 + $0x480] ss:$16 sps:$4 sm:$0xff]  }
  0x99   : > { %1110 = vmatpush1.bf16.msra.mxu0 %v2186_v44  ;;  %1153 = vmatpush1.bf16.msra.mxu1 %v2189_v45  ;;  %v2284_v44 = vld [vmem:[#allocation2 + $0x4a4] ss:$16 sps:$4 sm:$0xff]   ;;  %v2287_v45 = vld [vmem:[#allocation2 + $0x4ac] ss:$16 sps:$4 sm:$0xff]  }
  0x9a   : > { %1111 = vmatprep.subr.bf16.mxu0 %v2194_v46  ;;  %1154 = vmatprep.subr.bf16.mxu1 %v2197_v47  ;;  %v2282_v46 = vld [vmem:[#allocation2 + $0x4a0] ss:$16 sps:$4 sm:$0xff]   ;;  %v2285_v47 = vld [vmem:[#allocation2 + $0x4a8] ss:$16 sps:$4 sm:$0xff]  }
  0x9d   : > { %1112 = vmatpush1.bf16.msra.mxu0 %v2192_v48  ;;  %1155 = vmatpush1.bf16.msra.mxu1 %v2195_v49  ;;  %v2290_v48 = vld [vmem:[#allocation2 + $0x4c4] ss:$16 sps:$4 sm:$0xff]   ;;  %v2293_v49 = vld [vmem:[#allocation2 + $0x4cc] ss:$16 sps:$4 sm:$0xff]  }
  0x9e   : > { %1113 = vmatprep.subr.bf16.mxu0 %v2200_v50  ;;  %1156 = vmatprep.subr.bf16.mxu1 %v2203_v51  ;;  %v2288_v50 = vld [vmem:[#allocation2 + $0x4c0] ss:$16 sps:$4 sm:$0xff]   ;;  %v2291_v51 = vld [vmem:[#allocation2 + $0x4c8] ss:$16 sps:$4 sm:$0xff]  }
  0xa1   : > { %1114 = vmatpush1.bf16.msra.mxu0 %v2198_v52  ;;  %1157 = vmatpush1.bf16.msra.mxu1 %v2201_v53  ;;  %v2296_v52 = vld [vmem:[#allocation2 + $0x4e4] ss:$16 sps:$4 sm:$0xff]   ;;  %v2299_v53 = vld [vmem:[#allocation2 + $0x4ec] ss:$16 sps:$4 sm:$0xff]  }
  0xa2   : > { %1115 = vmatprep.subr.bf16.mxu0 %v2206_v54  ;;  %1158 = vmatprep.subr.bf16.mxu1 %v2209_v55  ;;  %v2294_v54 = vld [vmem:[#allocation2 + $0x4e0] ss:$16 sps:$4 sm:$0xff]   ;;  %v2297_v55 = vld [vmem:[#allocation2 + $0x4e8] ss:$16 sps:$4 sm:$0xff]  }
  0xa5   : > { %1116 = vmatpush1.bf16.msra.mxu0 %v2204_v56  ;;  %1159 = vmatpush1.bf16.msra.mxu1 %v2207_v57  ;;  %v2302_v56 = vld [vmem:[#allocation2 + $0x504] ss:$16 sps:$4 sm:$0xff]   ;;  %v2305_v57 = vld [vmem:[#allocation2 + $0x50c] ss:$16 sps:$4 sm:$0xff]  }
  0xa6   : > { %1117 = vmatprep.subr.bf16.mxu0 %v2212_v58  ;;  %1160 = vmatprep.subr.bf16.mxu1 %v2215_v60  ;;  %v2300_v58 = vld [vmem:[#allocation2 + $0x500] ss:$16 sps:$4 sm:$0xff]   ;;  %v2303_v60 = vld [vmem:[#allocation2 + $0x508] ss:$16 sps:$4 sm:$0xff]  }
  0xa9   : > { %1118 = vmatpush1.bf16.msra.mxu0 %v2210_v61  ;;  %1161 = vmatpush1.bf16.msra.mxu1 %v2213_v62  ;;  %v2308_v61 = vld [vmem:[#allocation2 + $0x524] ss:$16 sps:$4 sm:$0xff]   ;;  %v2311_v62 = vld [vmem:[#allocation2 + $0x52c] ss:$16 sps:$4 sm:$0xff]  }
  0xaa   : > { %1119 = vmatprep.subr.bf16.mxu0 %v2218_v63  ;;  %1162 = vmatprep.subr.bf16.mxu1 %v2221_v0  ;;  %v2306_v63 = vld [vmem:[#allocation2 + $0x520] ss:$16 sps:$4 sm:$0xff]   ;;  %v2309_v0 = vld [vmem:[#allocation2 + $0x528] ss:$16 sps:$4 sm:$0xff]  }
  0xad   : > { %1120 = vmatpush1.bf16.msra.mxu0 %v2216_v1  ;;  %1163 = vmatpush1.bf16.msra.mxu1 %v2219_v2  ;;  %v2314_v1 = vld [vmem:[#allocation2 + $0x544] ss:$16 sps:$4 sm:$0xff]   ;;  %v2317_v2 = vld [vmem:[#allocation2 + $0x54c] ss:$16 sps:$4 sm:$0xff]  }
  0xae   : > { %1121 = vmatprep.subr.bf16.mxu0 %v2224_v3  ;;  %1164 = vmatprep.subr.bf16.mxu1 %v2227_v5  ;;  %v2312_v3 = vld [vmem:[#allocation2 + $0x540] ss:$16 sps:$4 sm:$0xff]   ;;  %v2315_v5 = vld [vmem:[#allocation2 + $0x548] ss:$16 sps:$4 sm:$0xff]  }
  0xb1   : > { %1122 = vmatpush1.bf16.msra.mxu0 %v2222_v6  ;;  %1165 = vmatpush1.bf16.msra.mxu1 %v2225_v7  ;;  %v2320_v6 = vld [vmem:[#allocation2 + $0x564] ss:$16 sps:$4 sm:$0xff]   ;;  %v2323_v7 = vld [vmem:[#allocation2 + $0x56c] ss:$16 sps:$4 sm:$0xff]  }
  0xb2   : > { %1123 = vmatprep.subr.bf16.mxu0 %v2230_v8  ;;  %1166 = vmatprep.subr.bf16.mxu1 %v2233_v9  ;;  %v2318_v8 = vld [vmem:[#allocation2 + $0x560] ss:$16 sps:$4 sm:$0xff]   ;;  %v2321_v9 = vld [vmem:[#allocation2 + $0x568] ss:$16 sps:$4 sm:$0xff]  }
  0xb5   : > { %1124 = vmatpush1.bf16.msra.mxu0 %v2228_v10  ;;  %1167 = vmatpush1.bf16.msra.mxu1 %v2231_v11  ;;  %v2326_v10 = vld [vmem:[#allocation2 + $0x584] ss:$16 sps:$4 sm:$0xff]   ;;  %v2329_v11 = vld [vmem:[#allocation2 + $0x58c] ss:$16 sps:$4 sm:$0xff]  }
  0xb6   : > { %1125 = vmatprep.subr.bf16.mxu0 %v2236_v12  ;;  %1168 = vmatprep.subr.bf16.mxu1 %v2239_v13  ;;  %v2324_v12 = vld [vmem:[#allocation2 + $0x580] ss:$16 sps:$4 sm:$0xff]   ;;  %v2327_v13 = vld [vmem:[#allocation2 + $0x588] ss:$16 sps:$4 sm:$0xff]  }
  0xb9   : > { %1126 = vmatpush1.bf16.msra.mxu0 %v2234_v14  ;;  %1169 = vmatpush1.bf16.msra.mxu1 %v2237_v15  ;;  %v2332_v14 = vld [vmem:[#allocation2 + $0x5a4] ss:$16 sps:$4 sm:$0xff]   ;;  %v2335_v15 = vld [vmem:[#allocation2 + $0x5ac] ss:$16 sps:$4 sm:$0xff]  }
  0xba   : > { %1127 = vmatprep.subr.bf16.mxu0 %v2242_v16  ;;  %1170 = vmatprep.subr.bf16.mxu1 %v2245_v17  ;;  %v2330_v16 = vld [vmem:[#allocation2 + $0x5a0] ss:$16 sps:$4 sm:$0xff]   ;;  %v2333_v17 = vld [vmem:[#allocation2 + $0x5a8] ss:$16 sps:$4 sm:$0xff]  }
  0xbd   : > { %1128 = vmatpush1.bf16.msra.mxu0 %v2240_v18  ;;  %1171 = vmatpush1.bf16.msra.mxu1 %v2243_v19  ;;  %v2338_v18 = vld [vmem:[#allocation2 + $0x5c4] ss:$16 sps:$4 sm:$0xff]   ;;  %v2341_v19 = vld [vmem:[#allocation2 + $0x5cc] ss:$16 sps:$4 sm:$0xff]  }
  0xbe   : > { %1129 = vmatprep.subr.bf16.mxu0 %v2248_v20  ;;  %1172 = vmatprep.subr.bf16.mxu1 %v2251_v21  ;;  %v2336_v20 = vld [vmem:[#allocation2 + $0x5c0] ss:$16 sps:$4 sm:$0xff]   ;;  %v2339_v21 = vld [vmem:[#allocation2 + $0x5c8] ss:$16 sps:$4 sm:$0xff]  }
  0xc1   : > { %1130 = vmatpush1.bf16.msra.mxu0 %v2246_v22  ;;  %1173 = vmatpush1.bf16.msra.mxu1 %v2249_v23  ;;  %v2344_v22 = vld [vmem:[#allocation2 + $0x5e4] ss:$16 sps:$4 sm:$0xff]   ;;  %v2347_v23 = vld [vmem:[#allocation2 + $0x5ec] ss:$16 sps:$4 sm:$0xff]  }
  0xc2   : > { %1579 = vmatprep.subr.bf16.mxu0 %v2254_v24  ;;  %1622 = vmatprep.subr.bf16.mxu1 %v2257_v25  ;;  %v2342_v24 = vld [vmem:[#allocation2 + $0x5e0] ss:$16 sps:$4 sm:$0xff]   ;;  %v2345_v25 = vld [vmem:[#allocation2 + $0x5e8] ss:$16 sps:$4 sm:$0xff]  }
  0xc4   : > { %1132 = vmatmul.mubr.bf16.vlgmr.msra.gmra.mrb[0].mxu0 %v2541_v59  ;;  %1175 = vmatmul.mubr.bf16.vlgmr.msra.gmra.mrb[0].mxu1 %v2541_v59 }
  0xc5   : > { %1580 = vmatpush1.bf16.msra.mxu0 %v2252_v26  ;;  %1623 = vmatpush1.bf16.msra.mxu1 %v2255_v27  ;;  %v1251_v26 = vrot.slane %v2541_v59, 1  ;;  %v1252_v27 = vrot.slane %v2544_v4, 1 }
  0xc6   : > { %1581 = vmatprep.subr.bf16.mxu0 %v2260_v29  ;;  %1624 = vmatprep.subr.bf16.mxu1 %v2263_v30  ;;  %v1675_v30 = vlaneseq }
  0xc7   : > { %1611 = vmatprep.mubr.bf16.mxu0 %v2553_v28  ;;  %1654 = vmatprep.mubr.bf16.mxu1 %v2553_v28  ;;  %v2279_v28 = vld [vmem:[#allocation2 + $0x488] ss:$16 sps:$4 sm:$0xff]   ;;  %v1253_v29 = vsel %vm1250_vm1, %v1251_v26, %v1252_v27 }
  0xc9   : > { %1582 = vmatpush1.bf16.msra.mxu0 %v2258_v31  ;;  %1625 = vmatpush1.bf16.msra.mxu1 %v2261_v32  ;;  %v1676_v31 = vshrl.u32 %v1675_v30, 7 }
  0xca   : > { %1583 = vmatprep.subr.bf16.mxu0 %v2266_v33  ;;  %1626 = vmatprep.subr.bf16.mxu1 %v2269_v34  ;;  %v1673_v34 = vld [vmem:[#allocation4] sm:$0xf] }
  0xcb   : > { %v1677_v32 = vsub.s32 0, %v1676_v31  ;;  %v1685_v33 = vsub.s32 2, %v1676_v31 }
  0xcd   : > { %1584 = vmatpush1.bf16.msra.mxu0 %v2264_v35  ;;  %1627 = vmatpush1.bf16.msra.mxu1 %v2267_v36  ;;  %v1681_v35 = vsub.s32 1, %v1676_v31  ;;  %v1689_v36 = vsub.s32 3, %v1676_v31  ;;  %v1686_v59 = vrot.slane %v1673_v34, %v1685_v33 }
  0xce   : > { %1585 = vmatprep.subr.bf16.mxu0 %v2272_v37  ;;  %1628 = vmatprep.subr.bf16.mxu1 %v2275_v38  ;;  %v1678_v37 = vrot.slane %v1673_v34, %v1677_v32 }
  0xcf   : > { %v1682_v38 = vrot.slane %v1673_v34, %v1681_v35  ;;  %v1690_v4 = vrot.slane %v1673_v34, %v1689_v36 }
  0xd1   : > { %1586 = vmatpush1.bf16.msra.mxu0 %v2270_v39  ;;  %1629 = vmatpush1.bf16.msra.mxu1 %v2273_v40 }
  0xd2   : > { %1587 = vmatprep.subr.bf16.mxu0 %v2278_v41  ;;  %1630 = vmatprep.subr.bf16.mxu1 %v2281_v42 }
  0xd5   : > { %1588 = vmatpush1.bf16.msra.mxu0 %v2276_v43  ;;  %1631 = vmatpush1.bf16.msra.mxu1 %v2279_v28 }
  0xd6   : > { %1589 = vmatprep.subr.bf16.mxu0 %v2284_v44  ;;  %1632 = vmatprep.subr.bf16.mxu1 %v2287_v45 }
  0xd9   : > { %1590 = vmatpush1.bf16.msra.mxu0 %v2282_v46  ;;  %1633 = vmatpush1.bf16.msra.mxu1 %v2285_v47 }
  0xda   : > { %1591 = vmatprep.subr.bf16.mxu0 %v2290_v48  ;;  %1634 = vmatprep.subr.bf16.mxu1 %v2293_v49 }
  0xdd   : > { %1592 = vmatpush1.bf16.msra.mxu0 %v2288_v50  ;;  %1635 = vmatpush1.bf16.msra.mxu1 %v2291_v51 }
  0xde   : > { %1593 = vmatprep.subr.bf16.mxu0 %v2296_v52  ;;  %1636 = vmatprep.subr.bf16.mxu1 %v2299_v53 }
  0xe1   : > { %1594 = vmatpush1.bf16.msra.mxu0 %v2294_v54  ;;  %1637 = vmatpush1.bf16.msra.mxu1 %v2297_v55 }
  0xe2   : > { %1595 = vmatprep.subr.bf16.mxu0 %v2302_v56  ;;  %1638 = vmatprep.subr.bf16.mxu1 %v2305_v57 }
  0xe5   : > { %1596 = vmatpush1.bf16.msra.mxu0 %v2300_v58  ;;  %1639 = vmatpush1.bf16.msra.mxu1 %v2303_v60 }
  0xe6   : > { %1597 = vmatprep.subr.bf16.mxu0 %v2308_v61  ;;  %1640 = vmatprep.subr.bf16.mxu1 %v2311_v62 }
  0xe9   : > { %1598 = vmatpush1.bf16.msra.mxu0 %v2306_v63  ;;  %1641 = vmatpush1.bf16.msra.mxu1 %v2309_v0 }
  0xea   : > { %1599 = vmatprep.subr.bf16.mxu0 %v2314_v1  ;;  %1642 = vmatprep.subr.bf16.mxu1 %v2317_v2 }
  0xed   : > { %1600 = vmatpush1.bf16.msra.mxu0 %v2312_v3  ;;  %1643 = vmatpush1.bf16.msra.mxu1 %v2315_v5 }
  0xee   : > { %1601 = vmatprep.subr.bf16.mxu0 %v2320_v6  ;;  %1644 = vmatprep.subr.bf16.mxu1 %v2323_v7 }
  0xf1   : > { %1602 = vmatpush1.bf16.msra.mxu0 %v2318_v8  ;;  %1645 = vmatpush1.bf16.msra.mxu1 %v2321_v9 }
  0xf2   : > { %1603 = vmatprep.subr.bf16.mxu0 %v2326_v10  ;;  %1646 = vmatprep.subr.bf16.mxu1 %v2329_v11 }
  0xf5   : > { %1604 = vmatpush1.bf16.msra.mxu0 %v2324_v12  ;;  %1647 = vmatpush1.bf16.msra.mxu1 %v2327_v13 }
  0xf6   : > { %1605 = vmatprep.subr.bf16.mxu0 %v2332_v14  ;;  %1648 = vmatprep.subr.bf16.mxu1 %v2335_v15 }
  0xf9   : > { %1606 = vmatpush1.bf16.msra.mxu0 %v2330_v16  ;;  %1649 = vmatpush1.bf16.msra.mxu1 %v2333_v17 }
  0xfa   : > { %1607 = vmatprep.subr.bf16.mxu0 %v2338_v18  ;;  %1650 = vmatprep.subr.bf16.mxu1 %v2341_v19 }
  0xfd   : > { %1608 = vmatpush1.bf16.msra.mxu0 %v2336_v20  ;;  %1651 = vmatpush1.bf16.msra.mxu1 %v2339_v21 }
  0xfe   : > { %1609 = vmatprep.subr.bf16.mxu0 %v2344_v22  ;;  %1652 = vmatprep.subr.bf16.mxu1 %v2347_v23 }
 0x101   : > { %1610 = vmatpush1.bf16.msra.mxu0 %v2342_v24  ;;  %1653 = vmatpush1.bf16.msra.mxu1 %v2345_v25 }
 0x104   : > { %1612 = vmatmul.mubr.bf16.vlgmr.msra.gmra.mrb[0].mxu0 %v1253_v29  ;;  %1655 = vmatmul.mubr.bf16.vlgmr.msra.gmra.mrb[0].mxu1 %v1253_v29 }
 0x1d7   : > { %v1613_v39 = vpop.f32.mrb[0].mxu0  ;;  %v1656_v40 = vpop.f32.mrb[0].mxu1 }
 0x1d8   : > { %v1695_v41 = vadd.f32 %v1678_v37, %v1613_v39  ;;  %v1697_v42 = vadd.f32 %v1686_v59, %v1656_v40  ;;  %v1615_v43 = vpop.f32.mrb[1].mxu0  ;;  %v1658_v28 = vpop.f32.mrb[1].mxu1 }
 0x1d9   : > { %v1696_v44 = vadd.f32 %v1682_v38, %v1615_v43  ;;  %v1698_v45 = vadd.f32 %v1690_v4, %v1658_v28  ;;  %v1617_v46 = vpop.f32.mrb[2].mxu0  ;;  %v1660_v47 = vpop.f32.mrb[2].mxu1 }
 0x1da   : > { %v1703_v48 = vmax.f32 %v1695_v41, 0.0  ;;  %v1705_v49 = vmax.f32 %v1697_v42, 0.0  ;;  %v1699_v50 = vadd.f32 %v1678_v37, %v1617_v46  ;;  %v1701_v51 = vadd.f32 %v1686_v59, %v1660_v47  ;;  %v1619_v52 = vpop.f32.mrb[3].mxu0  ;;  %v1662_v53 = vpop.f32.mrb[3].mxu1 }
 0x1db   : > { %v1704_v54 = vmax.f32 %v1696_v44, 0.0  ;;  %v1706_v55 = vmax.f32 %v1698_v45, 0.0  ;;  %v1700_v56 = vadd.f32 %v1682_v38, %v1619_v52  ;;  %v1702_v57 = vadd.f32 %v1690_v4, %v1662_v53 }
 0x1dc   : > { %1711 = vst [vmem:[%s198_s24] sm:$0xff] %v1703_v48  ;;  %1713 = vst [vmem:[%s198_s24 + $0x10] sm:$0xff] %v1705_v49  ;;  %v1707_v58 = vmax.f32 %v1699_v50, 0.0  ;;  %v1709_v60 = vmax.f32 %v1701_v51, 0.0 }
 0x1dd   : > { %1712 = vst [vmem:[%s198_s24 + $0x8] sm:$0xff] %v1704_v54  ;;  %1714 = vst [vmem:[%s198_s24 + $0x18] sm:$0xff] %v1706_v55  ;;  %v1708_v61 = vmax.f32 %v1700_v56, 0.0  ;;  %v1710_v62 = vmax.f32 %v1702_v57, 0.0 }
 0x1de   : > { %1715 = vst [vmem:[%s198_s24 + $0x20] sm:$0xff] %v1707_v58  ;;  %1717 = vst [vmem:[%s198_s24 + $0x30] sm:$0xff] %v1709_v60 }
 0x1df   : > { %1716 = vst [vmem:[%s198_s24 + $0x28] sm:$0xff] %v1708_v61  ;;  %1718 = vst [vmem:[%s198_s24 + $0x38] sm:$0xff] %v1710_v62 }
 0x1e0 PF: > { %s15_s12 = sadd.s32 1, %s2418_s12  }
 0x1e1   : > { %p12_p9 = scmp.ge.s32.totalorder %s15_s12, 4  }
 0x1e3   :  { %14 = sbr.rel (!%p12_p9) target bundleno = 2 (0x2), region = 73 }
 0x1ea   :  { %1740 = vsyncpa [#allocation3], 1 }
 0x1eb   :  { %1742 = vsyncpa [#allocation3 + $0x1], 1 }
 0x1ec   :  { %1743 = vsyncpa [#allocation5], 1 }

// kernel: xrd_classifier_forward.18
= control target key start
LH: loop header
LB: loop body
LE: loop exit
PB: predicated region body
PF: predicated region fallthrough
CT: control target
= control target key end

     0   :  { %s3490_s1 = inlined_call_operand.vmem [shape: bf16[1024,512], index: 1, kind: input, shape index: {}]   ;;  %s3491_s0 = inlined_call_operand.vmem [shape: bf16[8,1024], index: 0, kind: input, shape index: {}]   ;;  %s3492_s2 = inlined_call_operand.vmem [shape: f32[1,512], index: 2, kind: input, shape index: {}]   ;;  %s3493_s3 = inlined_call_operand.vmem [shape: f32[8,512], index: 3, kind: output, shape index: {}]  }
   0x1   :  { %v2239_v0 = vld [vmem:[%s3490_s1 + $0x4] ss:$16 sps:$4 sm:$0xff]   ;;  %v2243_v2 = vld [vmem:[%s3490_s1] ss:$16 sps:$4 sm:$0xff]   ;;  %v27_v48 = vld [vmem:[%s3491_s0 + $0x8] sm:$0xff] }
   0x2   :  { %v2241_v1 = vld [vmem:[%s3490_s1 + $0x204] ss:$16 sps:$4 sm:$0xff]   ;;  %1594 = vmatprep.subr.bf16.mxu0 %v2239_v0  ;;  %v2244_v3 = vld [vmem:[%s3490_s1 + $0x200] ss:$16 sps:$4 sm:$0xff]   ;;  %v2803_v51 = vcombine.high %v27_v48, %v27_v48 }
   0x3   :  { %1635 = vmatprep.subr.bf16.mxu1 %v2241_v1  ;;  %v2245_v4 = vld [vmem:[%s3490_s1 + $0x24] ss:$16 sps:$4 sm:$0xff]   ;;  %1595 = vmatpush1.bf16.msra.mxu0 %v2243_v2  ;;  %v2249_v6 = vld [vmem:[%s3490_s1 + $0x20] ss:$16 sps:$4 sm:$0xff]  }
   0x4   :  { %1636 = vmatpush1.bf16.msra.mxu1 %v2244_v3  ;;  %v2247_v5 = vld [vmem:[%s3490_s1 + $0x224] ss:$16 sps:$4 sm:$0xff]   ;;  %1596 = vmatprep.subr.bf16.mxu0 %v2245_v4  ;;  %v2250_v7 = vld [vmem:[%s3490_s1 + $0x220] ss:$16 sps:$4 sm:$0xff]  }
   0x5   :  { %1637 = vmatprep.subr.bf16.mxu1 %v2247_v5  ;;  %v2251_v8 = vld [vmem:[%s3490_s1 + $0x44] ss:$16 sps:$4 sm:$0xff]   ;;  %v2255_v10 = vld [vmem:[%s3490_s1 + $0x40] ss:$16 sps:$4 sm:$0xff]   ;;  %1667 = vmatprep.mubr.bf16.mxu1 %v2803_v51 }
   0x6   :  { %v2253_v9 = vld [vmem:[%s3490_s1 + $0x244] ss:$16 sps:$4 sm:$0xff]   ;;  %v2256_v11 = vld [vmem:[%s3490_s1 + $0x240] ss:$16 sps:$4 sm:$0xff]  }
   0x7   :  { %1597 = vmatpush1.bf16.msra.mxu0 %v2249_v6  ;;  %v2257_v12 = vld [vmem:[%s3490_s1 + $0x64] ss:$16 sps:$4 sm:$0xff]   ;;  %v2261_v14 = vld [vmem:[%s3490_s1 + $0x60] ss:$16 sps:$4 sm:$0xff]  }
   0x8   :  { %1638 = vmatpush1.bf16.msra.mxu1 %v2250_v7  ;;  %1598 = vmatprep.subr.bf16.mxu0 %v2251_v8  ;;  %v2259_v13 = vld [vmem:[%s3490_s1 + $0x264] ss:$16 sps:$4 sm:$0xff]   ;;  %v2262_v15 = vld [vmem:[%s3490_s1 + $0x260] ss:$16 sps:$4 sm:$0xff]   ;;  %v2863_v7 = vcombine.low %v27_v48, %v27_v48 }
   0x9   :  { %1639 = vmatprep.subr.bf16.mxu1 %v2253_v9  ;;  %v2263_v16 = vld [vmem:[%s3490_s1 + $0x84] ss:$16 sps:$4 sm:$0xff]   ;;  %v2267_v18 = vld [vmem:[%s3490_s1 + $0x80] ss:$16 sps:$4 sm:$0xff]  }
   0xa   :  { %v2265_v17 = vld [vmem:[%s3490_s1 + $0x284] ss:$16 sps:$4 sm:$0xff]   ;;  %v2268_v19 = vld [vmem:[%s3490_s1 + $0x280] ss:$16 sps:$4 sm:$0xff]  }
   0xb   :  { %1599 = vmatpush1.bf16.msra.mxu0 %v2255_v10  ;;  %v2269_v20 = vld [vmem:[%s3490_s1 + $0xa4] ss:$16 sps:$4 sm:$0xff]   ;;  %v2273_v22 = vld [vmem:[%s3490_s1 + $0xa0] ss:$16 sps:$4 sm:$0xff]  }
   0xc   :  { %1640 = vmatpush1.bf16.msra.mxu1 %v2256_v11  ;;  %1600 = vmatprep.subr.bf16.mxu0 %v2257_v12  ;;  %v2271_v21 = vld [vmem:[%s3490_s1 + $0x2a4] ss:$16 sps:$4 sm:$0xff]   ;;  %v2274_v23 = vld [vmem:[%s3490_s1 + $0x2a0] ss:$16 sps:$4 sm:$0xff]  }
   0xd   :  { %1641 = vmatprep.subr.bf16.mxu1 %v2259_v13  ;;  %v2275_v24 = vld [vmem:[%s3490_s1 + $0xc4] ss:$16 sps:$4 sm:$0xff]   ;;  %v2279_v26 = vld [vmem:[%s3490_s1 + $0xc0] ss:$16 sps:$4 sm:$0xff]  }
   0xe   :  { %v2277_v25 = vld [vmem:[%s3490_s1 + $0x2c4] ss:$16 sps:$4 sm:$0xff]   ;;  %v2280_v27 = vld [vmem:[%s3490_s1 + $0x2c0] ss:$16 sps:$4 sm:$0xff]  }
   0xf   :  { %1601 = vmatpush1.bf16.msra.mxu0 %v2261_v14  ;;  %v2281_v28 = vld [vmem:[%s3490_s1 + $0xe4] ss:$16 sps:$4 sm:$0xff]   ;;  %v2285_v30 = vld [vmem:[%s3490_s1 + $0xe0] ss:$16 sps:$4 sm:$0xff]  }
  0x10   :  { %1642 = vmatpush1.bf16.msra.mxu1 %v2262_v15  ;;  %1602 = vmatprep.subr.bf16.mxu0 %v2263_v16  ;;  %v2283_v29 = vld [vmem:[%s3490_s1 + $0x2e4] ss:$16 sps:$4 sm:$0xff]   ;;  %v2286_v31 = vld [vmem:[%s3490_s1 + $0x2e0] ss:$16 sps:$4 sm:$0xff]  }
  0x11   :  { %1643 = vmatprep.subr.bf16.mxu1 %v2265_v17  ;;  %v2287_v32 = vld [vmem:[%s3490_s1 + $0x104] ss:$16 sps:$4 sm:$0xff]   ;;  %v2291_v34 = vld [vmem:[%s3490_s1 + $0x100] ss:$16 sps:$4 sm:$0xff]  }
  0x12   :  { %v2289_v33 = vld [vmem:[%s3490_s1 + $0x304] ss:$16 sps:$4 sm:$0xff]   ;;  %v2292_v35 = vld [vmem:[%s3490_s1 + $0x300] ss:$16 sps:$4 sm:$0xff]  }
  0x13   :  { %1603 = vmatpush1.bf16.msra.mxu0 %v2267_v18  ;;  %v2293_v36 = vld [vmem:[%s3490_s1 + $0x124] ss:$16 sps:$4 sm:$0xff]   ;;  %v2297_v38 = vld [vmem:[%s3490_s1 + $0x120] ss:$16 sps:$4 sm:$0xff]  }
  0x14   :  { %1644 = vmatpush1.bf16.msra.mxu1 %v2268_v19  ;;  %1604 = vmatprep.subr.bf16.mxu0 %v2269_v20  ;;  %v2295_v37 = vld [vmem:[%s3490_s1 + $0x324] ss:$16 sps:$4 sm:$0xff]   ;;  %v2298_v39 = vld [vmem:[%s3490_s1 + $0x320] ss:$16 sps:$4 sm:$0xff]  }
  0x15   :  { %1645 = vmatprep.subr.bf16.mxu1 %v2271_v21  ;;  %v2299_v40 = vld [vmem:[%s3490_s1 + $0x144] ss:$16 sps:$4 sm:$0xff]   ;;  %v2303_v42 = vld [vmem:[%s3490_s1 + $0x140] ss:$16 sps:$4 sm:$0xff]  }
  0x16   :  { %v2301_v41 = vld [vmem:[%s3490_s1 + $0x344] ss:$16 sps:$4 sm:$0xff]   ;;  %v2304_v43 = vld [vmem:[%s3490_s1 + $0x340] ss:$16 sps:$4 sm:$0xff]  }
  0x17   :  { %1605 = vmatpush1.bf16.msra.mxu0 %v2273_v22  ;;  %v2305_v44 = vld [vmem:[%s3490_s1 + $0x164] ss:$16 sps:$4 sm:$0xff]   ;;  %v2309_v49 = vld [vmem:[%s3490_s1 + $0x160] ss:$16 sps:$4 sm:$0xff]  }
  0x18   :  { %1646 = vmatpush1.bf16.msra.mxu1 %v2274_v23  ;;  %1606 = vmatprep.subr.bf16.mxu0 %v2275_v24  ;;  %v2307_v45 = vld [vmem:[%s3490_s1 + $0x364] ss:$16 sps:$4 sm:$0xff]   ;;  %v2310_v50 = vld [vmem:[%s3490_s1 + $0x360] ss:$16 sps:$4 sm:$0xff]  }
  0x19   :  { %1647 = vmatprep.subr.bf16.mxu1 %v2277_v25  ;;  %v26_v46 = vld [vmem:[%s3491_s0] sm:$0xff] }
  0x1a   :  { %v2792_v47 = vcombine.high %v26_v46, %v26_v46  ;;  %v2311_v52 = vld [vmem:[%s3490_s1 + $0x184] ss:$16 sps:$4 sm:$0xff]   ;;  %v2315_v54 = vld [vmem:[%s3490_s1 + $0x180] ss:$16 sps:$4 sm:$0xff]   ;;  %v2861_v6 = vcombine.low %v26_v46, %v26_v46 }
  0x1b   :  { %1607 = vmatpush1.bf16.msra.mxu0 %v2279_v26  ;;  %v2313_v53 = vld [vmem:[%s3490_s1 + $0x384] ss:$16 sps:$4 sm:$0xff]   ;;  %v2316_v55 = vld [vmem:[%s3490_s1 + $0x380] ss:$16 sps:$4 sm:$0xff]  }
  0x1c   :  { %1648 = vmatpush1.bf16.msra.mxu1 %v2280_v27  ;;  %1608 = vmatprep.subr.bf16.mxu0 %v2281_v28  ;;  %v2317_v56 = vld [vmem:[%s3490_s1 + $0x1a4] ss:$16 sps:$4 sm:$0xff]   ;;  %v2321_v58 = vld [vmem:[%s3490_s1 + $0x1a0] ss:$16 sps:$4 sm:$0xff]  }
  0x1d   :  { %1649 = vmatprep.subr.bf16.mxu1 %v2283_v29  ;;  %1626 = vmatprep.mubr.bf16.mxu0 %v2792_v47  ;;  %v2319_v57 = vld [vmem:[%s3490_s1 + $0x3a4] ss:$16 sps:$4 sm:$0xff]   ;;  %v2322_v59 = vld [vmem:[%s3490_s1 + $0x3a0] ss:$16 sps:$4 sm:$0xff]  }
  0x1e   :  { %v2323_v60 = vld [vmem:[%s3490_s1 + $0x1c4] ss:$16 sps:$4 sm:$0xff]   ;;  %v2327_v62 = vld [vmem:[%s3490_s1 + $0x1c0] ss:$16 sps:$4 sm:$0xff]  }
  0x1f   :  { %1609 = vmatpush1.bf16.msra.mxu0 %v2285_v30  ;;  %v2325_v61 = vld [vmem:[%s3490_s1 + $0x3c4] ss:$16 sps:$4 sm:$0xff]   ;;  %v2328_v63 = vld [vmem:[%s3490_s1 + $0x3c0] ss:$16 sps:$4 sm:$0xff]  }
  0x20   :  { %1650 = vmatpush1.bf16.msra.mxu1 %v2286_v31  ;;  %1610 = vmatprep.subr.bf16.mxu0 %v2287_v32  ;;  %v2329_v0 = vld [vmem:[%s3490_s1 + $0x1e4] ss:$16 sps:$4 sm:$0xff]   ;;  %v2333_v2 = vld [vmem:[%s3490_s1 + $0x1e0] ss:$16 sps:$4 sm:$0xff]  }
  0x21   :  { %1651 = vmatprep.subr.bf16.mxu1 %v2289_v33  ;;  %v2331_v1 = vld [vmem:[%s3490_s1 + $0x3e4] ss:$16 sps:$4 sm:$0xff]   ;;  %v2334_v3 = vld [vmem:[%s3490_s1 + $0x3e0] ss:$16 sps:$4 sm:$0xff]   ;;  %v2947_v33 = vld [vmem:[%s3491_s0 + $0x18] sm:$0xff] }
  0x22   :  { %v2341_v4 = vld [vmem:[%s3490_s1 + $0x404] ss:$16 sps:$4 sm:$0xff]   ;;  %v2339_v8 = vld [vmem:[%s3490_s1 + $0x400] ss:$16 sps:$4 sm:$0xff]  }
  0x23   :  { %1611 = vmatpush1.bf16.msra.mxu0 %v2291_v34  ;;  %v2344_v5 = vld [vmem:[%s3490_s1 + $0x604] ss:$16 sps:$4 sm:$0xff]   ;;  %v2342_v9 = vld [vmem:[%s3490_s1 + $0x600] ss:$16 sps:$4 sm:$0xff]  }
  0x24   :  { %1652 = vmatpush1.bf16.msra.mxu1 %v2292_v35  ;;  %1612 = vmatprep.subr.bf16.mxu0 %v2293_v36  ;;  %v2347_v10 = vld [vmem:[%s3490_s1 + $0x424] ss:$16 sps:$4 sm:$0xff]   ;;  %v2345_v12 = vld [vmem:[%s3490_s1 + $0x420] ss:$16 sps:$4 sm:$0xff]  }
  0x25   :  { %1653 = vmatprep.subr.bf16.mxu1 %v2295_v37  ;;  %v2350_v11 = vld [vmem:[%s3490_s1 + $0x624] ss:$16 sps:$4 sm:$0xff]   ;;  %v2348_v13 = vld [vmem:[%s3490_s1 + $0x620] ss:$16 sps:$4 sm:$0xff]   ;;  %v2961_v37 = vcombine.high %v2947_v33, %v2947_v33 }
  0x26   :  { %v2353_v14 = vld [vmem:[%s3490_s1 + $0x444] ss:$16 sps:$4 sm:$0xff]   ;;  %v2351_v16 = vld [vmem:[%s3490_s1 + $0x440] ss:$16 sps:$4 sm:$0xff]  }
  0x27   :  { %1613 = vmatpush1.bf16.msra.mxu0 %v2297_v38  ;;  %v2356_v15 = vld [vmem:[%s3490_s1 + $0x644] ss:$16 sps:$4 sm:$0xff]   ;;  %v2354_v17 = vld [vmem:[%s3490_s1 + $0x640] ss:$16 sps:$4 sm:$0xff]  }
  0x28   :  { %1654 = vmatpush1.bf16.msra.mxu1 %v2298_v39  ;;  %1614 = vmatprep.subr.bf16.mxu0 %v2299_v40  ;;  %v2359_v18 = vld [vmem:[%s3490_s1 + $0x464] ss:$16 sps:$4 sm:$0xff]   ;;  %v2357_v20 = vld [vmem:[%s3490_s1 + $0x460] ss:$16 sps:$4 sm:$0xff]  }
  0x29   :  { %1655 = vmatprep.subr.bf16.mxu1 %v2301_v41  ;;  %v2362_v19 = vld [vmem:[%s3490_s1 + $0x664] ss:$16 sps:$4 sm:$0xff]   ;;  %v2360_v21 = vld [vmem:[%s3490_s1 + $0x660] ss:$16 sps:$4 sm:$0xff]  }
  0x2a   :  { %v2365_v22 = vld [vmem:[%s3490_s1 + $0x484] ss:$16 sps:$4 sm:$0xff]   ;;  %v2363_v24 = vld [vmem:[%s3490_s1 + $0x480] ss:$16 sps:$4 sm:$0xff]  }
  0x2b   :  { %1615 = vmatpush1.bf16.msra.mxu0 %v2303_v42  ;;  %v2368_v23 = vld [vmem:[%s3490_s1 + $0x684] ss:$16 sps:$4 sm:$0xff]   ;;  %v2366_v25 = vld [vmem:[%s3490_s1 + $0x680] ss:$16 sps:$4 sm:$0xff]  }
  0x2c   :  { %1656 = vmatpush1.bf16.msra.mxu1 %v2304_v43  ;;  %1616 = vmatprep.subr.bf16.mxu0 %v2305_v44  ;;  %v2371_v26 = vld [vmem:[%s3490_s1 + $0x4a4] ss:$16 sps:$4 sm:$0xff]   ;;  %v2369_v28 = vld [vmem:[%s3490_s1 + $0x4a0] ss:$16 sps:$4 sm:$0xff]  }
  0x2d   :  { %1657 = vmatprep.subr.bf16.mxu1 %v2307_v45  ;;  %v2374_v27 = vld [vmem:[%s3490_s1 + $0x6a4] ss:$16 sps:$4 sm:$0xff]   ;;  %v2372_v29 = vld [vmem:[%s3490_s1 + $0x6a0] ss:$16 sps:$4 sm:$0xff]  }
  0x2e   :  { %v2377_v30 = vld [vmem:[%s3490_s1 + $0x4c4] ss:$16 sps:$4 sm:$0xff]   ;;  %v2375_v34 = vld [vmem:[%s3490_s1 + $0x4c0] ss:$16 sps:$4 sm:$0xff]  }
  0x2f   :  { %1617 = vmatpush1.bf16.msra.mxu0 %v2309_v49  ;;  %v2380_v31 = vld [vmem:[%s3490_s1 + $0x6c4] ss:$16 sps:$4 sm:$0xff]   ;;  %v2378_v35 = vld [vmem:[%s3490_s1 + $0x6c0] ss:$16 sps:$4 sm:$0xff]  }
  0x30   :  { %1658 = vmatpush1.bf16.msra.mxu1 %v2310_v50  ;;  %1618 = vmatprep.subr.bf16.mxu0 %v2311_v52  ;;  %v2942_v32 = vld [vmem:[%s3491_s0 + $0x10] sm:$0xff] }
  0x31   :  { %1659 = vmatprep.subr.bf16.mxu1 %v2313_v53  ;;  %v2957_v36 = vcombine.high %v2942_v32, %v2942_v32  ;;  %v2383_v38 = vld [vmem:[%s3490_s1 + $0x4e4] ss:$16 sps:$4 sm:$0xff]   ;;  %v2381_v40 = vld [vmem:[%s3490_s1 + $0x4e0] ss:$16 sps:$4 sm:$0xff]  }
  0x32   :  { %v2386_v39 = vld [vmem:[%s3490_s1 + $0x6e4] ss:$16 sps:$4 sm:$0xff]   ;;  %v2384_v41 = vld [vmem:[%s3490_s1 + $0x6e0] ss:$16 sps:$4 sm:$0xff]  }
  0x33   :  { %1619 = vmatpush1.bf16.msra.mxu0 %v2315_v54  ;;  %v2389_v42 = vld [vmem:[%s3490_s1 + $0x504] ss:$16 sps:$4 sm:$0xff]   ;;  %v2387_v44 = vld [vmem:[%s3490_s1 + $0x500] ss:$16 sps:$4 sm:$0xff]  }
  0x34   :  { %1660 = vmatpush1.bf16.msra.mxu1 %v2316_v55  ;;  %1620 = vmatprep.subr.bf16.mxu0 %v2317_v56  ;;  %v2392_v43 = vld [vmem:[%s3490_s1 + $0x704] ss:$16 sps:$4 sm:$0xff]   ;;  %v2390_v45 = vld [vmem:[%s3490_s1 + $0x700] ss:$16 sps:$4 sm:$0xff]  }
  0x35   :  { %1661 = vmatprep.subr.bf16.mxu1 %v2319_v57  ;;  %v2395_v46 = vld [vmem:[%s3490_s1 + $0x524] ss:$16 sps:$4 sm:$0xff]   ;;  %v2393_v49 = vld [vmem:[%s3490_s1 + $0x520] ss:$16 sps:$4 sm:$0xff]  }
  0x36   :  { %v2398_v48 = vld [vmem:[%s3490_s1 + $0x724] ss:$16 sps:$4 sm:$0xff]   ;;  %v2396_v50 = vld [vmem:[%s3490_s1 + $0x720] ss:$16 sps:$4 sm:$0xff]  }
  0x37   :  { %1621 = vmatpush1.bf16.msra.mxu0 %v2321_v58  ;;  %v2401_v52 = vld [vmem:[%s3490_s1 + $0x544] ss:$16 sps:$4 sm:$0xff]   ;;  %v2399_v54 = vld [vmem:[%s3490_s1 + $0x540] ss:$16 sps:$4 sm:$0xff]  }
  0x38   :  { %1662 = vmatpush1.bf16.msra.mxu1 %v2322_v59  ;;  %1622 = vmatprep.subr.bf16.mxu0 %v2323_v60  ;;  %v2404_v53 = vld [vmem:[%s3490_s1 + $0x744] ss:$16 sps:$4 sm:$0xff]   ;;  %v2402_v55 = vld [vmem:[%s3490_s1 + $0x740] ss:$16 sps:$4 sm:$0xff]  }
  0x39   :  { %1663 = vmatprep.subr.bf16.mxu1 %v2325_v61  ;;  %v2407_v56 = vld [vmem:[%s3490_s1 + $0x564] ss:$16 sps:$4 sm:$0xff]   ;;  %v2405_v58 = vld [vmem:[%s3490_s1 + $0x560] ss:$16 sps:$4 sm:$0xff]  }
  0x3a   :  { %v2410_v57 = vld [vmem:[%s3490_s1 + $0x764] ss:$16 sps:$4 sm:$0xff]   ;;  %v2408_v59 = vld [vmem:[%s3490_s1 + $0x760] ss:$16 sps:$4 sm:$0xff]  }
  0x3b   :  { %1623 = vmatpush1.bf16.msra.mxu0 %v2327_v62  ;;  %v2413_v60 = vld [vmem:[%s3490_s1 + $0x584] ss:$16 sps:$4 sm:$0xff]   ;;  %v2411_v62 = vld [vmem:[%s3490_s1 + $0x580] ss:$16 sps:$4 sm:$0xff]  }
  0x3c   :  { %1664 = vmatpush1.bf16.msra.mxu1 %v2328_v63  ;;  %1624 = vmatprep.subr.bf16.mxu0 %v2329_v0  ;;  %v2416_v61 = vld [vmem:[%s3490_s1 + $0x784] ss:$16 sps:$4 sm:$0xff]   ;;  %v2414_v63 = vld [vmem:[%s3490_s1 + $0x780] ss:$16 sps:$4 sm:$0xff]  }
  0x3d   :  { %1665 = vmatprep.subr.bf16.mxu1 %v2331_v1  ;;  %v2419_v0 = vld [vmem:[%s3490_s1 + $0x5a4] ss:$16 sps:$4 sm:$0xff]  }
  0x3e   :  { %v2422_v1 = vld [vmem:[%s3490_s1 + $0x7a4] ss:$16 sps:$4 sm:$0xff]  }
  0x3f   :  { %1625 = vmatpush1.bf16.msra.mxu0 %v2333_v2  ;;  %v2417_v2 = vld [vmem:[%s3490_s1 + $0x5a0] ss:$16 sps:$4 sm:$0xff]  }
  0x40   :  { %1666 = vmatpush1.bf16.msra.mxu1 %v2334_v3  ;;  %1676 = vmatprep.subr.bf16.mxu0 %v2341_v4  ;;  %v2420_v3 = vld [vmem:[%s3490_s1 + $0x7a0] ss:$16 sps:$4 sm:$0xff]   ;;  %v2425_v4 = vld [vmem:[%s3490_s1 + $0x5c4] ss:$16 sps:$4 sm:$0xff]  }
  0x41   :  { %1717 = vmatprep.subr.bf16.mxu1 %v2344_v5  ;;  %v2428_v5 = vld [vmem:[%s3490_s1 + $0x7c4] ss:$16 sps:$4 sm:$0xff]  }
  0x42   :  { %1627 = vmatmul.mubr.bf16.vlgmr.msra.gmra.mrb[0].mxu0 %v2861_v6 }
  0x43   :  { %1668 = vmatmul.mubr.bf16.vlgmr.msra.gmra.mrb[0].mxu1 %v2863_v7  ;;  %1677 = vmatpush1.bf16.msra.mxu0 %v2339_v8  ;;  %v2423_v8 = vld [vmem:[%s3490_s1 + $0x5c0] ss:$16 sps:$4 sm:$0xff]  }
  0x44   :  { %1718 = vmatpush1.bf16.msra.mxu1 %v2342_v9  ;;  %1678 = vmatprep.subr.bf16.mxu0 %v2347_v10  ;;  %v2426_v9 = vld [vmem:[%s3490_s1 + $0x7c0] ss:$16 sps:$4 sm:$0xff]   ;;  %v2431_v10 = vld [vmem:[%s3490_s1 + $0x5e4] ss:$16 sps:$4 sm:$0xff]  }
  0x45   :  { %1719 = vmatprep.subr.bf16.mxu1 %v2350_v11  ;;  %1708 = vmatprep.mubr.bf16.mxu0 %v2957_v36  ;;  %v2434_v11 = vld [vmem:[%s3490_s1 + $0x7e4] ss:$16 sps:$4 sm:$0xff]  }
  0x46   :  { %1749 = vmatprep.mubr.bf16.mxu1 %v2961_v37 }
  0x47   :  { %1679 = vmatpush1.bf16.msra.mxu0 %v2345_v12  ;;  %v2429_v12 = vld [vmem:[%s3490_s1 + $0x5e0] ss:$16 sps:$4 sm:$0xff]  }
  0x48   :  { %1720 = vmatpush1.bf16.msra.mxu1 %v2348_v13  ;;  %1680 = vmatprep.subr.bf16.mxu0 %v2353_v14  ;;  %v2432_v13 = vld [vmem:[%s3490_s1 + $0x7e0] ss:$16 sps:$4 sm:$0xff]   ;;  %v2441_v14 = vld [vmem:[%s3490_s1 + $0xc] ss:$16 sps:$4 sm:$0xff]  }
  0x49   :  { %1721 = vmatprep.subr.bf16.mxu1 %v2356_v15  ;;  %v2444_v15 = vld [vmem:[%s3490_s1 + $0x20c] ss:$16 sps:$4 sm:$0xff]  }
  0x4b   :  { %1681 = vmatpush1.bf16.msra.mxu0 %v2351_v16  ;;  %v3081_v16 = vcombine.low %v2942_v32, %v2942_v32  ;;  %v2463_v32 = vld [vmem:[%s3490_s1 + $0x88] ss:$16 sps:$4 sm:$0xff]  }
  0x4c   :  { %1722 = vmatpush1.bf16.msra.mxu1 %v2354_v17  ;;  %1682 = vmatprep.subr.bf16.mxu0 %v2359_v18  ;;  %v3085_v17 = vcombine.low %v2947_v33, %v2947_v33  ;;  %v2439_v18 = vld [vmem:[%s3490_s1 + $0x8] ss:$16 sps:$4 sm:$0xff]  }
  0x4d   :  { %1723 = vmatprep.subr.bf16.mxu1 %v2362_v19  ;;  %v2442_v19 = vld [vmem:[%s3490_s1 + $0x208] ss:$16 sps:$4 sm:$0xff]  }
  0x4e   :  { %v2466_v33 = vld [vmem:[%s3490_s1 + $0x288] ss:$16 sps:$4 sm:$0xff]  }
  0x4f   :  { %1683 = vmatpush1.bf16.msra.mxu0 %v2357_v20  ;;  %v2447_v20 = vld [vmem:[%s3490_s1 + $0x2c] ss:$16 sps:$4 sm:$0xff]  }
  0x50   :  { %1724 = vmatpush1.bf16.msra.mxu1 %v2360_v21  ;;  %1684 = vmatprep.subr.bf16.mxu0 %v2365_v22  ;;  %v2450_v21 = vld [vmem:[%s3490_s1 + $0x22c] ss:$16 sps:$4 sm:$0xff]   ;;  %v2445_v22 = vld [vmem:[%s3490_s1 + $0x28] ss:$16 sps:$4 sm:$0xff]  }
  0x51   :  { %1725 = vmatprep.subr.bf16.mxu1 %v2368_v23  ;;  %v2448_v23 = vld [vmem:[%s3490_s1 + $0x228] ss:$16 sps:$4 sm:$0xff]  }
  0x53   :  { %1685 = vmatpush1.bf16.msra.mxu0 %v2363_v24  ;;  %v2453_v24 = vld [vmem:[%s3490_s1 + $0x4c] ss:$16 sps:$4 sm:$0xff]  }
  0x54   :  { %1726 = vmatpush1.bf16.msra.mxu1 %v2366_v25  ;;  %1686 = vmatprep.subr.bf16.mxu0 %v2371_v26  ;;  %v2456_v25 = vld [vmem:[%s3490_s1 + $0x24c] ss:$16 sps:$4 sm:$0xff]   ;;  %v2451_v26 = vld [vmem:[%s3490_s1 + $0x48] ss:$16 sps:$4 sm:$0xff]  }
  0x55   :  { %1727 = vmatprep.subr.bf16.mxu1 %v2374_v27  ;;  %v2454_v27 = vld [vmem:[%s3490_s1 + $0x248] ss:$16 sps:$4 sm:$0xff]  }
  0x57   :  { %1687 = vmatpush1.bf16.msra.mxu0 %v2369_v28  ;;  %v2459_v28 = vld [vmem:[%s3490_s1 + $0x6c] ss:$16 sps:$4 sm:$0xff]  }
  0x58   :  { %1728 = vmatpush1.bf16.msra.mxu1 %v2372_v29  ;;  %1688 = vmatprep.subr.bf16.mxu0 %v2377_v30  ;;  %v2460_v29 = vld [vmem:[%s3490_s1 + $0x268] ss:$16 sps:$4 sm:$0xff]   ;;  %v2465_v30 = vld [vmem:[%s3490_s1 + $0x8c] ss:$16 sps:$4 sm:$0xff]  }
  0x59   :  { %1729 = vmatprep.subr.bf16.mxu1 %v2380_v31  ;;  %v2468_v31 = vld [vmem:[%s3490_s1 + $0x28c] ss:$16 sps:$4 sm:$0xff]  }
  0x5b   :  { %1689 = vmatpush1.bf16.msra.mxu0 %v2375_v34  ;;  %v2471_v34 = vld [vmem:[%s3490_s1 + $0xac] ss:$16 sps:$4 sm:$0xff]  }
  0x5c   :  { %1730 = vmatpush1.bf16.msra.mxu1 %v2378_v35  ;;  %1690 = vmatprep.subr.bf16.mxu0 %v2383_v38  ;;  %v2474_v35 = vld [vmem:[%s3490_s1 + $0x2ac] ss:$16 sps:$4 sm:$0xff]   ;;  %v2469_v38 = vld [vmem:[%s3490_s1 + $0xa8] ss:$16 sps:$4 sm:$0xff]  }
  0x5d   :  { %1731 = vmatprep.subr.bf16.mxu1 %v2386_v39  ;;  %v2472_v39 = vld [vmem:[%s3490_s1 + $0x2a8] ss:$16 sps:$4 sm:$0xff]  }
  0x5f   :  { %1691 = vmatpush1.bf16.msra.mxu0 %v2381_v40  ;;  %v2477_v40 = vld [vmem:[%s3490_s1 + $0xcc] ss:$16 sps:$4 sm:$0xff]  }
  0x60   :  { %1732 = vmatpush1.bf16.msra.mxu1 %v2384_v41  ;;  %1692 = vmatprep.subr.bf16.mxu0 %v2389_v42  ;;  %v2480_v41 = vld [vmem:[%s3490_s1 + $0x2cc] ss:$16 sps:$4 sm:$0xff]   ;;  %v2475_v42 = vld [vmem:[%s3490_s1 + $0xc8] ss:$16 sps:$4 sm:$0xff]  }
  0x61   :  { %1733 = vmatprep.subr.bf16.mxu1 %v2392_v43  ;;  %v2478_v43 = vld [vmem:[%s3490_s1 + $0x2c8] ss:$16 sps:$4 sm:$0xff]  }
  0x63   :  { %1693 = vmatpush1.bf16.msra.mxu0 %v2387_v44  ;;  %v2483_v44 = vld [vmem:[%s3490_s1 + $0xec] ss:$16 sps:$4 sm:$0xff]  }
  0x64   :  { %1734 = vmatpush1.bf16.msra.mxu1 %v2390_v45  ;;  %1694 = vmatprep.subr.bf16.mxu0 %v2395_v46  ;;  %v2486_v45 = vld [vmem:[%s3490_s1 + $0x2ec] ss:$16 sps:$4 sm:$0xff]   ;;  %v2481_v46 = vld [vmem:[%s3490_s1 + $0xe8] ss:$16 sps:$4 sm:$0xff]  }
  0x65   :  { %1735 = vmatprep.subr.bf16.mxu1 %v2398_v48  ;;  %v2484_v48 = vld [vmem:[%s3490_s1 + $0x2e8] ss:$16 sps:$4 sm:$0xff]  }
  0x67   :  { %1695 = vmatpush1.bf16.msra.mxu0 %v2393_v49  ;;  %v2489_v49 = vld [vmem:[%s3490_s1 + $0x10c] ss:$16 sps:$4 sm:$0xff]  }
  0x68   :  { %1736 = vmatpush1.bf16.msra.mxu1 %v2396_v50  ;;  %1696 = vmatprep.subr.bf16.mxu0 %v2401_v52  ;;  %v2492_v50 = vld [vmem:[%s3490_s1 + $0x30c] ss:$16 sps:$4 sm:$0xff]   ;;  %v2487_v52 = vld [vmem:[%s3490_s1 + $0x108] ss:$16 sps:$4 sm:$0xff]  }
  0x69   :  { %1737 = vmatprep.subr.bf16.mxu1 %v2404_v53  ;;  %v2490_v53 = vld [vmem:[%s3490_s1 + $0x308] ss:$16 sps:$4 sm:$0xff]  }
  0x6b   :  { %1697 = vmatpush1.bf16.msra.mxu0 %v2399_v54  ;;  %v2495_v54 = vld [vmem:[%s3490_s1 + $0x12c] ss:$16 sps:$4 sm:$0xff]  }
  0x6c   :  { %1738 = vmatpush1.bf16.msra.mxu1 %v2402_v55  ;;  %1698 = vmatprep.subr.bf16.mxu0 %v2407_v56  ;;  %v2498_v55 = vld [vmem:[%s3490_s1 + $0x32c] ss:$16 sps:$4 sm:$0xff]   ;;  %v2493_v56 = vld [vmem:[%s3490_s1 + $0x128] ss:$16 sps:$4 sm:$0xff]  }
  0x6d   :  { %1739 = vmatprep.subr.bf16.mxu1 %v2410_v57  ;;  %v2496_v57 = vld [vmem:[%s3490_s1 + $0x328] ss:$16 sps:$4 sm:$0xff]  }
  0x6f   :  { %1699 = vmatpush1.bf16.msra.mxu0 %v2405_v58  ;;  %v2501_v58 = vld [vmem:[%s3490_s1 + $0x14c] ss:$16 sps:$4 sm:$0xff]  }
  0x70   :  { %1740 = vmatpush1.bf16.msra.mxu1 %v2408_v59  ;;  %1700 = vmatprep.subr.bf16.mxu0 %v2413_v60  ;;  %v2504_v59 = vld [vmem:[%s3490_s1 + $0x34c] ss:$16 sps:$4 sm:$0xff]   ;;  %v2499_v60 = vld [vmem:[%s3490_s1 + $0x148] ss:$16 sps:$4 sm:$0xff]  }
  0x71   :  { %1741 = vmatprep.subr.bf16.mxu1 %v2416_v61  ;;  %v2502_v61 = vld [vmem:[%s3490_s1 + $0x348] ss:$16 sps:$4 sm:$0xff]  }
  0x73   :  { %1701 = vmatpush1.bf16.msra.mxu0 %v2411_v62  ;;  %v2507_v62 = vld [vmem:[%s3490_s1 + $0x16c] ss:$16 sps:$4 sm:$0xff]  }
  0x74   :  { %1742 = vmatpush1.bf16.msra.mxu1 %v2414_v63  ;;  %1702 = vmatprep.subr.bf16.mxu0 %v2419_v0  ;;  %v2510_v63 = vld [vmem:[%s3490_s1 + $0x36c] ss:$16 sps:$4 sm:$0xff]   ;;  %v2505_v0 = vld [vmem:[%s3490_s1 + $0x168] ss:$16 sps:$4 sm:$0xff]  }
  0x75   :  { %1743 = vmatprep.subr.bf16.mxu1 %v2422_v1  ;;  %v2508_v1 = vld [vmem:[%s3490_s1 + $0x368] ss:$16 sps:$4 sm:$0xff]  }
  0x77   :  { %1703 = vmatpush1.bf16.msra.mxu0 %v2417_v2  ;;  %v2513_v2 = vld [vmem:[%s3490_s1 + $0x18c] ss:$16 sps:$4 sm:$0xff]  }
  0x78   :  { %1744 = vmatpush1.bf16.msra.mxu1 %v2420_v3  ;;  %1704 = vmatprep.subr.bf16.mxu0 %v2425_v4  ;;  %v2516_v3 = vld [vmem:[%s3490_s1 + $0x38c] ss:$16 sps:$4 sm:$0xff]   ;;  %v2511_v4 = vld [vmem:[%s3490_s1 + $0x188] ss:$16 sps:$4 sm:$0xff]  }
  0x79   :  { %1745 = vmatprep.subr.bf16.mxu1 %v2428_v5  ;;  %v2514_v5 = vld [vmem:[%s3490_s1 + $0x388] ss:$16 sps:$4 sm:$0xff]  }
  0x7b   :  { %1705 = vmatpush1.bf16.msra.mxu0 %v2423_v8  ;;  %v2519_v8 = vld [vmem:[%s3490_s1 + $0x1ac] ss:$16 sps:$4 sm:$0xff]  }
  0x7c   :  { %1746 = vmatpush1.bf16.msra.mxu1 %v2426_v9  ;;  %1706 = vmatprep.subr.bf16.mxu0 %v2431_v10  ;;  %v2522_v9 = vld [vmem:[%s3490_s1 + $0x3ac] ss:$16 sps:$4 sm:$0xff]   ;;  %v2517_v10 = vld [vmem:[%s3490_s1 + $0x1a8] ss:$16 sps:$4 sm:$0xff]  }
  0x7d   :  { %1747 = vmatprep.subr.bf16.mxu1 %v2434_v11  ;;  %v2520_v11 = vld [vmem:[%s3490_s1 + $0x3a8] ss:$16 sps:$4 sm:$0xff]  }
  0x7f   :  { %1707 = vmatpush1.bf16.msra.mxu0 %v2429_v12  ;;  %v2525_v12 = vld [vmem:[%s3490_s1 + $0x1cc] ss:$16 sps:$4 sm:$0xff]  }
  0x80   :  { %1748 = vmatpush1.bf16.msra.mxu1 %v2432_v13  ;;  %1758 = vmatprep.subr.bf16.mxu0 %v2441_v14  ;;  %v2528_v13 = vld [vmem:[%s3490_s1 + $0x3cc] ss:$16 sps:$4 sm:$0xff]   ;;  %v2523_v14 = vld [vmem:[%s3490_s1 + $0x1c8] ss:$16 sps:$4 sm:$0xff]  }
  0x81   :  { %1799 = vmatprep.subr.bf16.mxu1 %v2444_v15  ;;  %v2526_v15 = vld [vmem:[%s3490_s1 + $0x3c8] ss:$16 sps:$4 sm:$0xff]  }
  0x82   :  { %1709 = vmatmul.mubr.bf16.vlgmr.msra.gmra.mrb[4].mxu0 %v3081_v16 }
  0x83   :  { %1750 = vmatmul.mubr.bf16.vlgmr.msra.gmra.mrb[4].mxu1 %v3085_v17  ;;  %1759 = vmatpush1.bf16.msra.mxu0 %v2439_v18  ;;  %v2531_v18 = vld [vmem:[%s3490_s1 + $0x1ec] ss:$16 sps:$4 sm:$0xff]  }
  0x84   :  { %1800 = vmatpush1.bf16.msra.mxu1 %v2442_v19  ;;  %1760 = vmatprep.subr.bf16.mxu0 %v2447_v20  ;;  %v2534_v19 = vld [vmem:[%s3490_s1 + $0x3ec] ss:$16 sps:$4 sm:$0xff]   ;;  %v2529_v20 = vld [vmem:[%s3490_s1 + $0x1e8] ss:$16 sps:$4 sm:$0xff]  }
  0x85   :  { %1801 = vmatprep.subr.bf16.mxu1 %v2450_v21  ;;  %1790 = vmatprep.mubr.bf16.mxu0 %v2792_v47  ;;  %v2462_v47 = vld [vmem:[%s3490_s1 + $0x26c] ss:$16 sps:$4 sm:$0xff]   ;;  %v2532_v21 = vld [vmem:[%s3490_s1 + $0x3e8] ss:$16 sps:$4 sm:$0xff]  }
  0x86   :  { %1831 = vmatprep.mubr.bf16.mxu1 %v2803_v51  ;;  %v2457_v51 = vld [vmem:[%s3490_s1 + $0x68] ss:$16 sps:$4 sm:$0xff]  }
  0x87   :  { %1761 = vmatpush1.bf16.msra.mxu0 %v2445_v22  ;;  %v2537_v22 = vld [vmem:[%s3490_s1 + $0x40c] ss:$16 sps:$4 sm:$0xff]  }
  0x88   :  { %1802 = vmatpush1.bf16.msra.mxu1 %v2448_v23  ;;  %1762 = vmatprep.subr.bf16.mxu0 %v2453_v24  ;;  %v2540_v23 = vld [vmem:[%s3490_s1 + $0x60c] ss:$16 sps:$4 sm:$0xff]   ;;  %v2535_v24 = vld [vmem:[%s3490_s1 + $0x408] ss:$16 sps:$4 sm:$0xff]  }
  0x89   :  { %1803 = vmatprep.subr.bf16.mxu1 %v2456_v25  ;;  %v2538_v25 = vld [vmem:[%s3490_s1 + $0x608] ss:$16 sps:$4 sm:$0xff]  }
  0x8b   :  { %1763 = vmatpush1.bf16.msra.mxu0 %v2451_v26  ;;  %v2543_v26 = vld [vmem:[%s3490_s1 + $0x42c] ss:$16 sps:$4 sm:$0xff]  }
  0x8c   :  { %1804 = vmatpush1.bf16.msra.mxu1 %v2454_v27  ;;  %1764 = vmatprep.subr.bf16.mxu0 %v2459_v28  ;;  %v2546_v27 = vld [vmem:[%s3490_s1 + $0x62c] ss:$16 sps:$4 sm:$0xff]   ;;  %v2541_v28 = vld [vmem:[%s3490_s1 + $0x428] ss:$16 sps:$4 sm:$0xff]  }
  0x8d   :  { %1805 = vmatprep.subr.bf16.mxu1 %v2462_v47  ;;  %v2544_v47 = vld [vmem:[%s3490_s1 + $0x628] ss:$16 sps:$4 sm:$0xff]  }
  0x8f   :  { %1765 = vmatpush1.bf16.msra.mxu0 %v2457_v51  ;;  %v2549_v51 = vld [vmem:[%s3490_s1 + $0x44c] ss:$16 sps:$4 sm:$0xff]  }
  0x90   :  { %1806 = vmatpush1.bf16.msra.mxu1 %v2460_v29  ;;  %1766 = vmatprep.subr.bf16.mxu0 %v2465_v30  ;;  %v2550_v29 = vld [vmem:[%s3490_s1 + $0x648] ss:$16 sps:$4 sm:$0xff]   ;;  %v2555_v30 = vld [vmem:[%s3490_s1 + $0x46c] ss:$16 sps:$4 sm:$0xff]  }
  0x91   :  { %1807 = vmatprep.subr.bf16.mxu1 %v2468_v31  ;;  %v2556_v31 = vld [vmem:[%s3490_s1 + $0x668] ss:$16 sps:$4 sm:$0xff]  }
  0x93   :  { %1767 = vmatpush1.bf16.msra.mxu0 %v2463_v32  ;;  %v2561_v32 = vld [vmem:[%s3490_s1 + $0x48c] ss:$16 sps:$4 sm:$0xff]  }
  0x94   :  { %1808 = vmatpush1.bf16.msra.mxu1 %v2466_v33  ;;  %1768 = vmatprep.subr.bf16.mxu0 %v2471_v34  ;;  %v2564_v33 = vld [vmem:[%s3490_s1 + $0x68c] ss:$16 sps:$4 sm:$0xff]   ;;  %v2559_v34 = vld [vmem:[%s3490_s1 + $0x488] ss:$16 sps:$4 sm:$0xff]  }
  0x95   :  { %1809 = vmatprep.subr.bf16.mxu1 %v2474_v35  ;;  %v2562_v35 = vld [vmem:[%s3490_s1 + $0x688] ss:$16 sps:$4 sm:$0xff]  }
  0x97   :  { %1769 = vmatpush1.bf16.msra.mxu0 %v2469_v38  ;;  %v2567_v38 = vld [vmem:[%s3490_s1 + $0x4ac] ss:$16 sps:$4 sm:$0xff]  }
  0x98   :  { %1810 = vmatpush1.bf16.msra.mxu1 %v2472_v39  ;;  %1770 = vmatprep.subr.bf16.mxu0 %v2477_v40  ;;  %v2570_v39 = vld [vmem:[%s3490_s1 + $0x6ac] ss:$16 sps:$4 sm:$0xff]   ;;  %v2565_v40 = vld [vmem:[%s3490_s1 + $0x4a8] ss:$16 sps:$4 sm:$0xff]  }
  0x99   :  { %1811 = vmatprep.subr.bf16.mxu1 %v2480_v41  ;;  %v2568_v41 = vld [vmem:[%s3490_s1 + $0x6a8] ss:$16 sps:$4 sm:$0xff]  }
  0x9b   :  { %1771 = vmatpush1.bf16.msra.mxu0 %v2475_v42  ;;  %v2573_v42 = vld [vmem:[%s3490_s1 + $0x4cc] ss:$16 sps:$4 sm:$0xff]  }
  0x9c   :  { %1812 = vmatpush1.bf16.msra.mxu1 %v2478_v43  ;;  %1772 = vmatprep.subr.bf16.mxu0 %v2483_v44  ;;  %v2576_v43 = vld [vmem:[%s3490_s1 + $0x6cc] ss:$16 sps:$4 sm:$0xff]   ;;  %v2571_v44 = vld [vmem:[%s3490_s1 + $0x4c8] ss:$16 sps:$4 sm:$0xff]  }
  0x9d   :  { %1813 = vmatprep.subr.bf16.mxu1 %v2486_v45  ;;  %v2574_v45 = vld [vmem:[%s3490_s1 + $0x6c8] ss:$16 sps:$4 sm:$0xff]  }
  0x9f   :  { %1773 = vmatpush1.bf16.msra.mxu0 %v2481_v46  ;;  %v2579_v46 = vld [vmem:[%s3490_s1 + $0x4ec] ss:$16 sps:$4 sm:$0xff]  }
  0xa0   :  { %1814 = vmatpush1.bf16.msra.mxu1 %v2484_v48  ;;  %1774 = vmatprep.subr.bf16.mxu0 %v2489_v49  ;;  %v2582_v48 = vld [vmem:[%s3490_s1 + $0x6ec] ss:$16 sps:$4 sm:$0xff]   ;;  %v2577_v49 = vld [vmem:[%s3490_s1 + $0x4e8] ss:$16 sps:$4 sm:$0xff]  }
  0xa1   :  { %1815 = vmatprep.subr.bf16.mxu1 %v2492_v50  ;;  %v2580_v50 = vld [vmem:[%s3490_s1 + $0x6e8] ss:$16 sps:$4 sm:$0xff]  }
  0xa3   :  { %1775 = vmatpush1.bf16.msra.mxu0 %v2487_v52  ;;  %v2585_v52 = vld [vmem:[%s3490_s1 + $0x50c] ss:$16 sps:$4 sm:$0xff]  }
  0xa4   :  { %1816 = vmatpush1.bf16.msra.mxu1 %v2490_v53  ;;  %1776 = vmatprep.subr.bf16.mxu0 %v2495_v54  ;;  %v2588_v53 = vld [vmem:[%s3490_s1 + $0x70c] ss:$16 sps:$4 sm:$0xff]   ;;  %v2583_v54 = vld [vmem:[%s3490_s1 + $0x508] ss:$16 sps:$4 sm:$0xff]  }
  0xa5   :  { %1817 = vmatprep.subr.bf16.mxu1 %v2498_v55  ;;  %v2586_v55 = vld [vmem:[%s3490_s1 + $0x708] ss:$16 sps:$4 sm:$0xff]  }
  0xa7   :  { %1777 = vmatpush1.bf16.msra.mxu0 %v2493_v56  ;;  %v2591_v56 = vld [vmem:[%s3490_s1 + $0x52c] ss:$16 sps:$4 sm:$0xff]  }
  0xa8   :  { %1818 = vmatpush1.bf16.msra.mxu1 %v2496_v57  ;;  %1778 = vmatprep.subr.bf16.mxu0 %v2501_v58  ;;  %v2594_v57 = vld [vmem:[%s3490_s1 + $0x72c] ss:$16 sps:$4 sm:$0xff]   ;;  %v2589_v58 = vld [vmem:[%s3490_s1 + $0x528] ss:$16 sps:$4 sm:$0xff]  }
  0xa9   :  { %1819 = vmatprep.subr.bf16.mxu1 %v2504_v59  ;;  %v2592_v59 = vld [vmem:[%s3490_s1 + $0x728] ss:$16 sps:$4 sm:$0xff]  }
  0xab   :  { %1779 = vmatpush1.bf16.msra.mxu0 %v2499_v60  ;;  %v2597_v60 = vld [vmem:[%s3490_s1 + $0x54c] ss:$16 sps:$4 sm:$0xff]  }
  0xac   :  { %1820 = vmatpush1.bf16.msra.mxu1 %v2502_v61  ;;  %1780 = vmatprep.subr.bf16.mxu0 %v2507_v62  ;;  %v2600_v61 = vld [vmem:[%s3490_s1 + $0x74c] ss:$16 sps:$4 sm:$0xff]   ;;  %v2595_v62 = vld [vmem:[%s3490_s1 + $0x548] ss:$16 sps:$4 sm:$0xff]  }
  0xad   :  { %1821 = vmatprep.subr.bf16.mxu1 %v2510_v63  ;;  %v2598_v63 = vld [vmem:[%s3490_s1 + $0x748] ss:$16 sps:$4 sm:$0xff]  }
  0xaf   :  { %1781 = vmatpush1.bf16.msra.mxu0 %v2505_v0  ;;  %v2603_v0 = vld [vmem:[%s3490_s1 + $0x56c] ss:$16 sps:$4 sm:$0xff]  }
  0xb0   :  { %1822 = vmatpush1.bf16.msra.mxu1 %v2508_v1  ;;  %1782 = vmatprep.subr.bf16.mxu0 %v2513_v2  ;;  %v2606_v1 = vld [vmem:[%s3490_s1 + $0x76c] ss:$16 sps:$4 sm:$0xff]   ;;  %v2601_v2 = vld [vmem:[%s3490_s1 + $0x568] ss:$16 sps:$4 sm:$0xff]  }
  0xb1   :  { %1823 = vmatprep.subr.bf16.mxu1 %v2516_v3  ;;  %v2604_v3 = vld [vmem:[%s3490_s1 + $0x768] ss:$16 sps:$4 sm:$0xff]  }
  0xb3   :  { %1783 = vmatpush1.bf16.msra.mxu0 %v2511_v4  ;;  %v2609_v4 = vld [vmem:[%s3490_s1 + $0x58c] ss:$16 sps:$4 sm:$0xff]  }
  0xb4   :  { %1824 = vmatpush1.bf16.msra.mxu1 %v2514_v5  ;;  %1784 = vmatprep.subr.bf16.mxu0 %v2519_v8  ;;  %v2612_v5 = vld [vmem:[%s3490_s1 + $0x78c] ss:$16 sps:$4 sm:$0xff]   ;;  %v2607_v8 = vld [vmem:[%s3490_s1 + $0x588] ss:$16 sps:$4 sm:$0xff]  }
  0xb5   :  { %1825 = vmatprep.subr.bf16.mxu1 %v2522_v9  ;;  %v2610_v9 = vld [vmem:[%s3490_s1 + $0x788] ss:$16 sps:$4 sm:$0xff]  }
  0xb7   :  { %1785 = vmatpush1.bf16.msra.mxu0 %v2517_v10  ;;  %v2615_v10 = vld [vmem:[%s3490_s1 + $0x5ac] ss:$16 sps:$4 sm:$0xff]  }
  0xb8   :  { %1826 = vmatpush1.bf16.msra.mxu1 %v2520_v11  ;;  %1786 = vmatprep.subr.bf16.mxu0 %v2525_v12  ;;  %v2618_v11 = vld [vmem:[%s3490_s1 + $0x7ac] ss:$16 sps:$4 sm:$0xff]   ;;  %v2613_v12 = vld [vmem:[%s3490_s1 + $0x5a8] ss:$16 sps:$4 sm:$0xff]  }
  0xb9   :  { %1827 = vmatprep.subr.bf16.mxu1 %v2528_v13  ;;  %v2616_v13 = vld [vmem:[%s3490_s1 + $0x7a8] ss:$16 sps:$4 sm:$0xff]  }
  0xbb   :  { %1787 = vmatpush1.bf16.msra.mxu0 %v2523_v14  ;;  %v2621_v14 = vld [vmem:[%s3490_s1 + $0x5cc] ss:$16 sps:$4 sm:$0xff]  }
  0xbc   :  { %1828 = vmatpush1.bf16.msra.mxu1 %v2526_v15  ;;  %1788 = vmatprep.subr.bf16.mxu0 %v2531_v18  ;;  %v2624_v15 = vld [vmem:[%s3490_s1 + $0x7cc] ss:$16 sps:$4 sm:$0xff]   ;;  %v2619_v18 = vld [vmem:[%s3490_s1 + $0x5c8] ss:$16 sps:$4 sm:$0xff]  }
  0xbd   :  { %1829 = vmatprep.subr.bf16.mxu1 %v2534_v19  ;;  %v2622_v19 = vld [vmem:[%s3490_s1 + $0x7c8] ss:$16 sps:$4 sm:$0xff]  }
  0xbf   :  { %1789 = vmatpush1.bf16.msra.mxu0 %v2529_v20  ;;  %v2627_v20 = vld [vmem:[%s3490_s1 + $0x5ec] ss:$16 sps:$4 sm:$0xff]  }
  0xc0   :  { %1830 = vmatpush1.bf16.msra.mxu1 %v2532_v21  ;;  %1840 = vmatprep.subr.bf16.mxu0 %v2537_v22  ;;  %v2630_v21 = vld [vmem:[%s3490_s1 + $0x7ec] ss:$16 sps:$4 sm:$0xff]   ;;  %v2625_v22 = vld [vmem:[%s3490_s1 + $0x5e8] ss:$16 sps:$4 sm:$0xff]  }
  0xc1   :  { %1881 = vmatprep.subr.bf16.mxu1 %v2540_v23  ;;  %v2628_v23 = vld [vmem:[%s3490_s1 + $0x7e8] ss:$16 sps:$4 sm:$0xff]  }
  0xc2   :  { %1791 = vmatmul.mubr.bf16.vlgmr.msra.gmra.mrb[8].mxu0 %v2861_v6  ;;  %v2552_v6 = vld [vmem:[%s3490_s1 + $0x64c] ss:$16 sps:$4 sm:$0xff]  }
  0xc3   :  { %1832 = vmatmul.mubr.bf16.vlgmr.msra.gmra.mrb[8].mxu1 %v2863_v7  ;;  %1841 = vmatpush1.bf16.msra.mxu0 %v2535_v24  ;;  %v2547_v7 = vld [vmem:[%s3490_s1 + $0x448] ss:$16 sps:$4 sm:$0xff]  }
  0xc4   :  { %1882 = vmatpush1.bf16.msra.mxu1 %v2538_v25  ;;  %1842 = vmatprep.subr.bf16.mxu0 %v2543_v26 }
  0xc5   :  { %1883 = vmatprep.subr.bf16.mxu1 %v2546_v27  ;;  %1872 = vmatprep.mubr.bf16.mxu0 %v2957_v36  ;;  %v2558_v36 = vld [vmem:[%s3490_s1 + $0x66c] ss:$16 sps:$4 sm:$0xff]  }
  0xc6   :  { %1913 = vmatprep.mubr.bf16.mxu1 %v2961_v37  ;;  %v2553_v37 = vld [vmem:[%s3490_s1 + $0x468] ss:$16 sps:$4 sm:$0xff]  }
  0xc7   :  { %1843 = vmatpush1.bf16.msra.mxu0 %v2541_v28 }
  0xc8   :  { %1884 = vmatpush1.bf16.msra.mxu1 %v2544_v47  ;;  %1844 = vmatprep.subr.bf16.mxu0 %v2549_v51 }
  0xc9   :  { %1885 = vmatprep.subr.bf16.mxu1 %v2552_v6 }
  0xcb   :  { %1845 = vmatpush1.bf16.msra.mxu0 %v2547_v7 }
  0xcc   :  { %1886 = vmatpush1.bf16.msra.mxu1 %v2550_v29  ;;  %1846 = vmatprep.subr.bf16.mxu0 %v2555_v30  ;;  %v1939_v30 = vlaneseq }
  0xcd   :  { %1887 = vmatprep.subr.bf16.mxu1 %v2558_v36 }
  0xce   :  { %v1940_v36 = vshrl.u32 %v1939_v30, 7 }
  0xcf   :  { %1847 = vmatpush1.bf16.msra.mxu0 %v2553_v37 }
  0xd0   :  { %1888 = vmatpush1.bf16.msra.mxu1 %v2556_v31  ;;  %1848 = vmatprep.subr.bf16.mxu0 %v2561_v32  ;;  %v1941_v37 = vsub.s32 0, %v1940_v36  ;;  %v1937_v31 = vld [vmem:[%s3492_s2] sm:$0xf] }
  0xd1   :  { %1889 = vmatprep.subr.bf16.mxu1 %v2564_v33 }
  0xd3   :  { %1849 = vmatpush1.bf16.msra.mxu0 %v2559_v34  ;;  %v1942_v34 = vrot.slane %v1937_v31, %v1941_v37 }
  0xd4   :  { %1890 = vmatpush1.bf16.msra.mxu1 %v2562_v35  ;;  %1850 = vmatprep.subr.bf16.mxu0 %v2567_v38 }
  0xd5   :  { %1891 = vmatprep.subr.bf16.mxu1 %v2570_v39 }
  0xd7   :  { %1851 = vmatpush1.bf16.msra.mxu0 %v2565_v40 }
  0xd8   :  { %1892 = vmatpush1.bf16.msra.mxu1 %v2568_v41  ;;  %1852 = vmatprep.subr.bf16.mxu0 %v2573_v42 }
  0xd9   :  { %1893 = vmatprep.subr.bf16.mxu1 %v2576_v43 }
  0xdb   :  { %1853 = vmatpush1.bf16.msra.mxu0 %v2571_v44 }
  0xdc   :  { %1894 = vmatpush1.bf16.msra.mxu1 %v2574_v45  ;;  %1854 = vmatprep.subr.bf16.mxu0 %v2579_v46 }
  0xdd   :  { %1895 = vmatprep.subr.bf16.mxu1 %v2582_v48 }
  0xdf   :  { %1855 = vmatpush1.bf16.msra.mxu0 %v2577_v49 }
  0xe0   :  { %1896 = vmatpush1.bf16.msra.mxu1 %v2580_v50  ;;  %1856 = vmatprep.subr.bf16.mxu0 %v2585_v52 }
  0xe1   :  { %1897 = vmatprep.subr.bf16.mxu1 %v2588_v53 }
  0xe3   :  { %1857 = vmatpush1.bf16.msra.mxu0 %v2583_v54 }
  0xe4   :  { %1898 = vmatpush1.bf16.msra.mxu1 %v2586_v55  ;;  %1858 = vmatprep.subr.bf16.mxu0 %v2591_v56 }
  0xe5   :  { %1899 = vmatprep.subr.bf16.mxu1 %v2594_v57 }
  0xe7   :  { %1859 = vmatpush1.bf16.msra.mxu0 %v2589_v58 }
  0xe8   :  { %1900 = vmatpush1.bf16.msra.mxu1 %v2592_v59  ;;  %1860 = vmatprep.subr.bf16.mxu0 %v2597_v60 }
  0xe9   :  { %1901 = vmatprep.subr.bf16.mxu1 %v2600_v61 }
  0xeb   :  { %1861 = vmatpush1.bf16.msra.mxu0 %v2595_v62 }
  0xec   :  { %1902 = vmatpush1.bf16.msra.mxu1 %v2598_v63  ;;  %1862 = vmatprep.subr.bf16.mxu0 %v2603_v0  ;;  %v1949_v63 = vsub.s32 2, %v1940_v36  ;;  %v1953_v0 = vsub.s32 3, %v1940_v36 }
  0xed   :  { %1903 = vmatprep.subr.bf16.mxu1 %v2606_v1 }
  0xef   :  { %1863 = vmatpush1.bf16.msra.mxu0 %v2601_v2 }
  0xf0   :  { %1904 = vmatpush1.bf16.msra.mxu1 %v2604_v3  ;;  %1864 = vmatprep.subr.bf16.mxu0 %v2609_v4  ;;  %v1950_v4 = vrot.slane %v1937_v31, %v1949_v63 }
  0xf1   :  { %1905 = vmatprep.subr.bf16.mxu1 %v2612_v5 }
  0xf3   :  { %1865 = vmatpush1.bf16.msra.mxu0 %v2607_v8 }
  0xf4   :  { %1906 = vmatpush1.bf16.msra.mxu1 %v2610_v9  ;;  %1866 = vmatprep.subr.bf16.mxu0 %v2615_v10  ;;  %v1954_v10 = vrot.slane %v1937_v31, %v1953_v0 }
  0xf5   :  { %1907 = vmatprep.subr.bf16.mxu1 %v2618_v11 }
  0xf7   :  { %1867 = vmatpush1.bf16.msra.mxu0 %v2613_v12 }
  0xf8   :  { %1908 = vmatpush1.bf16.msra.mxu1 %v2616_v13  ;;  %1868 = vmatprep.subr.bf16.mxu0 %v2621_v14 }
  0xf9   :  { %1909 = vmatprep.subr.bf16.mxu1 %v2624_v15 }
  0xfb   :  { %1869 = vmatpush1.bf16.msra.mxu0 %v2619_v18 }
  0xfc   :  { %1910 = vmatpush1.bf16.msra.mxu1 %v2622_v19  ;;  %1870 = vmatprep.subr.bf16.mxu0 %v2627_v20 }
  0xfd   :  { %1911 = vmatprep.subr.bf16.mxu1 %v2630_v21 }
  0xff   :  { %1871 = vmatpush1.bf16.msra.mxu0 %v2625_v22 }
 0x100   :  { %1912 = vmatpush1.bf16.msra.mxu1 %v2628_v23 }
 0x102   :  { %1873 = vmatmul.mubr.bf16.vlgmr.msra.gmra.mrb[12].mxu0 %v3081_v16  ;;  %v1945_v16 = vsub.s32 1, %v1940_v36 }
 0x103   :  { %1914 = vmatmul.mubr.bf16.vlgmr.msra.gmra.mrb[12].mxu1 %v3085_v17 }
 0x104   :  { %v1946_v40 = vrot.slane %v1937_v31, %v1945_v16 }
 0x115   :  { %v1628_v24 = vpop.f32.mrb[0].mxu0 }
 0x116   :  { %v1669_v25 = vpop.f32.mrb[0].mxu1  ;;  %v1630_v27 = vpop.f32.mrb[1].mxu0 }
 0x117   :  { %v1670_v26 = vadd.f32 %v1669_v25, %v1628_v24  ;;  %v1671_v28 = vpop.f32.mrb[1].mxu1  ;;  %v1632_v51 = vpop.f32.mrb[2].mxu0 }
 0x118   :  { %v1672_v47 = vadd.f32 %v1671_v28, %v1630_v27  ;;  %v1673_v6 = vpop.f32.mrb[2].mxu1  ;;  %v1633_v7 = vpop.f32.mrb[3].mxu0 }
 0x119   :  { %v1674_v29 = vpop.f32.mrb[3].mxu1 }
 0x155   :  { %v1710_v32 = vpop.f32.mrb[4].mxu0 }
 0x156   :  { %v1751_v17 = vpop.f32.mrb[4].mxu1  ;;  %v1711_v33 = vadd.f32 %v1710_v32, %v1670_v26  ;;  %v1712_v35 = vpop.f32.mrb[5].mxu0 }
 0x157   :  { %v1753_v38 = vpop.f32.mrb[5].mxu1  ;;  %v1713_v39 = vadd.f32 %v1712_v35, %v1672_v47  ;;  %v1714_v41 = vpop.f32.mrb[6].mxu0 }
 0x158   :  { %v1755_v42 = vpop.f32.mrb[6].mxu1  ;;  %v1752_v43 = vadd.f32 %v1751_v17, %v1711_v33  ;;  %v1715_v44 = vpop.f32.mrb[7].mxu0 }
 0x159   :  { %v1756_v45 = vpop.f32.mrb[7].mxu1  ;;  %v1754_v46 = vadd.f32 %v1753_v38, %v1713_v39 }
 0x15a   :  { %v1959_v48 = vadd.f32 %v1942_v34, %v1752_v43 }
 0x15b   :  { %v1960_v49 = vadd.f32 %v1946_v40, %v1754_v46 }
 0x15c   :  { %v1963_v50 = vmax.f32 %v1959_v48, 0.0 }
 0x15d   :  { %v1964_v52 = vmax.f32 %v1960_v49, 0.0 }
 0x15e   :  { %1967 = vst [vmem:[%s3493_s3] sm:$0xff] %v1963_v50 }
 0x15f   :  { %1968 = vst [vmem:[%s3493_s3 + $0x8] sm:$0xff] %v1964_v52 }
 0x195   :  { %v1792_v53 = vpop.f32.mrb[8].mxu0 }
 0x196   :  { %v1833_v54 = vpop.f32.mrb[8].mxu1  ;;  %v1794_v56 = vpop.f32.mrb[9].mxu0 }
 0x197   :  { %v1834_v55 = vadd.f32 %v1833_v54, %v1792_v53  ;;  %v1835_v57 = vpop.f32.mrb[9].mxu1  ;;  %v1796_v59 = vpop.f32.mrb[10].mxu0 }
 0x198   :  { %v1836_v58 = vadd.f32 %v1835_v57, %v1794_v56  ;;  %v1837_v60 = vpop.f32.mrb[10].mxu1  ;;  %v1797_v61 = vpop.f32.mrb[11].mxu0 }
 0x199   :  { %v1838_v62 = vpop.f32.mrb[11].mxu1 }
 0x1d5   :  { %v1874_v1 = vpop.f32.mrb[12].mxu0 }
 0x1d6   :  { %v1915_v2 = vpop.f32.mrb[12].mxu1  ;;  %v1875_v3 = vadd.f32 %v1874_v1, %v1834_v55  ;;  %v1876_v5 = vpop.f32.mrb[13].mxu0 }
 0x1d7   :  { %v1917_v8 = vpop.f32.mrb[13].mxu1  ;;  %v1877_v9 = vadd.f32 %v1876_v5, %v1836_v58  ;;  %v1878_v11 = vpop.f32.mrb[14].mxu0 }
 0x1d8   :  { %v1919_v12 = vpop.f32.mrb[14].mxu1  ;;  %v1916_v13 = vadd.f32 %v1915_v2, %v1875_v3  ;;  %v1879_v14 = vpop.f32.mrb[15].mxu0 }
 0x1d9   :  { %v1920_v15 = vpop.f32.mrb[15].mxu1  ;;  %v1918_v18 = vadd.f32 %v1917_v8, %v1877_v9 }
 0x1da   :  { %v1961_v19 = vadd.f32 %v1950_v4, %v1916_v13 }
 0x1db   :  { %v1962_v20 = vadd.f32 %v1954_v10, %v1918_v18 }
 0x1dc   :  { %v1965_v21 = vmax.f32 %v1961_v19, 0.0 }
 0x1dd   :  { %v1966_v22 = vmax.f32 %v1962_v20, 0.0 }
 0x1de   :  { %1969 = vst [vmem:[%s3493_s3 + $0x10] sm:$0xff] %v1965_v21 }
 0x1df   :  { %1970 = vst [vmem:[%s3493_s3 + $0x18] sm:$0xff] %v1966_v22 }

// kernel: xrd_classifier_forward.19
= control target key start
LH: loop header
LB: loop body
LE: loop exit
PB: predicated region body
PF: predicated region fallthrough
CT: control target
= control target key end

     0   :  { %s637_s1 = inlined_call_operand.vmem [shape: bf16[512,128], index: 1, kind: input, shape index: {}]   ;;  %s638_s0 = inlined_call_operand.vmem [shape: bf16[8,512], index: 0, kind: input, shape index: {}]   ;;  %s639_s2 = inlined_call_operand.vmem [shape: f32[1,128], index: 2, kind: input, shape index: {}]   ;;  %s640_s3 = inlined_call_operand.vmem [shape: f32[8,128], index: 3, kind: output, shape index: {}]  }
   0x1   :  { %v473_v0 = vld [vmem:[%s637_s1 + $0x40] sm:$0xff]   ;;  %v477_v4 = vld [vmem:[%s637_s1 + $0x48] sm:$0xff]   ;;  %v481_v8 = vld [vmem:[%s637_s1 + $0x50] sm:$0xff]  }
   0x2   :  { %v474_v1 = vld [vmem:[%s637_s1 + $0xc0] sm:$0xff]   ;;  %429 = vmatprep.subr.bf16.mxu0 %v473_v0  ;;  %v478_v5 = vld [vmem:[%s637_s1 + $0xc8] sm:$0xff]   ;;  %v482_v9 = vld [vmem:[%s637_s1 + $0xd0] sm:$0xff]  }
   0x3   :  { %v475_v2 = vld [vmem:[%s637_s1] sm:$0xff]   ;;  %451 = vmatprep.subr.bf16.mxu1 %v474_v1  ;;  %v479_v6 = vld [vmem:[%s637_s1 + $0x8] sm:$0xff]   ;;  %v483_v10 = vld [vmem:[%s637_s1 + $0x10] sm:$0xff]  }
   0x4   :  { %v476_v3 = vld [vmem:[%s637_s1 + $0x80] sm:$0xff]   ;;  %430 = vmatpush3.bf16.msra.mxu0 %v475_v2  ;;  %v480_v7 = vld [vmem:[%s637_s1 + $0x88] sm:$0xff]   ;;  %v484_v11 = vld [vmem:[%s637_s1 + $0x90] sm:$0xff]  }
   0x5   :  { %452 = vmatpush3.bf16.msra.mxu1 %v476_v3  ;;  %431 = vmatprep.subr.bf16.mxu0 %v477_v4  ;;  %v485_v12 = vld [vmem:[%s637_s1 + $0x58] sm:$0xff]   ;;  %v489_v16 = vld [vmem:[%s637_s1 + $0x60] sm:$0xff]   ;;  %v493_v20 = vld [vmem:[%s637_s1 + $0x68] sm:$0xff]  }
   0x6   :  { %453 = vmatprep.subr.bf16.mxu1 %v478_v5  ;;  %v486_v13 = vld [vmem:[%s637_s1 + $0xd8] sm:$0xff]   ;;  %v490_v17 = vld [vmem:[%s637_s1 + $0xe0] sm:$0xff]   ;;  %v494_v21 = vld [vmem:[%s637_s1 + $0xe8] sm:$0xff]  }
   0x7   :  { %v487_v14 = vld [vmem:[%s637_s1 + $0x18] sm:$0xff]   ;;  %v491_v18 = vld [vmem:[%s637_s1 + $0x20] sm:$0xff]   ;;  %v495_v22 = vld [vmem:[%s637_s1 + $0x28] sm:$0xff]  }
   0x8   :  { %432 = vmatpush3.bf16.msra.mxu0 %v479_v6  ;;  %v488_v15 = vld [vmem:[%s637_s1 + $0x98] sm:$0xff]   ;;  %v492_v19 = vld [vmem:[%s637_s1 + $0xa0] sm:$0xff]   ;;  %v496_v23 = vld [vmem:[%s637_s1 + $0xa8] sm:$0xff]  }
   0x9   :  { %454 = vmatpush3.bf16.msra.mxu1 %v480_v7  ;;  %433 = vmatprep.subr.bf16.mxu0 %v481_v8  ;;  %v497_v24 = vld [vmem:[%s637_s1 + $0x70] sm:$0xff]   ;;  %v501_v28 = vld [vmem:[%s637_s1 + $0x78] sm:$0xff]   ;;  %v21_v32 = vld [vmem:[%s638_s0] sm:$0xff] }
   0xa   :  { %455 = vmatprep.subr.bf16.mxu1 %v482_v9  ;;  %v498_v25 = vld [vmem:[%s637_s1 + $0xf0] sm:$0xff]   ;;  %v502_v29 = vld [vmem:[%s637_s1 + $0xf8] sm:$0xff]   ;;  %v22_v33 = vld [vmem:[%s638_s0 + $0x8] sm:$0xff]  ;;  %v392_v34 = vcombine.low %v21_v32, %v21_v32  ;;  %v393_v35 = vcombine.high %v21_v32, %v21_v32 }
   0xb   :  { %v499_v26 = vld [vmem:[%s637_s1 + $0x30] sm:$0xff]   ;;  %v503_v30 = vld [vmem:[%s637_s1 + $0x38] sm:$0xff]   ;;  %v394_v36 = vcombine.low %v22_v33, %v22_v33  ;;  %v395_v37 = vcombine.high %v22_v33, %v22_v33  ;;  %v428_v46 = vld [vmem:[%s639_s2] ss:$0 sm:$0xff] }
   0xc   :  { %434 = vmatpush3.bf16.msra.mxu0 %v483_v10  ;;  %v500_v27 = vld [vmem:[%s637_s1 + $0xb0] sm:$0xff]   ;;  %v504_v31 = vld [vmem:[%s637_s1 + $0xb8] sm:$0xff]   ;;  %325 = vmatprep.mubr.bf16.mxu0 %v393_v35 }
   0xd   :  { %456 = vmatpush3.bf16.msra.mxu1 %v484_v11  ;;  %435 = vmatprep.subr.bf16.mxu0 %v485_v12 }
   0xe   :  { %457 = vmatprep.subr.bf16.mxu1 %v486_v13  ;;  %365 = vmatprep.mubr.bf16.mxu1 %v395_v37 }
  0x10   :  { %436 = vmatpush3.bf16.msra.mxu0 %v487_v14 }
  0x11   :  { %458 = vmatpush3.bf16.msra.mxu1 %v488_v15  ;;  %437 = vmatprep.subr.bf16.mxu0 %v489_v16 }
  0x12   :  { %459 = vmatprep.subr.bf16.mxu1 %v490_v17 }
  0x14   :  { %438 = vmatpush3.bf16.msra.mxu0 %v491_v18 }
  0x15   :  { %460 = vmatpush3.bf16.msra.mxu1 %v492_v19  ;;  %439 = vmatprep.subr.bf16.mxu0 %v493_v20 }
  0x16   :  { %461 = vmatprep.subr.bf16.mxu1 %v494_v21 }
  0x18   :  { %440 = vmatpush3.bf16.msra.mxu0 %v495_v22 }
  0x19   :  { %462 = vmatpush3.bf16.msra.mxu1 %v496_v23  ;;  %441 = vmatprep.subr.bf16.mxu0 %v497_v24 }
  0x1a   :  { %463 = vmatprep.subr.bf16.mxu1 %v498_v25 }
  0x1c   :  { %442 = vmatpush3.bf16.msra.mxu0 %v499_v26 }
  0x1d   :  { %464 = vmatpush3.bf16.msra.mxu1 %v500_v27  ;;  %443 = vmatprep.subr.bf16.mxu0 %v501_v28 }
  0x1e   :  { %465 = vmatprep.subr.bf16.mxu1 %v502_v29 }
  0x20   :  { %444 = vmatpush3.bf16.msra.mxu0 %v503_v30 }
  0x21   :  { %466 = vmatpush3.bf16.msra.mxu1 %v504_v31 }
  0x23   :  { %326 = vmatmul.mubr.bf16.vlgmr.msra.gmra.mrb[0].mxu0 %v392_v34 }
  0x24   :  { %366 = vmatmul.mubr.bf16.vlgmr.msra.gmra.mrb[0].mxu1 %v394_v36 }
  0xf6   :  { %v445_v38 = vpop.f32.mrb[0].mxu0 }
  0xf7   :  { %v467_v39 = vpop.f32.mrb[0].mxu1  ;;  %v446_v40 = vpop.f32.mrb[1].mxu0 }
  0xf8   :  { %v468_v41 = vpop.f32.mrb[1].mxu1  ;;  %v447_v42 = vadd.f32 %v446_v40, %v445_v38  ;;  %v448_v44 = vpop.f32.mrb[2].mxu0 }
  0xf9   :  { %v469_v43 = vadd.f32 %v468_v41, %v467_v39  ;;  %v470_v45 = vpop.f32.mrb[2].mxu1  ;;  %v449_v47 = vpop.f32.mrb[3].mxu0 }
  0xfa   :  { %v471_v48 = vpop.f32.mrb[3].mxu1 }
  0xfb   :  { %v368_v49 = vadd.f32 %v469_v43, %v447_v42 }
  0xfd   :  { %v386_v50 = vadd.f32 %v428_v46, %v368_v49 }
  0xff   :  { %387 = vst [vmem:[%s640_s3] sm:$0xff] %v386_v50 }

// kernel: xrd_classifier_forward.17
= control target key start
LH: loop header
LB: loop body
LE: loop exit
PB: predicated region body
PF: predicated region fallthrough
CT: control target
= control target key end

     0   :  { %s6846_s0 = inlined_call_operand.vmem [shape: bf16[8,4096], index: 0, kind: input, shape index: {}]   ;;  %s6847_s1 = inlined_call_operand.hbm [shape: bf16[4096,1024], index: 1, kind: input, shape index: {}]   ;;  %s6848_s2 = inlined_call_operand.hbm [shape: f32[1,1024], index: 2, kind: input, shape index: {}]   ;;  %s6849_s3 = inlined_call_operand.vmem [shape: f32[8,1024], index: 3, kind: output, shape index: {}]  }
   0x1   :  { %6855 = sst [smem:[#allocation10_spill]] %s6847_s1 }
   0x2   :  { %8 = vsyncpa [#allocation4], 0 }
   0x3   :  { %10 = vsyncpa [#allocation4 + $0x1], 0 }
   0x4   :  { %11 = vsyncpa [#allocation6], 0 }
   0x5   :  { %13 = vsyncpa [#allocation6 + $0x1], 0  ;;  %s5922_s12 = smov 0   ;;  %s5924_s13 = smov 0  }
   0x6   :  { %s5926_s14 = smov 0   ;;  %s5928_s15 = smov 0  }
   0x7   :  { %s5930_s16 = smov 0   ;;  %s5932_s17 = smov 0  }
   0x8   :  { %s5934_s18 = smov 0   ;;  %s5936_s19 = smov 0  }
   0x9   :  { %s5938_s20 = smov 0   ;;  %s5940_s21 = smov 0  }
   0xa   :  { %s5942_s22 = smov 0  }
   0xb LB: > { %s31_s23 = sadd.s32 1, %s5886_s20  ;;  %s75_s24 = sadd.s32 1, %s5874_s17  ;;  %s5894_s22 = sphi %s5942_s22, %s19_s22   ;;  %s5890_s21 = sphi %s5940_s21, %s6881_s21   ;;  %s5886_s20 = sphi %s5938_s20, %s6880_s20   ;;  %s5882_s19 = sphi %s5936_s19, %s6879_s19   ;;  %s5878_s18 = sphi %s5934_s18, %s6878_s18   ;;  %s5874_s17 = sphi %s5932_s17, %s6877_s17   ;;  %s5870_s16 = sphi %s5930_s16, %s6876_s16   ;;  %s5866_s15 = sphi %s5928_s15, %s6875_s15   ;;  %s5862_s14 = sphi %s5926_s14, %s6874_s14   ;;  %s5858_s13 = sphi %s5924_s13, %s6873_s13   ;;  %s5854_s12 = sphi %s5922_s12, %s6872_s12  }
   0xc   : > { %p5979_p0 = scmp.ge.s32.totalorder %s31_s23, 2  ;;  %p82_p1 = scmp.ne.s32.totalorder %s5874_s17, %s5870_s16 }
   0xd   : > { %p6851_p2 = scmp.eq.s32.totalorder %s5894_s22, 0  ;;  %p6850_p4 = scmp.lt.s32.totalorder %s5894_s22, 4 }
   0xe   : > { %s6883_s23 = smov (%p5979_p0, %s31_s23), 0  ;;  %s179_s27 = sand.u32 1, %s5874_s17  }
   0xf   : > { %p84_p3 = por %p6851_p2, %p82_p1  ;;  %s70_s26 = ssub.s32 %s5886_s20, %s6883_s23 }
  0x10   : > { %s4303_s28 = sshll.u32 %s179_s27, 12  ;;  %s4305_s29 = sshll.u32 %s5890_s21, 2 }
  0x11   : > { %s4850_s30 = sshll.u32 %s5886_s20, 11  ;;  %s183_s4 = scalar_lea.vmem [#allocation3], %s4303_s28 }
  0x12   : > { %s193_s5 = sshll.u32 %s183_s4, 4  ;;  %s190_s6 = sadd.s32 %s4850_s30, %s4305_s29  ;;  %s5998_s5 = int_to_ptr.vmem [resolvable:$true] %s193_s5 }
  0x13   : > { %s4307_s7 = sshll.u32 %s190_s6, 6  ;;  %p6002_p5 = pnand %p6850_p4, %p84_p3 }
  0x14   : > { %s6858_s1 = sld [smem:[#allocation10_spill]]  ;;  %s6012_s28 = scalar_lea.sflag [#allocation4], %s179_s27 }
  0x15   : > { %p5742_p8 = pneg %p6002_p5 }
  0x1a   : > { %s6009_s11 = scalar_lea.hbm %s6858_s1, %s4307_s7  ;;  %s5745_s6 = scalar_lea.hbm %s6858_s1, 262144 }
  0x1b   : > { %s5740_s29 = scalar_lea.hbm %s6009_s11, 65536  ;;  %p5746_p11 = scmp.lt.u32.totalorder %s6009_s11, %s6858_s1 }
  0x1c   : > { %p5741_p7 = scmp.ne.s32.totalorder %s6009_s11, %s5740_s29  ;;  %p5747_p12 = scmp.lt.u32.totalorder %s5745_s6, %s5740_s29 }
  0x1d   : > { %p5749_p1 = scmp.lt.u32.totalorder %s5740_s29, %s6009_s11 }
  0x1e   : > { %p5743_p9 = pnand %p5742_p8, %p5741_p7  ;;  %p5748_p13 = por %p5747_p12, %p5746_p11 }
  0x20   : > { %p5744_p10 = pneg %p5743_p9  ;;  %p5750_p3 = por %p5749_p1, %p5748_p13 }
  0x22   : > { %p5751_p4 = pnand %p5750_p3, %p5744_p10 }
  0x24   : > { %5754 = shalt.err (!%p5751_p4)
}
  0x25   : > { %s5755_s27 = scalar_lea.vmem %s5998_s5, 65536  ;;  %s5896_s10 = smov [#allocation3]  }
  0x26   : > { %p5756_p7 = scmp.ne.s32.totalorder %s5998_s5, %s5755_s27  ;;  %s5760_s30 = sshll.u32 %s5896_s10, 4  ;;  %s5761_s30 = int_to_ptr.vmem [resolvable:$false] %s5760_s30 }
  0x27   : > { %s5762_s4 = scalar_lea.vmem %s5761_s30, 131072  ;;  %p5763_p6 = scmp.lt.s32.totalorder %s5998_s5, %s5761_s30 }
  0x28   : > { %p5758_p9 = pnand %p5756_p7, %p5742_p8  ;;  %p5764_p11 = scmp.lt.s32.totalorder %s5762_s4, %s5755_s27 }
  0x2a   : > { %p5759_p2 = pneg %p5758_p9  ;;  %p5765_p12 = por %p5764_p11, %p5763_p6 }
  0x2c   : > { %p5766_p13 = pnand %p5765_p12, %p5759_p2 }
  0x2e   : > { %5769 = shalt.err (!%p5766_p13)
}
  0x2f   : > { %s5897_s29 = smov 512   ;;  %s5898_s6 = smov 256  }
  0x30   : > { %s5899_s7 = smov 16   ;;  %p220_p2 = scmp.lt.s32.totalorder %s5894_s22, 5 }
  0x31   : > { %4859 = dma.hbm_to_vmem [thread:$0]  (!%p6002_p5), %s6009_s11, 65536, %s5998_s5, %s6012_s28, %s5897_s29, %s5898_s6, %s5899_s7  }
  0x32   : > { %p6859_p4 = scmp.ge.s32.totalorder %s5894_s22, 1  ;;  %s4299_s27 = sadd.s32 4294967295, %s5894_s22  }
  0x33   : > { %s34_s10 = sadd.s32 1, %s5890_s21  ;;  %p88_p8 = scmp.ne.s32.totalorder %s5870_s16, %s5866_s15 }
  0x34   : > { %p6043_p6 = pnand %p6859_p4, %p220_p2  ;;  %s6885_s10 = smov (!%p5979_p0, %s34_s10), %s5890_s21 }
  0x35   : > { %p6054_p10 = scmp.eq.s32.totalorder %s4299_s27, 0  ;;  %p36_p5 = scmp.ge.s32.totalorder %s6885_s10, 2 }
  0x36   : > { %s101_s5 = sadd.s32 1, %s5862_s14  ;;  %p108_p3 = scmp.ne.s32.totalorder %s5862_s14, %s5858_s13 }
  0x37   : > { %p6061_p1 = por %p6054_p10, %p88_p8  ;;  %s6887_s10 = smov (%p36_p5, %s6885_s10), 0 }
  0x38   : > { %6863 = sst [smem:[#allocation9_spill]] %s6887_s10  ;;  %p6864_p0 = scmp.eq.s32.totalorder %s5894_s22, 0 }
  0x39   : > { %s6862_s11 = scalar_select %p6061_p1, 1, 0 }
  0x3a   : > { %p6071_p7 = por %p108_p3, %p6864_p0  ;;  %p114_p9 = scmp.ne.s32.totalorder %s5858_s13, %s5854_s12 }
  0x3b   : > { %s71_s25 = ssub.s32 %s5890_s21, %s6887_s10  ;;  %s203_s28 = sand.u32 1, %s5862_s14  }
  0x3c   : > { %s72_s30 = sor.u32 %s71_s25, %s70_s26  ;;  %p99_p11 = scmp.eq.s32.totalorder %s71_s25, 0 }
  0x3d   : > { %p73_p12 = scmp.eq.s32.totalorder %s72_s30, 0  ;;  %p6085_p13 = por %p114_p9, %p6054_p10 }
  0x3e   : > { %s6090_s29 = scalar_select %p99_p11, %s5862_s14, %s101_s5  }
  0x3f   : > { %s6866_s4 = scalar_select %p6085_p13, 1, 0 }
  0x40   : > { %s6095_s6 = scalar_select %p73_p12, %s5874_s17, %s75_s24  }
  0x41   : > { %s4308_s7 = sshll.u32 %s203_s28, 2  ;;  %s4851_s27 = sshll.u32 %s5890_s21, 6 }
  0x42   : > { %s6101_s10 = scalar_lea.hbm %s6848_s2, %s4851_s27  ;;  %s207_s26 = scalar_lea.vmem [#allocation5], %s4308_s7 }
  0x43   : > { %s215_s8 = sshll.u32 %s207_s26, 4  ;;  %p6867_p2 = scmp.lt.s32.totalorder %s5894_s22, 4  ;;  %s6103_s8 = int_to_ptr.vmem [resolvable:$true] %s215_s8 }
  0x44   : > { %s204_s5 = scalar_lea.sflag [#allocation6], %s203_s28  ;;  %s5770_s1 = scalar_lea.hbm %s6101_s10, 64 }
  0x45   : > { %p6109_p4 = pnand %p6867_p2, %p6071_p7  ;;  %p5771_p8 = scmp.ne.s32.totalorder %s6101_s10, %s5770_s1 }
  0x46   : > { %s5775_s15 = scalar_lea.hbm %s6848_s2, 128  ;;  %p5776_p0 = scmp.lt.u32.totalorder %s6101_s10, %s6848_s2 }
  0x47   : > { %p5772_p10 = pneg %p6109_p4  ;;  %p5777_p7 = scmp.lt.u32.totalorder %s5775_s15, %s5770_s1 }
  0x48   : > { %p5779_p11 = scmp.lt.u32.totalorder %s5770_s1, %s6101_s10 }
  0x49   : > { %p5773_p5 = pnand %p5772_p10, %p5771_p8  ;;  %p5778_p9 = por %p5777_p7, %p5776_p0 }
  0x4b   : > { %p5774_p3 = pneg %p5773_p5  ;;  %p5780_p12 = por %p5779_p11, %p5778_p9 }
  0x4d   : > { %p5781_p2 = pnand %p5780_p12, %p5774_p3 }
  0x4f   : > { %5784 = shalt.err (!%p5781_p2)
}
  0x50   : > { %s5785_s28 = scalar_lea.vmem %s6103_s8, 64  ;;  %s5900_s12 = smov [#allocation5]  }
  0x51   : > { %p5786_p8 = scmp.ne.s32.totalorder %s6103_s8, %s5785_s28  ;;  %s5790_s26 = sshll.u32 %s5900_s12, 4  ;;  %s5791_s26 = int_to_ptr.vmem [resolvable:$false] %s5790_s26 }
  0x52   : > { %s5792_s25 = scalar_lea.vmem %s5791_s26, 128  ;;  %p5793_p1 = scmp.lt.s32.totalorder %s6103_s8, %s5791_s26 }
  0x53   : > { %p5788_p5 = pnand %p5786_p8, %p5772_p10  ;;  %p5794_p0 = scmp.lt.s32.totalorder %s5792_s25, %s5785_s28 }
  0x55   : > { %p5789_p13 = pneg %p5788_p5  ;;  %p5795_p7 = por %p5794_p0, %p5793_p1 }
  0x57   : > { %p5796_p9 = pnand %p5795_p7, %p5789_p13 }
  0x59   : > { %5799 = shalt.err (!%p5796_p9)
}
  0x5a   : > { %4862 = dma.hbm_to_vmem [thread:$0]  (!%p6109_p4), %s6101_s10, 64, %s6103_s8, %s204_s5  }
  0x5b   : > { %224 = sbr.rel (%p6043_p6) target bundleno = 861 (0x35d), region = 32  ;;  %s226_s1 = sand.u32 (!%p6043_p6), 1, %s5870_s16  }
  0x5c   : > { %s4312_s30 = sshll.u32 (!%p6043_p6), %s226_s1, 12  ;;  %s227_s15 = scalar_lea.sflag (!%p6043_p6), [#allocation4], %s226_s1 }
  0x5d   : > { %s6141_s7 = scalar_lea.vmem (!%p6043_p6), [#allocation3], %s4312_s30  ;;  %p6869_p10 = scmp.ne.s32.totalorder (!%p6043_p6), %s6862_s11, 0 }
  0x62   : > { %5845 = dma.done.wait (%p6869_p10), %s227_s15, 65536  }
  0x63   : > { %5847 = vsyncadd (%p6869_p10), %s227_s15, 4294901760  ;;  %s235_s24 = sand.u32 1, %s5858_s13   ;;  %p6870_p6 = scmp.ne.s32.totalorder %s6866_s4, 0 }
  0x64   : > { %s6148_s27 = sshll.u32 %s235_s24, 2  ;;  %s236_s9 = scalar_lea.sflag [#allocation6], %s235_s24 }
  0x65   : > { %s239_s10 = scalar_lea.vmem [#allocation5], %s6148_s27 }
  0x66   : > { %5849 = dma.done.wait (%p6870_p6), %s236_s9, 64  }
  0x67   : > { %5851 = vsyncadd (%p6870_p6), %s236_s9, 4294967232  ;;  %s4314_s8 = sshll.u32 %s5878_s18, 4  ;;  %s4316_s5 = sshll.u32 %s5882_s19, 2 }
  0x68   : > { %p283_p1 = scmp.lt.s32.totalorder %s4314_s8, 31  ;;  %p296_p13 = scmp.lt.s32.totalorder %s4316_s5, 7 }
  0x69   : > { %p4318_p4 = scmp.ne.s32.totalorder %s5878_s18, 0 }
  0x6a   : > { %s6889_s8 = smov (!%p283_p1, %s4314_s8), 31  ;;  %s6891_s5 = smov (!%p296_p13, %s4316_s5), 7 }
  0x6b   : > { %s4315_s11 = sshll.u32 %s6889_s8, 2  ;;  %s4317_s25 = sshll.u32 %s6891_s5, 3  ;;  %v5901_v0 = vmov (!%p4318_p4), 0.0  }
  0x6c   : > { %s6160_s26 = scalar_lea.vmem %s6846_s0, %s4315_s11  ;;  %s6165_s4 = scalar_lea.vmem %s6849_s3, %s4317_s25  ;;  %307 = vst [vmem:[#allocation2] sm:$0xff] (!%p4318_p4), %v5901_v0  ;;  %308 = vst [vmem:[#allocation2 + $0x8] sm:$0xff] (!%p4318_p4), %v5901_v0 }
  0x6d   : > { %306 = sbr.rel (%p4318_p4) target bundleno = 116 (0x74), region = 44  ;;  %309 = vst [vmem:[#allocation2 + $0x10] sm:$0xff] (!%p4318_p4), %v5901_v0  ;;  %310 = vst [vmem:[#allocation2 + $0x18] sm:$0xff] (!%p4318_p4), %v5901_v0 }
  0x74 PF: > { %v4956_v1 = vld [vmem:[%s6141_s7 + $0x4] ss:$16 sps:$4 sm:$0xff]   ;;  %v4960_v3 = vld [vmem:[%s6141_s7] ss:$16 sps:$4 sm:$0xff]   ;;  %v316_v49 = vld [vmem:[%s6160_s26 + $0x8] sm:$0xff]  ;;  %p4847_p3 = scmp.ne.s32.totalorder %s5878_s18, 1 }
  0x75   : > { %v4958_v2 = vld [vmem:[%s6141_s7 + $0x204] ss:$16 sps:$4 sm:$0xff]   ;;  %3451 = vmatprep.subr.bf16.mxu0 %v4956_v1  ;;  %v4961_v4 = vld [vmem:[%s6141_s7 + $0x200] ss:$16 sps:$4 sm:$0xff]   ;;  %v6220_v52 = vcombine.high %v316_v49, %v316_v49 }
  0x76   : > { %3492 = vmatprep.subr.bf16.mxu1 %v4958_v2  ;;  %v4962_v5 = vld [vmem:[%s6141_s7 + $0x24] ss:$16 sps:$4 sm:$0xff]   ;;  %3452 = vmatpush1.bf16.msra.mxu0 %v4960_v3  ;;  %v4966_v7 = vld [vmem:[%s6141_s7 + $0x20] ss:$16 sps:$4 sm:$0xff]  }
  0x77   : > { %3493 = vmatpush1.bf16.msra.mxu1 %v4961_v4  ;;  %v4964_v6 = vld [vmem:[%s6141_s7 + $0x224] ss:$16 sps:$4 sm:$0xff]   ;;  %3453 = vmatprep.subr.bf16.mxu0 %v4962_v5  ;;  %v4967_v8 = vld [vmem:[%s6141_s7 + $0x220] ss:$16 sps:$4 sm:$0xff]  }
  0x78   : > { %3494 = vmatprep.subr.bf16.mxu1 %v4964_v6  ;;  %v4968_v9 = vld [vmem:[%s6141_s7 + $0x44] ss:$16 sps:$4 sm:$0xff]   ;;  %v4972_v11 = vld [vmem:[%s6141_s7 + $0x40] ss:$16 sps:$4 sm:$0xff]   ;;  %3524 = vmatprep.mubr.bf16.mxu1 %v6220_v52 }
  0x79   : > { %v4970_v10 = vld [vmem:[%s6141_s7 + $0x244] ss:$16 sps:$4 sm:$0xff]   ;;  %v4973_v12 = vld [vmem:[%s6141_s7 + $0x240] ss:$16 sps:$4 sm:$0xff]  }
  0x7a   : > { %3454 = vmatpush1.bf16.msra.mxu0 %v4966_v7  ;;  %v4974_v13 = vld [vmem:[%s6141_s7 + $0x64] ss:$16 sps:$4 sm:$0xff]   ;;  %v4978_v15 = vld [vmem:[%s6141_s7 + $0x60] ss:$16 sps:$4 sm:$0xff]  }
  0x7b   : > { %3495 = vmatpush1.bf16.msra.mxu1 %v4967_v8  ;;  %3455 = vmatprep.subr.bf16.mxu0 %v4968_v9  ;;  %v4976_v14 = vld [vmem:[%s6141_s7 + $0x264] ss:$16 sps:$4 sm:$0xff]   ;;  %v4979_v16 = vld [vmem:[%s6141_s7 + $0x260] ss:$16 sps:$4 sm:$0xff]   ;;  %v6244_v8 = vcombine.low %v316_v49, %v316_v49 }
  0x7c   : > { %3496 = vmatprep.subr.bf16.mxu1 %v4970_v10  ;;  %v4980_v17 = vld [vmem:[%s6141_s7 + $0x84] ss:$16 sps:$4 sm:$0xff]   ;;  %v4984_v19 = vld [vmem:[%s6141_s7 + $0x80] ss:$16 sps:$4 sm:$0xff]  }
  0x7d   : > { %v4982_v18 = vld [vmem:[%s6141_s7 + $0x284] ss:$16 sps:$4 sm:$0xff]   ;;  %v4985_v20 = vld [vmem:[%s6141_s7 + $0x280] ss:$16 sps:$4 sm:$0xff]  }
  0x7e   : > { %3456 = vmatpush1.bf16.msra.mxu0 %v4972_v11  ;;  %v4986_v21 = vld [vmem:[%s6141_s7 + $0xa4] ss:$16 sps:$4 sm:$0xff]   ;;  %v4990_v23 = vld [vmem:[%s6141_s7 + $0xa0] ss:$16 sps:$4 sm:$0xff]  }
  0x7f   : > { %3497 = vmatpush1.bf16.msra.mxu1 %v4973_v12  ;;  %3457 = vmatprep.subr.bf16.mxu0 %v4974_v13  ;;  %v4988_v22 = vld [vmem:[%s6141_s7 + $0x2a4] ss:$16 sps:$4 sm:$0xff]   ;;  %v4991_v24 = vld [vmem:[%s6141_s7 + $0x2a0] ss:$16 sps:$4 sm:$0xff]  }
  0x80   : > { %3498 = vmatprep.subr.bf16.mxu1 %v4976_v14  ;;  %v4992_v25 = vld [vmem:[%s6141_s7 + $0xc4] ss:$16 sps:$4 sm:$0xff]   ;;  %v4996_v27 = vld [vmem:[%s6141_s7 + $0xc0] ss:$16 sps:$4 sm:$0xff]  }
  0x81   : > { %v4994_v26 = vld [vmem:[%s6141_s7 + $0x2c4] ss:$16 sps:$4 sm:$0xff]   ;;  %v4997_v28 = vld [vmem:[%s6141_s7 + $0x2c0] ss:$16 sps:$4 sm:$0xff]  }
  0x82   : > { %3458 = vmatpush1.bf16.msra.mxu0 %v4978_v15  ;;  %v4998_v29 = vld [vmem:[%s6141_s7 + $0xe4] ss:$16 sps:$4 sm:$0xff]   ;;  %v5002_v31 = vld [vmem:[%s6141_s7 + $0xe0] ss:$16 sps:$4 sm:$0xff]  }
  0x83   : > { %3499 = vmatpush1.bf16.msra.mxu1 %v4979_v16  ;;  %3459 = vmatprep.subr.bf16.mxu0 %v4980_v17  ;;  %v5000_v30 = vld [vmem:[%s6141_s7 + $0x2e4] ss:$16 sps:$4 sm:$0xff]   ;;  %v5003_v32 = vld [vmem:[%s6141_s7 + $0x2e0] ss:$16 sps:$4 sm:$0xff]  }
  0x84   : > { %3500 = vmatprep.subr.bf16.mxu1 %v4982_v18  ;;  %v5004_v33 = vld [vmem:[%s6141_s7 + $0x104] ss:$16 sps:$4 sm:$0xff]   ;;  %v5008_v35 = vld [vmem:[%s6141_s7 + $0x100] ss:$16 sps:$4 sm:$0xff]  }
  0x85   : > { %v5006_v34 = vld [vmem:[%s6141_s7 + $0x304] ss:$16 sps:$4 sm:$0xff]   ;;  %v5009_v36 = vld [vmem:[%s6141_s7 + $0x300] ss:$16 sps:$4 sm:$0xff]  }
  0x86   : > { %3460 = vmatpush1.bf16.msra.mxu0 %v4984_v19  ;;  %v5010_v37 = vld [vmem:[%s6141_s7 + $0x124] ss:$16 sps:$4 sm:$0xff]   ;;  %v5014_v39 = vld [vmem:[%s6141_s7 + $0x120] ss:$16 sps:$4 sm:$0xff]  }
  0x87   : > { %3501 = vmatpush1.bf16.msra.mxu1 %v4985_v20  ;;  %3461 = vmatprep.subr.bf16.mxu0 %v4986_v21  ;;  %v5012_v38 = vld [vmem:[%s6141_s7 + $0x324] ss:$16 sps:$4 sm:$0xff]   ;;  %v5015_v40 = vld [vmem:[%s6141_s7 + $0x320] ss:$16 sps:$4 sm:$0xff]  }
  0x88   : > { %3502 = vmatprep.subr.bf16.mxu1 %v4988_v22  ;;  %v5016_v41 = vld [vmem:[%s6141_s7 + $0x144] ss:$16 sps:$4 sm:$0xff]   ;;  %v5020_v43 = vld [vmem:[%s6141_s7 + $0x140] ss:$16 sps:$4 sm:$0xff]  }
  0x89   : > { %v5018_v42 = vld [vmem:[%s6141_s7 + $0x344] ss:$16 sps:$4 sm:$0xff]   ;;  %v5021_v44 = vld [vmem:[%s6141_s7 + $0x340] ss:$16 sps:$4 sm:$0xff]  }
  0x8a   : > { %3462 = vmatpush1.bf16.msra.mxu0 %v4990_v23  ;;  %v5022_v45 = vld [vmem:[%s6141_s7 + $0x164] ss:$16 sps:$4 sm:$0xff]   ;;  %v5026_v50 = vld [vmem:[%s6141_s7 + $0x160] ss:$16 sps:$4 sm:$0xff]  }
  0x8b   : > { %3503 = vmatpush1.bf16.msra.mxu1 %v4991_v24  ;;  %3463 = vmatprep.subr.bf16.mxu0 %v4992_v25  ;;  %v5024_v46 = vld [vmem:[%s6141_s7 + $0x364] ss:$16 sps:$4 sm:$0xff]   ;;  %v5027_v51 = vld [vmem:[%s6141_s7 + $0x360] ss:$16 sps:$4 sm:$0xff]  }
  0x8c   : > { %3504 = vmatprep.subr.bf16.mxu1 %v4994_v26  ;;  %v315_v47 = vld [vmem:[%s6160_s26] sm:$0xff] }
  0x8d   : > { %v6215_v48 = vcombine.high %v315_v47, %v315_v47  ;;  %v5028_v53 = vld [vmem:[%s6141_s7 + $0x184] ss:$16 sps:$4 sm:$0xff]   ;;  %v5032_v55 = vld [vmem:[%s6141_s7 + $0x180] ss:$16 sps:$4 sm:$0xff]   ;;  %v6242_v7 = vcombine.low %v315_v47, %v315_v47 }
  0x8e   : > { %3464 = vmatpush1.bf16.msra.mxu0 %v4996_v27  ;;  %v5030_v54 = vld [vmem:[%s6141_s7 + $0x384] ss:$16 sps:$4 sm:$0xff]   ;;  %v5033_v56 = vld [vmem:[%s6141_s7 + $0x380] ss:$16 sps:$4 sm:$0xff]  }
  0x8f   : > { %3505 = vmatpush1.bf16.msra.mxu1 %v4997_v28  ;;  %3465 = vmatprep.subr.bf16.mxu0 %v4998_v29  ;;  %v5034_v57 = vld [vmem:[%s6141_s7 + $0x1a4] ss:$16 sps:$4 sm:$0xff]   ;;  %v5038_v59 = vld [vmem:[%s6141_s7 + $0x1a0] ss:$16 sps:$4 sm:$0xff]  }
  0x90   : > { %3506 = vmatprep.subr.bf16.mxu1 %v5000_v30  ;;  %3483 = vmatprep.mubr.bf16.mxu0 %v6215_v48  ;;  %v5036_v58 = vld [vmem:[%s6141_s7 + $0x3a4] ss:$16 sps:$4 sm:$0xff]   ;;  %v5039_v60 = vld [vmem:[%s6141_s7 + $0x3a0] ss:$16 sps:$4 sm:$0xff]  }
  0x91   : > { %v5040_v61 = vld [vmem:[%s6141_s7 + $0x1c4] ss:$16 sps:$4 sm:$0xff]   ;;  %v5044_v63 = vld [vmem:[%s6141_s7 + $0x1c0] ss:$16 sps:$4 sm:$0xff]  }
  0x92   : > { %3466 = vmatpush1.bf16.msra.mxu0 %v5002_v31  ;;  %v5042_v62 = vld [vmem:[%s6141_s7 + $0x3c4] ss:$16 sps:$4 sm:$0xff]   ;;  %v5045_v0 = vld [vmem:[%s6141_s7 + $0x3c0] ss:$16 sps:$4 sm:$0xff]  }
  0x93   : > { %3507 = vmatpush1.bf16.msra.mxu1 %v5003_v32  ;;  %3467 = vmatprep.subr.bf16.mxu0 %v5004_v33  ;;  %v5046_v1 = vld [vmem:[%s6141_s7 + $0x1e4] ss:$16 sps:$4 sm:$0xff]   ;;  %v5050_v3 = vld [vmem:[%s6141_s7 + $0x1e0] ss:$16 sps:$4 sm:$0xff]  }
  0x94   : > { %3508 = vmatprep.subr.bf16.mxu1 %v5006_v34  ;;  %v5048_v2 = vld [vmem:[%s6141_s7 + $0x3e4] ss:$16 sps:$4 sm:$0xff]   ;;  %v5051_v4 = vld [vmem:[%s6141_s7 + $0x3e0] ss:$16 sps:$4 sm:$0xff]   ;;  %v6276_v34 = vld [vmem:[%s6160_s26 + $0x18] sm:$0xff] }
  0x95   : > { %v5058_v5 = vld [vmem:[%s6141_s7 + $0x404] ss:$16 sps:$4 sm:$0xff]   ;;  %v5056_v9 = vld [vmem:[%s6141_s7 + $0x400] ss:$16 sps:$4 sm:$0xff]  }
  0x96   : > { %3468 = vmatpush1.bf16.msra.mxu0 %v5008_v35  ;;  %v5061_v6 = vld [vmem:[%s6141_s7 + $0x604] ss:$16 sps:$4 sm:$0xff]   ;;  %v5059_v10 = vld [vmem:[%s6141_s7 + $0x600] ss:$16 sps:$4 sm:$0xff]  }
  0x97   : > { %3509 = vmatpush1.bf16.msra.mxu1 %v5009_v36  ;;  %3469 = vmatprep.subr.bf16.mxu0 %v5010_v37  ;;  %v5064_v11 = vld [vmem:[%s6141_s7 + $0x424] ss:$16 sps:$4 sm:$0xff]   ;;  %v5062_v13 = vld [vmem:[%s6141_s7 + $0x420] ss:$16 sps:$4 sm:$0xff]  }
  0x98   : > { %3510 = vmatprep.subr.bf16.mxu1 %v5012_v38  ;;  %v5067_v12 = vld [vmem:[%s6141_s7 + $0x624] ss:$16 sps:$4 sm:$0xff]   ;;  %v5065_v14 = vld [vmem:[%s6141_s7 + $0x620] ss:$16 sps:$4 sm:$0xff]   ;;  %v6286_v38 = vcombine.high %v6276_v34, %v6276_v34 }
  0x99   : > { %v5070_v15 = vld [vmem:[%s6141_s7 + $0x444] ss:$16 sps:$4 sm:$0xff]   ;;  %v5068_v17 = vld [vmem:[%s6141_s7 + $0x440] ss:$16 sps:$4 sm:$0xff]  }
  0x9a   : > { %3470 = vmatpush1.bf16.msra.mxu0 %v5014_v39  ;;  %v5073_v16 = vld [vmem:[%s6141_s7 + $0x644] ss:$16 sps:$4 sm:$0xff]   ;;  %v5071_v18 = vld [vmem:[%s6141_s7 + $0x640] ss:$16 sps:$4 sm:$0xff]  }
  0x9b   : > { %3511 = vmatpush1.bf16.msra.mxu1 %v5015_v40  ;;  %3471 = vmatprep.subr.bf16.mxu0 %v5016_v41  ;;  %v5076_v19 = vld [vmem:[%s6141_s7 + $0x464] ss:$16 sps:$4 sm:$0xff]   ;;  %v5074_v21 = vld [vmem:[%s6141_s7 + $0x460] ss:$16 sps:$4 sm:$0xff]  }
  0x9c   : > { %3512 = vmatprep.subr.bf16.mxu1 %v5018_v42  ;;  %v5079_v20 = vld [vmem:[%s6141_s7 + $0x664] ss:$16 sps:$4 sm:$0xff]   ;;  %v5077_v22 = vld [vmem:[%s6141_s7 + $0x660] ss:$16 sps:$4 sm:$0xff]  }
  0x9d   : > { %v5082_v23 = vld [vmem:[%s6141_s7 + $0x484] ss:$16 sps:$4 sm:$0xff]   ;;  %v5080_v25 = vld [vmem:[%s6141_s7 + $0x480] ss:$16 sps:$4 sm:$0xff]  }
  0x9e   : > { %3472 = vmatpush1.bf16.msra.mxu0 %v5020_v43  ;;  %v5085_v24 = vld [vmem:[%s6141_s7 + $0x684] ss:$16 sps:$4 sm:$0xff]   ;;  %v5083_v26 = vld [vmem:[%s6141_s7 + $0x680] ss:$16 sps:$4 sm:$0xff]  }
  0x9f   : > { %3513 = vmatpush1.bf16.msra.mxu1 %v5021_v44  ;;  %3473 = vmatprep.subr.bf16.mxu0 %v5022_v45  ;;  %v5088_v27 = vld [vmem:[%s6141_s7 + $0x4a4] ss:$16 sps:$4 sm:$0xff]   ;;  %v5086_v29 = vld [vmem:[%s6141_s7 + $0x4a0] ss:$16 sps:$4 sm:$0xff]  }
  0xa0   : > { %3514 = vmatprep.subr.bf16.mxu1 %v5024_v46  ;;  %v5091_v28 = vld [vmem:[%s6141_s7 + $0x6a4] ss:$16 sps:$4 sm:$0xff]   ;;  %v5089_v30 = vld [vmem:[%s6141_s7 + $0x6a0] ss:$16 sps:$4 sm:$0xff]  }
  0xa1   : > { %v5094_v31 = vld [vmem:[%s6141_s7 + $0x4c4] ss:$16 sps:$4 sm:$0xff]   ;;  %v5092_v35 = vld [vmem:[%s6141_s7 + $0x4c0] ss:$16 sps:$4 sm:$0xff]  }
  0xa2   : > { %3474 = vmatpush1.bf16.msra.mxu0 %v5026_v50  ;;  %v5097_v32 = vld [vmem:[%s6141_s7 + $0x6c4] ss:$16 sps:$4 sm:$0xff]   ;;  %v5095_v36 = vld [vmem:[%s6141_s7 + $0x6c0] ss:$16 sps:$4 sm:$0xff]  }
  0xa3   : > { %3515 = vmatpush1.bf16.msra.mxu1 %v5027_v51  ;;  %3475 = vmatprep.subr.bf16.mxu0 %v5028_v53  ;;  %v6273_v33 = vld [vmem:[%s6160_s26 + $0x10] sm:$0xff] }
  0xa4   : > { %3516 = vmatprep.subr.bf16.mxu1 %v5030_v54  ;;  %v6282_v37 = vcombine.high %v6273_v33, %v6273_v33  ;;  %v5100_v39 = vld [vmem:[%s6141_s7 + $0x4e4] ss:$16 sps:$4 sm:$0xff]   ;;  %v5098_v41 = vld [vmem:[%s6141_s7 + $0x4e0] ss:$16 sps:$4 sm:$0xff]  }
  0xa5   : > { %v5103_v40 = vld [vmem:[%s6141_s7 + $0x6e4] ss:$16 sps:$4 sm:$0xff]   ;;  %v5101_v42 = vld [vmem:[%s6141_s7 + $0x6e0] ss:$16 sps:$4 sm:$0xff]  }
  0xa6   : > { %3476 = vmatpush1.bf16.msra.mxu0 %v5032_v55  ;;  %v5106_v43 = vld [vmem:[%s6141_s7 + $0x504] ss:$16 sps:$4 sm:$0xff]   ;;  %v5104_v45 = vld [vmem:[%s6141_s7 + $0x500] ss:$16 sps:$4 sm:$0xff]  }
  0xa7   : > { %3517 = vmatpush1.bf16.msra.mxu1 %v5033_v56  ;;  %3477 = vmatprep.subr.bf16.mxu0 %v5034_v57  ;;  %v5109_v44 = vld [vmem:[%s6141_s7 + $0x704] ss:$16 sps:$4 sm:$0xff]   ;;  %v5107_v46 = vld [vmem:[%s6141_s7 + $0x700] ss:$16 sps:$4 sm:$0xff]  }
  0xa8   : > { %3518 = vmatprep.subr.bf16.mxu1 %v5036_v58  ;;  %v5112_v47 = vld [vmem:[%s6141_s7 + $0x524] ss:$16 sps:$4 sm:$0xff]   ;;  %v5110_v50 = vld [vmem:[%s6141_s7 + $0x520] ss:$16 sps:$4 sm:$0xff]  }
  0xa9   : > { %v5115_v49 = vld [vmem:[%s6141_s7 + $0x724] ss:$16 sps:$4 sm:$0xff]   ;;  %v5113_v51 = vld [vmem:[%s6141_s7 + $0x720] ss:$16 sps:$4 sm:$0xff]  }
  0xaa   : > { %3478 = vmatpush1.bf16.msra.mxu0 %v5038_v59  ;;  %v5118_v53 = vld [vmem:[%s6141_s7 + $0x544] ss:$16 sps:$4 sm:$0xff]   ;;  %v5116_v55 = vld [vmem:[%s6141_s7 + $0x540] ss:$16 sps:$4 sm:$0xff]  }
  0xab   : > { %3519 = vmatpush1.bf16.msra.mxu1 %v5039_v60  ;;  %3479 = vmatprep.subr.bf16.mxu0 %v5040_v61  ;;  %v5121_v54 = vld [vmem:[%s6141_s7 + $0x744] ss:$16 sps:$4 sm:$0xff]   ;;  %v5119_v56 = vld [vmem:[%s6141_s7 + $0x740] ss:$16 sps:$4 sm:$0xff]  }
  0xac   : > { %3520 = vmatprep.subr.bf16.mxu1 %v5042_v62  ;;  %v5124_v57 = vld [vmem:[%s6141_s7 + $0x564] ss:$16 sps:$4 sm:$0xff]   ;;  %v5122_v59 = vld [vmem:[%s6141_s7 + $0x560] ss:$16 sps:$4 sm:$0xff]  }
  0xad   : > { %v5127_v58 = vld [vmem:[%s6141_s7 + $0x764] ss:$16 sps:$4 sm:$0xff]   ;;  %v5125_v60 = vld [vmem:[%s6141_s7 + $0x760] ss:$16 sps:$4 sm:$0xff]  }
  0xae   : > { %3480 = vmatpush1.bf16.msra.mxu0 %v5044_v63  ;;  %v5130_v61 = vld [vmem:[%s6141_s7 + $0x584] ss:$16 sps:$4 sm:$0xff]   ;;  %v5128_v63 = vld [vmem:[%s6141_s7 + $0x580] ss:$16 sps:$4 sm:$0xff]  }
  0xaf   : > { %3521 = vmatpush1.bf16.msra.mxu1 %v5045_v0  ;;  %3481 = vmatprep.subr.bf16.mxu0 %v5046_v1  ;;  %v5133_v62 = vld [vmem:[%s6141_s7 + $0x784] ss:$16 sps:$4 sm:$0xff]   ;;  %v5131_v0 = vld [vmem:[%s6141_s7 + $0x780] ss:$16 sps:$4 sm:$0xff]  }
  0xb0   : > { %3522 = vmatprep.subr.bf16.mxu1 %v5048_v2  ;;  %v5136_v1 = vld [vmem:[%s6141_s7 + $0x5a4] ss:$16 sps:$4 sm:$0xff]  }
  0xb1   : > { %v5139_v2 = vld [vmem:[%s6141_s7 + $0x7a4] ss:$16 sps:$4 sm:$0xff]  }
  0xb2   : > { %3482 = vmatpush1.bf16.msra.mxu0 %v5050_v3  ;;  %v5134_v3 = vld [vmem:[%s6141_s7 + $0x5a0] ss:$16 sps:$4 sm:$0xff]  }
  0xb3   : > { %3523 = vmatpush1.bf16.msra.mxu1 %v5051_v4  ;;  %3533 = vmatprep.subr.bf16.mxu0 %v5058_v5  ;;  %v5137_v4 = vld [vmem:[%s6141_s7 + $0x7a0] ss:$16 sps:$4 sm:$0xff]   ;;  %v5142_v5 = vld [vmem:[%s6141_s7 + $0x5c4] ss:$16 sps:$4 sm:$0xff]  }
  0xb4   : > { %3574 = vmatprep.subr.bf16.mxu1 %v5061_v6  ;;  %v5145_v6 = vld [vmem:[%s6141_s7 + $0x7c4] ss:$16 sps:$4 sm:$0xff]  }
  0xb5   : > { %3484 = vmatmul.mubr.bf16.vlgmr.msra.gmra.mrb[0].mxu0 %v6242_v7 }
  0xb6   : > { %3525 = vmatmul.mubr.bf16.vlgmr.msra.gmra.mrb[0].mxu1 %v6244_v8  ;;  %3534 = vmatpush1.bf16.msra.mxu0 %v5056_v9  ;;  %v5140_v9 = vld [vmem:[%s6141_s7 + $0x5c0] ss:$16 sps:$4 sm:$0xff]  }
  0xb7   : > { %3575 = vmatpush1.bf16.msra.mxu1 %v5059_v10  ;;  %3535 = vmatprep.subr.bf16.mxu0 %v5064_v11  ;;  %v5143_v10 = vld [vmem:[%s6141_s7 + $0x7c0] ss:$16 sps:$4 sm:$0xff]   ;;  %v5148_v11 = vld [vmem:[%s6141_s7 + $0x5e4] ss:$16 sps:$4 sm:$0xff]  }
  0xb8   : > { %3576 = vmatprep.subr.bf16.mxu1 %v5067_v12  ;;  %3565 = vmatprep.mubr.bf16.mxu0 %v6282_v37  ;;  %v5151_v12 = vld [vmem:[%s6141_s7 + $0x7e4] ss:$16 sps:$4 sm:$0xff]  }
  0xb9   : > { %3606 = vmatprep.mubr.bf16.mxu1 %v6286_v38 }
  0xba   : > { %3536 = vmatpush1.bf16.msra.mxu0 %v5062_v13  ;;  %v5146_v13 = vld [vmem:[%s6141_s7 + $0x5e0] ss:$16 sps:$4 sm:$0xff]  }
  0xbb   : > { %3577 = vmatpush1.bf16.msra.mxu1 %v5065_v14  ;;  %3537 = vmatprep.subr.bf16.mxu0 %v5070_v15  ;;  %v5149_v14 = vld [vmem:[%s6141_s7 + $0x7e0] ss:$16 sps:$4 sm:$0xff]   ;;  %v5158_v15 = vld [vmem:[%s6141_s7 + $0x804] ss:$16 sps:$4 sm:$0xff]  }
  0xbc   : > { %3578 = vmatprep.subr.bf16.mxu1 %v5073_v16  ;;  %v5161_v16 = vld [vmem:[%s6141_s7 + $0xa04] ss:$16 sps:$4 sm:$0xff]  }
  0xbe   : > { %3538 = vmatpush1.bf16.msra.mxu0 %v5068_v17  ;;  %v6330_v17 = vcombine.low %v6273_v33, %v6273_v33  ;;  %v5176_v33 = vld [vmem:[%s6141_s7 + $0x864] ss:$16 sps:$4 sm:$0xff]  }
  0xbf   : > { %3579 = vmatpush1.bf16.msra.mxu1 %v5071_v18  ;;  %3539 = vmatprep.subr.bf16.mxu0 %v5076_v19  ;;  %v6334_v18 = vcombine.low %v6276_v34, %v6276_v34  ;;  %v5156_v19 = vld [vmem:[%s6141_s7 + $0x800] ss:$16 sps:$4 sm:$0xff]   ;;  %v5179_v34 = vld [vmem:[%s6141_s7 + $0xa64] ss:$16 sps:$4 sm:$0xff]  }
  0xc0   : > { %3580 = vmatprep.subr.bf16.mxu1 %v5079_v20  ;;  %v5159_v20 = vld [vmem:[%s6141_s7 + $0xa00] ss:$16 sps:$4 sm:$0xff]  }
  0xc2   : > { %3540 = vmatpush1.bf16.msra.mxu0 %v5074_v21  ;;  %v5164_v21 = vld [vmem:[%s6141_s7 + $0x824] ss:$16 sps:$4 sm:$0xff]  }
  0xc3   : > { %3581 = vmatpush1.bf16.msra.mxu1 %v5077_v22  ;;  %3541 = vmatprep.subr.bf16.mxu0 %v5082_v23  ;;  %v5167_v22 = vld [vmem:[%s6141_s7 + $0xa24] ss:$16 sps:$4 sm:$0xff]  }
  0xc4   : > { %3582 = vmatprep.subr.bf16.mxu1 %v5085_v24  ;;  %v6341_v23 = vld [vmem:[%s6160_s26 + $0x20] sm:$0xff]  ;;  %v6344_v24 = vld [vmem:[%s6160_s26 + $0x28] sm:$0xff] }
  0xc6   : > { %3542 = vmatpush1.bf16.msra.mxu0 %v5080_v25  ;;  %v6348_v25 = vcombine.high %v6341_v23, %v6341_v23 }
  0xc7   : > { %3583 = vmatpush1.bf16.msra.mxu1 %v5083_v26  ;;  %3543 = vmatprep.subr.bf16.mxu0 %v5088_v27  ;;  %v6352_v26 = vcombine.high %v6344_v24, %v6344_v24  ;;  %v5162_v27 = vld [vmem:[%s6141_s7 + $0x820] ss:$16 sps:$4 sm:$0xff]  }
  0xc8   : > { %3584 = vmatprep.subr.bf16.mxu1 %v5091_v28  ;;  %v5165_v28 = vld [vmem:[%s6141_s7 + $0xa20] ss:$16 sps:$4 sm:$0xff]  }
  0xca   : > { %3544 = vmatpush1.bf16.msra.mxu0 %v5086_v29  ;;  %v5170_v29 = vld [vmem:[%s6141_s7 + $0x844] ss:$16 sps:$4 sm:$0xff]  }
  0xcb   : > { %3585 = vmatpush1.bf16.msra.mxu1 %v5089_v30  ;;  %3545 = vmatprep.subr.bf16.mxu0 %v5094_v31  ;;  %v5173_v30 = vld [vmem:[%s6141_s7 + $0xa44] ss:$16 sps:$4 sm:$0xff]   ;;  %v5168_v31 = vld [vmem:[%s6141_s7 + $0x840] ss:$16 sps:$4 sm:$0xff]  }
  0xcc   : > { %3586 = vmatprep.subr.bf16.mxu1 %v5097_v32  ;;  %v5171_v32 = vld [vmem:[%s6141_s7 + $0xa40] ss:$16 sps:$4 sm:$0xff]  }
  0xce   : > { %3546 = vmatpush1.bf16.msra.mxu0 %v5092_v35  ;;  %v5174_v35 = vld [vmem:[%s6141_s7 + $0x860] ss:$16 sps:$4 sm:$0xff]  }
  0xcf   : > { %3587 = vmatpush1.bf16.msra.mxu1 %v5095_v36  ;;  %3547 = vmatprep.subr.bf16.mxu0 %v5100_v39  ;;  %v5177_v36 = vld [vmem:[%s6141_s7 + $0xa60] ss:$16 sps:$4 sm:$0xff]   ;;  %v5182_v39 = vld [vmem:[%s6141_s7 + $0x884] ss:$16 sps:$4 sm:$0xff]  }
  0xd0   : > { %3588 = vmatprep.subr.bf16.mxu1 %v5103_v40  ;;  %v5185_v40 = vld [vmem:[%s6141_s7 + $0xa84] ss:$16 sps:$4 sm:$0xff]  }
  0xd2   : > { %3548 = vmatpush1.bf16.msra.mxu0 %v5098_v41  ;;  %v5180_v41 = vld [vmem:[%s6141_s7 + $0x880] ss:$16 sps:$4 sm:$0xff]  }
  0xd3   : > { %3589 = vmatpush1.bf16.msra.mxu1 %v5101_v42  ;;  %3549 = vmatprep.subr.bf16.mxu0 %v5106_v43  ;;  %v5183_v42 = vld [vmem:[%s6141_s7 + $0xa80] ss:$16 sps:$4 sm:$0xff]   ;;  %v5188_v43 = vld [vmem:[%s6141_s7 + $0x8a4] ss:$16 sps:$4 sm:$0xff]  }
  0xd4   : > { %3590 = vmatprep.subr.bf16.mxu1 %v5109_v44  ;;  %v5191_v44 = vld [vmem:[%s6141_s7 + $0xaa4] ss:$16 sps:$4 sm:$0xff]  }
  0xd6   : > { %3550 = vmatpush1.bf16.msra.mxu0 %v5104_v45  ;;  %v5186_v45 = vld [vmem:[%s6141_s7 + $0x8a0] ss:$16 sps:$4 sm:$0xff]  }
  0xd7   : > { %3591 = vmatpush1.bf16.msra.mxu1 %v5107_v46  ;;  %3551 = vmatprep.subr.bf16.mxu0 %v5112_v47  ;;  %v5189_v46 = vld [vmem:[%s6141_s7 + $0xaa0] ss:$16 sps:$4 sm:$0xff]   ;;  %v5194_v47 = vld [vmem:[%s6141_s7 + $0x8c4] ss:$16 sps:$4 sm:$0xff]  }
  0xd8   : > { %3592 = vmatprep.subr.bf16.mxu1 %v5115_v49  ;;  %v5197_v49 = vld [vmem:[%s6141_s7 + $0xac4] ss:$16 sps:$4 sm:$0xff]  }
  0xda   : > { %3552 = vmatpush1.bf16.msra.mxu0 %v5110_v50  ;;  %v5192_v50 = vld [vmem:[%s6141_s7 + $0x8c0] ss:$16 sps:$4 sm:$0xff]  }
  0xdb   : > { %3593 = vmatpush1.bf16.msra.mxu1 %v5113_v51  ;;  %3553 = vmatprep.subr.bf16.mxu0 %v5118_v53  ;;  %v5195_v51 = vld [vmem:[%s6141_s7 + $0xac0] ss:$16 sps:$4 sm:$0xff]   ;;  %v5200_v53 = vld [vmem:[%s6141_s7 + $0x8e4] ss:$16 sps:$4 sm:$0xff]  }
  0xdc   : > { %3594 = vmatprep.subr.bf16.mxu1 %v5121_v54  ;;  %v5203_v54 = vld [vmem:[%s6141_s7 + $0xae4] ss:$16 sps:$4 sm:$0xff]  }
  0xde   : > { %3554 = vmatpush1.bf16.msra.mxu0 %v5116_v55  ;;  %v5198_v55 = vld [vmem:[%s6141_s7 + $0x8e0] ss:$16 sps:$4 sm:$0xff]  }
  0xdf   : > { %3595 = vmatpush1.bf16.msra.mxu1 %v5119_v56  ;;  %3555 = vmatprep.subr.bf16.mxu0 %v5124_v57  ;;  %v5201_v56 = vld [vmem:[%s6141_s7 + $0xae0] ss:$16 sps:$4 sm:$0xff]   ;;  %v5206_v57 = vld [vmem:[%s6141_s7 + $0x904] ss:$16 sps:$4 sm:$0xff]  }
  0xe0   : > { %3596 = vmatprep.subr.bf16.mxu1 %v5127_v58  ;;  %v5209_v58 = vld [vmem:[%s6141_s7 + $0xb04] ss:$16 sps:$4 sm:$0xff]  }
  0xe2   : > { %3556 = vmatpush1.bf16.msra.mxu0 %v5122_v59  ;;  %v5204_v59 = vld [vmem:[%s6141_s7 + $0x900] ss:$16 sps:$4 sm:$0xff]  }
  0xe3   : > { %3597 = vmatpush1.bf16.msra.mxu1 %v5125_v60  ;;  %3557 = vmatprep.subr.bf16.mxu0 %v5130_v61  ;;  %v5207_v60 = vld [vmem:[%s6141_s7 + $0xb00] ss:$16 sps:$4 sm:$0xff]   ;;  %v5212_v61 = vld [vmem:[%s6141_s7 + $0x924] ss:$16 sps:$4 sm:$0xff]  }
  0xe4   : > { %3598 = vmatprep.subr.bf16.mxu1 %v5133_v62  ;;  %v5215_v62 = vld [vmem:[%s6141_s7 + $0xb24] ss:$16 sps:$4 sm:$0xff]  }
  0xe6   : > { %3558 = vmatpush1.bf16.msra.mxu0 %v5128_v63  ;;  %v5210_v63 = vld [vmem:[%s6141_s7 + $0x920] ss:$16 sps:$4 sm:$0xff]  }
  0xe7   : > { %3599 = vmatpush1.bf16.msra.mxu1 %v5131_v0  ;;  %3559 = vmatprep.subr.bf16.mxu0 %v5136_v1  ;;  %v5213_v0 = vld [vmem:[%s6141_s7 + $0xb20] ss:$16 sps:$4 sm:$0xff]   ;;  %v5218_v1 = vld [vmem:[%s6141_s7 + $0x944] ss:$16 sps:$4 sm:$0xff]  }
  0xe8   : > { %3600 = vmatprep.subr.bf16.mxu1 %v5139_v2  ;;  %v5221_v2 = vld [vmem:[%s6141_s7 + $0xb44] ss:$16 sps:$4 sm:$0xff]  }
  0xea   : > { %3560 = vmatpush1.bf16.msra.mxu0 %v5134_v3  ;;  %v5216_v3 = vld [vmem:[%s6141_s7 + $0x940] ss:$16 sps:$4 sm:$0xff]  }
  0xeb   : > { %3601 = vmatpush1.bf16.msra.mxu1 %v5137_v4  ;;  %3561 = vmatprep.subr.bf16.mxu0 %v5142_v5  ;;  %v5219_v4 = vld [vmem:[%s6141_s7 + $0xb40] ss:$16 sps:$4 sm:$0xff]   ;;  %v5224_v5 = vld [vmem:[%s6141_s7 + $0x964] ss:$16 sps:$4 sm:$0xff]  }
  0xec   : > { %3602 = vmatprep.subr.bf16.mxu1 %v5145_v6  ;;  %v5227_v6 = vld [vmem:[%s6141_s7 + $0xb64] ss:$16 sps:$4 sm:$0xff]  }
  0xee   : > { %3562 = vmatpush1.bf16.msra.mxu0 %v5140_v9  ;;  %v5222_v9 = vld [vmem:[%s6141_s7 + $0x960] ss:$16 sps:$4 sm:$0xff]  }
  0xef   : > { %3603 = vmatpush1.bf16.msra.mxu1 %v5143_v10  ;;  %3563 = vmatprep.subr.bf16.mxu0 %v5148_v11  ;;  %v5225_v10 = vld [vmem:[%s6141_s7 + $0xb60] ss:$16 sps:$4 sm:$0xff]   ;;  %v5230_v11 = vld [vmem:[%s6141_s7 + $0x984] ss:$16 sps:$4 sm:$0xff]  }
  0xf0   : > { %3604 = vmatprep.subr.bf16.mxu1 %v5151_v12  ;;  %v5233_v12 = vld [vmem:[%s6141_s7 + $0xb84] ss:$16 sps:$4 sm:$0xff]  }
  0xf2   : > { %3564 = vmatpush1.bf16.msra.mxu0 %v5146_v13  ;;  %v5228_v13 = vld [vmem:[%s6141_s7 + $0x980] ss:$16 sps:$4 sm:$0xff]  }
  0xf3   : > { %3605 = vmatpush1.bf16.msra.mxu1 %v5149_v14  ;;  %3615 = vmatprep.subr.bf16.mxu0 %v5158_v15  ;;  %v5231_v14 = vld [vmem:[%s6141_s7 + $0xb80] ss:$16 sps:$4 sm:$0xff]   ;;  %v5236_v15 = vld [vmem:[%s6141_s7 + $0x9a4] ss:$16 sps:$4 sm:$0xff]  }
  0xf4   : > { %3656 = vmatprep.subr.bf16.mxu1 %v5161_v16  ;;  %v5239_v16 = vld [vmem:[%s6141_s7 + $0xba4] ss:$16 sps:$4 sm:$0xff]  }
  0xf5   : > { %3566 = vmatmul.mubr.bf16.vlgmr.msra.gmra.mrb[4].mxu0 %v6330_v17 }
  0xf6   : > { %3607 = vmatmul.mubr.bf16.vlgmr.msra.gmra.mrb[4].mxu1 %v6334_v18  ;;  %3616 = vmatpush1.bf16.msra.mxu0 %v5156_v19  ;;  %v5234_v19 = vld [vmem:[%s6141_s7 + $0x9a0] ss:$16 sps:$4 sm:$0xff]  }
  0xf7   : > { %3657 = vmatpush1.bf16.msra.mxu1 %v5159_v20  ;;  %3617 = vmatprep.subr.bf16.mxu0 %v5164_v21  ;;  %v5237_v20 = vld [vmem:[%s6141_s7 + $0xba0] ss:$16 sps:$4 sm:$0xff]   ;;  %v5242_v21 = vld [vmem:[%s6141_s7 + $0x9c4] ss:$16 sps:$4 sm:$0xff]  }
  0xf8   : > { %3658 = vmatprep.subr.bf16.mxu1 %v5167_v22  ;;  %3647 = vmatprep.mubr.bf16.mxu0 %v6348_v25  ;;  %v5245_v22 = vld [vmem:[%s6141_s7 + $0xbc4] ss:$16 sps:$4 sm:$0xff]  }
  0xf9   : > { %3688 = vmatprep.mubr.bf16.mxu1 %v6352_v26 }
  0xfa   : > { %3618 = vmatpush1.bf16.msra.mxu0 %v5162_v27  ;;  %v5240_v27 = vld [vmem:[%s6141_s7 + $0x9c0] ss:$16 sps:$4 sm:$0xff]  }
  0xfb   : > { %3659 = vmatpush1.bf16.msra.mxu1 %v5165_v28  ;;  %3619 = vmatprep.subr.bf16.mxu0 %v5170_v29  ;;  %v5243_v28 = vld [vmem:[%s6141_s7 + $0xbc0] ss:$16 sps:$4 sm:$0xff]   ;;  %v5248_v29 = vld [vmem:[%s6141_s7 + $0x9e4] ss:$16 sps:$4 sm:$0xff]  }
  0xfc   : > { %3660 = vmatprep.subr.bf16.mxu1 %v5173_v30  ;;  %v5251_v30 = vld [vmem:[%s6141_s7 + $0xbe4] ss:$16 sps:$4 sm:$0xff]  }
  0xfe   : > { %3620 = vmatpush1.bf16.msra.mxu0 %v5168_v31  ;;  %v5246_v31 = vld [vmem:[%s6141_s7 + $0x9e0] ss:$16 sps:$4 sm:$0xff]  }
  0xff   : > { %3661 = vmatpush1.bf16.msra.mxu1 %v5171_v32  ;;  %3621 = vmatprep.subr.bf16.mxu0 %v5176_v33  ;;  %v5249_v32 = vld [vmem:[%s6141_s7 + $0xbe0] ss:$16 sps:$4 sm:$0xff]   ;;  %v5258_v33 = vld [vmem:[%s6141_s7 + $0xc04] ss:$16 sps:$4 sm:$0xff]  }
 0x100   : > { %3662 = vmatprep.subr.bf16.mxu1 %v5179_v34  ;;  %v5261_v34 = vld [vmem:[%s6141_s7 + $0xe04] ss:$16 sps:$4 sm:$0xff]  }
 0x102   : > { %3622 = vmatpush1.bf16.msra.mxu0 %v5174_v35  ;;  %v5256_v35 = vld [vmem:[%s6141_s7 + $0xc00] ss:$16 sps:$4 sm:$0xff]  }
 0x103   : > { %3663 = vmatpush1.bf16.msra.mxu1 %v5177_v36  ;;  %3623 = vmatprep.subr.bf16.mxu0 %v5182_v39  ;;  %v5259_v36 = vld [vmem:[%s6141_s7 + $0xe00] ss:$16 sps:$4 sm:$0xff]   ;;  %v6422_v39 = vcombine.low %v6341_v23, %v6341_v23 }
 0x104   : > { %3664 = vmatprep.subr.bf16.mxu1 %v5185_v40  ;;  %v6426_v40 = vcombine.low %v6344_v24, %v6344_v24 }
 0x106   : > { %3624 = vmatpush1.bf16.msra.mxu0 %v5180_v41  ;;  %v6429_v41 = vld [vmem:[%s6160_s26 + $0x30] sm:$0xff] }
 0x107   : > { %3665 = vmatpush1.bf16.msra.mxu1 %v5183_v42  ;;  %3625 = vmatprep.subr.bf16.mxu0 %v5188_v43  ;;  %v6432_v42 = vld [vmem:[%s6160_s26 + $0x38] sm:$0xff]  ;;  %v5264_v43 = vld [vmem:[%s6141_s7 + $0xc24] ss:$16 sps:$4 sm:$0xff]   ;;  %v6438_v23 = vcombine.high %v6429_v41, %v6429_v41 }
 0x108   : > { %3666 = vmatprep.subr.bf16.mxu1 %v5191_v44  ;;  %v5267_v44 = vld [vmem:[%s6141_s7 + $0xe24] ss:$16 sps:$4 sm:$0xff]   ;;  %v6442_v24 = vcombine.high %v6432_v42, %v6432_v42 }
 0x10a   : > { %3626 = vmatpush1.bf16.msra.mxu0 %v5186_v45  ;;  %v5262_v45 = vld [vmem:[%s6141_s7 + $0xc20] ss:$16 sps:$4 sm:$0xff]  }
 0x10b   : > { %3667 = vmatpush1.bf16.msra.mxu1 %v5189_v46  ;;  %3627 = vmatprep.subr.bf16.mxu0 %v5194_v47  ;;  %v5265_v46 = vld [vmem:[%s6141_s7 + $0xe20] ss:$16 sps:$4 sm:$0xff]   ;;  %v5270_v47 = vld [vmem:[%s6141_s7 + $0xc44] ss:$16 sps:$4 sm:$0xff]  }
 0x10c   : > { %3668 = vmatprep.subr.bf16.mxu1 %v5197_v49  ;;  %v5273_v49 = vld [vmem:[%s6141_s7 + $0xe44] ss:$16 sps:$4 sm:$0xff]  }
 0x10e   : > { %3628 = vmatpush1.bf16.msra.mxu0 %v5192_v50  ;;  %v5268_v50 = vld [vmem:[%s6141_s7 + $0xc40] ss:$16 sps:$4 sm:$0xff]  }
 0x10f   : > { %3669 = vmatpush1.bf16.msra.mxu1 %v5195_v51  ;;  %3629 = vmatprep.subr.bf16.mxu0 %v5200_v53  ;;  %v5271_v51 = vld [vmem:[%s6141_s7 + $0xe40] ss:$16 sps:$4 sm:$0xff]   ;;  %v5276_v53 = vld [vmem:[%s6141_s7 + $0xc64] ss:$16 sps:$4 sm:$0xff]  }
 0x110   : > { %3670 = vmatprep.subr.bf16.mxu1 %v5203_v54  ;;  %v5279_v54 = vld [vmem:[%s6141_s7 + $0xe64] ss:$16 sps:$4 sm:$0xff]  }
 0x112   : > { %3630 = vmatpush1.bf16.msra.mxu0 %v5198_v55  ;;  %v5274_v55 = vld [vmem:[%s6141_s7 + $0xc60] ss:$16 sps:$4 sm:$0xff]  }
 0x113   : > { %3671 = vmatpush1.bf16.msra.mxu1 %v5201_v56  ;;  %3631 = vmatprep.subr.bf16.mxu0 %v5206_v57  ;;  %v5277_v56 = vld [vmem:[%s6141_s7 + $0xe60] ss:$16 sps:$4 sm:$0xff]   ;;  %v5282_v57 = vld [vmem:[%s6141_s7 + $0xc84] ss:$16 sps:$4 sm:$0xff]  }
 0x114   : > { %3672 = vmatprep.subr.bf16.mxu1 %v5209_v58  ;;  %v5285_v58 = vld [vmem:[%s6141_s7 + $0xe84] ss:$16 sps:$4 sm:$0xff]  }
 0x116   : > { %3632 = vmatpush1.bf16.msra.mxu0 %v5204_v59  ;;  %v5280_v59 = vld [vmem:[%s6141_s7 + $0xc80] ss:$16 sps:$4 sm:$0xff]  }
 0x117   : > { %3673 = vmatpush1.bf16.msra.mxu1 %v5207_v60  ;;  %3633 = vmatprep.subr.bf16.mxu0 %v5212_v61  ;;  %v5283_v60 = vld [vmem:[%s6141_s7 + $0xe80] ss:$16 sps:$4 sm:$0xff]   ;;  %v5288_v61 = vld [vmem:[%s6141_s7 + $0xca4] ss:$16 sps:$4 sm:$0xff]  }
 0x118   : > { %3674 = vmatprep.subr.bf16.mxu1 %v5215_v62  ;;  %v5291_v62 = vld [vmem:[%s6141_s7 + $0xea4] ss:$16 sps:$4 sm:$0xff]  }
 0x11a   : > { %3634 = vmatpush1.bf16.msra.mxu0 %v5210_v63  ;;  %v5286_v63 = vld [vmem:[%s6141_s7 + $0xca0] ss:$16 sps:$4 sm:$0xff]  }
 0x11b   : > { %3675 = vmatpush1.bf16.msra.mxu1 %v5213_v0  ;;  %3635 = vmatprep.subr.bf16.mxu0 %v5218_v1  ;;  %v5289_v0 = vld [vmem:[%s6141_s7 + $0xea0] ss:$16 sps:$4 sm:$0xff]   ;;  %v5294_v1 = vld [vmem:[%s6141_s7 + $0xcc4] ss:$16 sps:$4 sm:$0xff]  }
 0x11c   : > { %3676 = vmatprep.subr.bf16.mxu1 %v5221_v2  ;;  %v5297_v2 = vld [vmem:[%s6141_s7 + $0xec4] ss:$16 sps:$4 sm:$0xff]  }
 0x11e   : > { %3636 = vmatpush1.bf16.msra.mxu0 %v5216_v3  ;;  %v5292_v3 = vld [vmem:[%s6141_s7 + $0xcc0] ss:$16 sps:$4 sm:$0xff]  }
 0x11f   : > { %3677 = vmatpush1.bf16.msra.mxu1 %v5219_v4  ;;  %3637 = vmatprep.subr.bf16.mxu0 %v5224_v5  ;;  %v5295_v4 = vld [vmem:[%s6141_s7 + $0xec0] ss:$16 sps:$4 sm:$0xff]   ;;  %v5300_v5 = vld [vmem:[%s6141_s7 + $0xce4] ss:$16 sps:$4 sm:$0xff]  }
 0x120   : > { %3678 = vmatprep.subr.bf16.mxu1 %v5227_v6  ;;  %v5303_v6 = vld [vmem:[%s6141_s7 + $0xee4] ss:$16 sps:$4 sm:$0xff]  }
 0x122   : > { %3638 = vmatpush1.bf16.msra.mxu0 %v5222_v9  ;;  %v5298_v9 = vld [vmem:[%s6141_s7 + $0xce0] ss:$16 sps:$4 sm:$0xff]  }
 0x123   : > { %3679 = vmatpush1.bf16.msra.mxu1 %v5225_v10  ;;  %3639 = vmatprep.subr.bf16.mxu0 %v5230_v11  ;;  %v5301_v10 = vld [vmem:[%s6141_s7 + $0xee0] ss:$16 sps:$4 sm:$0xff]   ;;  %v5306_v11 = vld [vmem:[%s6141_s7 + $0xd04] ss:$16 sps:$4 sm:$0xff]  }
 0x124   : > { %3680 = vmatprep.subr.bf16.mxu1 %v5233_v12  ;;  %v5309_v12 = vld [vmem:[%s6141_s7 + $0xf04] ss:$16 sps:$4 sm:$0xff]  }
 0x126   : > { %3640 = vmatpush1.bf16.msra.mxu0 %v5228_v13  ;;  %v5304_v13 = vld [vmem:[%s6141_s7 + $0xd00] ss:$16 sps:$4 sm:$0xff]  }
 0x127   : > { %3681 = vmatpush1.bf16.msra.mxu1 %v5231_v14  ;;  %3641 = vmatprep.subr.bf16.mxu0 %v5236_v15  ;;  %v5307_v14 = vld [vmem:[%s6141_s7 + $0xf00] ss:$16 sps:$4 sm:$0xff]   ;;  %v5312_v15 = vld [vmem:[%s6141_s7 + $0xd24] ss:$16 sps:$4 sm:$0xff]  }
 0x128   : > { %3682 = vmatprep.subr.bf16.mxu1 %v5239_v16  ;;  %v5315_v16 = vld [vmem:[%s6141_s7 + $0xf24] ss:$16 sps:$4 sm:$0xff]  }
 0x12a   : > { %3642 = vmatpush1.bf16.msra.mxu0 %v5234_v19  ;;  %v5310_v19 = vld [vmem:[%s6141_s7 + $0xd20] ss:$16 sps:$4 sm:$0xff]  }
 0x12b   : > { %3683 = vmatpush1.bf16.msra.mxu1 %v5237_v20  ;;  %3643 = vmatprep.subr.bf16.mxu0 %v5242_v21  ;;  %v5313_v20 = vld [vmem:[%s6141_s7 + $0xf20] ss:$16 sps:$4 sm:$0xff]   ;;  %v5318_v21 = vld [vmem:[%s6141_s7 + $0xd44] ss:$16 sps:$4 sm:$0xff]  }
 0x12c   : > { %3684 = vmatprep.subr.bf16.mxu1 %v5245_v22  ;;  %v5321_v22 = vld [vmem:[%s6141_s7 + $0xf44] ss:$16 sps:$4 sm:$0xff]  }
 0x12e   : > { %3644 = vmatpush1.bf16.msra.mxu0 %v5240_v27  ;;  %v5316_v27 = vld [vmem:[%s6141_s7 + $0xd40] ss:$16 sps:$4 sm:$0xff]  }
 0x12f   : > { %3685 = vmatpush1.bf16.msra.mxu1 %v5243_v28  ;;  %3645 = vmatprep.subr.bf16.mxu0 %v5248_v29  ;;  %v5319_v28 = vld [vmem:[%s6141_s7 + $0xf40] ss:$16 sps:$4 sm:$0xff]   ;;  %v5324_v29 = vld [vmem:[%s6141_s7 + $0xd64] ss:$16 sps:$4 sm:$0xff]  }
 0x130   : > { %3686 = vmatprep.subr.bf16.mxu1 %v5251_v30  ;;  %v5327_v30 = vld [vmem:[%s6141_s7 + $0xf64] ss:$16 sps:$4 sm:$0xff]  }
 0x132   : > { %3646 = vmatpush1.bf16.msra.mxu0 %v5246_v31  ;;  %v5322_v31 = vld [vmem:[%s6141_s7 + $0xd60] ss:$16 sps:$4 sm:$0xff]  }
 0x133   : > { %3687 = vmatpush1.bf16.msra.mxu1 %v5249_v32  ;;  %3697 = vmatprep.subr.bf16.mxu0 %v5258_v33  ;;  %v5325_v32 = vld [vmem:[%s6141_s7 + $0xf60] ss:$16 sps:$4 sm:$0xff]   ;;  %v5330_v33 = vld [vmem:[%s6141_s7 + $0xd84] ss:$16 sps:$4 sm:$0xff]  }
 0x134   : > { %3738 = vmatprep.subr.bf16.mxu1 %v5261_v34  ;;  %v5333_v34 = vld [vmem:[%s6141_s7 + $0xf84] ss:$16 sps:$4 sm:$0xff]  }
 0x135   : > { %3648 = vmatmul.mubr.bf16.vlgmr.msra.gmra.mrb[8].mxu0 %v6422_v39 }
 0x136   : > { %3689 = vmatmul.mubr.bf16.vlgmr.msra.gmra.mrb[8].mxu1 %v6426_v40  ;;  %3698 = vmatpush1.bf16.msra.mxu0 %v5256_v35  ;;  %v5328_v35 = vld [vmem:[%s6141_s7 + $0xd80] ss:$16 sps:$4 sm:$0xff]  }
 0x137   : > { %3739 = vmatpush1.bf16.msra.mxu1 %v5259_v36  ;;  %3699 = vmatprep.subr.bf16.mxu0 %v5264_v43  ;;  %v5331_v36 = vld [vmem:[%s6141_s7 + $0xf80] ss:$16 sps:$4 sm:$0xff]   ;;  %v5336_v43 = vld [vmem:[%s6141_s7 + $0xda4] ss:$16 sps:$4 sm:$0xff]  }
 0x138   : > { %3740 = vmatprep.subr.bf16.mxu1 %v5267_v44  ;;  %3729 = vmatprep.mubr.bf16.mxu0 %v6438_v23  ;;  %v5339_v44 = vld [vmem:[%s6141_s7 + $0xfa4] ss:$16 sps:$4 sm:$0xff]  }
 0x139   : > { %3770 = vmatprep.mubr.bf16.mxu1 %v6442_v24 }
 0x13a   : > { %3700 = vmatpush1.bf16.msra.mxu0 %v5262_v45  ;;  %v5334_v45 = vld [vmem:[%s6141_s7 + $0xda0] ss:$16 sps:$4 sm:$0xff]  }
 0x13b   : > { %3741 = vmatpush1.bf16.msra.mxu1 %v5265_v46  ;;  %3701 = vmatprep.subr.bf16.mxu0 %v5270_v47  ;;  %v5337_v46 = vld [vmem:[%s6141_s7 + $0xfa0] ss:$16 sps:$4 sm:$0xff]   ;;  %v5342_v47 = vld [vmem:[%s6141_s7 + $0xdc4] ss:$16 sps:$4 sm:$0xff]  }
 0x13c   : > { %3742 = vmatprep.subr.bf16.mxu1 %v5273_v49  ;;  %v5345_v49 = vld [vmem:[%s6141_s7 + $0xfc4] ss:$16 sps:$4 sm:$0xff]  }
 0x13e   : > { %3702 = vmatpush1.bf16.msra.mxu0 %v5268_v50  ;;  %v5340_v50 = vld [vmem:[%s6141_s7 + $0xdc0] ss:$16 sps:$4 sm:$0xff]  }
 0x13f   : > { %3743 = vmatpush1.bf16.msra.mxu1 %v5271_v51  ;;  %3703 = vmatprep.subr.bf16.mxu0 %v5276_v53  ;;  %v5343_v51 = vld [vmem:[%s6141_s7 + $0xfc0] ss:$16 sps:$4 sm:$0xff]   ;;  %v5348_v53 = vld [vmem:[%s6141_s7 + $0xde4] ss:$16 sps:$4 sm:$0xff]  }
 0x140   : > { %3744 = vmatprep.subr.bf16.mxu1 %v5279_v54  ;;  %v5351_v54 = vld [vmem:[%s6141_s7 + $0xfe4] ss:$16 sps:$4 sm:$0xff]  }
 0x142   : > { %3704 = vmatpush1.bf16.msra.mxu0 %v5274_v55  ;;  %v5346_v55 = vld [vmem:[%s6141_s7 + $0xde0] ss:$16 sps:$4 sm:$0xff]  }
 0x143   : > { %3745 = vmatpush1.bf16.msra.mxu1 %v5277_v56  ;;  %3705 = vmatprep.subr.bf16.mxu0 %v5282_v57  ;;  %v5349_v56 = vld [vmem:[%s6141_s7 + $0xfe0] ss:$16 sps:$4 sm:$0xff]   ;;  %v5358_v57 = vld [vmem:[%s6141_s7 + $0xc] ss:$16 sps:$4 sm:$0xff]  }
 0x144   : > { %3746 = vmatprep.subr.bf16.mxu1 %v5285_v58  ;;  %v5361_v58 = vld [vmem:[%s6141_s7 + $0x20c] ss:$16 sps:$4 sm:$0xff]  }
 0x146   : > { %3706 = vmatpush1.bf16.msra.mxu0 %v5280_v59  ;;  %v6510_v59 = vcombine.low %v6429_v41, %v6429_v41  ;;  %v5362_v41 = vld [vmem:[%s6141_s7 + $0x28] ss:$16 sps:$4 sm:$0xff]  }
 0x147   : > { %3747 = vmatpush1.bf16.msra.mxu1 %v5283_v60  ;;  %3707 = vmatprep.subr.bf16.mxu0 %v5288_v61  ;;  %v6514_v60 = vcombine.low %v6432_v42, %v6432_v42  ;;  %v5356_v61 = vld [vmem:[%s6141_s7 + $0x8] ss:$16 sps:$4 sm:$0xff]   ;;  %v5370_v42 = vld [vmem:[%s6141_s7 + $0x4c] ss:$16 sps:$4 sm:$0xff]  }
 0x148   : > { %3748 = vmatprep.subr.bf16.mxu1 %v5291_v62  ;;  %v5359_v62 = vld [vmem:[%s6141_s7 + $0x208] ss:$16 sps:$4 sm:$0xff]  }
 0x14a   : > { %3708 = vmatpush1.bf16.msra.mxu0 %v5286_v63  ;;  %v5364_v63 = vld [vmem:[%s6141_s7 + $0x2c] ss:$16 sps:$4 sm:$0xff]  }
 0x14b   : > { %3749 = vmatpush1.bf16.msra.mxu1 %v5289_v0  ;;  %3709 = vmatprep.subr.bf16.mxu0 %v5294_v1  ;;  %v5367_v0 = vld [vmem:[%s6141_s7 + $0x22c] ss:$16 sps:$4 sm:$0xff]   ;;  %v5365_v1 = vld [vmem:[%s6141_s7 + $0x228] ss:$16 sps:$4 sm:$0xff]  }
 0x14c   : > { %3750 = vmatprep.subr.bf16.mxu1 %v5297_v2  ;;  %v5373_v2 = vld [vmem:[%s6141_s7 + $0x24c] ss:$16 sps:$4 sm:$0xff]  }
 0x14e   : > { %3710 = vmatpush1.bf16.msra.mxu0 %v5292_v3  ;;  %v5368_v3 = vld [vmem:[%s6141_s7 + $0x48] ss:$16 sps:$4 sm:$0xff]  }
 0x14f   : > { %3751 = vmatpush1.bf16.msra.mxu1 %v5295_v4  ;;  %3711 = vmatprep.subr.bf16.mxu0 %v5300_v5  ;;  %v5371_v4 = vld [vmem:[%s6141_s7 + $0x248] ss:$16 sps:$4 sm:$0xff]   ;;  %v5376_v5 = vld [vmem:[%s6141_s7 + $0x6c] ss:$16 sps:$4 sm:$0xff]  }
 0x150   : > { %3752 = vmatprep.subr.bf16.mxu1 %v5303_v6  ;;  %v5379_v6 = vld [vmem:[%s6141_s7 + $0x26c] ss:$16 sps:$4 sm:$0xff]  }
 0x152   : > { %3712 = vmatpush1.bf16.msra.mxu0 %v5298_v9  ;;  %v5377_v9 = vld [vmem:[%s6141_s7 + $0x268] ss:$16 sps:$4 sm:$0xff]  }
 0x153   : > { %3753 = vmatpush1.bf16.msra.mxu1 %v5301_v10  ;;  %3713 = vmatprep.subr.bf16.mxu0 %v5306_v11  ;;  %v5385_v10 = vld [vmem:[%s6141_s7 + $0x28c] ss:$16 sps:$4 sm:$0xff]   ;;  %v5380_v11 = vld [vmem:[%s6141_s7 + $0x88] ss:$16 sps:$4 sm:$0xff]  }
 0x154   : > { %3754 = vmatprep.subr.bf16.mxu1 %v5309_v12  ;;  %v5383_v12 = vld [vmem:[%s6141_s7 + $0x288] ss:$16 sps:$4 sm:$0xff]  }
 0x156   : > { %3714 = vmatpush1.bf16.msra.mxu0 %v5304_v13  ;;  %v5388_v13 = vld [vmem:[%s6141_s7 + $0xac] ss:$16 sps:$4 sm:$0xff]  }
 0x157   : > { %3755 = vmatpush1.bf16.msra.mxu1 %v5307_v14  ;;  %3715 = vmatprep.subr.bf16.mxu0 %v5312_v15  ;;  %v5391_v14 = vld [vmem:[%s6141_s7 + $0x2ac] ss:$16 sps:$4 sm:$0xff]   ;;  %v5386_v15 = vld [vmem:[%s6141_s7 + $0xa8] ss:$16 sps:$4 sm:$0xff]  }
 0x158   : > { %3756 = vmatprep.subr.bf16.mxu1 %v5315_v16  ;;  %v5389_v16 = vld [vmem:[%s6141_s7 + $0x2a8] ss:$16 sps:$4 sm:$0xff]  }
 0x15a   : > { %3716 = vmatpush1.bf16.msra.mxu0 %v5310_v19  ;;  %v5394_v19 = vld [vmem:[%s6141_s7 + $0xcc] ss:$16 sps:$4 sm:$0xff]  }
 0x15b   : > { %3757 = vmatpush1.bf16.msra.mxu1 %v5313_v20  ;;  %3717 = vmatprep.subr.bf16.mxu0 %v5318_v21  ;;  %v5397_v20 = vld [vmem:[%s6141_s7 + $0x2cc] ss:$16 sps:$4 sm:$0xff]  }
 0x15c   : > { %3758 = vmatprep.subr.bf16.mxu1 %v5321_v22 }
 0x15e   : > { %3718 = vmatpush1.bf16.msra.mxu0 %v5316_v27  ;;  %v5392_v27 = vld [vmem:[%s6141_s7 + $0xc8] ss:$16 sps:$4 sm:$0xff]  }
 0x15f   : > { %3759 = vmatpush1.bf16.msra.mxu1 %v5319_v28  ;;  %3719 = vmatprep.subr.bf16.mxu0 %v5324_v29  ;;  %v5395_v28 = vld [vmem:[%s6141_s7 + $0x2c8] ss:$16 sps:$4 sm:$0xff]  }
 0x160   : > { %3760 = vmatprep.subr.bf16.mxu1 %v5327_v30 }
 0x162   : > { %3720 = vmatpush1.bf16.msra.mxu0 %v5322_v31 }
 0x163   : > { %3761 = vmatpush1.bf16.msra.mxu1 %v5325_v32  ;;  %3721 = vmatprep.subr.bf16.mxu0 %v5330_v33 }
 0x164   : > { %3762 = vmatprep.subr.bf16.mxu1 %v5333_v34 }
 0x166   : > { %3722 = vmatpush1.bf16.msra.mxu0 %v5328_v35 }
 0x167   : > { %3763 = vmatpush1.bf16.msra.mxu1 %v5331_v36  ;;  %3723 = vmatprep.subr.bf16.mxu0 %v5336_v43  ;;  %v5400_v43 = vld [vmem:[%s6141_s7 + $0xec] ss:$16 sps:$4 sm:$0xff]  }
 0x168   : > { %3764 = vmatprep.subr.bf16.mxu1 %v5339_v44  ;;  %v5403_v44 = vld [vmem:[%s6141_s7 + $0x2ec] ss:$16 sps:$4 sm:$0xff]  }
 0x16a   : > { %3724 = vmatpush1.bf16.msra.mxu0 %v5334_v45  ;;  %v5398_v45 = vld [vmem:[%s6141_s7 + $0xe8] ss:$16 sps:$4 sm:$0xff]  }
 0x16b   : > { %3765 = vmatpush1.bf16.msra.mxu1 %v5337_v46  ;;  %3725 = vmatprep.subr.bf16.mxu0 %v5342_v47  ;;  %v5401_v46 = vld [vmem:[%s6141_s7 + $0x2e8] ss:$16 sps:$4 sm:$0xff]   ;;  %v5406_v47 = vld [vmem:[%s6141_s7 + $0x10c] ss:$16 sps:$4 sm:$0xff]  }
 0x16c   : > { %3766 = vmatprep.subr.bf16.mxu1 %v5345_v49  ;;  %v5409_v49 = vld [vmem:[%s6141_s7 + $0x30c] ss:$16 sps:$4 sm:$0xff]  }
 0x16e   : > { %3726 = vmatpush1.bf16.msra.mxu0 %v5340_v50  ;;  %v5404_v50 = vld [vmem:[%s6141_s7 + $0x108] ss:$16 sps:$4 sm:$0xff]  }
 0x16f   : > { %3767 = vmatpush1.bf16.msra.mxu1 %v5343_v51  ;;  %3727 = vmatprep.subr.bf16.mxu0 %v5348_v53  ;;  %v5407_v51 = vld [vmem:[%s6141_s7 + $0x308] ss:$16 sps:$4 sm:$0xff]   ;;  %v5412_v53 = vld [vmem:[%s6141_s7 + $0x12c] ss:$16 sps:$4 sm:$0xff]  }
 0x170   : > { %3768 = vmatprep.subr.bf16.mxu1 %v5351_v54  ;;  %v5415_v54 = vld [vmem:[%s6141_s7 + $0x32c] ss:$16 sps:$4 sm:$0xff]  }
 0x172   : > { %3728 = vmatpush1.bf16.msra.mxu0 %v5346_v55  ;;  %v5410_v55 = vld [vmem:[%s6141_s7 + $0x128] ss:$16 sps:$4 sm:$0xff]  }
 0x173   : > { %3769 = vmatpush1.bf16.msra.mxu1 %v5349_v56  ;;  %3779 = vmatprep.subr.bf16.mxu0 %v5358_v57  ;;  %v5413_v56 = vld [vmem:[%s6141_s7 + $0x328] ss:$16 sps:$4 sm:$0xff]   ;;  %v5418_v57 = vld [vmem:[%s6141_s7 + $0x14c] ss:$16 sps:$4 sm:$0xff]  }
 0x174   : > { %3820 = vmatprep.subr.bf16.mxu1 %v5361_v58  ;;  %v5421_v58 = vld [vmem:[%s6141_s7 + $0x34c] ss:$16 sps:$4 sm:$0xff]  }
 0x175   : > { %3730 = vmatmul.mubr.bf16.vlgmr.msra.gmra.mrb[12].mxu0 %v6510_v59 }
 0x176   : > { %3771 = vmatmul.mubr.bf16.vlgmr.msra.gmra.mrb[12].mxu1 %v6514_v60  ;;  %3780 = vmatpush1.bf16.msra.mxu0 %v5356_v61  ;;  %v5416_v61 = vld [vmem:[%s6141_s7 + $0x148] ss:$16 sps:$4 sm:$0xff]  }
 0x177   : > { %3821 = vmatpush1.bf16.msra.mxu1 %v5359_v62  ;;  %3781 = vmatprep.subr.bf16.mxu0 %v5364_v63  ;;  %v5419_v62 = vld [vmem:[%s6141_s7 + $0x348] ss:$16 sps:$4 sm:$0xff]   ;;  %v5424_v63 = vld [vmem:[%s6141_s7 + $0x16c] ss:$16 sps:$4 sm:$0xff]  }
 0x178   : > { %3822 = vmatprep.subr.bf16.mxu1 %v5367_v0  ;;  %3811 = vmatprep.mubr.bf16.mxu0 %v6215_v48  ;;  %v5374_v48 = vld [vmem:[%s6141_s7 + $0x68] ss:$16 sps:$4 sm:$0xff]   ;;  %v5427_v0 = vld [vmem:[%s6141_s7 + $0x36c] ss:$16 sps:$4 sm:$0xff]  }
 0x179   : > { %3852 = vmatprep.mubr.bf16.mxu1 %v6220_v52  ;;  %v5382_v52 = vld [vmem:[%s6141_s7 + $0x8c] ss:$16 sps:$4 sm:$0xff]  }
 0x17a   : > { %3782 = vmatpush1.bf16.msra.mxu0 %v5362_v41  ;;  %v5422_v41 = vld [vmem:[%s6141_s7 + $0x168] ss:$16 sps:$4 sm:$0xff]  }
 0x17b   : > { %3823 = vmatpush1.bf16.msra.mxu1 %v5365_v1  ;;  %3783 = vmatprep.subr.bf16.mxu0 %v5370_v42  ;;  %v5425_v1 = vld [vmem:[%s6141_s7 + $0x368] ss:$16 sps:$4 sm:$0xff]   ;;  %v5430_v42 = vld [vmem:[%s6141_s7 + $0x18c] ss:$16 sps:$4 sm:$0xff]  }
 0x17c   : > { %3824 = vmatprep.subr.bf16.mxu1 %v5373_v2  ;;  %v5433_v2 = vld [vmem:[%s6141_s7 + $0x38c] ss:$16 sps:$4 sm:$0xff]  }
 0x17e   : > { %3784 = vmatpush1.bf16.msra.mxu0 %v5368_v3  ;;  %v5428_v3 = vld [vmem:[%s6141_s7 + $0x188] ss:$16 sps:$4 sm:$0xff]  }
 0x17f   : > { %3825 = vmatpush1.bf16.msra.mxu1 %v5371_v4  ;;  %3785 = vmatprep.subr.bf16.mxu0 %v5376_v5  ;;  %v5431_v4 = vld [vmem:[%s6141_s7 + $0x388] ss:$16 sps:$4 sm:$0xff]   ;;  %v5436_v5 = vld [vmem:[%s6141_s7 + $0x1ac] ss:$16 sps:$4 sm:$0xff]  }
 0x180   : > { %3826 = vmatprep.subr.bf16.mxu1 %v5379_v6  ;;  %v5439_v6 = vld [vmem:[%s6141_s7 + $0x3ac] ss:$16 sps:$4 sm:$0xff]  }
 0x182   : > { %3786 = vmatpush1.bf16.msra.mxu0 %v5374_v48  ;;  %v5434_v48 = vld [vmem:[%s6141_s7 + $0x1a8] ss:$16 sps:$4 sm:$0xff]  }
 0x183   : > { %3827 = vmatpush1.bf16.msra.mxu1 %v5377_v9  ;;  %3787 = vmatprep.subr.bf16.mxu0 %v5382_v52  ;;  %v5437_v9 = vld [vmem:[%s6141_s7 + $0x3a8] ss:$16 sps:$4 sm:$0xff]   ;;  %v5442_v52 = vld [vmem:[%s6141_s7 + $0x1cc] ss:$16 sps:$4 sm:$0xff]  }
 0x184   : > { %3828 = vmatprep.subr.bf16.mxu1 %v5385_v10  ;;  %v5445_v10 = vld [vmem:[%s6141_s7 + $0x3cc] ss:$16 sps:$4 sm:$0xff]  }
 0x186   : > { %3788 = vmatpush1.bf16.msra.mxu0 %v5380_v11  ;;  %v5440_v11 = vld [vmem:[%s6141_s7 + $0x1c8] ss:$16 sps:$4 sm:$0xff]  }
 0x187   : > { %3829 = vmatpush1.bf16.msra.mxu1 %v5383_v12  ;;  %3789 = vmatprep.subr.bf16.mxu0 %v5388_v13  ;;  %v5443_v12 = vld [vmem:[%s6141_s7 + $0x3c8] ss:$16 sps:$4 sm:$0xff]   ;;  %v5448_v13 = vld [vmem:[%s6141_s7 + $0x1ec] ss:$16 sps:$4 sm:$0xff]  }
 0x188   : > { %3830 = vmatprep.subr.bf16.mxu1 %v5391_v14  ;;  %v3485_v21 = vpop.f32.mrb[0].mxu0  ;;  %v5451_v14 = vld [vmem:[%s6141_s7 + $0x3ec] ss:$16 sps:$4 sm:$0xff]  }
 0x189   : > { %v3526_v22 = vpop.f32.mrb[0].mxu1  ;;  %v3487_v30 = vpop.f32.mrb[1].mxu0 }
 0x18a   : > { %v6546_v29 = vadd.f32 %v3526_v22, %v3485_v21  ;;  %v3528_v31 = vpop.f32.mrb[1].mxu1  ;;  %v3489_v33 = vpop.f32.mrb[2].mxu0  ;;  %3790 = vmatpush1.bf16.msra.mxu0 %v5386_v15  ;;  %v5446_v15 = vld [vmem:[%s6141_s7 + $0x1e8] ss:$16 sps:$4 sm:$0xff]  }
 0x18b   : > { %v6548_v32 = vadd.f32 %v3528_v31, %v3487_v30  ;;  %v3530_v34 = vpop.f32.mrb[2].mxu1  ;;  %3831 = vmatpush1.bf16.msra.mxu1 %v5389_v16  ;;  %v3490_v35 = vpop.f32.mrb[3].mxu0  ;;  %3791 = vmatprep.subr.bf16.mxu0 %v5394_v19  ;;  %v5449_v16 = vld [vmem:[%s6141_s7 + $0x3e8] ss:$16 sps:$4 sm:$0xff]   ;;  %v5454_v19 = vld [vmem:[%s6141_s7 + $0x40c] ss:$16 sps:$4 sm:$0xff]  }
 0x18c   : > { %v3531_v36 = vpop.f32.mrb[3].mxu1  ;;  %3832 = vmatprep.subr.bf16.mxu1 %v5397_v20  ;;  %v5457_v20 = vld [vmem:[%s6141_s7 + $0x60c] ss:$16 sps:$4 sm:$0xff]   ;;  %v5452_v21 = vld [vmem:[%s6141_s7 + $0x408] ss:$16 sps:$4 sm:$0xff]  }
 0x18d   : > { %v5455_v22 = vld [vmem:[%s6141_s7 + $0x608] ss:$16 sps:$4 sm:$0xff]   ;;  %v5466_v33 = vld [vmem:[%s6141_s7 + $0x44c] ss:$16 sps:$4 sm:$0xff]  }
 0x18e   : > { %3792 = vmatpush1.bf16.msra.mxu0 %v5392_v27  ;;  %v5460_v27 = vld [vmem:[%s6141_s7 + $0x42c] ss:$16 sps:$4 sm:$0xff]   ;;  %v5458_v30 = vld [vmem:[%s6141_s7 + $0x428] ss:$16 sps:$4 sm:$0xff]  }
 0x18f   : > { %3833 = vmatpush1.bf16.msra.mxu1 %v5395_v28  ;;  %3793 = vmatprep.subr.bf16.mxu0 %v5400_v43  ;;  %v5463_v28 = vld [vmem:[%s6141_s7 + $0x62c] ss:$16 sps:$4 sm:$0xff]   ;;  %v5461_v31 = vld [vmem:[%s6141_s7 + $0x628] ss:$16 sps:$4 sm:$0xff]  }
 0x190   : > { %3834 = vmatprep.subr.bf16.mxu1 %v5403_v44  ;;  %v5469_v34 = vld [vmem:[%s6141_s7 + $0x64c] ss:$16 sps:$4 sm:$0xff]   ;;  %v5470_v43 = vld [vmem:[%s6141_s7 + $0x468] ss:$16 sps:$4 sm:$0xff]  }
 0x191   : > { %v5472_v35 = vld [vmem:[%s6141_s7 + $0x46c] ss:$16 sps:$4 sm:$0xff]  }
 0x192   : > { %3794 = vmatpush1.bf16.msra.mxu0 %v5398_v45  ;;  %v5475_v36 = vld [vmem:[%s6141_s7 + $0x66c] ss:$16 sps:$4 sm:$0xff]   ;;  %v5476_v45 = vld [vmem:[%s6141_s7 + $0x488] ss:$16 sps:$4 sm:$0xff]  }
 0x193   : > { %3835 = vmatpush1.bf16.msra.mxu1 %v5401_v46  ;;  %3795 = vmatprep.subr.bf16.mxu0 %v5406_v47  ;;  %v5481_v44 = vld [vmem:[%s6141_s7 + $0x68c] ss:$16 sps:$4 sm:$0xff]   ;;  %v5479_v46 = vld [vmem:[%s6141_s7 + $0x688] ss:$16 sps:$4 sm:$0xff]  }
 0x194   : > { %3836 = vmatprep.subr.bf16.mxu1 %v5409_v49  ;;  %v5484_v47 = vld [vmem:[%s6141_s7 + $0x4ac] ss:$16 sps:$4 sm:$0xff]  }
 0x195   : > { %v5487_v49 = vld [vmem:[%s6141_s7 + $0x6ac] ss:$16 sps:$4 sm:$0xff]  }
 0x196   : > { %3796 = vmatpush1.bf16.msra.mxu0 %v5404_v50  ;;  %v5482_v50 = vld [vmem:[%s6141_s7 + $0x4a8] ss:$16 sps:$4 sm:$0xff]  }
 0x197   : > { %3837 = vmatpush1.bf16.msra.mxu1 %v5407_v51  ;;  %3797 = vmatprep.subr.bf16.mxu0 %v5412_v53  ;;  %v5485_v51 = vld [vmem:[%s6141_s7 + $0x6a8] ss:$16 sps:$4 sm:$0xff]   ;;  %v5490_v53 = vld [vmem:[%s6141_s7 + $0x4cc] ss:$16 sps:$4 sm:$0xff]  }
 0x198   : > { %3838 = vmatprep.subr.bf16.mxu1 %v5415_v54  ;;  %v5493_v54 = vld [vmem:[%s6141_s7 + $0x6cc] ss:$16 sps:$4 sm:$0xff]  }
 0x19a   : > { %3798 = vmatpush1.bf16.msra.mxu0 %v5410_v55 }
 0x19b   : > { %3839 = vmatpush1.bf16.msra.mxu1 %v5413_v56  ;;  %3799 = vmatprep.subr.bf16.mxu0 %v5418_v57 }
 0x19c   : > { %3840 = vmatprep.subr.bf16.mxu1 %v5421_v58 }
 0x19e   : > { %3800 = vmatpush1.bf16.msra.mxu0 %v5416_v61 }
 0x19f   : > { %3841 = vmatpush1.bf16.msra.mxu1 %v5419_v62  ;;  %3801 = vmatprep.subr.bf16.mxu0 %v5424_v63 }
 0x1a0   : > { %3842 = vmatprep.subr.bf16.mxu1 %v5427_v0 }
 0x1a2   : > { %3802 = vmatpush1.bf16.msra.mxu0 %v5422_v41  ;;  %v5488_v41 = vld [vmem:[%s6141_s7 + $0x4c8] ss:$16 sps:$4 sm:$0xff]  }
 0x1a3   : > { %3843 = vmatpush1.bf16.msra.mxu1 %v5425_v1  ;;  %3803 = vmatprep.subr.bf16.mxu0 %v5430_v42  ;;  %v5491_v1 = vld [vmem:[%s6141_s7 + $0x6c8] ss:$16 sps:$4 sm:$0xff]  }
 0x1a4   : > { %3844 = vmatprep.subr.bf16.mxu1 %v5433_v2 }
 0x1a6   : > { %3804 = vmatpush1.bf16.msra.mxu0 %v5428_v3 }
 0x1a7   : > { %3845 = vmatpush1.bf16.msra.mxu1 %v5431_v4  ;;  %3805 = vmatprep.subr.bf16.mxu0 %v5436_v5  ;;  %v5494_v5 = vld [vmem:[%s6141_s7 + $0x4e8] ss:$16 sps:$4 sm:$0xff]  }
 0x1a8   : > { %3846 = vmatprep.subr.bf16.mxu1 %v5439_v6  ;;  %v5497_v6 = vld [vmem:[%s6141_s7 + $0x6e8] ss:$16 sps:$4 sm:$0xff]  }
 0x1aa   : > { %3806 = vmatpush1.bf16.msra.mxu0 %v5434_v48  ;;  %v5502_v48 = vld [vmem:[%s6141_s7 + $0x50c] ss:$16 sps:$4 sm:$0xff]  }
 0x1ab   : > { %3847 = vmatpush1.bf16.msra.mxu1 %v5437_v9  ;;  %3807 = vmatprep.subr.bf16.mxu0 %v5442_v52  ;;  %v5505_v9 = vld [vmem:[%s6141_s7 + $0x70c] ss:$16 sps:$4 sm:$0xff]   ;;  %v5500_v52 = vld [vmem:[%s6141_s7 + $0x508] ss:$16 sps:$4 sm:$0xff]  }
 0x1ac   : > { %3848 = vmatprep.subr.bf16.mxu1 %v5445_v10  ;;  %v5503_v10 = vld [vmem:[%s6141_s7 + $0x708] ss:$16 sps:$4 sm:$0xff]  }
 0x1ae   : > { %3808 = vmatpush1.bf16.msra.mxu0 %v5440_v11  ;;  %v5508_v11 = vld [vmem:[%s6141_s7 + $0x52c] ss:$16 sps:$4 sm:$0xff]  }
 0x1af   : > { %3849 = vmatpush1.bf16.msra.mxu1 %v5443_v12  ;;  %3809 = vmatprep.subr.bf16.mxu0 %v5448_v13  ;;  %v5511_v12 = vld [vmem:[%s6141_s7 + $0x72c] ss:$16 sps:$4 sm:$0xff]   ;;  %v5506_v13 = vld [vmem:[%s6141_s7 + $0x528] ss:$16 sps:$4 sm:$0xff]  }
 0x1b0   : > { %3850 = vmatprep.subr.bf16.mxu1 %v5451_v14  ;;  %v5509_v14 = vld [vmem:[%s6141_s7 + $0x728] ss:$16 sps:$4 sm:$0xff]  }
 0x1b2   : > { %3810 = vmatpush1.bf16.msra.mxu0 %v5446_v15  ;;  %v5514_v15 = vld [vmem:[%s6141_s7 + $0x54c] ss:$16 sps:$4 sm:$0xff]  }
 0x1b3   : > { %3851 = vmatpush1.bf16.msra.mxu1 %v5449_v16  ;;  %3861 = vmatprep.subr.bf16.mxu0 %v5454_v19  ;;  %v5517_v16 = vld [vmem:[%s6141_s7 + $0x74c] ss:$16 sps:$4 sm:$0xff]   ;;  %v5512_v19 = vld [vmem:[%s6141_s7 + $0x548] ss:$16 sps:$4 sm:$0xff]  }
 0x1b4   : > { %3902 = vmatprep.subr.bf16.mxu1 %v5457_v20  ;;  %v5515_v20 = vld [vmem:[%s6141_s7 + $0x748] ss:$16 sps:$4 sm:$0xff]  }
 0x1b5   : > { %3812 = vmatmul.mubr.bf16.vlgmr.msra.gmra.mrb[16].mxu0 %v6242_v7  ;;  %v5464_v7 = vld [vmem:[%s6141_s7 + $0x448] ss:$16 sps:$4 sm:$0xff]  }
 0x1b6   : > { %3853 = vmatmul.mubr.bf16.vlgmr.msra.gmra.mrb[16].mxu1 %v6244_v8  ;;  %3862 = vmatpush1.bf16.msra.mxu0 %v5452_v21  ;;  %v5467_v8 = vld [vmem:[%s6141_s7 + $0x648] ss:$16 sps:$4 sm:$0xff]   ;;  %v5520_v21 = vld [vmem:[%s6141_s7 + $0x56c] ss:$16 sps:$4 sm:$0xff]  }
 0x1b7   : > { %3903 = vmatpush1.bf16.msra.mxu1 %v5455_v22  ;;  %3863 = vmatprep.subr.bf16.mxu0 %v5460_v27  ;;  %v5523_v22 = vld [vmem:[%s6141_s7 + $0x76c] ss:$16 sps:$4 sm:$0xff]   ;;  %v5518_v27 = vld [vmem:[%s6141_s7 + $0x568] ss:$16 sps:$4 sm:$0xff]  }
 0x1b8   : > { %3904 = vmatprep.subr.bf16.mxu1 %v5463_v28  ;;  %3893 = vmatprep.mubr.bf16.mxu0 %v6282_v37  ;;  %v5473_v37 = vld [vmem:[%s6141_s7 + $0x668] ss:$16 sps:$4 sm:$0xff]  }
 0x1b9   : > { %3934 = vmatprep.mubr.bf16.mxu1 %v6286_v38  ;;  %v5478_v38 = vld [vmem:[%s6141_s7 + $0x48c] ss:$16 sps:$4 sm:$0xff]   ;;  %v5521_v28 = vld [vmem:[%s6141_s7 + $0x768] ss:$16 sps:$4 sm:$0xff]  }
 0x1ba   : > { %3864 = vmatpush1.bf16.msra.mxu0 %v5458_v30  ;;  %v5526_v30 = vld [vmem:[%s6141_s7 + $0x58c] ss:$16 sps:$4 sm:$0xff]  }
 0x1bb   : > { %3905 = vmatpush1.bf16.msra.mxu1 %v5461_v31  ;;  %3865 = vmatprep.subr.bf16.mxu0 %v5466_v33  ;;  %v5529_v31 = vld [vmem:[%s6141_s7 + $0x78c] ss:$16 sps:$4 sm:$0xff]   ;;  %v5524_v33 = vld [vmem:[%s6141_s7 + $0x588] ss:$16 sps:$4 sm:$0xff]  }
 0x1bc   : > { %3906 = vmatprep.subr.bf16.mxu1 %v5469_v34  ;;  %v5527_v34 = vld [vmem:[%s6141_s7 + $0x788] ss:$16 sps:$4 sm:$0xff]  }
 0x1be   : > { %3866 = vmatpush1.bf16.msra.mxu0 %v5464_v7  ;;  %v5532_v7 = vld [vmem:[%s6141_s7 + $0x5ac] ss:$16 sps:$4 sm:$0xff]  }
 0x1bf   : > { %3907 = vmatpush1.bf16.msra.mxu1 %v5467_v8  ;;  %3867 = vmatprep.subr.bf16.mxu0 %v5472_v35  ;;  %v5535_v8 = vld [vmem:[%s6141_s7 + $0x7ac] ss:$16 sps:$4 sm:$0xff]   ;;  %v5530_v35 = vld [vmem:[%s6141_s7 + $0x5a8] ss:$16 sps:$4 sm:$0xff]  }
 0x1c0   : > { %3908 = vmatprep.subr.bf16.mxu1 %v5475_v36  ;;  %v5533_v36 = vld [vmem:[%s6141_s7 + $0x7a8] ss:$16 sps:$4 sm:$0xff]  }
 0x1c2   : > { %3868 = vmatpush1.bf16.msra.mxu0 %v5470_v43  ;;  %v5538_v43 = vld [vmem:[%s6141_s7 + $0x5cc] ss:$16 sps:$4 sm:$0xff]  }
 0x1c3   : > { %3909 = vmatpush1.bf16.msra.mxu1 %v5473_v37  ;;  %3869 = vmatprep.subr.bf16.mxu0 %v5478_v38  ;;  %v5541_v37 = vld [vmem:[%s6141_s7 + $0x7cc] ss:$16 sps:$4 sm:$0xff]   ;;  %v5536_v38 = vld [vmem:[%s6141_s7 + $0x5c8] ss:$16 sps:$4 sm:$0xff]  }
 0x1c4   : > { %3910 = vmatprep.subr.bf16.mxu1 %v5481_v44  ;;  %v5539_v44 = vld [vmem:[%s6141_s7 + $0x7c8] ss:$16 sps:$4 sm:$0xff]  }
 0x1c6   : > { %3870 = vmatpush1.bf16.msra.mxu0 %v5476_v45  ;;  %v5544_v45 = vld [vmem:[%s6141_s7 + $0x5ec] ss:$16 sps:$4 sm:$0xff]  }
 0x1c7   : > { %3911 = vmatpush1.bf16.msra.mxu1 %v5479_v46  ;;  %3871 = vmatprep.subr.bf16.mxu0 %v5484_v47  ;;  %v5547_v46 = vld [vmem:[%s6141_s7 + $0x7ec] ss:$16 sps:$4 sm:$0xff]   ;;  %v5542_v47 = vld [vmem:[%s6141_s7 + $0x5e8] ss:$16 sps:$4 sm:$0xff]  }
 0x1c8   : > { %3912 = vmatprep.subr.bf16.mxu1 %v5487_v49  ;;  %v3567_v55 = vpop.f32.mrb[4].mxu0  ;;  %v5545_v49 = vld [vmem:[%s6141_s7 + $0x7e8] ss:$16 sps:$4 sm:$0xff]  }
 0x1c9   : > { %v3608_v56 = vpop.f32.mrb[4].mxu1  ;;  %v3568_v57 = vadd.f32 %v3567_v55, %v6546_v29  ;;  %v3569_v58 = vpop.f32.mrb[5].mxu0  ;;  %v5496_v29 = vld [vmem:[%s6141_s7 + $0x4ec] ss:$16 sps:$4 sm:$0xff]  }
 0x1ca   : > { %v3610_v61 = vpop.f32.mrb[5].mxu1  ;;  %v3570_v62 = vadd.f32 %v3569_v58, %v6548_v32  ;;  %v3571_v63 = vpop.f32.mrb[6].mxu0  ;;  %3872 = vmatpush1.bf16.msra.mxu0 %v5482_v50  ;;  %v5499_v32 = vld [vmem:[%s6141_s7 + $0x6ec] ss:$16 sps:$4 sm:$0xff]   ;;  %v5557_v58 = vld [vmem:[%s6141_s7 + $0xa28] ss:$16 sps:$4 sm:$0xff]  }
 0x1cb   : > { %v3612_v0 = vpop.f32.mrb[6].mxu1  ;;  %3913 = vmatpush1.bf16.msra.mxu1 %v5485_v51  ;;  %v6620_v42 = vadd.f32 %v3608_v56, %v3568_v57  ;;  %v3572_v2 = vpop.f32.mrb[7].mxu0  ;;  %3873 = vmatprep.subr.bf16.mxu0 %v5490_v53  ;;  %v5550_v50 = vld [vmem:[%s6141_s7 + $0x80c] ss:$16 sps:$4 sm:$0xff]   ;;  %v5548_v53 = vld [vmem:[%s6141_s7 + $0x808] ss:$16 sps:$4 sm:$0xff]  }
 0x1cc   : > { %v3613_v3 = vpop.f32.mrb[7].mxu1  ;;  %3914 = vmatprep.subr.bf16.mxu1 %v5493_v54  ;;  %v6624_v4 = vadd.f32 %v3610_v61, %v3570_v62  ;;  %v5553_v51 = vld [vmem:[%s6141_s7 + $0xa0c] ss:$16 sps:$4 sm:$0xff]   ;;  %v5551_v54 = vld [vmem:[%s6141_s7 + $0xa08] ss:$16 sps:$4 sm:$0xff]  }
 0x1cd   : > { %v5556_v55 = vld [vmem:[%s6141_s7 + $0x82c] ss:$16 sps:$4 sm:$0xff]   ;;  %v5554_v57 = vld [vmem:[%s6141_s7 + $0x828] ss:$16 sps:$4 sm:$0xff]  }
 0x1ce   : > { %3874 = vmatpush1.bf16.msra.mxu0 %v5488_v41  ;;  %v5559_v56 = vld [vmem:[%s6141_s7 + $0xa2c] ss:$16 sps:$4 sm:$0xff]   ;;  %v5566_v41 = vld [vmem:[%s6141_s7 + $0x868] ss:$16 sps:$4 sm:$0xff]  }
 0x1cf   : > { %3915 = vmatpush1.bf16.msra.mxu1 %v5491_v1  ;;  %3875 = vmatprep.subr.bf16.mxu0 %v5496_v29  ;;  %v5562_v61 = vld [vmem:[%s6141_s7 + $0x84c] ss:$16 sps:$4 sm:$0xff]   ;;  %v5572_v2 = vld [vmem:[%s6141_s7 + $0x888] ss:$16 sps:$4 sm:$0xff]  }
 0x1d0   : > { %3916 = vmatprep.subr.bf16.mxu1 %v5499_v32  ;;  %v5565_v62 = vld [vmem:[%s6141_s7 + $0xa4c] ss:$16 sps:$4 sm:$0xff]   ;;  %v5575_v3 = vld [vmem:[%s6141_s7 + $0xa88] ss:$16 sps:$4 sm:$0xff]  }
 0x1d1   : > { %v5568_v63 = vld [vmem:[%s6141_s7 + $0x86c] ss:$16 sps:$4 sm:$0xff]  }
 0x1d2   : > { %3876 = vmatpush1.bf16.msra.mxu0 %v5494_v5  ;;  %v5571_v0 = vld [vmem:[%s6141_s7 + $0xa6c] ss:$16 sps:$4 sm:$0xff]   ;;  %v5578_v5 = vld [vmem:[%s6141_s7 + $0x8a8] ss:$16 sps:$4 sm:$0xff]  }
 0x1d3   : > { %3917 = vmatpush1.bf16.msra.mxu1 %v5497_v6  ;;  %3877 = vmatprep.subr.bf16.mxu0 %v5502_v48  ;;  %v5577_v1 = vld [vmem:[%s6141_s7 + $0xa8c] ss:$16 sps:$4 sm:$0xff]   ;;  %v5581_v6 = vld [vmem:[%s6141_s7 + $0xaa8] ss:$16 sps:$4 sm:$0xff]  }
 0x1d4   : > { %3918 = vmatprep.subr.bf16.mxu1 %v5505_v9  ;;  %v5580_v29 = vld [vmem:[%s6141_s7 + $0x8ac] ss:$16 sps:$4 sm:$0xff]  }
 0x1d5   : > { %v5583_v32 = vld [vmem:[%s6141_s7 + $0xaac] ss:$16 sps:$4 sm:$0xff]  }
 0x1d6   : > { %3878 = vmatpush1.bf16.msra.mxu0 %v5500_v52  ;;  %v5586_v48 = vld [vmem:[%s6141_s7 + $0x8cc] ss:$16 sps:$4 sm:$0xff]  }
 0x1d7   : > { %3919 = vmatpush1.bf16.msra.mxu1 %v5503_v10  ;;  %3879 = vmatprep.subr.bf16.mxu0 %v5508_v11  ;;  %v5589_v9 = vld [vmem:[%s6141_s7 + $0xacc] ss:$16 sps:$4 sm:$0xff]  }
 0x1d8   : > { %3920 = vmatprep.subr.bf16.mxu1 %v5511_v12 }
 0x1da   : > { %3880 = vmatpush1.bf16.msra.mxu0 %v5506_v13 }
 0x1db   : > { %3921 = vmatpush1.bf16.msra.mxu1 %v5509_v14  ;;  %3881 = vmatprep.subr.bf16.mxu0 %v5514_v15 }
 0x1dc   : > { %3922 = vmatprep.subr.bf16.mxu1 %v5517_v16 }
 0x1de   : > { %3882 = vmatpush1.bf16.msra.mxu0 %v5512_v19  ;;  %v5584_v19 = vld [vmem:[%s6141_s7 + $0x8c8] ss:$16 sps:$4 sm:$0xff]  }
 0x1df   : > { %3923 = vmatpush1.bf16.msra.mxu1 %v5515_v20  ;;  %3883 = vmatprep.subr.bf16.mxu0 %v5520_v21  ;;  %v5587_v20 = vld [vmem:[%s6141_s7 + $0xac8] ss:$16 sps:$4 sm:$0xff]  }
 0x1e0   : > { %3924 = vmatprep.subr.bf16.mxu1 %v5523_v22 }
 0x1e2   : > { %3884 = vmatpush1.bf16.msra.mxu0 %v5518_v27 }
 0x1e3   : > { %3925 = vmatpush1.bf16.msra.mxu1 %v5521_v28  ;;  %3885 = vmatprep.subr.bf16.mxu0 %v5526_v30  ;;  %v5590_v30 = vld [vmem:[%s6141_s7 + $0x8e8] ss:$16 sps:$4 sm:$0xff]  }
 0x1e4   : > { %3926 = vmatprep.subr.bf16.mxu1 %v5529_v31  ;;  %v5593_v31 = vld [vmem:[%s6141_s7 + $0xae8] ss:$16 sps:$4 sm:$0xff]  }
 0x1e6   : > { %3886 = vmatpush1.bf16.msra.mxu0 %v5524_v33  ;;  %v5598_v33 = vld [vmem:[%s6141_s7 + $0x90c] ss:$16 sps:$4 sm:$0xff]  }
 0x1e7   : > { %3927 = vmatpush1.bf16.msra.mxu1 %v5527_v34  ;;  %3887 = vmatprep.subr.bf16.mxu0 %v5532_v7  ;;  %v5601_v34 = vld [vmem:[%s6141_s7 + $0xb0c] ss:$16 sps:$4 sm:$0xff]   ;;  %v5596_v7 = vld [vmem:[%s6141_s7 + $0x908] ss:$16 sps:$4 sm:$0xff]  }
 0x1e8   : > { %3928 = vmatprep.subr.bf16.mxu1 %v5535_v8  ;;  %v5599_v8 = vld [vmem:[%s6141_s7 + $0xb08] ss:$16 sps:$4 sm:$0xff]  }
 0x1ea   : > { %3888 = vmatpush1.bf16.msra.mxu0 %v5530_v35  ;;  %v5604_v35 = vld [vmem:[%s6141_s7 + $0x92c] ss:$16 sps:$4 sm:$0xff]  }
 0x1eb   : > { %3929 = vmatpush1.bf16.msra.mxu1 %v5533_v36  ;;  %3889 = vmatprep.subr.bf16.mxu0 %v5538_v43  ;;  %v5607_v36 = vld [vmem:[%s6141_s7 + $0xb2c] ss:$16 sps:$4 sm:$0xff]   ;;  %v5602_v43 = vld [vmem:[%s6141_s7 + $0x928] ss:$16 sps:$4 sm:$0xff]  }
 0x1ec   : > { %3930 = vmatprep.subr.bf16.mxu1 %v5541_v37  ;;  %v5605_v37 = vld [vmem:[%s6141_s7 + $0xb28] ss:$16 sps:$4 sm:$0xff]  }
 0x1ee   : > { %3890 = vmatpush1.bf16.msra.mxu0 %v5536_v38  ;;  %v5610_v38 = vld [vmem:[%s6141_s7 + $0x94c] ss:$16 sps:$4 sm:$0xff]  }
 0x1ef   : > { %3931 = vmatpush1.bf16.msra.mxu1 %v5539_v44  ;;  %3891 = vmatprep.subr.bf16.mxu0 %v5544_v45  ;;  %v5613_v44 = vld [vmem:[%s6141_s7 + $0xb4c] ss:$16 sps:$4 sm:$0xff]   ;;  %v5608_v45 = vld [vmem:[%s6141_s7 + $0x948] ss:$16 sps:$4 sm:$0xff]  }
 0x1f0   : > { %3932 = vmatprep.subr.bf16.mxu1 %v5547_v46  ;;  %v5611_v46 = vld [vmem:[%s6141_s7 + $0xb48] ss:$16 sps:$4 sm:$0xff]  }
 0x1f2   : > { %3892 = vmatpush1.bf16.msra.mxu0 %v5542_v47  ;;  %v5616_v47 = vld [vmem:[%s6141_s7 + $0x96c] ss:$16 sps:$4 sm:$0xff]  }
 0x1f3   : > { %3933 = vmatpush1.bf16.msra.mxu1 %v5545_v49  ;;  %3943 = vmatprep.subr.bf16.mxu0 %v5550_v50  ;;  %v5619_v49 = vld [vmem:[%s6141_s7 + $0xb6c] ss:$16 sps:$4 sm:$0xff]   ;;  %v5614_v50 = vld [vmem:[%s6141_s7 + $0x968] ss:$16 sps:$4 sm:$0xff]  }
 0x1f4   : > { %3984 = vmatprep.subr.bf16.mxu1 %v5553_v51  ;;  %v5617_v51 = vld [vmem:[%s6141_s7 + $0xb68] ss:$16 sps:$4 sm:$0xff]  }
 0x1f5   : > { %3894 = vmatmul.mubr.bf16.vlgmr.msra.gmra.mrb[20].mxu0 %v6330_v17  ;;  %v5560_v17 = vld [vmem:[%s6141_s7 + $0x848] ss:$16 sps:$4 sm:$0xff]  }
 0x1f6   : > { %3935 = vmatmul.mubr.bf16.vlgmr.msra.gmra.mrb[20].mxu1 %v6334_v18  ;;  %3944 = vmatpush1.bf16.msra.mxu0 %v5548_v53  ;;  %v5563_v18 = vld [vmem:[%s6141_s7 + $0xa48] ss:$16 sps:$4 sm:$0xff]   ;;  %v5622_v53 = vld [vmem:[%s6141_s7 + $0x98c] ss:$16 sps:$4 sm:$0xff]  }
 0x1f7   : > { %3985 = vmatpush1.bf16.msra.mxu1 %v5551_v54  ;;  %3945 = vmatprep.subr.bf16.mxu0 %v5556_v55  ;;  %v5625_v54 = vld [vmem:[%s6141_s7 + $0xb8c] ss:$16 sps:$4 sm:$0xff]   ;;  %v5620_v55 = vld [vmem:[%s6141_s7 + $0x988] ss:$16 sps:$4 sm:$0xff]  }
 0x1f8   : > { %3986 = vmatprep.subr.bf16.mxu1 %v5559_v56  ;;  %3975 = vmatprep.mubr.bf16.mxu0 %v6348_v25  ;;  %v5569_v25 = vld [vmem:[%s6141_s7 + $0xa68] ss:$16 sps:$4 sm:$0xff]  }
 0x1f9   : > { %4016 = vmatprep.mubr.bf16.mxu1 %v6352_v26  ;;  %v5574_v26 = vld [vmem:[%s6141_s7 + $0x88c] ss:$16 sps:$4 sm:$0xff]   ;;  %v5623_v56 = vld [vmem:[%s6141_s7 + $0xb88] ss:$16 sps:$4 sm:$0xff]  }
 0x1fa   : > { %3946 = vmatpush1.bf16.msra.mxu0 %v5554_v57  ;;  %v5628_v57 = vld [vmem:[%s6141_s7 + $0x9ac] ss:$16 sps:$4 sm:$0xff]  }
 0x1fb   : > { %3987 = vmatpush1.bf16.msra.mxu1 %v5557_v58  ;;  %3947 = vmatprep.subr.bf16.mxu0 %v5562_v61  ;;  %v5631_v58 = vld [vmem:[%s6141_s7 + $0xbac] ss:$16 sps:$4 sm:$0xff]   ;;  %v5626_v61 = vld [vmem:[%s6141_s7 + $0x9a8] ss:$16 sps:$4 sm:$0xff]  }
 0x1fc   : > { %3988 = vmatprep.subr.bf16.mxu1 %v5565_v62  ;;  %v5629_v62 = vld [vmem:[%s6141_s7 + $0xba8] ss:$16 sps:$4 sm:$0xff]  }
 0x1fe   : > { %3948 = vmatpush1.bf16.msra.mxu0 %v5560_v17  ;;  %v5634_v17 = vld [vmem:[%s6141_s7 + $0x9cc] ss:$16 sps:$4 sm:$0xff]  }
 0x1ff   : > { %3989 = vmatpush1.bf16.msra.mxu1 %v5563_v18  ;;  %3949 = vmatprep.subr.bf16.mxu0 %v5568_v63  ;;  %v5637_v18 = vld [vmem:[%s6141_s7 + $0xbcc] ss:$16 sps:$4 sm:$0xff]   ;;  %v5632_v63 = vld [vmem:[%s6141_s7 + $0x9c8] ss:$16 sps:$4 sm:$0xff]  }
 0x200   : > { %3990 = vmatprep.subr.bf16.mxu1 %v5571_v0  ;;  %v5635_v0 = vld [vmem:[%s6141_s7 + $0xbc8] ss:$16 sps:$4 sm:$0xff]  }
 0x202   : > { %3950 = vmatpush1.bf16.msra.mxu0 %v5566_v41  ;;  %v5640_v41 = vld [vmem:[%s6141_s7 + $0x9ec] ss:$16 sps:$4 sm:$0xff]  }
 0x203   : > { %3991 = vmatpush1.bf16.msra.mxu1 %v5569_v25  ;;  %3951 = vmatprep.subr.bf16.mxu0 %v5574_v26  ;;  %v5643_v25 = vld [vmem:[%s6141_s7 + $0xbec] ss:$16 sps:$4 sm:$0xff]   ;;  %v5638_v26 = vld [vmem:[%s6141_s7 + $0x9e8] ss:$16 sps:$4 sm:$0xff]  }
 0x204   : > { %3992 = vmatprep.subr.bf16.mxu1 %v5577_v1  ;;  %v5641_v1 = vld [vmem:[%s6141_s7 + $0xbe8] ss:$16 sps:$4 sm:$0xff]  }
 0x206   : > { %3952 = vmatpush1.bf16.msra.mxu0 %v5572_v2  ;;  %v5646_v2 = vld [vmem:[%s6141_s7 + $0xc0c] ss:$16 sps:$4 sm:$0xff]  }
 0x207   : > { %3993 = vmatpush1.bf16.msra.mxu1 %v5575_v3  ;;  %3953 = vmatprep.subr.bf16.mxu0 %v5580_v29  ;;  %v5649_v3 = vld [vmem:[%s6141_s7 + $0xe0c] ss:$16 sps:$4 sm:$0xff]   ;;  %v5644_v29 = vld [vmem:[%s6141_s7 + $0xc08] ss:$16 sps:$4 sm:$0xff]  }
 0x208   : > { %3994 = vmatprep.subr.bf16.mxu1 %v5583_v32  ;;  %v3649_v52 = vpop.f32.mrb[8].mxu0  ;;  %v5647_v32 = vld [vmem:[%s6141_s7 + $0xe08] ss:$16 sps:$4 sm:$0xff]  }
 0x209   : > { %v3690_v10 = vpop.f32.mrb[8].mxu1  ;;  %v3650_v11 = vadd.f32 %v3649_v52, %v6620_v42  ;;  %v3651_v12 = vpop.f32.mrb[9].mxu0  ;;  %v5592_v42 = vld [vmem:[%s6141_s7 + $0x8ec] ss:$16 sps:$4 sm:$0xff]  }
 0x20a   : > { %v3692_v13 = vpop.f32.mrb[9].mxu1  ;;  %v3652_v14 = vadd.f32 %v3651_v12, %v6624_v4  ;;  %v3653_v15 = vpop.f32.mrb[10].mxu0  ;;  %3954 = vmatpush1.bf16.msra.mxu0 %v5578_v5  ;;  %v5595_v4 = vld [vmem:[%s6141_s7 + $0xaec] ss:$16 sps:$4 sm:$0xff]  }
 0x20b   : > { %v3694_v16 = vpop.f32.mrb[10].mxu1  ;;  %3995 = vmatpush1.bf16.msra.mxu1 %v5581_v6  ;;  %v6694_v21 = vadd.f32 %v3690_v10, %v3650_v11  ;;  %v3654_v22 = vpop.f32.mrb[11].mxu0  ;;  %3955 = vmatprep.subr.bf16.mxu0 %v5586_v48  ;;  %v5652_v5 = vld [vmem:[%s6141_s7 + $0xc2c] ss:$16 sps:$4 sm:$0xff]   ;;  %v5650_v48 = vld [vmem:[%s6141_s7 + $0xc28] ss:$16 sps:$4 sm:$0xff]  }
 0x20c   : > { %v3695_v27 = vpop.f32.mrb[11].mxu1  ;;  %3996 = vmatprep.subr.bf16.mxu1 %v5589_v9  ;;  %v6698_v28 = vadd.f32 %v3692_v13, %v3652_v14  ;;  %v5655_v6 = vld [vmem:[%s6141_s7 + $0xe2c] ss:$16 sps:$4 sm:$0xff]   ;;  %v5653_v9 = vld [vmem:[%s6141_s7 + $0xe28] ss:$16 sps:$4 sm:$0xff]  }
 0x20d   : > { %v5658_v52 = vld [vmem:[%s6141_s7 + $0xc4c] ss:$16 sps:$4 sm:$0xff]   ;;  %v5662_v13 = vld [vmem:[%s6141_s7 + $0xc68] ss:$16 sps:$4 sm:$0xff]  }
 0x20e   : > { %3956 = vmatpush1.bf16.msra.mxu0 %v5584_v19  ;;  %v5661_v10 = vld [vmem:[%s6141_s7 + $0xe4c] ss:$16 sps:$4 sm:$0xff]   ;;  %v5668_v15 = vld [vmem:[%s6141_s7 + $0xc88] ss:$16 sps:$4 sm:$0xff]  }
 0x20f   : > { %3997 = vmatpush1.bf16.msra.mxu1 %v5587_v20  ;;  %3957 = vmatprep.subr.bf16.mxu0 %v5592_v42  ;;  %v5664_v11 = vld [vmem:[%s6141_s7 + $0xc6c] ss:$16 sps:$4 sm:$0xff]   ;;  %v5671_v16 = vld [vmem:[%s6141_s7 + $0xe88] ss:$16 sps:$4 sm:$0xff]  }
 0x210   : > { %3998 = vmatprep.subr.bf16.mxu1 %v5595_v4  ;;  %v5667_v12 = vld [vmem:[%s6141_s7 + $0xe6c] ss:$16 sps:$4 sm:$0xff]   ;;  %v5674_v22 = vld [vmem:[%s6141_s7 + $0xca8] ss:$16 sps:$4 sm:$0xff]  }
 0x211   : > { %v5673_v14 = vld [vmem:[%s6141_s7 + $0xe8c] ss:$16 sps:$4 sm:$0xff]   ;;  %v5677_v27 = vld [vmem:[%s6141_s7 + $0xea8] ss:$16 sps:$4 sm:$0xff]  }
 0x212   : > { %3958 = vmatpush1.bf16.msra.mxu0 %v5590_v30  ;;  %v5676_v19 = vld [vmem:[%s6141_s7 + $0xcac] ss:$16 sps:$4 sm:$0xff]  }
 0x213   : > { %3999 = vmatpush1.bf16.msra.mxu1 %v5593_v31  ;;  %3959 = vmatprep.subr.bf16.mxu0 %v5598_v33  ;;  %v5679_v20 = vld [vmem:[%s6141_s7 + $0xeac] ss:$16 sps:$4 sm:$0xff]  }
 0x214   : > { %4000 = vmatprep.subr.bf16.mxu1 %v5601_v34  ;;  %v5682_v42 = vld [vmem:[%s6141_s7 + $0xccc] ss:$16 sps:$4 sm:$0xff]  }
 0x215   : > { %v5685_v4 = vld [vmem:[%s6141_s7 + $0xecc] ss:$16 sps:$4 sm:$0xff]  }
 0x216   : > { %3960 = vmatpush1.bf16.msra.mxu0 %v5596_v7 }
 0x217   : > { %4001 = vmatpush1.bf16.msra.mxu1 %v5599_v8  ;;  %3961 = vmatprep.subr.bf16.mxu0 %v5604_v35  ;;  %v5680_v8 = vld [vmem:[%s6141_s7 + $0xcc8] ss:$16 sps:$4 sm:$0xff]   ;;  %v311_v35 = vld [vmem:[#allocation2] sm:$0xff] }
 0x218   : > { %4002 = vmatprep.subr.bf16.mxu1 %v5607_v36 }
 0x21a   : > { %3962 = vmatpush1.bf16.msra.mxu0 %v5602_v43  ;;  %v312_v43 = vld [vmem:[#allocation2 + $0x8] sm:$0xff] }
 0x21b   : > { %4003 = vmatpush1.bf16.msra.mxu1 %v5605_v37  ;;  %3963 = vmatprep.subr.bf16.mxu0 %v5610_v38 }
 0x21c   : > { %4004 = vmatprep.subr.bf16.mxu1 %v5613_v44  ;;  %v5683_v44 = vld [vmem:[%s6141_s7 + $0xec8] ss:$16 sps:$4 sm:$0xff]  }
 0x21e   : > { %3964 = vmatpush1.bf16.msra.mxu0 %v5608_v45 }
 0x21f   : > { %4005 = vmatpush1.bf16.msra.mxu1 %v5611_v46  ;;  %3965 = vmatprep.subr.bf16.mxu0 %v5616_v47  ;;  %v5688_v47 = vld [vmem:[%s6141_s7 + $0xcec] ss:$16 sps:$4 sm:$0xff]  }
 0x220   : > { %4006 = vmatprep.subr.bf16.mxu1 %v5619_v49  ;;  %v5691_v49 = vld [vmem:[%s6141_s7 + $0xeec] ss:$16 sps:$4 sm:$0xff]  }
 0x222   : > { %3966 = vmatpush1.bf16.msra.mxu0 %v5614_v50 }
 0x223   : > { %4007 = vmatpush1.bf16.msra.mxu1 %v5617_v51  ;;  %3967 = vmatprep.subr.bf16.mxu0 %v5622_v53  ;;  %v5686_v53 = vld [vmem:[%s6141_s7 + $0xce8] ss:$16 sps:$4 sm:$0xff]  }
 0x224   : > { %4008 = vmatprep.subr.bf16.mxu1 %v5625_v54  ;;  %v5689_v54 = vld [vmem:[%s6141_s7 + $0xee8] ss:$16 sps:$4 sm:$0xff]  }
 0x226   : > { %3968 = vmatpush1.bf16.msra.mxu0 %v5620_v55  ;;  %v5694_v55 = vld [vmem:[%s6141_s7 + $0xd0c] ss:$16 sps:$4 sm:$0xff]  }
 0x227   : > { %4009 = vmatpush1.bf16.msra.mxu1 %v5623_v56  ;;  %3969 = vmatprep.subr.bf16.mxu0 %v5628_v57  ;;  %v5697_v56 = vld [vmem:[%s6141_s7 + $0xf0c] ss:$16 sps:$4 sm:$0xff]   ;;  %v5692_v57 = vld [vmem:[%s6141_s7 + $0xd08] ss:$16 sps:$4 sm:$0xff]  }
 0x228   : > { %4010 = vmatprep.subr.bf16.mxu1 %v5631_v58  ;;  %v5695_v58 = vld [vmem:[%s6141_s7 + $0xf08] ss:$16 sps:$4 sm:$0xff]  }
 0x22a   : > { %3970 = vmatpush1.bf16.msra.mxu0 %v5626_v61  ;;  %v5700_v61 = vld [vmem:[%s6141_s7 + $0xd2c] ss:$16 sps:$4 sm:$0xff]  }
 0x22b   : > { %4011 = vmatpush1.bf16.msra.mxu1 %v5629_v62  ;;  %3971 = vmatprep.subr.bf16.mxu0 %v5634_v17  ;;  %v5703_v62 = vld [vmem:[%s6141_s7 + $0xf2c] ss:$16 sps:$4 sm:$0xff]   ;;  %v5698_v17 = vld [vmem:[%s6141_s7 + $0xd28] ss:$16 sps:$4 sm:$0xff]  }
 0x22c   : > { %4012 = vmatprep.subr.bf16.mxu1 %v5637_v18  ;;  %v5701_v18 = vld [vmem:[%s6141_s7 + $0xf28] ss:$16 sps:$4 sm:$0xff]  }
 0x22e   : > { %3972 = vmatpush1.bf16.msra.mxu0 %v5632_v63  ;;  %v5706_v63 = vld [vmem:[%s6141_s7 + $0xd4c] ss:$16 sps:$4 sm:$0xff]  }
 0x22f   : > { %4013 = vmatpush1.bf16.msra.mxu1 %v5635_v0  ;;  %3973 = vmatprep.subr.bf16.mxu0 %v5640_v41  ;;  %v5709_v0 = vld [vmem:[%s6141_s7 + $0xf4c] ss:$16 sps:$4 sm:$0xff]   ;;  %v5704_v41 = vld [vmem:[%s6141_s7 + $0xd48] ss:$16 sps:$4 sm:$0xff]  }
 0x230   : > { %4014 = vmatprep.subr.bf16.mxu1 %v5643_v25  ;;  %v5707_v25 = vld [vmem:[%s6141_s7 + $0xf48] ss:$16 sps:$4 sm:$0xff]  }
 0x232   : > { %3974 = vmatpush1.bf16.msra.mxu0 %v5638_v26  ;;  %v5712_v26 = vld [vmem:[%s6141_s7 + $0xd6c] ss:$16 sps:$4 sm:$0xff]  }
 0x233   : > { %4015 = vmatpush1.bf16.msra.mxu1 %v5641_v1  ;;  %4025 = vmatprep.subr.bf16.mxu0 %v5646_v2  ;;  %v5715_v1 = vld [vmem:[%s6141_s7 + $0xf6c] ss:$16 sps:$4 sm:$0xff]   ;;  %v5710_v2 = vld [vmem:[%s6141_s7 + $0xd68] ss:$16 sps:$4 sm:$0xff]  }
 0x234   : > { %4066 = vmatprep.subr.bf16.mxu1 %v5649_v3  ;;  %v5713_v3 = vld [vmem:[%s6141_s7 + $0xf68] ss:$16 sps:$4 sm:$0xff]  }
 0x235   : > { %3976 = vmatmul.mubr.bf16.vlgmr.msra.gmra.mrb[24].mxu0 %v6422_v39  ;;  %v5656_v39 = vld [vmem:[%s6141_s7 + $0xc48] ss:$16 sps:$4 sm:$0xff]  }
 0x236   : > { %4017 = vmatmul.mubr.bf16.vlgmr.msra.gmra.mrb[24].mxu1 %v6426_v40  ;;  %4026 = vmatpush1.bf16.msra.mxu0 %v5644_v29  ;;  %v5659_v40 = vld [vmem:[%s6141_s7 + $0xe48] ss:$16 sps:$4 sm:$0xff]   ;;  %v5718_v29 = vld [vmem:[%s6141_s7 + $0xd8c] ss:$16 sps:$4 sm:$0xff]  }
 0x237   : > { %4067 = vmatpush1.bf16.msra.mxu1 %v5647_v32  ;;  %4027 = vmatprep.subr.bf16.mxu0 %v5652_v5  ;;  %v5721_v32 = vld [vmem:[%s6141_s7 + $0xf8c] ss:$16 sps:$4 sm:$0xff]   ;;  %v5716_v5 = vld [vmem:[%s6141_s7 + $0xd88] ss:$16 sps:$4 sm:$0xff]  }
 0x238   : > { %4068 = vmatprep.subr.bf16.mxu1 %v5655_v6  ;;  %4057 = vmatprep.mubr.bf16.mxu0 %v6438_v23  ;;  %v5665_v23 = vld [vmem:[%s6141_s7 + $0xe68] ss:$16 sps:$4 sm:$0xff]  }
 0x239   : > { %4098 = vmatprep.mubr.bf16.mxu1 %v6442_v24  ;;  %v5670_v24 = vld [vmem:[%s6141_s7 + $0xc8c] ss:$16 sps:$4 sm:$0xff]   ;;  %v5719_v6 = vld [vmem:[%s6141_s7 + $0xf88] ss:$16 sps:$4 sm:$0xff]  }
 0x23a   : > { %4028 = vmatpush1.bf16.msra.mxu0 %v5650_v48  ;;  %v5724_v48 = vld [vmem:[%s6141_s7 + $0xdac] ss:$16 sps:$4 sm:$0xff]  }
 0x23b   : > { %4069 = vmatpush1.bf16.msra.mxu1 %v5653_v9  ;;  %4029 = vmatprep.subr.bf16.mxu0 %v5658_v52  ;;  %v5727_v9 = vld [vmem:[%s6141_s7 + $0xfac] ss:$16 sps:$4 sm:$0xff]   ;;  %v5722_v52 = vld [vmem:[%s6141_s7 + $0xda8] ss:$16 sps:$4 sm:$0xff]  }
 0x23c   : > { %4070 = vmatprep.subr.bf16.mxu1 %v5661_v10  ;;  %v5725_v10 = vld [vmem:[%s6141_s7 + $0xfa8] ss:$16 sps:$4 sm:$0xff]  }
 0x23e   : > { %4030 = vmatpush1.bf16.msra.mxu0 %v5656_v39  ;;  %v5730_v39 = vld [vmem:[%s6141_s7 + $0xdcc] ss:$16 sps:$4 sm:$0xff]  }
 0x23f   : > { %4071 = vmatpush1.bf16.msra.mxu1 %v5659_v40  ;;  %4031 = vmatprep.subr.bf16.mxu0 %v5664_v11  ;;  %v5733_v40 = vld [vmem:[%s6141_s7 + $0xfcc] ss:$16 sps:$4 sm:$0xff]   ;;  %v5728_v11 = vld [vmem:[%s6141_s7 + $0xdc8] ss:$16 sps:$4 sm:$0xff]  }
 0x240   : > { %4072 = vmatprep.subr.bf16.mxu1 %v5667_v12  ;;  %v5731_v12 = vld [vmem:[%s6141_s7 + $0xfc8] ss:$16 sps:$4 sm:$0xff]  }
 0x242   : > { %4032 = vmatpush1.bf16.msra.mxu0 %v5662_v13  ;;  %v5736_v13 = vld [vmem:[%s6141_s7 + $0xdec] ss:$16 sps:$4 sm:$0xff]  }
 0x243   : > { %4073 = vmatpush1.bf16.msra.mxu1 %v5665_v23  ;;  %4033 = vmatprep.subr.bf16.mxu0 %v5670_v24  ;;  %v5739_v23 = vld [vmem:[%s6141_s7 + $0xfec] ss:$16 sps:$4 sm:$0xff]   ;;  %v5734_v24 = vld [vmem:[%s6141_s7 + $0xde8] ss:$16 sps:$4 sm:$0xff]  }
 0x244   : > { %4074 = vmatprep.subr.bf16.mxu1 %v5673_v14  ;;  %v5737_v14 = vld [vmem:[%s6141_s7 + $0xfe8] ss:$16 sps:$4 sm:$0xff]  }
 0x246   : > { %4034 = vmatpush1.bf16.msra.mxu0 %v5668_v15 }
 0x247   : > { %4075 = vmatpush1.bf16.msra.mxu1 %v5671_v16  ;;  %4035 = vmatprep.subr.bf16.mxu0 %v5676_v19 }
 0x248   : > { %4076 = vmatprep.subr.bf16.mxu1 %v5679_v20  ;;  %v3731_v30 = vpop.f32.mrb[12].mxu0 }
 0x249   : > { %v3772_v31 = vpop.f32.mrb[12].mxu1  ;;  %v3732_v33 = vadd.f32 %v3731_v30, %v6694_v21  ;;  %v3733_v34 = vpop.f32.mrb[13].mxu0 }
 0x24a   : > { %v3774_v7 = vpop.f32.mrb[13].mxu1  ;;  %v3734_v36 = vadd.f32 %v3733_v34, %v6698_v28  ;;  %v3735_v37 = vpop.f32.mrb[14].mxu0  ;;  %4036 = vmatpush1.bf16.msra.mxu0 %v5674_v22 }
 0x24b   : > { %v3776_v38 = vpop.f32.mrb[14].mxu1  ;;  %4077 = vmatpush1.bf16.msra.mxu1 %v5677_v27  ;;  %v3773_v45 = vadd.f32 %v3772_v31, %v3732_v33  ;;  %v3736_v46 = vpop.f32.mrb[15].mxu0  ;;  %4037 = vmatprep.subr.bf16.mxu0 %v5682_v42 }
 0x24c   : > { %v3777_v21 = vpop.f32.mrb[15].mxu1  ;;  %4078 = vmatprep.subr.bf16.mxu1 %v5685_v4  ;;  %v3775_v50 = vadd.f32 %v3774_v7, %v3734_v36 }
 0x24d   : > { %v4107_v28 = vadd.f32 %v3773_v45, %v311_v35 }
 0x24e   : > { %v4108_v51 = vadd.f32 %v3775_v50, %v312_v43  ;;  %4038 = vmatpush1.bf16.msra.mxu0 %v5680_v8 }
 0x24f   : > { %4079 = vmatpush1.bf16.msra.mxu1 %v5683_v44  ;;  %4111 = vst [vmem:[#allocation2] sm:$0xff] %v4107_v28  ;;  %4039 = vmatprep.subr.bf16.mxu0 %v5688_v47 }
 0x250   : > { %4080 = vmatprep.subr.bf16.mxu1 %v5691_v49  ;;  %4112 = vst [vmem:[#allocation2 + $0x8] sm:$0xff] %v4108_v51 }
 0x252   : > { %4040 = vmatpush1.bf16.msra.mxu0 %v5686_v53 }
 0x253   : > { %4081 = vmatpush1.bf16.msra.mxu1 %v5689_v54  ;;  %4041 = vmatprep.subr.bf16.mxu0 %v5694_v55 }
 0x254   : > { %4082 = vmatprep.subr.bf16.mxu1 %v5697_v56 }
 0x256   : > { %4042 = vmatpush1.bf16.msra.mxu0 %v5692_v57 }
 0x257   : > { %4083 = vmatpush1.bf16.msra.mxu1 %v5695_v58  ;;  %4043 = vmatprep.subr.bf16.mxu0 %v5700_v61 }
 0x258   : > { %4084 = vmatprep.subr.bf16.mxu1 %v5703_v62 }
 0x25a   : > { %4044 = vmatpush1.bf16.msra.mxu0 %v5698_v17 }
 0x25b   : > { %4085 = vmatpush1.bf16.msra.mxu1 %v5701_v18  ;;  %4045 = vmatprep.subr.bf16.mxu0 %v5706_v63  ;;  %v313_v18 = vld [vmem:[#allocation2 + $0x10] sm:$0xff] }
 0x25c   : > { %4086 = vmatprep.subr.bf16.mxu1 %v5709_v0 }
 0x25e   : > { %4046 = vmatpush1.bf16.msra.mxu0 %v5704_v41 }
 0x25f   : > { %4087 = vmatpush1.bf16.msra.mxu1 %v5707_v25  ;;  %4047 = vmatprep.subr.bf16.mxu0 %v5712_v26  ;;  %v314_v26 = vld [vmem:[#allocation2 + $0x18] sm:$0xff] }
 0x260   : > { %4088 = vmatprep.subr.bf16.mxu1 %v5715_v1 }
 0x262   : > { %4048 = vmatpush1.bf16.msra.mxu0 %v5710_v2 }
 0x263   : > { %4089 = vmatpush1.bf16.msra.mxu1 %v5713_v3  ;;  %4049 = vmatprep.subr.bf16.mxu0 %v5718_v29 }
 0x264   : > { %4090 = vmatprep.subr.bf16.mxu1 %v5721_v32 }
 0x266   : > { %4050 = vmatpush1.bf16.msra.mxu0 %v5716_v5  ;;  %v4125_v5 = vlaneseq (!%p4847_p3) }
 0x267   : > { %4091 = vmatpush1.bf16.msra.mxu1 %v5719_v6  ;;  %4051 = vmatprep.subr.bf16.mxu0 %v5724_v48  ;;  %v4123_v48 = vld [vmem:[%s239_s10] sm:$0xf] (!%p4847_p3) }
 0x268   : > { %4092 = vmatprep.subr.bf16.mxu1 %v5727_v9  ;;  %v4126_v6 = vshrl.u32 (!%p4847_p3), %v4125_v5, 7  ;;  %v4119_v9 = vld [vmem:[#allocation2] sm:$0xff] (!%p4847_p3) }
 0x26a   : > { %4052 = vmatpush1.bf16.msra.mxu0 %v5722_v52  ;;  %v4127_v52 = vsub.s32 (!%p4847_p3), 0, %v4126_v6 }
 0x26b   : > { %4093 = vmatpush1.bf16.msra.mxu1 %v5725_v10  ;;  %4053 = vmatprep.subr.bf16.mxu0 %v5730_v39  ;;  %v4131_v10 = vsub.s32 (!%p4847_p3), 1, %v4126_v6  ;;  %v4135_v39 = vsub.s32 (!%p4847_p3), 2, %v4126_v6 }
 0x26c   : > { %4094 = vmatprep.subr.bf16.mxu1 %v5733_v40  ;;  %v4139_v40 = vsub.s32 (!%p4847_p3), 3, %v4126_v6 }
 0x26e   : > { %4054 = vmatpush1.bf16.msra.mxu0 %v5728_v11  ;;  %v4120_v11 = vld [vmem:[#allocation2 + $0x8] sm:$0xff] (!%p4847_p3) }
 0x26f   : > { %4095 = vmatpush1.bf16.msra.mxu1 %v5731_v12  ;;  %4055 = vmatprep.subr.bf16.mxu0 %v5736_v13 }
 0x270   : > { %4096 = vmatprep.subr.bf16.mxu1 %v5739_v23  ;;  %v4128_v23 = vrot.slane (!%p4847_p3), %v4123_v48, %v4127_v52 }
 0x272   : > { %4056 = vmatpush1.bf16.msra.mxu0 %v5734_v24  ;;  %v4132_v24 = vrot.slane (!%p4847_p3), %v4123_v48, %v4131_v10 }
 0x273   : > { %4097 = vmatpush1.bf16.msra.mxu1 %v5737_v14  ;;  %v4136_v14 = vrot.slane (!%p4847_p3), %v4123_v48, %v4135_v39 }
 0x275   : > { %4058 = vmatmul.mubr.bf16.vlgmr.msra.gmra.mrb[28].mxu0 %v6510_v59 }
 0x276   : > { %4099 = vmatmul.mubr.bf16.vlgmr.msra.gmra.mrb[28].mxu1 %v6514_v60 }
 0x288   : > { %v3813_v15 = vpop.f32.mrb[16].mxu0 }
 0x289   : > { %v3854_v16 = vpop.f32.mrb[16].mxu1  ;;  %v3815_v20 = vpop.f32.mrb[17].mxu0 }
 0x28a   : > { %v3855_v19 = vadd.f32 %v3854_v16, %v3813_v15  ;;  %v3856_v22 = vpop.f32.mrb[17].mxu1  ;;  %v3817_v42 = vpop.f32.mrb[18].mxu0  ;;  %v4140_v15 = vrot.slane (!%p4847_p3), %v4123_v48, %v4139_v40  ;;  %v4145_v16 = vadd.f32 (!%p4847_p3), %v4128_v23, %v4119_v9 }
 0x28b   : > { %v3857_v27 = vadd.f32 %v3856_v22, %v3815_v20  ;;  %v3858_v4 = vpop.f32.mrb[18].mxu1  ;;  %v3818_v30 = vpop.f32.mrb[19].mxu0 }
 0x28c   : > { %v3859_v31 = vpop.f32.mrb[19].mxu1 }
 0x2c8   : > { %v3895_v33 = vpop.f32.mrb[20].mxu0 }
 0x2c9   : > { %v3936_v34 = vpop.f32.mrb[20].mxu1  ;;  %v3896_v7 = vadd.f32 %v3895_v33, %v3855_v19  ;;  %v3897_v8 = vpop.f32.mrb[21].mxu0  ;;  %v4146_v19 = vadd.f32 (!%p4847_p3), %v4132_v24, %v4120_v11 }
 0x2ca   : > { %v3938_v35 = vpop.f32.mrb[21].mxu1  ;;  %v3898_v36 = vadd.f32 %v3897_v8, %v3857_v27  ;;  %v3899_v43 = vpop.f32.mrb[22].mxu0  ;;  %v4149_v27 = vmax.f32 (!%p4847_p3), %v4145_v16, 0.0 }
 0x2cb   : > { %v3940_v59 = vpop.f32.mrb[22].mxu1  ;;  %v3937_v37 = vadd.f32 %v3936_v34, %v3896_v7  ;;  %v3900_v60 = vpop.f32.mrb[23].mxu0  ;;  %v4150_v42 = vmax.f32 (!%p4847_p3), %v4146_v19, 0.0 }
 0x2cc   : > { %v3941_v38 = vpop.f32.mrb[23].mxu1  ;;  %v3939_v44 = vadd.f32 %v3938_v35, %v3898_v36  ;;  %4153 = vst [vmem:[%s6165_s4] sm:$0xff] (!%p4847_p3), %v4149_v27 }
 0x2cd   : > { %4154 = vst [vmem:[%s6165_s4 + $0x8] sm:$0xff] (!%p4847_p3), %v4150_v42 }
 0x308   : > { %v3977_v45 = vpop.f32.mrb[24].mxu0 }
 0x309   : > { %v4018_v46 = vpop.f32.mrb[24].mxu1  ;;  %v3978_v21 = vadd.f32 %v3977_v45, %v3937_v37  ;;  %v3979_v47 = vpop.f32.mrb[25].mxu0 }
 0x30a   : > { %v4020_v49 = vpop.f32.mrb[25].mxu1  ;;  %v3980_v50 = vadd.f32 %v3979_v47, %v3939_v44  ;;  %v3981_v28 = vpop.f32.mrb[26].mxu0 }
 0x30b   : > { %v4022_v51 = vpop.f32.mrb[26].mxu1  ;;  %v4019_v53 = vadd.f32 %v4018_v46, %v3978_v21  ;;  %v3982_v54 = vpop.f32.mrb[27].mxu0 }
 0x30c   : > { %v4023_v55 = vpop.f32.mrb[27].mxu1  ;;  %v4021_v56 = vadd.f32 %v4020_v49, %v3980_v50 }
 0x348   : > { %v4059_v57 = vpop.f32.mrb[28].mxu0 }
 0x349   : > { %v4100_v58 = vpop.f32.mrb[28].mxu1  ;;  %v4060_v61 = vadd.f32 %v4059_v57, %v4019_v53  ;;  %v4061_v62 = vpop.f32.mrb[29].mxu0 }
 0x34a   : > { %v4102_v17 = vpop.f32.mrb[29].mxu1  ;;  %v4062_v63 = vadd.f32 %v4061_v62, %v4021_v56  ;;  %v4063_v0 = vpop.f32.mrb[30].mxu0  ;;  %4118 = sbr.rel (%p4847_p3) target bundleno = 861 (0x35d), region = 48 }
 0x34b   : > { %v4104_v41 = vpop.f32.mrb[30].mxu1  ;;  %v4101_v25 = vadd.f32 %v4100_v58, %v4060_v61  ;;  %v4064_v1 = vpop.f32.mrb[31].mxu0 }
 0x34c   : > { %v4105_v2 = vpop.f32.mrb[31].mxu1  ;;  %v4103_v3 = vadd.f32 %v4102_v17, %v4062_v63 }
 0x34d   : > { %v4109_v29 = vadd.f32 %v4101_v25, %v313_v18 }
 0x34e   : > { %v4110_v32 = vadd.f32 %v4103_v3, %v314_v26 }
 0x34f   : > { %4113 = vst [vmem:[#allocation2 + $0x10] sm:$0xff] %v4109_v29 }
 0x350   : > { %4114 = vst [vmem:[#allocation2 + $0x18] sm:$0xff] %v4110_v32 }
 0x356   : > { %v4121_v12 = vld [vmem:[#allocation2 + $0x10] sm:$0xff] }
 0x357   : > { %v4122_v13 = vld [vmem:[#allocation2 + $0x18] sm:$0xff]  ;;  %v4147_v20 = vadd.f32 %v4136_v14, %v4121_v12 }
 0x358   : > { %v4148_v22 = vadd.f32 %v4140_v15, %v4122_v13 }
 0x359   : > { %v4151_v4 = vmax.f32 %v4147_v20, 0.0 }
 0x35a   : > { %v4152_v30 = vmax.f32 %v4148_v22, 0.0 }
 0x35b   : > { %4155 = vst [vmem:[%s6165_s4 + $0x10] sm:$0xff] %v4151_v4 }
 0x35c   : > { %4156 = vst [vmem:[%s6165_s4 + $0x18] sm:$0xff] %v4152_v30 }
 0x35d PF: > { %s19_s22 = sadd.s32 1, %s5894_s22   ;;  %s6871_s7 = sld [smem:[#allocation9_spill]] }
 0x35e   : > { %p16_p11 = scmp.ge.s32.totalorder %s19_s22, 6   ;;  %s6872_s12 = smov %s5858_s13 }
 0x35f   : > { %s6873_s13 = smov %s5862_s14  ;;  %s6874_s14 = smov %s6090_s29 }
 0x360   : > { %s6875_s15 = smov %s5870_s16  ;;  %s6876_s16 = smov %s5874_s17 }
 0x361   : > { %s6877_s17 = smov %s6095_s6  ;;  %s6878_s18 = smov %s5886_s20 }
 0x362   : > { %s6879_s19 = smov %s5890_s21  ;;  %s6880_s20 = smov %s6883_s23 }
 0x363   : > { %s6881_s21 = smov %s6871_s7  ;;  %18 = sbr.rel (!%p16_p11) target bundleno = 11 (0xb), region = 96 }
 0x36a   :  { %4187 = vsyncpa [#allocation4], 1 }
 0x36b   :  { %4189 = vsyncpa [#allocation4 + $0x1], 1 }
 0x36c   :  { %4190 = vsyncpa [#allocation6], 1 }
 0x36d   :  { %4192 = vsyncpa [#allocation6 + $0x1], 1 }

</bundles_post_ra>
